<compile_context>
chip_gen: v7x
topology: tpu7x:2x2x1
jax: 0.10.0
libtpu: 0.0.40
codegen_flags: <defaults>
</compile_context>

<pallas_src>
import functools
import numpy as np

import jax
import jax.numpy as jnp
from jax.experimental import pallas as pl
from jax.experimental.pallas import tpu as pltpu


FEAT_CH = 128            # padded from 112 for lane-dense stores / full MXU columns


# ----------------------------------------------------------------------------
# Generation-aware VMEM budget (v7x has only 64 MiB per TensorCore)
# ----------------------------------------------------------------------------
@functools.lru_cache(maxsize=1)
def _vmem_limit_bytes():
    try:
        cap = int(pltpu.get_tpu_info().vmem_capacity_bytes)
    except Exception:
        cap = 64 * 1024 * 1024                     # conservative (v7x per-core)
    return min((cap * 3) // 4, 96 * 1024 * 1024)   # ~48 MiB v7x, ~96 MiB v5e/v6e


def _round_up(x, m):
    return ((x + m - 1) // m) * m


# ----------------------------------------------------------------------------
# Tiled / pipelined matmul kernel:  out = act(a @ w [+ b])
#   bf16 MXU operands, f32 VMEM accumulator, K-grid accumulation.
# ----------------------------------------------------------------------------
def _make_mm_kernel(activation, has_bias):
    def kernel(*refs):
        if has_bias:
            a_ref, w_ref, b_ref, o_ref, acc_ref = refs
        else:
            a_ref, w_ref, o_ref, acc_ref = refs
            b_ref = None
        k = pl.program_id(2)

        @pl.when(k == 0)
        def _():
            acc_ref[...] = jnp.zeros_like(acc_ref)

        acc_ref[...] += jnp.dot(a_ref[...], w_ref[...],
                                preferred_element_type=jnp.float32)

        @pl.when(k == pl.num_programs(2) - 1)
        def _():
            y = acc_ref[...]
            if b_ref is not None:
                y = y + b_ref[...]
            if activation == "relu":
                y = jnp.maximum(y, 0.0)
            elif activation == "sigmoid":
                y = jax.nn.sigmoid(y)
            o_ref[...] = y.astype(o_ref.dtype)

    return kernel


def matmul(a, w, b=None, activation="none", out_dtype=jnp.float32):
    """Tiled matmul with lane-dense (multiple-of-128) padded output tiles."""
    M, K = a.shape
    K2, N = w.shape
    assert K == K2

    Mp = _round_up(M, 8)
    Kp = _round_up(K, 128)
    Np = _round_up(N, 128)
    tm = Mp if Mp <= 256 else 256
    tk = Kp if Kp <= 512 else 512
    tn = Np if Np <= 256 else 256
    Mp = _round_up(Mp, tm)
    Kp = _round_up(Kp, tk)
    Np = _round_up(Np, tn)

    a_p = jnp.pad(a.astype(jnp.bfloat16), ((0, Mp - M), (0, Kp - K)))
    w_p = jnp.pad(w.astype(jnp.bfloat16), ((0, Kp - K), (0, Np - N)))

    in_specs = [
        pl.BlockSpec((tm, tk), lambda i, j, k: (i, k)),
        pl.BlockSpec((tk, tn), lambda i, j, k: (k, j)),
    ]
    operands = [a_p, w_p]
    if b is not None:
        b_p = jnp.pad(b.astype(jnp.float32).reshape(1, N), ((0, 0), (0, Np - N)))
        in_specs.append(pl.BlockSpec((1, tn), lambda i, j, k: (0, j)))
        operands.append(b_p)

    out = pl.pallas_call(
        _make_mm_kernel(activation, b is not None),
        out_shape=jax.ShapeDtypeStruct((Mp, Np), out_dtype),
        grid_spec=pltpu.PrefetchScalarGridSpec(
            num_scalar_prefetch=0,
            grid=(Mp // tm, Np // tn, Kp // tk),
            in_specs=in_specs,
            out_specs=pl.BlockSpec((tm, tn), lambda i, j, k: (i, j)),
            scratch_shapes=[pltpu.VMEM((tm, tn), jnp.float32)],
        ),
        compiler_params=pltpu.CompilerParams(
            dimension_semantics=("parallel", "parallel", "arbitrary"),
            vmem_limit_bytes=_vmem_limit_bytes(),
        ),
    )(*operands)
    return out[:M, :N]


# ----------------------------------------------------------------------------
# Fused hypercolumn 3x3 conv + bias + ReLU + squeeze-excite + spatial max-pool.
# Grid streams the 3 W-shift taps (K accumulation); the 3 H-shifts are unrolled
# in-kernel as cheap major-dim slices.  Reads the hypercolumn once, never
# materializes a 9x im2col or an un-gated "base" in HBM.
# ----------------------------------------------------------------------------
def _hc_fused_kernel(xw_ref, w_ref, b_ref, w1_ref, b1_ref, w2_ref, b2_ref,
                     o_ref, mx_ref, acc_ref):
    j = pl.program_id(0)
    _, Nb, Hp, Wf, Cin = xw_ref.shape
    Hf = Hp - 2
    Cout = acc_ref.shape[-1]

    @pl.when(j == 0)
    def _():
        acc_ref[...] = jnp.zeros_like(acc_ref)

    # accumulate the 3 H-shift taps of this W-shift slab
    for dh in range(3):
        a = xw_ref[0, :, dh:dh + Hf, :, :].reshape(Nb * Hf * Wf, Cin)
        acc_ref[...] += jnp.dot(a, w_ref[0, dh],
                                preferred_element_type=jnp.float32)

    @pl.when(j == pl.num_programs(0) - 1)
    def _():
        base = jnp.maximum(acc_ref[...] + b_ref[...], 0.0)            # (M, Cout)
        bm = base.reshape(Nb, Hf * Wf, Cout)
        mean = jnp.mean(bm, axis=1)                                    # (N, Cout)
        mx = jnp.max(bm, axis=1)                                       # (N, Cout)
        g = jnp.maximum(
            jnp.dot(mean, w1_ref[...], preferred_element_type=jnp.float32)
            + b1_ref[...], 0.0)
        g = jax.nn.sigmoid(
            jnp.dot(g, w2_ref[...], preferred_element_type=jnp.float32)
            + b2_ref[...])
        o_ref[...] = (bm * g[:, None, :]).reshape(Nb, Hf, Wf, Cout).astype(o_ref.dtype)
        # AdaptiveMaxPool2d(1) over the SE-scaled features: gate > 0, so
        # max(base * gate) == gate * max(base) exactly.
        mx_ref[...] = (mx * g).astype(mx_ref.dtype)


def hc_fuse_se_pool(hc, w, b, w1, b1, w2, b2):
    """hc: (N, Hf, Wf, Cin) bf16; w: (3, 3, Cin, Cout).
    Returns (SE-scaled base (N,Hf,Wf,Cout) f32, spatial max pool (N,Cout) f32)."""
    N, Hf, Wf, Cin = hc.shape
    Cout = w.shape[-1]
    Cse = w1.shape[-1]

    xp = jnp.pad(hc, ((0, 0), (1, 1), (1, 1), (0, 0)))            # (N,Hf+2,Wf+2,Cin)
    # Three W-shifted copies so the kernel only slices major dims (cheap, safe).
    xw = jnp.stack([xp[:, :, dw:dw + Wf, :] for dw in range(3)], axis=0)
    w_t = jnp.transpose(w, (1, 0, 2, 3)).astype(jnp.bfloat16)     # (dw, dh, Cin, Cout)

    return pl.pallas_call(
        _hc_fused_kernel,
        out_shape=(jax.ShapeDtypeStruct((N, Hf, Wf, Cout), jnp.float32),
                   jax.ShapeDtypeStruct((N, Cout), jnp.float32)),
        grid_spec=pltpu.PrefetchScalarGridSpec(
            num_scalar_prefetch=0,
            grid=(3,),
            in_specs=[
                pl.BlockSpec((1, N, Hf + 2, Wf, Cin), lambda d: (d, 0, 0, 0, 0)),
                pl.BlockSpec((1, 3, Cin, Cout), lambda d: (d, 0, 0, 0)),
                pl.BlockSpec((1, Cout), lambda d: (0, 0)),
                pl.BlockSpec((Cout, Cse), lambda d: (0, 0)),
                pl.BlockSpec((1, Cse), lambda d: (0, 0)),
                pl.BlockSpec((Cse, Cout), lambda d: (0, 0)),
                pl.BlockSpec((1, Cout), lambda d: (0, 0)),
            ],
            out_specs=[
                pl.BlockSpec((N, Hf, Wf, Cout), lambda d: (0, 0, 0, 0)),
                pl.BlockSpec((N, Cout), lambda d: (0, 0)),
            ],
            scratch_shapes=[pltpu.VMEM((N * Hf * Wf, Cout), jnp.float32)],
        ),
        compiler_params=pltpu.CompilerParams(
            dimension_semantics=("arbitrary",),
            vmem_limit_bytes=_vmem_limit_bytes(),
        ),
    )(xw, w_t,
      b.reshape(1, Cout).astype(jnp.float32),
      w1.astype(jnp.float32), b1.reshape(1, Cse).astype(jnp.float32),
      w2.astype(jnp.float32), b2.reshape(1, Cout).astype(jnp.float32))


# ----------------------------------------------------------------------------
# Conv building block: kernel_size == stride (patchify) conv via tiled matmul.
# ----------------------------------------------------------------------------
def conv_patchify(x, w, b, stride, activation="relu", out_dtype=jnp.bfloat16):
    """Non-overlapping conv, kernel_size == stride.  x: (N,H,W,Cin)."""
    N, H, W, Cin = x.shape
    Ho, Wo = H // stride, W // stride
    patches = x.reshape(N, Ho, stride, Wo, stride, Cin).transpose(0, 1, 3, 2, 4, 5)
    a = patches.reshape(N * Ho * Wo, stride * stride * Cin)
    out = matmul(a, w, b, activation=activation, out_dtype=out_dtype)
    return out.reshape(N, Ho, Wo, -1)


# ----------------------------------------------------------------------------
# Bilinear x8 upsample (align_corners=False), exact match to nn.Upsample.
# Separable interpolation matrices applied with two (bias-free) Pallas matmuls.
# ----------------------------------------------------------------------------
def _upsample_matrix(n_in, scale):
    n_out = n_in * scale
    U = np.zeros((n_out, n_in), dtype=np.float32)
    for i in range(n_out):
        src = (i + 0.5) / scale - 0.5
        src = max(src, 0.0)
        i0 = min(int(np.floor(src)), n_in - 1)
        i1 = min(i0 + 1, n_in - 1)
        frac = src - i0
        U[i, i0] += 1.0 - frac
        U[i, i1] += frac
    return U


def bilinear_upsample_x8(x):
    """x: (N, Hin, Win, C) -> (N, 8*Hin, 8*Win, C)."""
    N, Hi, Wi, C = x.shape
    uh = jnp.asarray(_upsample_matrix(Hi, 8))                  # (Ho, Hi)
    uw = jnp.asarray(_upsample_matrix(Wi, 8))                  # (Wo, Wi)
    Ho, Wo = Hi * 8, Wi * 8
    a = x.transpose(1, 0, 2, 3).reshape(Hi, N * Wi * C)
    t = matmul(uh, a)                                          # (Ho, N*Wi*C)
    t = t.reshape(Ho, N, Wi, C).transpose(2, 1, 0, 3).reshape(Wi, N * Ho * C)
    y = matmul(uw, t)                                          # (Wo, N*Ho*C)
    return y.reshape(Wo, N, Ho, C).transpose(1, 2, 0, 3)       # (N, Ho, Wo, C)


# ----------------------------------------------------------------------------
# Parameters (deterministic synthetic init)
# ----------------------------------------------------------------------------
def init_params(key, num_classes, ch=FEAT_CH, se_r=8):
    ks = jax.random.split(key, 16)

    def w(k, shape, fan_in):
        return jax.random.normal(k, shape, jnp.float32) / np.sqrt(fan_in)

    p = {}
    p["stem_w"] = w(ks[0], (8 * 8 * 3, ch), 8 * 8 * 3)
    p["stem_b"] = jnp.zeros((ch,), jnp.float32)
    for i, name in enumerate(["d4", "d5", "d6", "d7"]):
        p[f"{name}_w"] = w(ks[1 + i], (2 * 2 * ch, ch), 2 * 2 * ch)
        p[f"{name}_b"] = jnp.zeros((ch,), jnp.float32)
    p["hc_w"] = w(ks[5], (3, 3, 5 * ch, ch), 9 * 5 * ch)
    p["hc_b"] = jnp.zeros((ch,), jnp.float32)
    se_c = ch // se_r
    p["se_w1"] = w(ks[6], (ch, se_c), ch)
    p["se_b1"] = jnp.zeros((se_c,), jnp.float32)
    p["se_w2"] = w(ks[7], (se_c, ch), se_c)
    p["se_b2"] = jnp.zeros((ch,), jnp.float32)
    p["cls_w"] = w(ks[8], (ch, num_classes - 1), ch)
    p["cls_b"] = jnp.zeros((num_classes - 1,), jnp.float32)
    p["seg_w"] = w(ks[9], (ch, num_classes), ch)
    p["seg_b"] = jnp.zeros((num_classes,), jnp.float32)
    return p


# ----------------------------------------------------------------------------
# Forward pass (matches ISUEI_D2.forward semantics; NCHW in / NCHW out)
# ----------------------------------------------------------------------------
def isuei_d2_forward(x_nchw, params, num_classes):
    x = jnp.transpose(x_nchw, (0, 2, 3, 1)).astype(jnp.float32)   # NCHW -> NHWC

    # ImageNet normalization folded into the stem conv weights (no extra pass).
    mean = jnp.array([0.485, 0.456, 0.406], jnp.float32)
    inv_std = 1.0 / jnp.array([0.229, 0.224, 0.225], jnp.float32)
    scale_rows = jnp.tile(inv_std, 8 * 8)                         # (192,) c fastest
    shift_rows = jnp.tile(mean * inv_std, 8 * 8)
    stem_w = params["stem_w"] * scale_rows[:, None]
    stem_b = params["stem_b"] - shift_rows @ params["stem_w"]

    # --- encoder + BiFPN stand-in: pyramid p3..p7, FEAT_CH channels ----------
    p3 = conv_patchify(x, stem_w, stem_b, stride=8)               # H/8
    p4 = conv_patchify(p3, params["d4_w"], params["d4_b"], stride=2)   # H/16
    p5 = conv_patchify(p4, params["d5_w"], params["d5_b"], stride=2)   # H/32
    p6 = conv_patchify(p5, params["d6_w"], params["d6_b"], stride=2)   # H/64
    p7 = conv_patchify(p6, params["d7_w"], params["d7_b"], stride=2)   # H/128

    # --- HypercolumnsFusion([p7, p6, p5, p4, p3]) ----------------------------
    feats = []
    for f in (p7, p6, p5, p4, p3):
        r = p3.shape[1] // f.shape[1]
        if r > 1:
            f = jnp.repeat(jnp.repeat(f, r, axis=1), r, axis=2)   # nearest upsample
        feats.append(f)
    hc_in = jnp.concatenate(feats, axis=-1)                       # (N, Hf, Wf, 640)

    base, pooled_max = hc_fuse_se_pool(
        hc_in, params["hc_w"], params["hc_b"],
        params["se_w1"], params["se_b1"], params["se_w2"], params["se_b2"])

    N, Hf, Wf, Cch = base.shape

    # --- cls head: AdaptiveMaxPool2d(1) (fused above) + 1x1 conv -------------
    cls_logit = matmul(pooled_max, params["cls_w"], params["cls_b"])
    cls_out = cls_logit.reshape(N, num_classes - 1, 1, 1)

    # --- seg head: 1x1 conv (lane-dense kernel output) + bilinear x8 ---------
    seg = matmul(base.reshape(N * Hf * Wf, Cch),
                 params["seg_w"], params["seg_b"])
    seg = seg.reshape(N, Hf, Wf, num_classes)
    seg_up = bilinear_upsample_x8(seg)                            # (N, 8Hf, 8Wf, nc)
    seg_out = jnp.transpose(seg_up, (0, 3, 1, 2))                 # back to NCHW

    return [seg_out, cls_out]


# ----------------------------------------------------------------------------
if __name__ == "__main__":
    num_classes = 4
    batch, C, H, W = 2, 3, 128, 128    # H,W divisible by 128 so p7 exists

    key = jax.random.PRNGKey(0)
    k_x, k_p = jax.random.split(key)
    x = jax.random.uniform(k_x, (batch, C, H, W), jnp.float32)
    params = init_params(k_p, num_classes)

    fwd = jax.jit(functools.partial(isuei_d2_forward, num_classes=num_classes))
    seg_logit_up, cls_logit = fwd(x, params)
    jax.block_until_ready(seg_logit_up)
    jax.block_until_ready(cls_logit)

    assert seg_logit_up.shape == (batch, num_classes, H, W)
    assert cls_logit.shape == (batch, num_classes - 1, 1, 1)
    print("KERNEL_OK")
</pallas_src>

<mosaic_0001>
module attributes {stable_mosaic.version = 11 : i64} {
  func.func @kernel(%arg0: i32, %arg1: i32, %arg2: i32, %arg3: memref<256x256xbf16, #tpu.memory_space<vmem>>, %arg4: memref<256x128xbf16, #tpu.memory_space<vmem>>, %arg5: memref<1x128xf32, #tpu.memory_space<vmem>>, %arg6: memref<256x128xbf16, #tpu.memory_space<vmem>>, %arg7: memref<256x128xf32, #tpu.memory_space<vmem>>) attributes {dimension_semantics = [#tpu.dimension_semantics<parallel>, #tpu.dimension_semantics<parallel>, #tpu.dimension_semantics<arbitrary>], iteration_bounds = array<i64: 2, 1, 1>, scalar_prefetch = 0 : i64, scratch_operands = 1 : i64, tpu.core_type = #tpu.core_type<tc>, window_params = [{transform_indices = @transform_0, window_bounds = array<i64: 256, 256>}, {transform_indices = @transform_1, window_bounds = array<i64: 256, 128>}, {transform_indices = @transform_2, window_bounds = array<i64: 1, 128>}, {transform_indices = @transform_3, window_bounds = array<i64: 256, 128>}]} {
    %c0_i32 = arith.constant 0 : i32
    %0 = arith.cmpi eq, %arg2, %c0_i32 : i32
    %1 = arith.extui %0 : i1 to i32
    %c0_i32_0 = arith.constant 0 : i32
    %2 = arith.cmpi ne, %1, %c0_i32_0 : i32
    scf.if %2 {
      %cst_10 = arith.constant 0.000000e+00 : f32
      %12 = vector.broadcast %cst_10 : f32 to vector<256x128xf32>
      %c0_11 = arith.constant 0 : index
      %c0_12 = arith.constant 0 : index
      %13 = vector.load %arg7[%c0_11, %c0_12] : memref<256x128xf32, #tpu.memory_space<vmem>>, vector<256x128xf32>
      tpu.vector_store %arg7[%c0_11, %c0_12], %12 {strides = array<i32>} : memref<256x128xf32, #tpu.memory_space<vmem>>, vector<256x128xf32>,
    } else {
    }
    %c0 = arith.constant 0 : index
    %c0_1 = arith.constant 0 : index
    %3 = vector.load %arg7[%c0, %c0_1] : memref<256x128xf32, #tpu.memory_space<vmem>>, vector<256x128xf32>
    %c0_2 = arith.constant 0 : index
    %c0_3 = arith.constant 0 : index
    %4 = vector.load %arg3[%c0_2, %c0_3] : memref<256x256xbf16, #tpu.memory_space<vmem>>, vector<256x256xbf16>
    %c0_4 = arith.constant 0 : index
    %c0_5 = arith.constant 0 : index
    %5 = vector.load %arg4[%c0_4, %c0_5] : memref<256x128xbf16, #tpu.memory_space<vmem>>, vector<256x128xbf16>
    %cst = arith.constant dense<0.000000e+00> : vector<256x128xf32>
    %6 = tpu.matmul %4, %5, %cst {dimension_numbers = #tpu.dot_dimension_numbers<[1], [0], [0], [1], [0, 0, 1, 1], [], []>} : vector<256x256xbf16>, vector<256x128xbf16>, vector<256x128xf32> -> vector<256x128xf32>
    %7 = arith.addf %3, %6 : vector<256x128xf32>
    %c0_6 = arith.constant 0 : index
    %c0_7 = arith.constant 0 : index
    %8 = vector.load %arg7[%c0_6, %c0_7] : memref<256x128xf32, #tpu.memory_space<vmem>>, vector<256x128xf32>
    tpu.vector_store %arg7[%c0_6, %c0_7], %7 {strides = array<i32>} : memref<256x128xf32, #tpu.memory_space<vmem>>, vector<256x128xf32>,
    %c0_i32_8 = arith.constant 0 : i32
    %9 = arith.cmpi eq, %arg2, %c0_i32_8 : i32
    %10 = arith.extui %9 : i1 to i32
    %c0_i32_9 = arith.constant 0 : i32
    %11 = arith.cmpi ne, %10, %c0_i32_9 : i32
    scf.if %11 {
      %c0_10 = arith.constant 0 : index
      %c0_11 = arith.constant 0 : index
      %12 = vector.load %arg7[%c0_10, %c0_11] : memref<256x128xf32, #tpu.memory_space<vmem>>, vector<256x128xf32>
      %c0_12 = arith.constant 0 : index
      %c0_13 = arith.constant 0 : index
      %13 = vector.load %arg5[%c0_12, %c0_13] : memref<1x128xf32, #tpu.memory_space<vmem>>, vector<1x128xf32>
      %14 = vector.broadcast %13 : vector<1x128xf32> to vector<256x128xf32>
      %15 = arith.addf %12, %14 : vector<256x128xf32>
      %cst_14 = arith.constant 0.000000e+00 : f32
      %16 = vector.broadcast %cst_14 : f32 to vector<256x128xf32>
      %17 = arith.maximumf %15, %16 : vector<256x128xf32>
      %18 = arith.truncf %17 : vector<256x128xf32> to vector<256x128xbf16>
      %c0_15 = arith.constant 0 : index
      %c0_16 = arith.constant 0 : index
      %19 = vector.load %arg6[%c0_15, %c0_16] : memref<256x128xbf16, #tpu.memory_space<vmem>>, vector<256x128xbf16>
      tpu.vector_store %arg6[%c0_15, %c0_16], %18 {strides = array<i32>} : memref<256x128xbf16, #tpu.memory_space<vmem>>, vector<256x128xbf16>,
    } else {
    }
    return
  }
  func.func @transform_0(%arg0: i32, %arg1: i32, %arg2: i32) -> (i32, i32) {
    %c0_i32 = arith.constant 0 : i32
    return %arg0, %arg2 : i32, i32
  }
  func.func @transform_1(%arg0: i32, %arg1: i32, %arg2: i32) -> (i32, i32) {
    %c0_i32 = arith.constant 0 : i32
    return %arg2, %arg1 : i32, i32
  }
  func.func @transform_2(%arg0: i32, %arg1: i32, %arg2: i32) -> (i32, i32) {
    %c0_i32 = arith.constant 0 : i32
    %c0_i32_0 = arith.constant 0 : i32
    return %c0_i32, %arg1 : i32, i32
  }
  func.func @transform_3(%arg0: i32, %arg1: i32, %arg2: i32) -> (i32, i32) {
    %c0_i32 = arith.constant 0 : i32
    return %arg0, %arg1 : i32, i32
  }
}

module attributes {stable_mosaic.version = 11 : i64} {
  func.func @kernel(%arg0: i32, %arg1: i32, %arg2: i32, %arg3: memref<128x512xbf16, #tpu.memory_space<vmem>>, %arg4: memref<512x128xbf16, #tpu.memory_space<vmem>>, %arg5: memref<1x128xf32, #tpu.memory_space<vmem>>, %arg6: memref<128x128xbf16, #tpu.memory_space<vmem>>, %arg7: memref<128x128xf32, #tpu.memory_space<vmem>>) attributes {dimension_semantics = [#tpu.dimension_semantics<parallel>, #tpu.dimension_semantics<parallel>, #tpu.dimension_semantics<arbitrary>], iteration_bounds = array<i64: 1, 1, 1>, scalar_prefetch = 0 : i64, scratch_operands = 1 : i64, tpu.core_type = #tpu.core_type<tc>, window_params = [{transform_indices = @transform_0, window_bounds = array<i64: 128, 512>}, {transform_indices = @transform_1, window_bounds = array<i64: 512, 128>}, {transform_indices = @transform_2, window_bounds = array<i64: 1, 128>}, {transform_indices = @transform_3, window_bounds = array<i64: 128, 128>}]} {
    %c0_i32 = arith.constant 0 : i32
    %0 = arith.cmpi eq, %arg2, %c0_i32 : i32
    %1 = arith.extui %0 : i1 to i32
    %c0_i32_0 = arith.constant 0 : i32
    %2 = arith.cmpi ne, %1, %c0_i32_0 : i32
    scf.if %2 {
      %cst_10 = arith.constant 0.000000e+00 : f32
      %12 = vector.broadcast %cst_10 : f32 to vector<128x128xf32>
      %c0_11 = arith.constant 0 : index
      %c0_12 = arith.constant 0 : index
      %13 = vector.load %arg7[%c0_11, %c0_12] : memref<128x128xf32, #tpu.memory_space<vmem>>, vector<128x128xf32>
      tpu.vector_store %arg7[%c0_11, %c0_12], %12 {strides = array<i32>} : memref<128x128xf32, #tpu.memory_space<vmem>>, vector<128x128xf32>,
    } else {
    }
    %c0 = arith.constant 0 : index
    %c0_1 = arith.constant 0 : index
    %3 = vector.load %arg7[%c0, %c0_1] : memref<128x128xf32, #tpu.memory_space<vmem>>, vector<128x128xf32>
    %c0_2 = arith.constant 0 : index
    %c0_3 = arith.constant 0 : index
    %4 = vector.load %arg3[%c0_2, %c0_3] : memref<128x512xbf16, #tpu.memory_space<vmem>>, vector<128x512xbf16>
    %c0_4 = arith.constant 0 : index
    %c0_5 = arith.constant 0 : index
    %5 = vector.load %arg4[%c0_4, %c0_5] : memref<512x128xbf16, #tpu.memory_space<vmem>>, vector<512x128xbf16>
    %cst = arith.constant dense<0.000000e+00> : vector<128x128xf32>
    %6 = tpu.matmul %4, %5, %cst {dimension_numbers = #tpu.dot_dimension_numbers<[1], [0], [0], [1], [0, 0, 1, 1], [], []>} : vector<128x512xbf16>, vector<512x128xbf16>, vector<128x128xf32> -> vector<128x128xf32>
    %7 = arith.addf %3, %6 : vector<128x128xf32>
    %c0_6 = arith.constant 0 : index
    %c0_7 = arith.constant 0 : index
    %8 = vector.load %arg7[%c0_6, %c0_7] : memref<128x128xf32, #tpu.memory_space<vmem>>, vector<128x128xf32>
    tpu.vector_store %arg7[%c0_6, %c0_7], %7 {strides = array<i32>} : memref<128x128xf32, #tpu.memory_space<vmem>>, vector<128x128xf32>,
    %c0_i32_8 = arith.constant 0 : i32
    %9 = arith.cmpi eq, %arg2, %c0_i32_8 : i32
    %10 = arith.extui %9 : i1 to i32
    %c0_i32_9 = arith.constant 0 : i32
    %11 = arith.cmpi ne, %10, %c0_i32_9 : i32
    scf.if %11 {
      %c0_10 = arith.constant 0 : index
      %c0_11 = arith.constant 0 : index
      %12 = vector.load %arg7[%c0_10, %c0_11] : memref<128x128xf32, #tpu.memory_space<vmem>>, vector<128x128xf32>
      %c0_12 = arith.constant 0 : index
      %c0_13 = arith.constant 0 : index
      %13 = vector.load %arg5[%c0_12, %c0_13] : memref<1x128xf32, #tpu.memory_space<vmem>>, vector<1x128xf32>
      %14 = vector.broadcast %13 : vector<1x128xf32> to vector<128x128xf32>
      %15 = arith.addf %12, %14 : vector<128x128xf32>
      %cst_14 = arith.constant 0.000000e+00 : f32
      %16 = vector.broadcast %cst_14 : f32 to vector<128x128xf32>
      %17 = arith.maximumf %15, %16 : vector<128x128xf32>
      %18 = arith.truncf %17 : vector<128x128xf32> to vector<128x128xbf16>
      %c0_15 = arith.constant 0 : index
      %c0_16 = arith.constant 0 : index
      %19 = vector.load %arg6[%c0_15, %c0_16] : memref<128x128xbf16, #tpu.memory_space<vmem>>, vector<128x128xbf16>
      tpu.vector_store %arg6[%c0_15, %c0_16], %18 {strides = array<i32>} : memref<128x128xbf16, #tpu.memory_space<vmem>>, vector<128x128xbf16>,
    } else {
    }
    return
  }
  func.func @transform_0(%arg0: i32, %arg1: i32, %arg2: i32) -> (i32, i32) {
    %c0_i32 = arith.constant 0 : i32
    return %arg0, %arg2 : i32, i32
  }
  func.func @transform_1(%arg0: i32, %arg1: i32, %arg2: i32) -> (i32, i32) {
    %c0_i32 = arith.constant 0 : i32
    return %arg2, %arg1 : i32, i32
  }
  func.func @transform_2(%arg0: i32, %arg1: i32, %arg2: i32) -> (i32, i32) {
    %c0_i32 = arith.constant 0 : i32
    %c0_i32_0 = arith.constant 0 : i32
    return %c0_i32, %arg1 : i32, i32
  }
  func.func @transform_3(%arg0: i32, %arg1: i32, %arg2: i32) -> (i32, i32) {
    %c0_i32 = arith.constant 0 : i32
    return %arg0, %arg1 : i32, i32
  }
}

module attributes {stable_mosaic.version = 11 : i64} {
  func.func @kernel(%arg0: i32, %arg1: i32, %arg2: i32, %arg3: memref<32x512xbf16, #tpu.memory_space<vmem>>, %arg4: memref<512x128xbf16, #tpu.memory_space<vmem>>, %arg5: memref<1x128xf32, #tpu.memory_space<vmem>>, %arg6: memref<32x128xbf16, #tpu.memory_space<vmem>>, %arg7: memref<32x128xf32, #tpu.memory_space<vmem>>) attributes {dimension_semantics = [#tpu.dimension_semantics<parallel>, #tpu.dimension_semantics<parallel>, #tpu.dimension_semantics<arbitrary>], iteration_bounds = array<i64: 1, 1, 1>, scalar_prefetch = 0 : i64, scratch_operands = 1 : i64, tpu.core_type = #tpu.core_type<tc>, window_params = [{transform_indices = @transform_0, window_bounds = array<i64: 32, 512>}, {transform_indices = @transform_1, window_bounds = array<i64: 512, 128>}, {transform_indices = @transform_2, window_bounds = array<i64: 1, 128>}, {transform_indices = @transform_3, window_bounds = array<i64: 32, 128>}]} {
    %c0_i32 = arith.constant 0 : i32
    %0 = arith.cmpi eq, %arg2, %c0_i32 : i32
    %1 = arith.extui %0 : i1 to i32
    %c0_i32_0 = arith.constant 0 : i32
    %2 = arith.cmpi ne, %1, %c0_i32_0 : i32
    scf.if %2 {
      %cst_10 = arith.constant 0.000000e+00 : f32
      %12 = vector.broadcast %cst_10 : f32 to vector<32x128xf32>
      %c0_11 = arith.constant 0 : index
      %c0_12 = arith.constant 0 : index
      %13 = vector.load %arg7[%c0_11, %c0_12] : memref<32x128xf32, #tpu.memory_space<vmem>>, vector<32x128xf32>
      tpu.vector_store %arg7[%c0_11, %c0_12], %12 {strides = array<i32>} : memref<32x128xf32, #tpu.memory_space<vmem>>, vector<32x128xf32>,
    } else {
    }
    %c0 = arith.constant 0 : index
    %c0_1 = arith.constant 0 : index
    %3 = vector.load %arg7[%c0, %c0_1] : memref<32x128xf32, #tpu.memory_space<vmem>>, vector<32x128xf32>
    %c0_2 = arith.constant 0 : index
    %c0_3 = arith.constant 0 : index
    %4 = vector.load %arg3[%c0_2, %c0_3] : memref<32x512xbf16, #tpu.memory_space<vmem>>, vector<32x512xbf16>
    %c0_4 = arith.constant 0 : index
    %c0_5 = arith.constant 0 : index
    %5 = vector.load %arg4[%c0_4, %c0_5] : memref<512x128xbf16, #tpu.memory_space<vmem>>, vector<512x128xbf16>
    %cst = arith.constant dense<0.000000e+00> : vector<32x128xf32>
    %6 = tpu.matmul %4, %5, %cst {dimension_numbers = #tpu.dot_dimension_numbers<[1], [0], [0], [1], [0, 0, 1, 1], [], []>} : vector<32x512xbf16>, vector<512x128xbf16>, vector<32x128xf32> -> vector<32x128xf32>
    %7 = arith.addf %3, %6 : vector<32x128xf32>
    %c0_6 = arith.constant 0 : index
    %c0_7 = arith.constant 0 : index
    %8 = vector.load %arg7[%c0_6, %c0_7] : memref<32x128xf32, #tpu.memory_space<vmem>>, vector<32x128xf32>
    tpu.vector_store %arg7[%c0_6, %c0_7], %7 {strides = array<i32>} : memref<32x128xf32, #tpu.memory_space<vmem>>, vector<32x128xf32>,
    %c0_i32_8 = arith.constant 0 : i32
    %9 = arith.cmpi eq, %arg2, %c0_i32_8 : i32
    %10 = arith.extui %9 : i1 to i32
    %c0_i32_9 = arith.constant 0 : i32
    %11 = arith.cmpi ne, %10, %c0_i32_9 : i32
    scf.if %11 {
      %c0_10 = arith.constant 0 : index
      %c0_11 = arith.constant 0 : index
      %12 = vector.load %arg7[%c0_10, %c0_11] : memref<32x128xf32, #tpu.memory_space<vmem>>, vector<32x128xf32>
      %c0_12 = arith.constant 0 : index
      %c0_13 = arith.constant 0 : index
      %13 = vector.load %arg5[%c0_12, %c0_13] : memref<1x128xf32, #tpu.memory_space<vmem>>, vector<1x128xf32>
      %14 = vector.broadcast %13 : vector<1x128xf32> to vector<32x128xf32>
      %15 = arith.addf %12, %14 : vector<32x128xf32>
      %cst_14 = arith.constant 0.000000e+00 : f32
      %16 = vector.broadcast %cst_14 : f32 to vector<32x128xf32>
      %17 = arith.maximumf %15, %16 : vector<32x128xf32>
      %18 = arith.truncf %17 : vector<32x128xf32> to vector<32x128xbf16>
      %c0_15 = arith.constant 0 : index
      %c0_16 = arith.constant 0 : index
      %19 = vector.load %arg6[%c0_15, %c0_16] : memref<32x128xbf16, #tpu.memory_space<vmem>>, vector<32x128xbf16>
      tpu.vector_store %arg6[%c0_15, %c0_16], %18 {strides = array<i32>} : memref<32x128xbf16, #tpu.memory_space<vmem>>, vector<32x128xbf16>,
    } else {
    }
    return
  }
  func.func @transform_0(%arg0: i32, %arg1: i32, %arg2: i32) -> (i32, i32) {
    %c0_i32 = arith.constant 0 : i32
    return %arg0, %arg2 : i32, i32
  }
  func.func @transform_1(%arg0: i32, %arg1: i32, %arg2: i32) -> (i32, i32) {
    %c0_i32 = arith.constant 0 : i32
    return %arg2, %arg1 : i32, i32
  }
  func.func @transform_2(%arg0: i32, %arg1: i32, %arg2: i32) -> (i32, i32) {
    %c0_i32 = arith.constant 0 : i32
    %c0_i32_0 = arith.constant 0 : i32
    return %c0_i32, %arg1 : i32, i32
  }
  func.func @transform_3(%arg0: i32, %arg1: i32, %arg2: i32) -> (i32, i32) {
    %c0_i32 = arith.constant 0 : i32
    return %arg0, %arg1 : i32, i32
  }
}

module attributes {stable_mosaic.version = 11 : i64} {
  func.func @kernel(%arg0: i32, %arg1: i32, %arg2: i32, %arg3: memref<8x512xbf16, #tpu.memory_space<vmem>>, %arg4: memref<512x128xbf16, #tpu.memory_space<vmem>>, %arg5: memref<1x128xf32, #tpu.memory_space<vmem>>, %arg6: memref<8x128xbf16, #tpu.memory_space<vmem>>, %arg7: memref<8x128xf32, #tpu.memory_space<vmem>>) attributes {dimension_semantics = [#tpu.dimension_semantics<parallel>, #tpu.dimension_semantics<parallel>, #tpu.dimension_semantics<arbitrary>], iteration_bounds = array<i64: 1, 1, 1>, scalar_prefetch = 0 : i64, scratch_operands = 1 : i64, tpu.core_type = #tpu.core_type<tc>, window_params = [{transform_indices = @transform_0, window_bounds = array<i64: 8, 512>}, {transform_indices = @transform_1, window_bounds = array<i64: 512, 128>}, {transform_indices = @transform_2, window_bounds = array<i64: 1, 128>}, {transform_indices = @transform_3, window_bounds = array<i64: 8, 128>}]} {
    %c0_i32 = arith.constant 0 : i32
    %0 = arith.cmpi eq, %arg2, %c0_i32 : i32
    %1 = arith.extui %0 : i1 to i32
    %c0_i32_0 = arith.constant 0 : i32
    %2 = arith.cmpi ne, %1, %c0_i32_0 : i32
    scf.if %2 {
      %cst_10 = arith.constant 0.000000e+00 : f32
      %12 = vector.broadcast %cst_10 : f32 to vector<8x128xf32>
      %c0_11 = arith.constant 0 : index
      %c0_12 = arith.constant 0 : index
      %13 = vector.load %arg7[%c0_11, %c0_12] : memref<8x128xf32, #tpu.memory_space<vmem>>, vector<8x128xf32>
      tpu.vector_store %arg7[%c0_11, %c0_12], %12 {strides = array<i32>} : memref<8x128xf32, #tpu.memory_space<vmem>>, vector<8x128xf32>,
    } else {
    }
    %c0 = arith.constant 0 : index
    %c0_1 = arith.constant 0 : index
    %3 = vector.load %arg7[%c0, %c0_1] : memref<8x128xf32, #tpu.memory_space<vmem>>, vector<8x128xf32>
    %c0_2 = arith.constant 0 : index
    %c0_3 = arith.constant 0 : index
    %4 = vector.load %arg3[%c0_2, %c0_3] : memref<8x512xbf16, #tpu.memory_space<vmem>>, vector<8x512xbf16>
    %c0_4 = arith.constant 0 : index
    %c0_5 = arith.constant 0 : index
    %5 = vector.load %arg4[%c0_4, %c0_5] : memref<512x128xbf16, #tpu.memory_space<vmem>>, vector<512x128xbf16>
    %cst = arith.constant dense<0.000000e+00> : vector<8x128xf32>
    %6 = tpu.matmul %4, %5, %cst {dimension_numbers = #tpu.dot_dimension_numbers<[1], [0], [0], [1], [0, 0, 1, 1], [], []>} : vector<8x512xbf16>, vector<512x128xbf16>, vector<8x128xf32> -> vector<8x128xf32>
    %7 = arith.addf %3, %6 : vector<8x128xf32>
    %c0_6 = arith.constant 0 : index
    %c0_7 = arith.constant 0 : index
    %8 = vector.load %arg7[%c0_6, %c0_7] : memref<8x128xf32, #tpu.memory_space<vmem>>, vector<8x128xf32>
    tpu.vector_store %arg7[%c0_6, %c0_7], %7 {strides = array<i32>} : memref<8x128xf32, #tpu.memory_space<vmem>>, vector<8x128xf32>,
    %c0_i32_8 = arith.constant 0 : i32
    %9 = arith.cmpi eq, %arg2, %c0_i32_8 : i32
    %10 = arith.extui %9 : i1 to i32
    %c0_i32_9 = arith.constant 0 : i32
    %11 = arith.cmpi ne, %10, %c0_i32_9 : i32
    scf.if %11 {
      %c0_10 = arith.constant 0 : index
      %c0_11 = arith.constant 0 : index
      %12 = vector.load %arg7[%c0_10, %c0_11] : memref<8x128xf32, #tpu.memory_space<vmem>>, vector<8x128xf32>
      %c0_12 = arith.constant 0 : index
      %c0_13 = arith.constant 0 : index
      %13 = vector.load %arg5[%c0_12, %c0_13] : memref<1x128xf32, #tpu.memory_space<vmem>>, vector<1x128xf32>
      %14 = vector.broadcast %13 : vector<1x128xf32> to vector<8x128xf32>
      %15 = arith.addf %12, %14 : vector<8x128xf32>
      %cst_14 = arith.constant 0.000000e+00 : f32
      %16 = vector.broadcast %cst_14 : f32 to vector<8x128xf32>
      %17 = arith.maximumf %15, %16 : vector<8x128xf32>
      %18 = arith.truncf %17 : vector<8x128xf32> to vector<8x128xbf16>
      %c0_15 = arith.constant 0 : index
      %c0_16 = arith.constant 0 : index
      %19 = vector.load %arg6[%c0_15, %c0_16] : memref<8x128xbf16, #tpu.memory_space<vmem>>, vector<8x128xbf16>
      tpu.vector_store %arg6[%c0_15, %c0_16], %18 {strides = array<i32>} : memref<8x128xbf16, #tpu.memory_space<vmem>>, vector<8x128xbf16>,
    } else {
    }
    return
  }
  func.func @transform_0(%arg0: i32, %arg1: i32, %arg2: i32) -> (i32, i32) {
    %c0_i32 = arith.constant 0 : i32
    return %arg0, %arg2 : i32, i32
  }
  func.func @transform_1(%arg0: i32, %arg1: i32, %arg2: i32) -> (i32, i32) {
    %c0_i32 = arith.constant 0 : i32
    return %arg2, %arg1 : i32, i32
  }
  func.func @transform_2(%arg0: i32, %arg1: i32, %arg2: i32) -> (i32, i32) {
    %c0_i32 = arith.constant 0 : i32
    %c0_i32_0 = arith.constant 0 : i32
    return %c0_i32, %arg1 : i32, i32
  }
  func.func @transform_3(%arg0: i32, %arg1: i32, %arg2: i32) -> (i32, i32) {
    %c0_i32 = arith.constant 0 : i32
    return %arg0, %arg1 : i32, i32
  }
}

module attributes {stable_mosaic.version = 11 : i64} {
  func.func @_hc_fused_kernel(%arg0: i32, %arg1: memref<1x2x18x16x640xbf16, #tpu.memory_space<vmem>>, %arg2: memref<1x3x640x128xbf16, #tpu.memory_space<vmem>>, %arg3: memref<1x128xf32, #tpu.memory_space<vmem>>, %arg4: memref<128x16xf32, #tpu.memory_space<vmem>>, %arg5: memref<1x16xf32, #tpu.memory_space<vmem>>, %arg6: memref<16x128xf32, #tpu.memory_space<vmem>>, %arg7: memref<1x128xf32, #tpu.memory_space<vmem>>, %arg8: memref<2x16x16x128xf32, #tpu.memory_space<vmem>>, %arg9: memref<2x128xf32, #tpu.memory_space<vmem>>, %arg10: memref<512x128xf32, #tpu.memory_space<vmem>>) attributes {dimension_semantics = [#tpu.dimension_semantics<arbitrary>], iteration_bounds = array<i64: 3>, scalar_prefetch = 0 : i64, scratch_operands = 1 : i64, tpu.core_type = #tpu.core_type<tc>, window_params = [{transform_indices = @transform_0, window_bounds = array<i64: 1, 2, 18, 16, 640>}, {transform_indices = @transform_1, window_bounds = array<i64: 1, 3, 640, 128>}, {pipeline_mode = #tpu.pipeline_mode<synchronous>, transform_indices = @transform_2, window_bounds = array<i64: 1, 128>}, {pipeline_mode = #tpu.pipeline_mode<synchronous>, transform_indices = @transform_3, window_bounds = array<i64: 128, 16>}, {pipeline_mode = #tpu.pipeline_mode<synchronous>, transform_indices = @transform_4, window_bounds = array<i64: 1, 16>}, {pipeline_mode = #tpu.pipeline_mode<synchronous>, transform_indices = @transform_5, window_bounds = array<i64: 16, 128>}, {pipeline_mode = #tpu.pipeline_mode<synchronous>, transform_indices = @transform_6, window_bounds = array<i64: 1, 128>}, {pipeline_mode = #tpu.pipeline_mode<synchronous>, transform_indices = @transform_7, window_bounds = array<i64: 2, 16, 16, 128>}, {pipeline_mode = #tpu.pipeline_mode<synchronous>, transform_indices = @transform_8, window_bounds = array<i64: 2, 128>}]} {
    %c0_i32 = arith.constant 0 : i32
    %0 = arith.cmpi eq, %arg0, %c0_i32 : i32
    %1 = arith.extui %0 : i1 to i32
    %c0_i32_0 = arith.constant 0 : i32
    %2 = arith.cmpi ne, %1, %c0_i32_0 : i32
    scf.if %2 {
      %cst_40 = arith.constant 0.000000e+00 : f32
      %33 = vector.broadcast %cst_40 : f32 to vector<512x128xf32>
      %c0_41 = arith.constant 0 : index
      %c0_42 = arith.constant 0 : index
      %34 = vector.load %arg10[%c0_41, %c0_42] : memref<512x128xf32, #tpu.memory_space<vmem>>, vector<512x128xf32>
      tpu.vector_store %arg10[%c0_41, %c0_42], %33 {strides = array<i32>} : memref<512x128xf32, #tpu.memory_space<vmem>>, vector<512x128xf32>,
    } else {
    }
    %c0 = arith.constant 0 : index
    %c0_1 = arith.constant 0 : index
    %c0_2 = arith.constant 0 : index
    %c0_3 = arith.constant 0 : index
    %c0_4 = arith.constant 0 : index
    %3 = vector.load %arg1[%c0, %c0_1, %c0_2, %c0_3, %c0_4] : memref<1x2x18x16x640xbf16, #tpu.memory_space<vmem>>, vector<1x2x16x16x640xbf16>
    %4 = vector.shape_cast %3 : vector<1x2x16x16x640xbf16> to vector<2x16x16x640xbf16>
    %5 = vector.shape_cast %4 : vector<2x16x16x640xbf16> to vector<512x640xbf16>
    %c0_5 = arith.constant 0 : index
    %c0_6 = arith.constant 0 : index
    %6 = vector.load %arg10[%c0_5, %c0_6] : memref<512x128xf32, #tpu.memory_space<vmem>>, vector<512x128xf32>
    %c0_7 = arith.constant 0 : index
    %c0_8 = arith.constant 0 : index
    %c0_9 = arith.constant 0 : index
    %c0_10 = arith.constant 0 : index
    %7 = vector.load %arg2[%c0_7, %c0_8, %c0_9, %c0_10] : memref<1x3x640x128xbf16, #tpu.memory_space<vmem>>, vector<1x1x640x128xbf16>
    %8 = vector.shape_cast %7 : vector<1x1x640x128xbf16> to vector<640x128xbf16>
    %cst = arith.constant dense<0.000000e+00> : vector<512x128xf32>
    %9 = tpu.matmul %5, %8, %cst {dimension_numbers = #tpu.dot_dimension_numbers<[1], [0], [0], [1], [0, 0, 1, 1], [], []>} : vector<512x640xbf16>, vector<640x128xbf16>, vector<512x128xf32> -> vector<512x128xf32>
    %10 = arith.addf %6, %9 : vector<512x128xf32>
    %c0_11 = arith.constant 0 : index
    %c0_12 = arith.constant 0 : index
    %11 = vector.load %arg10[%c0_11, %c0_12] : memref<512x128xf32, #tpu.memory_space<vmem>>, vector<512x128xf32>
    tpu.vector_store %arg10[%c0_11, %c0_12], %10 {strides = array<i32>} : memref<512x128xf32, #tpu.memory_space<vmem>>, vector<512x128xf32>,
    %c0_13 = arith.constant 0 : index
    %c0_14 = arith.constant 0 : index
    %c1 = arith.constant 1 : index
    %c0_15 = arith.constant 0 : index
    %c0_16 = arith.constant 0 : index
    %12 = vector.load %arg1[%c0_13, %c0_14, %c1, %c0_15, %c0_16] : memref<1x2x18x16x640xbf16, #tpu.memory_space<vmem>>, vector<1x2x16x16x640xbf16>
    %13 = vector.shape_cast %12 : vector<1x2x16x16x640xbf16> to vector<2x16x16x640xbf16>
    %14 = vector.shape_cast %13 : vector<2x16x16x640xbf16> to vector<512x640xbf16>
    %c0_17 = arith.constant 0 : index
    %c0_18 = arith.constant 0 : index
    %15 = vector.load %arg10[%c0_17, %c0_18] : memref<512x128xf32, #tpu.memory_space<vmem>>, vector<512x128xf32>
    %c0_19 = arith.constant 0 : index
    %c1_20 = arith.constant 1 : index
    %c0_21 = arith.constant 0 : index
    %c0_22 = arith.constant 0 : index
    %16 = vector.load %arg2[%c0_19, %c1_20, %c0_21, %c0_22] : memref<1x3x640x128xbf16, #tpu.memory_space<vmem>>, vector<1x1x640x128xbf16>
    %17 = vector.shape_cast %16 : vector<1x1x640x128xbf16> to vector<640x128xbf16>
    %cst_23 = arith.constant dense<0.000000e+00> : vector<512x128xf32>
    %18 = tpu.matmul %14, %17, %cst_23 {dimension_numbers = #tpu.dot_dimension_numbers<[1], [0], [0], [1], [0, 0, 1, 1], [], []>} : vector<512x640xbf16>, vector<640x128xbf16>, vector<512x128xf32> -> vector<512x128xf32>
    %19 = arith.addf %15, %18 : vector<512x128xf32>
    %c0_24 = arith.constant 0 : index
    %c0_25 = arith.constant 0 : index
    %20 = vector.load %arg10[%c0_24, %c0_25] : memref<512x128xf32, #tpu.memory_space<vmem>>, vector<512x128xf32>
    tpu.vector_store %arg10[%c0_24, %c0_25], %19 {strides = array<i32>} : memref<512x128xf32, #tpu.memory_space<vmem>>, vector<512x128xf32>,
    %c0_26 = arith.constant 0 : index
    %c0_27 = arith.constant 0 : index
    %c2 = arith.constant 2 : index
    %c0_28 = arith.constant 0 : index
    %c0_29 = arith.constant 0 : index
    %21 = vector.load %arg1[%c0_26, %c0_27, %c2, %c0_28, %c0_29] : memref<1x2x18x16x640xbf16, #tpu.memory_space<vmem>>, vector<1x2x16x16x640xbf16>
    %22 = vector.shape_cast %21 : vector<1x2x16x16x640xbf16> to vector<2x16x16x640xbf16>
    %23 = vector.shape_cast %22 : vector<2x16x16x640xbf16> to vector<512x640xbf16>
    %c0_30 = arith.constant 0 : index
    %c0_31 = arith.constant 0 : index
    %24 = vector.load %arg10[%c0_30, %c0_31] : memref<512x128xf32, #tpu.memory_space<vmem>>, vector<512x128xf32>
    %c0_32 = arith.constant 0 : index
    %c2_33 = arith.constant 2 : index
    %c0_34 = arith.constant 0 : index
    %c0_35 = arith.constant 0 : index
    %25 = vector.load %arg2[%c0_32, %c2_33, %c0_34, %c0_35] : memref<1x3x640x128xbf16, #tpu.memory_space<vmem>>, vector<1x1x640x128xbf16>
    %26 = vector.shape_cast %25 : vector<1x1x640x128xbf16> to vector<640x128xbf16>
    %cst_36 = arith.constant dense<0.000000e+00> : vector<512x128xf32>
    %27 = tpu.matmul %23, %26, %cst_36 {dimension_numbers = #tpu.dot_dimension_numbers<[1], [0], [0], [1], [0, 0, 1, 1], [], []>} : vector<512x640xbf16>, vector<640x128xbf16>, vector<512x128xf32> -> vector<512x128xf32>
    %28 = arith.addf %24, %27 : vector<512x128xf32>
    %c0_37 = arith.constant 0 : index
    %c0_38 = arith.constant 0 : index
    %29 = vector.load %arg10[%c0_37, %c0_38] : memref<512x128xf32, #tpu.memory_space<vmem>>, vector<512x128xf32>
    tpu.vector_store %arg10[%c0_37, %c0_38], %28 {strides = array<i32>} : memref<512x128xf32, #tpu.memory_space<vmem>>, vector<512x128xf32>,
    %c2_i32 = arith.constant 2 : i32
    %30 = arith.cmpi eq, %arg0, %c2_i32 : i32
    %31 = arith.extui %30 : i1 to i32
    %c0_i32_39 = arith.constant 0 : i32
    %32 = arith.cmpi ne, %31, %c0_i32_39 : i32
    scf.if %32 {
      %c0_40 = arith.constant 0 : index
      %c0_41 = arith.constant 0 : index
      %33 = vector.load %arg10[%c0_40, %c0_41] : memref<512x128xf32, #tpu.memory_space<vmem>>, vector<512x128xf32>
      %c0_42 = arith.constant 0 : index
      %c0_43 = arith.constant 0 : index
      %34 = vector.load %arg3[%c0_42, %c0_43] : memref<1x128xf32, #tpu.memory_space<vmem>>, vector<1x128xf32>
      %35 = vector.broadcast %34 : vector<1x128xf32> to vector<512x128xf32>
      %36 = arith.addf %33, %35 : vector<512x128xf32>
      %cst_44 = arith.constant 0.000000e+00 : f32
      %37 = vector.broadcast %cst_44 : f32 to vector<512x128xf32>
      %38 = arith.maximumf %36, %37 : vector<512x128xf32>
      %39 = vector.shape_cast %38 : vector<512x128xf32> to vector<2x256x128xf32>
      %cst_45 = arith.constant dense<0.000000e+00> : vector<2x128xf32>
      %40 = vector.multi_reduction <add>, %39, %cst_45 [1] : vector<2x256x128xf32> to vector<2x128xf32>
      %cst_46 = arith.constant 2.560000e+02 : f32
      %41 = vector.broadcast %cst_46 : f32 to vector<2x128xf32>
      %42 = arith.divf %40, %41 : vector<2x128xf32>
      %cst_47 = arith.constant dense<0xFF800000> : vector<2x128xf32>
      %43 = vector.multi_reduction <maximumf>, %39, %cst_47 [1] : vector<2x256x128xf32> to vector<2x128xf32>
      %c0_48 = arith.constant 0 : index
      %c0_49 = arith.constant 0 : index
      %44 = vector.load %arg4[%c0_48, %c0_49] : memref<128x16xf32, #tpu.memory_space<vmem>>, vector<128x16xf32>
      %cst_50 = arith.constant dense<0.000000e+00> : vector<2x16xf32>
      %45 = tpu.matmul %42, %44, %cst_50 {dimension_numbers = #tpu.dot_dimension_numbers<[1], [0], [0], [1], [0, 0, 1, 1], [], []>} : vector<2x128xf32>, vector<128x16xf32>, vector<2x16xf32> -> vector<2x16xf32>
      %c0_51 = arith.constant 0 : index
      %c0_52 = arith.constant 0 : index
      %46 = vector.load %arg5[%c0_51, %c0_52] : memref<1x16xf32, #tpu.memory_space<vmem>>, vector<1x16xf32>
      %47 = vector.broadcast %46 : vector<1x16xf32> to vector<2x16xf32>
      %48 = arith.addf %45, %47 : vector<2x16xf32>
      %cst_53 = arith.constant 0.000000e+00 : f32
      %49 = vector.broadcast %cst_53 : f32 to vector<2x16xf32>
      %50 = arith.maximumf %48, %49 : vector<2x16xf32>
      %c0_54 = arith.constant 0 : index
      %c0_55 = arith.constant 0 : index
      %51 = vector.load %arg6[%c0_54, %c0_55] : memref<16x128xf32, #tpu.memory_space<vmem>>, vector<16x128xf32>
      %cst_56 = arith.constant dense<0.000000e+00> : vector<2x128xf32>
      %52 = tpu.matmul %50, %51, %cst_56 {dimension_numbers = #tpu.dot_dimension_numbers<[1], [0], [0], [1], [0, 0, 1, 1], [], []>} : vector<2x16xf32>, vector<16x128xf32>, vector<2x128xf32> -> vector<2x128xf32>
      %c0_57 = arith.constant 0 : index
      %c0_58 = arith.constant 0 : index
      %53 = vector.load %arg7[%c0_57, %c0_58] : memref<1x128xf32, #tpu.memory_space<vmem>>, vector<1x128xf32>
      %54 = vector.broadcast %53 : vector<1x128xf32> to vector<2x128xf32>
      %55 = arith.addf %52, %54 : vector<2x128xf32>
      %56 = arith.negf %55 : vector<2x128xf32>
      %57 = math.exp %56 : vector<2x128xf32>
      %cst_59 = arith.constant 1.000000e+00 : f32
      %58 = vector.broadcast %cst_59 : f32 to vector<2x128xf32>
      %59 = arith.addf %58, %57 : vector<2x128xf32>
      %60 = arith.divf %58, %59 : vector<2x128xf32>
      %61 = vector.shape_cast %60 : vector<2x128xf32> to vector<2x1x128xf32>
      %62 = vector.broadcast %61 : vector<2x1x128xf32> to vector<2x256x128xf32>
      %63 = arith.mulf %39, %62 : vector<2x256x128xf32>
      %64 = vector.shape_cast %63 : vector<2x256x128xf32> to vector<2x16x16x128xf32>
      %c0_60 = arith.constant 0 : index
      %c0_61 = arith.constant 0 : index
      %c0_62 = arith.constant 0 : index
      %c0_63 = arith.constant 0 : index
      %65 = vector.load %arg8[%c0_60, %c0_61, %c0_62, %c0_63] : memref<2x16x16x128xf32, #tpu.memory_space<vmem>>, vector<2x16x16x128xf32>
      tpu.vector_store %arg8[%c0_60, %c0_61, %c0_62, %c0_63], %64 {strides = array<i32>} : memref<2x16x16x128xf32, #tpu.memory_space<vmem>>, vector<2x16x16x128xf32>,
      %66 = arith.mulf %43, %60 : vector<2x128xf32>
      %c0_64 = arith.constant 0 : index
      %c0_65 = arith.constant 0 : index
      %67 = vector.load %arg9[%c0_64, %c0_65] : memref<2x128xf32, #tpu.memory_space<vmem>>, vector<2x128xf32>
      tpu.vector_store %arg9[%c0_64, %c0_65], %66 {strides = array<i32>} : memref<2x128xf32, #tpu.memory_space<vmem>>, vector<2x128xf32>,
    } else {
    }
    return
  }
  func.func @transform_0(%arg0: i32) -> (i32, i32, i32, i32, i32) {
    %c0_i32 = arith.constant 0 : i32
    %c0_i32_0 = arith.constant 0 : i32
    %c0_i32_1 = arith.constant 0 : i32
    %c0_i32_2 = arith.constant 0 : i32
    %c0_i32_3 = arith.constant 0 : i32
    return %arg0, %c0_i32, %c0_i32_0, %c0_i32_1, %c0_i32_2 : i32, i32, i32, i32, i32
  }
  func.func @transform_1(%arg0: i32) -> (i32, i32, i32, i32) {
    %c0_i32 = arith.constant 0 : i32
    %c0_i32_0 = arith.constant 0 : i32
    %c0_i32_1 = arith.constant 0 : i32
    %c0_i32_2 = arith.constant 0 : i32
    return %arg0, %c0_i32, %c0_i32_0, %c0_i32_1 : i32, i32, i32, i32
  }
  func.func @transform_2(%arg0: i32) -> (i32, i32) {
    %c0_i32 = arith.constant 0 : i32
    %c0_i32_0 = arith.constant 0 : i32
    %c0_i32_1 = arith.constant 0 : i32
    return %c0_i32, %c0_i32_0 : i32, i32
  }
  func.func @transform_3(%arg0: i32) -> (i32, i32) {
    %c0_i32 = arith.constant 0 : i32
    %c0_i32_0 = arith.constant 0 : i32
    %c0_i32_1 = arith.constant 0 : i32
    return %c0_i32, %c0_i32_0 : i32, i32
  }
  func.func @transform_4(%arg0: i32) -> (i32, i32) {
    %c0_i32 = arith.constant 0 : i32
    %c0_i32_0 = arith.constant 0 : i32
    %c0_i32_1 = arith.constant 0 : i32
    return %c0_i32, %c0_i32_0 : i32, i32
  }
  func.func @transform_5(%arg0: i32) -> (i32, i32) {
    %c0_i32 = arith.constant 0 : i32
    %c0_i32_0 = arith.constant 0 : i32
    %c0_i32_1 = arith.constant 0 : i32
    return %c0_i32, %c0_i32_0 : i32, i32
  }
  func.func @transform_6(%arg0: i32) -> (i32, i32) {
    %c0_i32 = arith.constant 0 : i32
    %c0_i32_0 = arith.constant 0 : i32
    %c0_i32_1 = arith.constant 0 : i32
    return %c0_i32, %c0_i32_0 : i32, i32
  }
  func.func @transform_7(%arg0: i32) -> (i32, i32, i32, i32) {
    %c0_i32 = arith.constant 0 : i32
    %c0_i32_0 = arith.constant 0 : i32
    %c0_i32_1 = arith.constant 0 : i32
    %c0_i32_2 = arith.constant 0 : i32
    %c0_i32_3 = arith.constant 0 : i32
    return %c0_i32, %c0_i32_0, %c0_i32_1, %c0_i32_2 : i32, i32, i32, i32
  }
  func.func @transform_8(%arg0: i32) -> (i32, i32) {
    %c0_i32 = arith.constant 0 : i32
    %c0_i32_0 = arith.constant 0 : i32
    %c0_i32_1 = arith.constant 0 : i32
    return %c0_i32, %c0_i32_0 : i32, i32
  }
}

module attributes {stable_mosaic.version = 11 : i64} {
  func.func @kernel(%arg0: i32, %arg1: i32, %arg2: i32, %arg3: memref<256x128xbf16, #tpu.memory_space<vmem>>, %arg4: memref<128x128xbf16, #tpu.memory_space<vmem>>, %arg5: memref<1x128xf32, #tpu.memory_space<vmem>>, %arg6: memref<256x128xf32, #tpu.memory_space<vmem>>, %arg7: memref<256x128xf32, #tpu.memory_space<vmem>>) attributes {dimension_semantics = [#tpu.dimension_semantics<parallel>, #tpu.dimension_semantics<parallel>, #tpu.dimension_semantics<arbitrary>], iteration_bounds = array<i64: 2, 1, 1>, scalar_prefetch = 0 : i64, scratch_operands = 1 : i64, tpu.core_type = #tpu.core_type<tc>, window_params = [{transform_indices = @transform_0, window_bounds = array<i64: 256, 128>}, {transform_indices = @transform_1, window_bounds = array<i64: 128, 128>}, {transform_indices = @transform_2, window_bounds = array<i64: 1, 128>}, {transform_indices = @transform_3, window_bounds = array<i64: 256, 128>}]} {
    %c0_i32 = arith.constant 0 : i32
    %0 = arith.cmpi eq, %arg2, %c0_i32 : i32
    %1 = arith.extui %0 : i1 to i32
    %c0_i32_0 = arith.constant 0 : i32
    %2 = arith.cmpi ne, %1, %c0_i32_0 : i32
    scf.if %2 {
      %cst_10 = arith.constant 0.000000e+00 : f32
      %12 = vector.broadcast %cst_10 : f32 to vector<256x128xf32>
      %c0_11 = arith.constant 0 : index
      %c0_12 = arith.constant 0 : index
      %13 = vector.load %arg7[%c0_11, %c0_12] : memref<256x128xf32, #tpu.memory_space<vmem>>, vector<256x128xf32>
      tpu.vector_store %arg7[%c0_11, %c0_12], %12 {strides = array<i32>} : memref<256x128xf32, #tpu.memory_space<vmem>>, vector<256x128xf32>,
    } else {
    }
    %c0 = arith.constant 0 : index
    %c0_1 = arith.constant 0 : index
    %3 = vector.load %arg7[%c0, %c0_1] : memref<256x128xf32, #tpu.memory_space<vmem>>, vector<256x128xf32>
    %c0_2 = arith.constant 0 : index
    %c0_3 = arith.constant 0 : index
    %4 = vector.load %arg3[%c0_2, %c0_3] : memref<256x128xbf16, #tpu.memory_space<vmem>>, vector<256x128xbf16>
    %c0_4 = arith.constant 0 : index
    %c0_5 = arith.constant 0 : index
    %5 = vector.load %arg4[%c0_4, %c0_5] : memref<128x128xbf16, #tpu.memory_space<vmem>>, vector<128x128xbf16>
    %cst = arith.constant dense<0.000000e+00> : vector<256x128xf32>
    %6 = tpu.matmul %4, %5, %cst {dimension_numbers = #tpu.dot_dimension_numbers<[1], [0], [0], [1], [0, 0, 1, 1], [], []>} : vector<256x128xbf16>, vector<128x128xbf16>, vector<256x128xf32> -> vector<256x128xf32>
    %7 = arith.addf %3, %6 : vector<256x128xf32>
    %c0_6 = arith.constant 0 : index
    %c0_7 = arith.constant 0 : index
    %8 = vector.load %arg7[%c0_6, %c0_7] : memref<256x128xf32, #tpu.memory_space<vmem>>, vector<256x128xf32>
    tpu.vector_store %arg7[%c0_6, %c0_7], %7 {strides = array<i32>} : memref<256x128xf32, #tpu.memory_space<vmem>>, vector<256x128xf32>,
    %c0_i32_8 = arith.constant 0 : i32
    %9 = arith.cmpi eq, %arg2, %c0_i32_8 : i32
    %10 = arith.extui %9 : i1 to i32
    %c0_i32_9 = arith.constant 0 : i32
    %11 = arith.cmpi ne, %10, %c0_i32_9 : i32
    scf.if %11 {
      %c0_10 = arith.constant 0 : index
      %c0_11 = arith.constant 0 : index
      %12 = vector.load %arg7[%c0_10, %c0_11] : memref<256x128xf32, #tpu.memory_space<vmem>>, vector<256x128xf32>
      %c0_12 = arith.constant 0 : index
      %c0_13 = arith.constant 0 : index
      %13 = vector.load %arg5[%c0_12, %c0_13] : memref<1x128xf32, #tpu.memory_space<vmem>>, vector<1x128xf32>
      %14 = vector.broadcast %13 : vector<1x128xf32> to vector<256x128xf32>
      %15 = arith.addf %12, %14 : vector<256x128xf32>
      %c0_14 = arith.constant 0 : index
      %c0_15 = arith.constant 0 : index
      %16 = vector.load %arg6[%c0_14, %c0_15] : memref<256x128xf32, #tpu.memory_space<vmem>>, vector<256x128xf32>
      tpu.vector_store %arg6[%c0_14, %c0_15], %15 {strides = array<i32>} : memref<256x128xf32, #tpu.memory_space<vmem>>, vector<256x128xf32>,
    } else {
    }
    return
  }
  func.func @transform_0(%arg0: i32, %arg1: i32, %arg2: i32) -> (i32, i32) {
    %c0_i32 = arith.constant 0 : i32
    return %arg0, %arg2 : i32, i32
  }
  func.func @transform_1(%arg0: i32, %arg1: i32, %arg2: i32) -> (i32, i32) {
    %c0_i32 = arith.constant 0 : i32
    return %arg2, %arg1 : i32, i32
  }
  func.func @transform_2(%arg0: i32, %arg1: i32, %arg2: i32) -> (i32, i32) {
    %c0_i32 = arith.constant 0 : i32
    %c0_i32_0 = arith.constant 0 : i32
    return %c0_i32, %arg1 : i32, i32
  }
  func.func @transform_3(%arg0: i32, %arg1: i32, %arg2: i32) -> (i32, i32) {
    %c0_i32 = arith.constant 0 : i32
    return %arg0, %arg1 : i32, i32
  }
}

module attributes {stable_mosaic.version = 11 : i64} {
  func.func @kernel(%arg0: i32, %arg1: i32, %arg2: i32, %arg3: memref<128x128xbf16, #tpu.memory_space<vmem>>, %arg4: memref<128x128xbf16, #tpu.memory_space<vmem>>, %arg5: memref<128x128xf32, #tpu.memory_space<vmem>>, %arg6: memref<128x128xf32, #tpu.memory_space<vmem>>) attributes {dimension_semantics = [#tpu.dimension_semantics<parallel>, #tpu.dimension_semantics<parallel>, #tpu.dimension_semantics<arbitrary>], iteration_bounds = array<i64: 1, 1, 1>, scalar_prefetch = 0 : i64, scratch_operands = 1 : i64, tpu.core_type = #tpu.core_type<tc>, window_params = [{transform_indices = @transform_0, window_bounds = array<i64: 128, 128>}, {transform_indices = @transform_1, window_bounds = array<i64: 128, 128>}, {transform_indices = @transform_2, window_bounds = array<i64: 128, 128>}]} {
    %c0_i32 = arith.constant 0 : i32
    %0 = arith.cmpi eq, %arg2, %c0_i32 : i32
    %1 = arith.extui %0 : i1 to i32
    %c0_i32_0 = arith.constant 0 : i32
    %2 = arith.cmpi ne, %1, %c0_i32_0 : i32
    scf.if %2 {
      %cst_10 = arith.constant 0.000000e+00 : f32
      %12 = vector.broadcast %cst_10 : f32 to vector<128x128xf32>
      %c0_11 = arith.constant 0 : index
      %c0_12 = arith.constant 0 : index
      %13 = vector.load %arg6[%c0_11, %c0_12] : memref<128x128xf32, #tpu.memory_space<vmem>>, vector<128x128xf32>
      tpu.vector_store %arg6[%c0_11, %c0_12], %12 {strides = array<i32>} : memref<128x128xf32, #tpu.memory_space<vmem>>, vector<128x128xf32>,
    } else {
    }
    %c0 = arith.constant 0 : index
    %c0_1 = arith.constant 0 : index
    %3 = vector.load %arg6[%c0, %c0_1] : memref<128x128xf32, #tpu.memory_space<vmem>>, vector<128x128xf32>
    %c0_2 = arith.constant 0 : index
    %c0_3 = arith.constant 0 : index
    %4 = vector.load %arg3[%c0_2, %c0_3] : memref<128x128xbf16, #tpu.memory_space<vmem>>, vector<128x128xbf16>
    %c0_4 = arith.constant 0 : index
    %c0_5 = arith.constant 0 : index
    %5 = vector.load %arg4[%c0_4, %c0_5] : memref<128x128xbf16, #tpu.memory_space<vmem>>, vector<128x128xbf16>
    %cst = arith.constant dense<0.000000e+00> : vector<128x128xf32>
    %6 = tpu.matmul %4, %5, %cst {dimension_numbers = #tpu.dot_dimension_numbers<[1], [0], [0], [1], [0, 0, 1, 1], [], []>} : vector<128x128xbf16>, vector<128x128xbf16>, vector<128x128xf32> -> vector<128x128xf32>
    %7 = arith.addf %3, %6 : vector<128x128xf32>
    %c0_6 = arith.constant 0 : index
    %c0_7 = arith.constant 0 : index
    %8 = vector.load %arg6[%c0_6, %c0_7] : memref<128x128xf32, #tpu.memory_space<vmem>>, vector<128x128xf32>
    tpu.vector_store %arg6[%c0_6, %c0_7], %7 {strides = array<i32>} : memref<128x128xf32, #tpu.memory_space<vmem>>, vector<128x128xf32>,
    %c0_i32_8 = arith.constant 0 : i32
    %9 = arith.cmpi eq, %arg2, %c0_i32_8 : i32
    %10 = arith.extui %9 : i1 to i32
    %c0_i32_9 = arith.constant 0 : i32
    %11 = arith.cmpi ne, %10, %c0_i32_9 : i32
    scf.if %11 {
      %c0_10 = arith.constant 0 : index
      %c0_11 = arith.constant 0 : index
      %12 = vector.load %arg6[%c0_10, %c0_11] : memref<128x128xf32, #tpu.memory_space<vmem>>, vector<128x128xf32>
      %c0_12 = arith.constant 0 : index
      %c0_13 = arith.constant 0 : index
      %13 = vector.load %arg5[%c0_12, %c0_13] : memref<128x128xf32, #tpu.memory_space<vmem>>, vector<128x128xf32>
      tpu.vector_store %arg5[%c0_12, %c0_13], %12 {strides = array<i32>} : memref<128x128xf32, #tpu.memory_space<vmem>>, vector<128x128xf32>,
    } else {
    }
    return
  }
  func.func @transform_0(%arg0: i32, %arg1: i32, %arg2: i32) -> (i32, i32) {
    %c0_i32 = arith.constant 0 : i32
    return %arg0, %arg2 : i32, i32
  }
  func.func @transform_1(%arg0: i32, %arg1: i32, %arg2: i32) -> (i32, i32) {
    %c0_i32 = arith.constant 0 : i32
    return %arg2, %arg1 : i32, i32
  }
  func.func @transform_2(%arg0: i32, %arg1: i32, %arg2: i32) -> (i32, i32) {
    %c0_i32 = arith.constant 0 : i32
    return %arg0, %arg1 : i32, i32
  }
}

module attributes {stable_mosaic.version = 11 : i64} {
  func.func @kernel(%arg0: i32, %arg1: i32, %arg2: i32, %arg3: memref<128x128xbf16, #tpu.memory_space<vmem>>, %arg4: memref<128x256xbf16, #tpu.memory_space<vmem>>, %arg5: memref<128x256xf32, #tpu.memory_space<vmem>>, %arg6: memref<128x256xf32, #tpu.memory_space<vmem>>) attributes {dimension_semantics = [#tpu.dimension_semantics<parallel>, #tpu.dimension_semantics<parallel>, #tpu.dimension_semantics<arbitrary>], iteration_bounds = array<i64: 1, 4, 1>, scalar_prefetch = 0 : i64, scratch_operands = 1 : i64, tpu.core_type = #tpu.core_type<tc>, window_params = [{transform_indices = @transform_0, window_bounds = array<i64: 128, 128>}, {transform_indices = @transform_1, window_bounds = array<i64: 128, 256>}, {transform_indices = @transform_2, window_bounds = array<i64: 128, 256>}]} {
    %c0_i32 = arith.constant 0 : i32
    %0 = arith.cmpi eq, %arg2, %c0_i32 : i32
    %1 = arith.extui %0 : i1 to i32
    %c0_i32_0 = arith.constant 0 : i32
    %2 = arith.cmpi ne, %1, %c0_i32_0 : i32
    scf.if %2 {
      %cst_10 = arith.constant 0.000000e+00 : f32
      %12 = vector.broadcast %cst_10 : f32 to vector<128x256xf32>
      %c0_11 = arith.constant 0 : index
      %c0_12 = arith.constant 0 : index
      %13 = vector.load %arg6[%c0_11, %c0_12] : memref<128x256xf32, #tpu.memory_space<vmem>>, vector<128x256xf32>
      tpu.vector_store %arg6[%c0_11, %c0_12], %12 {strides = array<i32>} : memref<128x256xf32, #tpu.memory_space<vmem>>, vector<128x256xf32>,
    } else {
    }
    %c0 = arith.constant 0 : index
    %c0_1 = arith.constant 0 : index
    %3 = vector.load %arg6[%c0, %c0_1] : memref<128x256xf32, #tpu.memory_space<vmem>>, vector<128x256xf32>
    %c0_2 = arith.constant 0 : index
    %c0_3 = arith.constant 0 : index
    %4 = vector.load %arg3[%c0_2, %c0_3] : memref<128x128xbf16, #tpu.memory_space<vmem>>, vector<128x128xbf16>
    %c0_4 = arith.constant 0 : index
    %c0_5 = arith.constant 0 : index
    %5 = vector.load %arg4[%c0_4, %c0_5] : memref<128x256xbf16, #tpu.memory_space<vmem>>, vector<128x256xbf16>
    %cst = arith.constant dense<0.000000e+00> : vector<128x256xf32>
    %6 = tpu.matmul %4, %5, %cst {dimension_numbers = #tpu.dot_dimension_numbers<[1], [0], [0], [1], [0, 0, 1, 1], [], []>} : vector<128x128xbf16>, vector<128x256xbf16>, vector<128x256xf32> -> vector<128x256xf32>
    %7 = arith.addf %3, %6 : vector<128x256xf32>
    %c0_6 = arith.constant 0 : index
    %c0_7 = arith.constant 0 : index
    %8 = vector.load %arg6[%c0_6, %c0_7] : memref<128x256xf32, #tpu.memory_space<vmem>>, vector<128x256xf32>
    tpu.vector_store %arg6[%c0_6, %c0_7], %7 {strides = array<i32>} : memref<128x256xf32, #tpu.memory_space<vmem>>, vector<128x256xf32>,
    %c0_i32_8 = arith.constant 0 : i32
    %9 = arith.cmpi eq, %arg2, %c0_i32_8 : i32
    %10 = arith.extui %9 : i1 to i32
    %c0_i32_9 = arith.constant 0 : i32
    %11 = arith.cmpi ne, %10, %c0_i32_9 : i32
    scf.if %11 {
      %c0_10 = arith.constant 0 : index
      %c0_11 = arith.constant 0 : index
      %12 = vector.load %arg6[%c0_10, %c0_11] : memref<128x256xf32, #tpu.memory_space<vmem>>, vector<128x256xf32>
      %c0_12 = arith.constant 0 : index
      %c0_13 = arith.constant 0 : index
      %13 = vector.load %arg5[%c0_12, %c0_13] : memref<128x256xf32, #tpu.memory_space<vmem>>, vector<128x256xf32>
      tpu.vector_store %arg5[%c0_12, %c0_13], %12 {strides = array<i32>} : memref<128x256xf32, #tpu.memory_space<vmem>>, vector<128x256xf32>,
    } else {
    }
    return
  }
  func.func @transform_0(%arg0: i32, %arg1: i32, %arg2: i32) -> (i32, i32) {
    %c0_i32 = arith.constant 0 : i32
    return %arg0, %arg2 : i32, i32
  }
  func.func @transform_1(%arg0: i32, %arg1: i32, %arg2: i32) -> (i32, i32) {
    %c0_i32 = arith.constant 0 : i32
    return %arg2, %arg1 : i32, i32
  }
  func.func @transform_2(%arg0: i32, %arg1: i32, %arg2: i32) -> (i32, i32) {
    %c0_i32 = arith.constant 0 : i32
    return %arg0, %arg1 : i32, i32
  }
}

module attributes {stable_mosaic.version = 11 : i64} {
  func.func @kernel(%arg0: i32, %arg1: i32, %arg2: i32, %arg3: memref<8x128xbf16, #tpu.memory_space<vmem>>, %arg4: memref<128x128xbf16, #tpu.memory_space<vmem>>, %arg5: memref<1x128xf32, #tpu.memory_space<vmem>>, %arg6: memref<8x128xf32, #tpu.memory_space<vmem>>, %arg7: memref<8x128xf32, #tpu.memory_space<vmem>>) attributes {dimension_semantics = [#tpu.dimension_semantics<parallel>, #tpu.dimension_semantics<parallel>, #tpu.dimension_semantics<arbitrary>], iteration_bounds = array<i64: 1, 1, 1>, scalar_prefetch = 0 : i64, scratch_operands = 1 : i64, tpu.core_type = #tpu.core_type<tc>, window_params = [{transform_indices = @transform_0, window_bounds = array<i64: 8, 128>}, {transform_indices = @transform_1, window_bounds = array<i64: 128, 128>}, {transform_indices = @transform_2, window_bounds = array<i64: 1, 128>}, {transform_indices = @transform_3, window_bounds = array<i64: 8, 128>}]} {
    %c0_i32 = arith.constant 0 : i32
    %0 = arith.cmpi eq, %arg2, %c0_i32 : i32
    %1 = arith.extui %0 : i1 to i32
    %c0_i32_0 = arith.constant 0 : i32
    %2 = arith.cmpi ne, %1, %c0_i32_0 : i32
    scf.if %2 {
      %cst_10 = arith.constant 0.000000e+00 : f32
      %12 = vector.broadcast %cst_10 : f32 to vector<8x128xf32>
      %c0_11 = arith.constant 0 : index
      %c0_12 = arith.constant 0 : index
      %13 = vector.load %arg7[%c0_11, %c0_12] : memref<8x128xf32, #tpu.memory_space<vmem>>, vector<8x128xf32>
      tpu.vector_store %arg7[%c0_11, %c0_12], %12 {strides = array<i32>} : memref<8x128xf32, #tpu.memory_space<vmem>>, vector<8x128xf32>,
    } else {
    }
    %c0 = arith.constant 0 : index
    %c0_1 = arith.constant 0 : index
    %3 = vector.load %arg7[%c0, %c0_1] : memref<8x128xf32, #tpu.memory_space<vmem>>, vector<8x128xf32>
    %c0_2 = arith.constant 0 : index
    %c0_3 = arith.constant 0 : index
    %4 = vector.load %arg3[%c0_2, %c0_3] : memref<8x128xbf16, #tpu.memory_space<vmem>>, vector<8x128xbf16>
    %c0_4 = arith.constant 0 : index
    %c0_5 = arith.constant 0 : index
    %5 = vector.load %arg4[%c0_4, %c0_5] : memref<128x128xbf16, #tpu.memory_space<vmem>>, vector<128x128xbf16>
    %cst = arith.constant dense<0.000000e+00> : vector<8x128xf32>
    %6 = tpu.matmul %4, %5, %cst {dimension_numbers = #tpu.dot_dimension_numbers<[1], [0], [0], [1], [0, 0, 1, 1], [], []>} : vector<8x128xbf16>, vector<128x128xbf16>, vector<8x128xf32> -> vector<8x128xf32>
    %7 = arith.addf %3, %6 : vector<8x128xf32>
    %c0_6 = arith.constant 0 : index
    %c0_7 = arith.constant 0 : index
    %8 = vector.load %arg7[%c0_6, %c0_7] : memref<8x128xf32, #tpu.memory_space<vmem>>, vector<8x128xf32>
    tpu.vector_store %arg7[%c0_6, %c0_7], %7 {strides = array<i32>} : memref<8x128xf32, #tpu.memory_space<vmem>>, vector<8x128xf32>,
    %c0_i32_8 = arith.constant 0 : i32
    %9 = arith.cmpi eq, %arg2, %c0_i32_8 : i32
    %10 = arith.extui %9 : i1 to i32
    %c0_i32_9 = arith.constant 0 : i32
    %11 = arith.cmpi ne, %10, %c0_i32_9 : i32
    scf.if %11 {
      %c0_10 = arith.constant 0 : index
      %c0_11 = arith.constant 0 : index
      %12 = vector.load %arg7[%c0_10, %c0_11] : memref<8x128xf32, #tpu.memory_space<vmem>>, vector<8x128xf32>
      %c0_12 = arith.constant 0 : index
      %c0_13 = arith.constant 0 : index
      %13 = vector.load %arg5[%c0_12, %c0_13] : memref<1x128xf32, #tpu.memory_space<vmem>>, vector<1x128xf32>
      %14 = vector.broadcast %13 : vector<1x128xf32> to vector<8x128xf32>
      %15 = arith.addf %12, %14 : vector<8x128xf32>
      %c0_14 = arith.constant 0 : index
      %c0_15 = arith.constant 0 : index
      %16 = vector.load %arg6[%c0_14, %c0_15] : memref<8x128xf32, #tpu.memory_space<vmem>>, vector<8x128xf32>
      tpu.vector_store %arg6[%c0_14, %c0_15], %15 {strides = array<i32>} : memref<8x128xf32, #tpu.memory_space<vmem>>, vector<8x128xf32>,
    } else {
    }
    return
  }
  func.func @transform_0(%arg0: i32, %arg1: i32, %arg2: i32) -> (i32, i32) {
    %c0_i32 = arith.constant 0 : i32
    return %arg0, %arg2 : i32, i32
  }
  func.func @transform_1(%arg0: i32, %arg1: i32, %arg2: i32) -> (i32, i32) {
    %c0_i32 = arith.constant 0 : i32
    return %arg2, %arg1 : i32, i32
  }
  func.func @transform_2(%arg0: i32, %arg1: i32, %arg2: i32) -> (i32, i32) {
    %c0_i32 = arith.constant 0 : i32
    %c0_i32_0 = arith.constant 0 : i32
    return %c0_i32, %arg1 : i32, i32
  }
  func.func @transform_3(%arg0: i32, %arg1: i32, %arg2: i32) -> (i32, i32) {
    %c0_i32 = arith.constant 0 : i32
    return %arg0, %arg1 : i32, i32
  }
}

</mosaic_0001>

<bundles_post_ra>
// kernel: tile.13
= control target key start
LH: loop header
LB: loop body
LE: loop exit
PB: predicated region body
PF: predicated region fallthrough
CT: control target
= control target key end

     0   :  { %s64_s0 = inlined_call_operand.vmem [shape: f32[3], index: 0, kind: input, shape index: {}]   ;;  %s65_s1 = inlined_call_operand.vmem [shape: f32[64,3], index: 1, kind: output, shape index: {}]  }
   0x1   :  { %v4_v0 = vld [vmem:[%s64_s0] ss:$0 sm:$0xff] }
   0x2   :  { %5 = vst [vmem:[%s65_s1] sm:$0xff] %v4_v0  ;;  %20 = vst [vmem:[%s65_s1 + $0x8] sm:$0xff] %v4_v0 }
   0x3   :  { %21 = vst [vmem:[%s65_s1 + $0x10] sm:$0xff] %v4_v0  ;;  %22 = vst [vmem:[%s65_s1 + $0x18] sm:$0xff] %v4_v0 }
   0x4   :  { %23 = vst [vmem:[%s65_s1 + $0x20] sm:$0xff] %v4_v0  ;;  %24 = vst [vmem:[%s65_s1 + $0x28] sm:$0xff] %v4_v0 }
   0x5   :  { %25 = vst [vmem:[%s65_s1 + $0x30] sm:$0xff] %v4_v0  ;;  %26 = vst [vmem:[%s65_s1 + $0x38] sm:$0xff] %v4_v0 }

// kernel: tile.14
= control target key start
LH: loop header
LB: loop body
LE: loop exit
PB: predicated region body
PF: predicated region fallthrough
CT: control target
= control target key end

     0   :  { %vm9_vm0 = vcmask 15360   ;;  %s544_s12 = smov 126   ;;  %s545_s13 = smov 120   ;;  %vm3_vm1 = vcmask 23552   ;;  %vm13_vm2 = vcmask 7168   ;;  %vm16_vm3 = vcmask 1048560   ;;  %s815_s0 = inlined_call_operand.vmem [shape: f32[64,3], index: 0, kind: input, shape index: {}]   ;;  %s816_s1 = inlined_call_operand.vmem [shape: f32[192], index: 1, kind: output, shape index: {}]  }
   0x1   :  { %v417_v0 = vld [vmem:[%s815_s0 + $0x2a] sm:$0x1]   ;;  %v420_v3 = vld [vmem:[%s815_s0 + $0x28] sm:$0x1]   ;;  %v419_v4 = vld [vmem:[%s815_s0 + $0x29] sm:$0x1]  }
   0x2   :  { %v418_v1 = vld [vmem:[%s815_s0 + $0x2a] sm:$0x1]   ;;  %26 = vrot.lane.b32.xlu1 %v420_v3, %s545_s13  ;;  %v421_v5 = vld [vmem:[%s815_s0 + $0x27] sm:$0x1]   ;;  %s546_s18 = smov 123   ;;  %s547_s19 = smov 117  }
   0x3   :  { %v10_v2 = vsel %vm9_vm0, %v418_v1, %v417_v0  ;;  %v422_v6 = vld [vmem:[%s815_s0 + $0x26] sm:$0x1]   ;;  %v423_v7 = vld [vmem:[%s815_s0 + $0x25] sm:$0x1]   ;;  %s548_s24 = smov 114   ;;  %s549_s25 = smov 111  }
   0x4   :  { %11 = vrot.lane.b32.xlu0 %v10_v2, %s544_s12  ;;  %v424_v8 = vld [vmem:[%s815_s0 + $0x24] sm:$0x1]   ;;  %v425_v9 = vld [vmem:[%s815_s0 + $0x23] sm:$0x1]   ;;  %s550_s30 = smov 108   ;;  %s551_s2 = smov 105  }
   0x5   :  { %v426_v10 = vld [vmem:[%s815_s0 + $0x22] sm:$0x1]   ;;  %v427_v11 = vld [vmem:[%s815_s0 + $0x21] sm:$0x1]   ;;  %s552_s7 = smov 102   ;;  %s553_s8 = smov 99  }
   0x6   :  { %32 = vrot.lane.b32.xlu1 %v421_v5, %s547_s19  ;;  %v428_v12 = vld [vmem:[%s815_s0 + $0x20] sm:$0x1]   ;;  %v429_v13 = vld [vmem:[%s815_s0 + $0x1f] sm:$0x1]   ;;  %s554_s13 = smov 96   ;;  %s555_s14 = smov 93  }
   0x7   :  { %v430_v14 = vld [vmem:[%s815_s0 + $0x1e] sm:$0x1]   ;;  %v431_v15 = vld [vmem:[%s815_s0 + $0x1d] sm:$0x1]   ;;  %s556_s19 = smov 90   ;;  %s557_s20 = smov 87  }
   0x8   :  { %20 = vrot.lane.b32.xlu0 %v419_v4, %s546_s18  ;;  %v432_v16 = vld [vmem:[%s815_s0 + $0x1c] sm:$0x1]   ;;  %v433_v17 = vld [vmem:[%s815_s0 + $0x1b] sm:$0x1]   ;;  %v2_v18 = vld [vmem:[%s815_s0] sm:$0x1]  }
   0x9   :  { %s558_s27 = smov 84   ;;  %s559_s28 = smov 81   ;;  %4 = vst.msk [vmem:[#allocation0] sm:$0x1] %vm3_vm1, %v2_v18   ;;  %v434_v19 = vld [vmem:[%s815_s0 + $0x1a] sm:$0x1]  }
   0xa   :  { %44 = vrot.lane.b32.xlu1 %v423_v7, %s549_s25  ;;  %v435_v20 = vld [vmem:[%s815_s0 + $0x19] sm:$0x1]   ;;  %s560_s4 = smov 78   ;;  %s561_s5 = smov 75   ;;  %v436_v21 = vld [vmem:[%s815_s0 + $0x18] sm:$0x1]  }
   0xb   :  { %v437_v22 = vld [vmem:[%s815_s0 + $0x17] sm:$0x1]   ;;  %s562_s10 = smov 72   ;;  %s563_s11 = smov 69   ;;  %v438_v23 = vld [vmem:[%s815_s0 + $0x16] sm:$0x1]  }
   0xc   :  { %38 = vrot.lane.b32.xlu0 %v422_v6, %s548_s24  ;;  %v439_v24 = vld [vmem:[%s815_s0 + $0x15] sm:$0x1]   ;;  %s564_s16 = smov 66   ;;  %s565_s17 = smov 63   ;;  %v440_v25 = vld [vmem:[%s815_s0 + $0x3f] sm:$0x1]  }
   0xd   :  { %v441_v26 = vld [vmem:[%s815_s0 + $0x14] sm:$0x1]   ;;  %s566_s22 = smov 61   ;;  %s567_s23 = smov 60   ;;  %v442_v27 = vld [vmem:[%s815_s0 + $0x3e] sm:$0x1]  }
   0xe   :  { %56 = vrot.lane.b32.xlu1 %v425_v9, %s551_s2  ;;  %v443_v28 = vld [vmem:[%s815_s0 + $0x13] sm:$0x1]   ;;  %s569_s29 = smov 57   ;;  %v444_v29 = vld [vmem:[%s815_s0 + $0x3d] sm:$0x1]   ;;  %s571_s6 = smov 54  }
   0xf   :  { %v445_v30 = vld [vmem:[%s815_s0 + $0x12] sm:$0x1]   ;;  %v446_v31 = vld [vmem:[%s815_s0 + $0x3c] sm:$0x1]   ;;  %v447_v32 = vld [vmem:[%s815_s0 + $0x11] sm:$0x1]  }
  0x10   :  { %50 = vrot.lane.b32.xlu0 %v424_v8, %s550_s30  ;;  %s573_s12 = smov 51   ;;  %v448_v33 = vld [vmem:[%s815_s0 + $0x3b] sm:$0x1]   ;;  %v449_v34 = vld [vmem:[%s815_s0 + $0x10] sm:$0x1]   ;;  %s575_s18 = smov 48  }
  0x11   :  { %v450_v35 = vld [vmem:[%s815_s0 + $0x3a] sm:$0x1]   ;;  %v451_v36 = vld [vmem:[%s815_s0 + $0xf] sm:$0x1]   ;;  %s577_s24 = smov 45   ;;  %s579_s30 = smov 42  }
  0x12   :  { %68 = vrot.lane.b32.xlu1 %v427_v11, %s553_s8  ;;  %v452_v37 = vld [vmem:[%s815_s0 + $0x39] sm:$0x1]   ;;  %v453_v38 = vld [vmem:[%s815_s0 + $0xe] sm:$0x1]   ;;  %v454_v39 = vld [vmem:[%s815_s0 + $0x38] sm:$0x1]  }
  0x13   :  { %v455_v40 = vld [vmem:[%s815_s0 + $0xd] sm:$0x1]   ;;  %v456_v41 = vld [vmem:[%s815_s0 + $0x37] sm:$0x1]   ;;  %v457_v42 = vld [vmem:[%s815_s0 + $0xc] sm:$0x1]  }
  0x14   :  { %62 = vrot.lane.b32.xlu0 %v426_v10, %s552_s7  ;;  %s581_s7 = smov 39   ;;  %v458_v43 = vld [vmem:[%s815_s0 + $0x36] sm:$0x1]   ;;  %v459_v44 = vld [vmem:[%s815_s0 + $0xb] sm:$0x1]   ;;  %s587_s25 = smov 30  }
  0x15   :  { %v460_v45 = vld [vmem:[%s815_s0 + $0x35] sm:$0x1]   ;;  %v461_v46 = vld [vmem:[%s815_s0 + $0xa] sm:$0x1]   ;;  %v462_v47 = vld [vmem:[%s815_s0 + $0x34] sm:$0x1]  }
  0x16   :  { %80 = vrot.lane.b32.xlu1 %v429_v13, %s555_s14  ;;  %v463_v48 = vld [vmem:[%s815_s0 + $0x9] sm:$0x1]   ;;  %s589_s2 = smov 27   ;;  %v464_v49 = vld [vmem:[%s815_s0 + $0x33] sm:$0x1]   ;;  %s591_s8 = smov 24  }
  0x17   :  { %v465_v50 = vld [vmem:[%s815_s0 + $0x8] sm:$0x1]   ;;  %v466_v51 = vld [vmem:[%s815_s0 + $0x32] sm:$0x1]   ;;  %v467_v52 = vld [vmem:[%s815_s0 + $0x7] sm:$0x1]  }
  0x18   :  { %74 = vrot.lane.b32.xlu0 %v428_v12, %s554_s13  ;;  %s583_s13 = smov 36   ;;  %s593_s14 = smov 21   ;;  %v468_v53 = vld [vmem:[%s815_s0 + $0x31] sm:$0x1]   ;;  %v469_v54 = vld [vmem:[%s815_s0 + $0x6] sm:$0x1]  }
  0x19   :  { %v470_v55 = vld [vmem:[%s815_s0 + $0x30] sm:$0x1]   ;;  %v471_v56 = vld [vmem:[%s815_s0 + $0x5] sm:$0x1]   ;;  %s597_s26 = smov 15   ;;  %s599_s3 = smov 12  }
  0x1a   :  { %92 = vrot.lane.b32.xlu1 %v431_v15, %s557_s20  ;;  %s595_s20 = smov 18   ;;  %v472_v57 = vld [vmem:[%s815_s0 + $0x2f] sm:$0x1]   ;;  %v473_v58 = vld [vmem:[%s815_s0 + $0x4] sm:$0x1]   ;;  %s601_s9 = smov 9  }
  0x1b   :  { %v474_v59 = vld [vmem:[%s815_s0 + $0x2e] sm:$0x1]   ;;  %v475_v60 = vld [vmem:[%s815_s0 + $0x3] sm:$0x1]   ;;  %v476_v61 = vld [vmem:[%s815_s0 + $0x2d] sm:$0x1]  }
  0x1c   :  { %86 = vrot.lane.b32.xlu0 %v430_v14, %s556_s19  ;;  %s585_s19 = smov 33   ;;  %v477_v62 = vld [vmem:[%s815_s0 + $0x2] sm:$0x1]   ;;  %vm28_vm4 = vcmask 1007552   ;;  %vm22_vm5 = vcmask 1032152   ;;  %s603_s15 = smov 6  }
  0x1d   :  { %v478_v1 = vld [vmem:[%s815_s0 + $0x2c] sm:$0x1]   ;;  %v479_v2 = vld [vmem:[%s815_s0 + $0x1] sm:$0x1]   ;;  %vm34_vm6 = vcmask 982952   ;;  %vm40_vm7 = vcmask 958352  }
  0x1e   :  { %104 = vrot.lane.b32.xlu1 %v433_v17, %s559_s28  ;;  %s568_s28 = smov 58   ;;  %s605_s21 = smov 3   ;;  %v480_v5 = vld [vmem:[%s815_s0 + $0x2b] sm:$0x1]   ;;  %vm46_vm8 = vcmask 933752   ;;  %vm52_vm9 = vcmask 909152  }
  0x1f   :  { %s606_s0 = smov 1   ;;  %vm58_vm10 = vcmask 884552   ;;  %vm64_vm11 = vcmask 859952   ;;  %vm70_vm12 = vcmask 835352   ;;  %vm76_vm13 = vcmask 810752  }
  0x20   :  { %98 = vrot.lane.b32.xlu0 %v432_v16, %s558_s27  ;;  %vm82_vm14 = vcmask 786152   ;;  %vm88_vm15 = vcmask 761552   ;;  %vm94_vm0 = vcmask 736952   ;;  %vm100_vm1 = vcmask 712352  }
  0x22   :  { %116 = vrot.lane.b32.xlu1 %v435_v20, %s561_s5  ;;  %s570_s5 = smov 55  }
  0x24   :  { %110 = vrot.lane.b32.xlu0 %v434_v19, %s560_s4 }
  0x26   :  { %128 = vrot.lane.b32.xlu1 %v437_v22, %s563_s11  ;;  %s572_s11 = smov 52  }
  0x28   :  { %122 = vrot.lane.b32.xlu0 %v436_v21, %s562_s10 }
  0x2a   :  { %140 = vrot.lane.b32.xlu1 %v439_v24, %s565_s17  ;;  %s574_s17 = smov 49  }
  0x2c   :  { %134 = vrot.lane.b32.xlu0 %v438_v23, %s564_s16 }
  0x2e   :  { %153 = vrot.lane.b32.xlu1 %v441_v26, %s567_s23  ;;  %s576_s23 = smov 46  }
  0x30   :  { %146 = vrot.lane.b32.xlu0 %v440_v25, %s566_s22 }
  0x32   :  { %166 = vrot.lane.b32.xlu1 %v443_v28, %s569_s29  ;;  %s578_s29 = smov 43  }
  0x34   :  { %159 = vrot.lane.b32.xlu0 %v442_v27, %s568_s28 }
  0x36   :  { %179 = vrot.lane.b32.xlu1 %v445_v30, %s571_s6  ;;  %s580_s6 = smov 40  }
  0x38   :  { %172 = vrot.lane.b32.xlu0 %v444_v29, %s570_s5 }
  0x3a   :  { %192 = vrot.lane.b32.xlu1 %v447_v32, %s573_s12  ;;  %s582_s12 = smov 37  }
  0x3c   :  { %185 = vrot.lane.b32.xlu0 %v446_v31, %s572_s11 }
  0x3e   :  { %205 = vrot.lane.b32.xlu1 %v449_v34, %s575_s18  ;;  %s584_s18 = smov 34  }
  0x40   :  { %198 = vrot.lane.b32.xlu0 %v448_v33, %s574_s17 }
  0x42   :  { %218 = vrot.lane.b32.xlu1 %v451_v36, %s577_s24  ;;  %s586_s24 = smov 31  }
  0x44   :  { %211 = vrot.lane.b32.xlu0 %v450_v35, %s576_s23 }
  0x46   :  { %231 = vrot.lane.b32.xlu1 %v453_v38, %s579_s30  ;;  %s588_s30 = smov 28  }
  0x48   :  { %224 = vrot.lane.b32.xlu0 %v452_v37, %s578_s29 }
  0x4a   :  { %244 = vrot.lane.b32.xlu1 %v455_v40, %s581_s7  ;;  %s590_s7 = smov 25  }
  0x4c   :  { %237 = vrot.lane.b32.xlu0 %v454_v39, %s580_s6 }
  0x4e   :  { %257 = vrot.lane.b32.xlu1 %v457_v42, %s583_s13  ;;  %s592_s13 = smov 22  }
  0x50   :  { %250 = vrot.lane.b32.xlu0 %v456_v41, %s582_s12 }
  0x52   :  { %270 = vrot.lane.b32.xlu1 %v459_v44, %s585_s19  ;;  %s594_s19 = smov 19  }
  0x54   :  { %263 = vrot.lane.b32.xlu0 %v458_v43, %s584_s18 }
  0x56   :  { %283 = vrot.lane.b32.xlu1 %v461_v46, %s587_s25  ;;  %s596_s25 = smov 16  }
  0x58   :  { %276 = vrot.lane.b32.xlu0 %v460_v45, %s586_s24 }
  0x5a   :  { %296 = vrot.lane.b32.xlu1 %v463_v48, %s589_s2  ;;  %s598_s2 = smov 13  }
  0x5c   :  { %289 = vrot.lane.b32.xlu0 %v462_v47, %s588_s30 }
  0x5e   :  { %309 = vrot.lane.b32.xlu1 %v465_v50, %s591_s8  ;;  %s600_s8 = smov 10  }
  0x60   :  { %302 = vrot.lane.b32.xlu0 %v464_v49, %s590_s7 }
  0x62   :  { %322 = vrot.lane.b32.xlu1 %v467_v52, %s593_s14  ;;  %s602_s14 = smov 7  }
  0x64   :  { %315 = vrot.lane.b32.xlu0 %v466_v51, %s592_s13 }
  0x66   :  { %335 = vrot.lane.b32.xlu1 %v469_v54, %s595_s20  ;;  %s604_s20 = smov 4  }
  0x68   :  { %328 = vrot.lane.b32.xlu0 %v468_v53, %s594_s19 }
  0x6a   :  { %348 = vrot.lane.b32.xlu1 %v471_v56, %s597_s26 }
  0x6c   :  { %341 = vrot.lane.b32.xlu0 %v470_v55, %s596_s25 }
  0x6e   :  { %361 = vrot.lane.b32.xlu1 %v473_v58, %s599_s3 }
  0x70   :  { %354 = vrot.lane.b32.xlu0 %v472_v57, %s598_s2 }
  0x72   :  { %374 = vrot.lane.b32.xlu1 %v475_v60, %s601_s9 }
  0x74   :  { %367 = vrot.lane.b32.xlu0 %v474_v59, %s600_s8  ;;  %v27_v0 = vpop.permute.xlu1 %26  }
  0x76   :  { %v12_v63 = vpop.permute.xlu0 %11   ;;  %387 = vrot.lane.b32.xlu1 %v477_v62, %s603_s15 }
  0x77   :  { %15 = vst.msk [vmem:[#allocation0 + $0x1] sm:$0x1] %vm13_vm2, %v12_v63   ;;  %vm106_vm2 = vcmask 687752  }
  0x78   :  { %17 = vst.msk [vmem:[#allocation0] sm:$0x1] %vm16_vm3, %v12_v63   ;;  %380 = vrot.lane.b32.xlu0 %v476_v61, %s602_s14  ;;  %v33_v4 = vpop.permute.xlu1 %32   ;;  %vm112_vm3 = vcmask 663152  }
  0x7a   :  { %v21_v3 = vpop.permute.xlu0 %20   ;;  %400 = vrot.lane.b32.xlu1 %v479_v2, %s605_s21 }
  0x7b   :  { %23 = vst.msk [vmem:[#allocation0] sm:$0x1] %vm22_vm5, %v21_v3   ;;  %vm124_vm5 = vcmask 613952  }
  0x7c   :  { %29 = vst.msk [vmem:[#allocation0] sm:$0x1] %vm28_vm4, %v27_v0   ;;  %393 = vrot.lane.b32.xlu0 %v478_v1, %s604_s20  ;;  %v45_v7 = vpop.permute.xlu1 %44   ;;  %vm118_vm4 = vcmask 638552  }
  0x7d   :  { %35 = vst.msk [vmem:[#allocation0] sm:$0x1] %vm34_vm6, %v33_v4   ;;  %vm130_vm6 = vcmask 589352  }
  0x7e   :  { %v39_v6 = vpop.permute.xlu0 %38  }
  0x7f   :  { %41 = vst.msk [vmem:[#allocation0] sm:$0x1] %vm40_vm7, %v39_v6   ;;  %vm136_vm7 = vcmask 564752  }
  0x80   :  { %406 = vrot.lane.b32.xlu0 %v480_v5, %s606_s0  ;;  %47 = vst.msk [vmem:[#allocation0] sm:$0x1] %vm46_vm8, %v45_v7   ;;  %v57_v9 = vpop.permute.xlu1 %56   ;;  %vm142_vm8 = vcmask 540152  }
  0x82   :  { %v51_v8 = vpop.permute.xlu0 %50  }
  0x83   :  { %53 = vst.msk [vmem:[#allocation0] sm:$0x1] %vm52_vm9, %v51_v8   ;;  %vm148_vm9 = vcmask 523752  }
  0x84   :  { %59 = vst.msk [vmem:[#allocation0] sm:$0x1] %vm58_vm10, %v57_v9   ;;  %v69_v11 = vpop.permute.xlu1 %68   ;;  %vm155_vm10 = vcmask 515552  }
  0x86   :  { %v63_v10 = vpop.permute.xlu0 %62  }
  0x87   :  { %65 = vst.msk [vmem:[#allocation0] sm:$0x1] %vm64_vm11, %v63_v10   ;;  %vm161_vm11 = vcmask 499152  }
  0x88   :  { %71 = vst.msk [vmem:[#allocation0] sm:$0x1] %vm70_vm12, %v69_v11   ;;  %v81_v13 = vpop.permute.xlu1 %80   ;;  %vm168_vm12 = vcmask 490952  }
  0x8a   :  { %v75_v12 = vpop.permute.xlu0 %74  }
  0x8b   :  { %77 = vst.msk [vmem:[#allocation0] sm:$0x1] %vm76_vm13, %v75_v12   ;;  %vm174_vm13 = vcmask 474552  }
  0x8c   :  { %83 = vst.msk [vmem:[#allocation0] sm:$0x1] %vm82_vm14, %v81_v13   ;;  %v93_v15 = vpop.permute.xlu1 %92   ;;  %vm181_vm14 = vcmask 466352  }
  0x8e   :  { %v87_v14 = vpop.permute.xlu0 %86  }
  0x8f   :  { %89 = vst.msk [vmem:[#allocation0] sm:$0x1] %vm88_vm15, %v87_v14   ;;  %vm187_vm15 = vcmask 449952  }
  0x90   :  { %95 = vst.msk [vmem:[#allocation0] sm:$0x1] %vm94_vm0, %v93_v15   ;;  %v105_v17 = vpop.permute.xlu1 %104   ;;  %vm194_vm0 = vcmask 441752  }
  0x92   :  { %v99_v16 = vpop.permute.xlu0 %98  }
  0x93   :  { %101 = vst.msk [vmem:[#allocation0] sm:$0x1] %vm100_vm1, %v99_v16   ;;  %vm200_vm1 = vcmask 425352  }
  0x94   :  { %107 = vst.msk [vmem:[#allocation0] sm:$0x1] %vm106_vm2, %v105_v17   ;;  %v117_v19 = vpop.permute.xlu1 %116   ;;  %vm207_vm2 = vcmask 417152  }
  0x96   :  { %v111_v18 = vpop.permute.xlu0 %110  }
  0x97   :  { %113 = vst.msk [vmem:[#allocation0] sm:$0x1] %vm112_vm3, %v111_v18   ;;  %vm213_vm3 = vcmask 400752  }
  0x98   :  { %119 = vst.msk [vmem:[#allocation0] sm:$0x1] %vm118_vm4, %v117_v19   ;;  %v129_v21 = vpop.permute.xlu1 %128   ;;  %vm220_vm4 = vcmask 392552  }
  0x9a   :  { %v123_v20 = vpop.permute.xlu0 %122  }
  0x9b   :  { %125 = vst.msk [vmem:[#allocation0] sm:$0x1] %vm124_vm5, %v123_v20   ;;  %vm226_vm5 = vcmask 376152  }
  0x9c   :  { %131 = vst.msk [vmem:[#allocation0] sm:$0x1] %vm130_vm6, %v129_v21   ;;  %v141_v23 = vpop.permute.xlu1 %140   ;;  %vm233_vm6 = vcmask 367952  }
  0x9e   :  { %v135_v22 = vpop.permute.xlu0 %134  }
  0x9f   :  { %137 = vst.msk [vmem:[#allocation0] sm:$0x1] %vm136_vm7, %v135_v22   ;;  %vm239_vm7 = vcmask 351552  }
  0xa0   :  { %143 = vst.msk [vmem:[#allocation0] sm:$0x1] %vm142_vm8, %v141_v23   ;;  %v154_v25 = vpop.permute.xlu1 %153   ;;  %vm246_vm8 = vcmask 343352  }
  0xa1   :  { %156 = vst.msk [vmem:[#allocation0] sm:$0x1] %vm155_vm10, %v154_v25   ;;  %vm259_vm10 = vcmask 318752  }
  0xa2   :  { %v147_v24 = vpop.permute.xlu0 %146  }
  0xa3   :  { %150 = vst.msk [vmem:[#allocation0 + $0x1] sm:$0x1] %vm148_vm9, %v147_v24   ;;  %vm252_vm9 = vcmask 326952  }
  0xa4   :  { %v167_v27 = vpop.permute.xlu1 %166  }
  0xa5   :  { %169 = vst.msk [vmem:[#allocation0] sm:$0x1] %vm168_vm12, %v167_v27   ;;  %vm272_vm12 = vcmask 294152  }
  0xa6   :  { %v160_v26 = vpop.permute.xlu0 %159  }
  0xa7   :  { %163 = vst.msk [vmem:[#allocation0 + $0x1] sm:$0x1] %vm161_vm11, %v160_v26   ;;  %vm265_vm11 = vcmask 302352  }
  0xa8   :  { %v180_v29 = vpop.permute.xlu1 %179  }
  0xa9   :  { %182 = vst.msk [vmem:[#allocation0] sm:$0x1] %vm181_vm14, %v180_v29   ;;  %vm285_vm14 = vcmask 269552  }
  0xaa   :  { %v173_v28 = vpop.permute.xlu0 %172  }
  0xab   :  { %176 = vst.msk [vmem:[#allocation0 + $0x1] sm:$0x1] %vm174_vm13, %v173_v28   ;;  %vm278_vm13 = vcmask 277752  }
  0xac   :  { %v193_v31 = vpop.permute.xlu1 %192  }
  0xad   :  { %195 = vst.msk [vmem:[#allocation0] sm:$0x1] %vm194_vm0, %v193_v31   ;;  %vm298_vm0 = vcmask 244952  }
  0xae   :  { %v186_v30 = vpop.permute.xlu0 %185  }
  0xaf   :  { %189 = vst.msk [vmem:[#allocation0 + $0x1] sm:$0x1] %vm187_vm15, %v186_v30   ;;  %vm291_vm15 = vcmask 253152  }
  0xb0   :  { %v206_v33 = vpop.permute.xlu1 %205  }
  0xb1   :  { %208 = vst.msk [vmem:[#allocation0] sm:$0x1] %vm207_vm2, %v206_v33   ;;  %vm311_vm2 = vcmask 220352  }
  0xb2   :  { %v199_v32 = vpop.permute.xlu0 %198  }
  0xb3   :  { %202 = vst.msk [vmem:[#allocation0 + $0x1] sm:$0x1] %vm200_vm1, %v199_v32   ;;  %vm304_vm1 = vcmask 228552  }
  0xb4   :  { %v219_v35 = vpop.permute.xlu1 %218  }
  0xb5   :  { %221 = vst.msk [vmem:[#allocation0] sm:$0x1] %vm220_vm4, %v219_v35   ;;  %vm324_vm4 = vcmask 195752  }
  0xb6   :  { %v212_v34 = vpop.permute.xlu0 %211  }
  0xb7   :  { %215 = vst.msk [vmem:[#allocation0 + $0x1] sm:$0x1] %vm213_vm3, %v212_v34   ;;  %vm317_vm3 = vcmask 203952  }
  0xb8   :  { %v232_v37 = vpop.permute.xlu1 %231  }
  0xb9   :  { %234 = vst.msk [vmem:[#allocation0] sm:$0x1] %vm233_vm6, %v232_v37   ;;  %vm337_vm6 = vcmask 171152  }
  0xba   :  { %v225_v36 = vpop.permute.xlu0 %224  }
  0xbb   :  { %228 = vst.msk [vmem:[#allocation0 + $0x1] sm:$0x1] %vm226_vm5, %v225_v36   ;;  %vm330_vm5 = vcmask 179352  }
  0xbc   :  { %v245_v39 = vpop.permute.xlu1 %244  }
  0xbd   :  { %247 = vst.msk [vmem:[#allocation0] sm:$0x1] %vm246_vm8, %v245_v39   ;;  %vm350_vm8 = vcmask 146552  }
  0xbe   :  { %v238_v38 = vpop.permute.xlu0 %237  }
  0xbf   :  { %241 = vst.msk [vmem:[#allocation0 + $0x1] sm:$0x1] %vm239_vm7, %v238_v38   ;;  %vm343_vm7 = vcmask 154752  }
  0xc0   :  { %v258_v41 = vpop.permute.xlu1 %257  }
  0xc1   :  { %260 = vst.msk [vmem:[#allocation0] sm:$0x1] %vm259_vm10, %v258_v41   ;;  %vm363_vm10 = vcmask 121952  }
  0xc2   :  { %v251_v40 = vpop.permute.xlu0 %250  }
  0xc3   :  { %254 = vst.msk [vmem:[#allocation0 + $0x1] sm:$0x1] %vm252_vm9, %v251_v40   ;;  %vm356_vm9 = vcmask 130152  }
  0xc4   :  { %v271_v43 = vpop.permute.xlu1 %270  }
  0xc5   :  { %273 = vst.msk [vmem:[#allocation0] sm:$0x1] %vm272_vm12, %v271_v43   ;;  %vm376_vm12 = vcmask 97352  }
  0xc6   :  { %v264_v42 = vpop.permute.xlu0 %263  }
  0xc7   :  { %267 = vst.msk [vmem:[#allocation0 + $0x1] sm:$0x1] %vm265_vm11, %v264_v42   ;;  %vm369_vm11 = vcmask 105552  }
  0xc8   :  { %v284_v45 = vpop.permute.xlu1 %283  }
  0xc9   :  { %286 = vst.msk [vmem:[#allocation0] sm:$0x1] %vm285_vm14, %v284_v45   ;;  %vm389_vm14 = vcmask 72752  }
  0xca   :  { %v277_v44 = vpop.permute.xlu0 %276  }
  0xcb   :  { %280 = vst.msk [vmem:[#allocation0 + $0x1] sm:$0x1] %vm278_vm13, %v277_v44   ;;  %vm382_vm13 = vcmask 80952  }
  0xcc   :  { %v297_v47 = vpop.permute.xlu1 %296  }
  0xcd   :  { %299 = vst.msk [vmem:[#allocation0] sm:$0x1] %vm298_vm0, %v297_v47   ;;  %vm402_vm0 = vcmask 48152  }
  0xce   :  { %v290_v46 = vpop.permute.xlu0 %289  }
  0xcf   :  { %293 = vst.msk [vmem:[#allocation0 + $0x1] sm:$0x1] %vm291_vm15, %v290_v46   ;;  %vm395_vm15 = vcmask 56352  }
  0xd0   :  { %v310_v49 = vpop.permute.xlu1 %309  }
  0xd1   :  { %312 = vst.msk [vmem:[#allocation0] sm:$0x1] %vm311_vm2, %v310_v49  }
  0xd2   :  { %v303_v48 = vpop.permute.xlu0 %302  }
  0xd3   :  { %306 = vst.msk [vmem:[#allocation0 + $0x1] sm:$0x1] %vm304_vm1, %v303_v48   ;;  %vm408_vm1 = vcmask 31752  }
  0xd4   :  { %v323_v51 = vpop.permute.xlu1 %322  }
  0xd5   :  { %325 = vst.msk [vmem:[#allocation0] sm:$0x1] %vm324_vm4, %v323_v51  }
  0xd6   :  { %v316_v50 = vpop.permute.xlu0 %315  }
  0xd7   :  { %319 = vst.msk [vmem:[#allocation0 + $0x1] sm:$0x1] %vm317_vm3, %v316_v50  }
  0xd8   :  { %v336_v53 = vpop.permute.xlu1 %335  }
  0xd9   :  { %338 = vst.msk [vmem:[#allocation0] sm:$0x1] %vm337_vm6, %v336_v53  }
  0xda   :  { %v329_v52 = vpop.permute.xlu0 %328  }
  0xdb   :  { %332 = vst.msk [vmem:[#allocation0 + $0x1] sm:$0x1] %vm330_vm5, %v329_v52  }
  0xdc   :  { %v349_v55 = vpop.permute.xlu1 %348  }
  0xdd   :  { %351 = vst.msk [vmem:[#allocation0] sm:$0x1] %vm350_vm8, %v349_v55  }
  0xde   :  { %v342_v54 = vpop.permute.xlu0 %341  }
  0xdf   :  { %345 = vst.msk [vmem:[#allocation0 + $0x1] sm:$0x1] %vm343_vm7, %v342_v54  }
  0xe0   :  { %v362_v57 = vpop.permute.xlu1 %361  }
  0xe1   :  { %364 = vst.msk [vmem:[#allocation0] sm:$0x1] %vm363_vm10, %v362_v57  }
  0xe2   :  { %v355_v56 = vpop.permute.xlu0 %354  }
  0xe3   :  { %358 = vst.msk [vmem:[#allocation0 + $0x1] sm:$0x1] %vm356_vm9, %v355_v56  }
  0xe4   :  { %v375_v59 = vpop.permute.xlu1 %374  }
  0xe5   :  { %377 = vst.msk [vmem:[#allocation0] sm:$0x1] %vm376_vm12, %v375_v59  }
  0xe6   :  { %v368_v58 = vpop.permute.xlu0 %367  }
  0xe7   :  { %371 = vst.msk [vmem:[#allocation0 + $0x1] sm:$0x1] %vm369_vm11, %v368_v58  }
  0xe8   :  { %v388_v61 = vpop.permute.xlu1 %387  }
  0xe9   :  { %390 = vst.msk [vmem:[#allocation0] sm:$0x1] %vm389_vm14, %v388_v61  }
  0xea   :  { %v381_v60 = vpop.permute.xlu0 %380  }
  0xeb   :  { %384 = vst.msk [vmem:[#allocation0 + $0x1] sm:$0x1] %vm382_vm13, %v381_v60  }
  0xec   :  { %v401_v63 = vpop.permute.xlu1 %400  }
  0xed   :  { %403 = vst.msk [vmem:[#allocation0] sm:$0x1] %vm402_vm0, %v401_v63  }
  0xee   :  { %v394_v62 = vpop.permute.xlu0 %393  }
  0xef   :  { %397 = vst.msk [vmem:[#allocation0 + $0x1] sm:$0x1] %vm395_vm15, %v394_v62  }
  0xf2   :  { %v407_v0 = vpop.permute.xlu0 %406  }
  0xf3   :  { %410 = vst.msk [vmem:[#allocation0 + $0x1] sm:$0x1] %vm408_vm1, %v407_v0  }
  0xfa   :  { %v414_v1 = vld [vmem:[#allocation0] sm:$0x3] }
  0xfb   :  { %416 = vst [vmem:[%s816_s1] sm:$0x3] %v414_v1 }

// kernel: isuei_d2_forward.10
= control target key start
LH: loop header
LB: loop body
LE: loop exit
PB: predicated region body
PF: predicated region fallthrough
CT: control target
= control target key end

     0   :  { %s1744_s12 = smov 0   ;;  %s1746_s13 = smov 0   ;;  %s1918_s0 = inlined_call_operand.vmem [shape: bf16[512,256], index: 0, kind: input, shape index: {}]   ;;  %s1919_s1 = inlined_call_operand.vmem [shape: bf16[256,128], index: 1, kind: input, shape index: {}]   ;;  %s1920_s2 = inlined_call_operand.vmem [shape: f32[1,128], index: 2, kind: input, shape index: {}]   ;;  %s1921_s3 = inlined_call_operand.vmem [shape: bf16[512,128], index: 3, kind: output, shape index: {}]  }
   0x1   :  { %s1748_s14 = smov 0  }
   0x2 LB: > { %s32_s15 = sadd.s32 1, %s1718_s13  ;;  %p1267_p0 = scmp.ge.s32.totalorder %s1722_s14, 1  ;;  %s1722_s14 = sphi %s1748_s14, %s13_s14   ;;  %s1718_s13 = sphi %s1746_s13, %s1923_s13   ;;  %s1714_s12 = sphi %s1744_s12, %s1922_s12  }
   0x3   : > { %p34_p1 = scmp.ge.s32.totalorder %s32_s15, 2  ;;  %p191_p2 = scmp.lt.s32.totalorder %s1722_s14, 3 }
   0x5   : > { %s1925_s15 = smov (%p34_p1, %s32_s15), 0  ;;  %p192_p3 = pnand %p1267_p0, %p191_p2 }
   0x6   : > { %v1636_v0 = vld [vmem:[%s1919_s1 + $0x40] sm:$0xff] (!%p192_p3)   ;;  %s1268_s18 = sshll.u32 (!%p192_p3), %s1714_s12, 5  ;;  %v1638_v2 = vld [vmem:[%s1919_s1 + $0x48] sm:$0xff] (!%p192_p3)   ;;  %v1640_v4 = vld [vmem:[%s1919_s1 + $0x50] sm:$0xff] (!%p192_p3)  }
   0x7   : > { %195 = sbr.rel (%p192_p3) target bundleno = 320 (0x140), region = 32  ;;  %v1637_v1 = vld [vmem:[%s1919_s1] sm:$0xff] (!%p192_p3)   ;;  %1484 = vmatprep.subr.bf16.mxu0 (!%p192_p3), %v1636_v0  ;;  %1596 = vmatprep.subr.bf16.mxu1 (!%p192_p3), %v1636_v0  ;;  %v1639_v3 = vld [vmem:[%s1919_s1 + $0x8] sm:$0xff] (!%p192_p3)   ;;  %p236_p4 = scmp.lt.s32.totalorder (!%p192_p3), %s1268_s18, 63  ;;  %v1641_v5 = vld [vmem:[%s1919_s1 + $0x10] sm:$0xff] (!%p192_p3)  }
   0x8   : > { %1485 = vmatpush3.bf16.msra.mxu0 (!%p192_p3), %v1637_v1  ;;  %1604 = vmatpush3.bf16.msra.mxu1 (!%p192_p3), %v1637_v1  ;;  %v1642_v6 = vld [vmem:[%s1919_s1 + $0x58] sm:$0xff] (!%p192_p3)   ;;  %v1644_v8 = vld [vmem:[%s1919_s1 + $0x60] sm:$0xff] (!%p192_p3)   ;;  %v1646_v10 = vld [vmem:[%s1919_s1 + $0x68] sm:$0xff] (!%p192_p3)  }
   0x9   : > { %1486 = vmatprep.subr.bf16.mxu0 (!%p192_p3), %v1638_v2  ;;  %1597 = vmatprep.subr.bf16.mxu1 (!%p192_p3), %v1638_v2  ;;  %v1643_v7 = vld [vmem:[%s1919_s1 + $0x18] sm:$0xff] (!%p192_p3)   ;;  %v1645_v9 = vld [vmem:[%s1919_s1 + $0x20] sm:$0xff] (!%p192_p3)   ;;  %v1647_v13 = vld [vmem:[%s1919_s1 + $0x28] sm:$0xff] (!%p192_p3)  }
   0xa   : > { %v1648_v14 = vld [vmem:[%s1919_s1 + $0x70] sm:$0xff] (!%p192_p3)   ;;  %v1650_v16 = vld [vmem:[%s1919_s1 + $0x78] sm:$0xff] (!%p192_p3)   ;;  %v1853_v51 = vld [vmem:[%s1920_s2] ss:$0 sm:$0xff] (!%p192_p3) }
   0xb   : > { %v1649_v15 = vld [vmem:[%s1919_s1 + $0x30] sm:$0xff] (!%p192_p3)   ;;  %v1651_v17 = vld [vmem:[%s1919_s1 + $0x38] sm:$0xff] (!%p192_p3)  }
   0xc   : > { %1487 = vmatpush3.bf16.msra.mxu0 (!%p192_p3), %v1639_v3  ;;  %1605 = vmatpush3.bf16.msra.mxu1 (!%p192_p3), %v1639_v3 }
   0xd   : > { %1488 = vmatprep.subr.bf16.mxu0 (!%p192_p3), %v1640_v4  ;;  %1598 = vmatprep.subr.bf16.mxu1 (!%p192_p3), %v1640_v4 }
   0xe   : > { %s1927_s18 = smov (!%p236_p4, %s1268_s18), 63 }
   0xf   : > { %s1356_s6 = sshll.u32 %s1927_s18, 3  ;;  %s1272_s5 = sshll.u32 %s1927_s18, 2 }
  0x10   : > { %1489 = vmatpush3.bf16.msra.mxu0 %v1641_v5  ;;  %1606 = vmatpush3.bf16.msra.mxu1 %v1641_v5  ;;  %s1795_s11 = scalar_lea.vmem %s1918_s0, %s1356_s6  ;;  %s1863_s8 = scalar_lea.vmem %s1921_s3, %s1272_s5 }
  0x11   : > { %1490 = vmatprep.subr.bf16.mxu0 %v1642_v6  ;;  %1599 = vmatprep.subr.bf16.mxu1 %v1642_v6  ;;  %v1654_v11 = vld [vmem:[%s1795_s11 + $0x4] ss:$8 sps:$4 sm:$0xff]   ;;  %v1652_v18 = vld [vmem:[%s1795_s11] ss:$8 sps:$4 sm:$0xff]   ;;  %v1658_v20 = vld [vmem:[%s1795_s11 + $0x14] ss:$8 sps:$4 sm:$0xff]  }
  0x12   : > { %v1657_v12 = vld [vmem:[%s1795_s11 + $0x84] ss:$8 sps:$4 sm:$0xff]   ;;  %688 = vmatprep.mubr.bf16.mxu0 %v1654_v11  ;;  %v1655_v19 = vld [vmem:[%s1795_s11 + $0x80] ss:$8 sps:$4 sm:$0xff]   ;;  %v1660_v21 = vld [vmem:[%s1795_s11 + $0x94] ss:$8 sps:$4 sm:$0xff]  }
  0x13   : > { %752 = vmatprep.mubr.bf16.mxu1 %v1657_v12  ;;  %v1662_v22 = vld [vmem:[%s1795_s11 + $0x10] ss:$8 sps:$4 sm:$0xff]   ;;  %v1664_v24 = vld [vmem:[%s1795_s11 + $0x24] ss:$8 sps:$4 sm:$0xff]   ;;  %v1668_v26 = vld [vmem:[%s1795_s11 + $0x20] ss:$8 sps:$4 sm:$0xff]  }
  0x14   : > { %1491 = vmatpush3.bf16.msra.mxu0 %v1643_v7  ;;  %1607 = vmatpush3.bf16.msra.mxu1 %v1643_v7  ;;  %v1663_v23 = vld [vmem:[%s1795_s11 + $0x90] ss:$8 sps:$4 sm:$0xff]   ;;  %v1666_v25 = vld [vmem:[%s1795_s11 + $0xa4] ss:$8 sps:$4 sm:$0xff]   ;;  %v1669_v27 = vld [vmem:[%s1795_s11 + $0xa0] ss:$8 sps:$4 sm:$0xff]  }
  0x15   : > { %1492 = vmatprep.subr.bf16.mxu0 %v1644_v8  ;;  %1600 = vmatprep.subr.bf16.mxu1 %v1644_v8  ;;  %v1670_v28 = vld [vmem:[%s1795_s11 + $0x34] ss:$8 sps:$4 sm:$0xff]   ;;  %v1674_v30 = vld [vmem:[%s1795_s11 + $0x30] ss:$8 sps:$4 sm:$0xff]   ;;  %v1676_v32 = vld [vmem:[%s1795_s11 + $0x44] ss:$8 sps:$4 sm:$0xff]  }
  0x16   : > { %v1672_v29 = vld [vmem:[%s1795_s11 + $0xb4] ss:$8 sps:$4 sm:$0xff]   ;;  %v1675_v31 = vld [vmem:[%s1795_s11 + $0xb0] ss:$8 sps:$4 sm:$0xff]   ;;  %v1678_v33 = vld [vmem:[%s1795_s11 + $0xc4] ss:$8 sps:$4 sm:$0xff]  }
  0x17   : > { %v1680_v34 = vld [vmem:[%s1795_s11 + $0x40] ss:$8 sps:$4 sm:$0xff]   ;;  %v1682_v36 = vld [vmem:[%s1795_s11 + $0x54] ss:$8 sps:$4 sm:$0xff]   ;;  %v1686_v38 = vld [vmem:[%s1795_s11 + $0x50] ss:$8 sps:$4 sm:$0xff]  }
  0x18   : > { %1493 = vmatpush3.bf16.msra.mxu0 %v1645_v9  ;;  %1608 = vmatpush3.bf16.msra.mxu1 %v1645_v9  ;;  %v1681_v35 = vld [vmem:[%s1795_s11 + $0xc0] ss:$8 sps:$4 sm:$0xff]   ;;  %v1684_v37 = vld [vmem:[%s1795_s11 + $0xd4] ss:$8 sps:$4 sm:$0xff]   ;;  %v1687_v39 = vld [vmem:[%s1795_s11 + $0xd0] ss:$8 sps:$4 sm:$0xff]  }
  0x19   : > { %1494 = vmatprep.subr.bf16.mxu0 %v1646_v10  ;;  %1601 = vmatprep.subr.bf16.mxu1 %v1646_v10  ;;  %v1688_v40 = vld [vmem:[%s1795_s11 + $0x64] ss:$8 sps:$4 sm:$0xff]   ;;  %v1692_v42 = vld [vmem:[%s1795_s11 + $0x60] ss:$8 sps:$4 sm:$0xff]   ;;  %v1694_v44 = vld [vmem:[%s1795_s11 + $0x74] ss:$8 sps:$4 sm:$0xff]  }
  0x1a   : > { %v1690_v41 = vld [vmem:[%s1795_s11 + $0xe4] ss:$8 sps:$4 sm:$0xff]   ;;  %v1693_v43 = vld [vmem:[%s1795_s11 + $0xe0] ss:$8 sps:$4 sm:$0xff]   ;;  %v1696_v45 = vld [vmem:[%s1795_s11 + $0xf4] ss:$8 sps:$4 sm:$0xff]  }
  0x1b   : > { %v1698_v46 = vld [vmem:[%s1795_s11 + $0x70] ss:$8 sps:$4 sm:$0xff]  }
  0x1c   : > { %1495 = vmatpush3.bf16.msra.mxu0 %v1647_v13  ;;  %1609 = vmatpush3.bf16.msra.mxu1 %v1647_v13  ;;  %v1699_v47 = vld [vmem:[%s1795_s11 + $0xf0] ss:$8 sps:$4 sm:$0xff]  }
  0x1d   : > { %1496 = vmatprep.subr.bf16.mxu0 %v1648_v14  ;;  %1602 = vmatprep.subr.bf16.mxu1 %v1648_v14 }
  0x20   : > { %1497 = vmatpush3.bf16.msra.mxu0 %v1649_v15  ;;  %1610 = vmatpush3.bf16.msra.mxu1 %v1649_v15 }
  0x21   : > { %1498 = vmatprep.subr.bf16.mxu0 %v1650_v16  ;;  %1603 = vmatprep.subr.bf16.mxu1 %v1650_v16 }
  0x24   : > { %1499 = vmatpush3.bf16.msra.mxu0 %v1651_v17  ;;  %1611 = vmatpush3.bf16.msra.mxu1 %v1651_v17 }
  0x27   : > { %689 = vmatmul.mubr.bf16.vlgmr.msra.gmra.mrb[0].mxu0 %v1652_v18  ;;  %753 = vmatmul.mubr.bf16.vlgmr.msra.gmra.mrb[0].mxu1 %v1655_v19 }
  0x28   : > { %696 = vmatprep.mubr.bf16.mxu0 %v1658_v20  ;;  %760 = vmatprep.mubr.bf16.mxu1 %v1660_v21 }
  0x2f   : > { %697 = vmatmul.mubr.bf16.gmra.mrb[4].mxu0 %v1662_v22  ;;  %761 = vmatmul.mubr.bf16.gmra.mrb[4].mxu1 %v1663_v23 }
  0x30   : > { %704 = vmatprep.mubr.bf16.mxu0 %v1664_v24  ;;  %768 = vmatprep.mubr.bf16.mxu1 %v1666_v25 }
  0x37   : > { %705 = vmatmul.mubr.bf16.gmra.mrb[8].mxu0 %v1668_v26  ;;  %769 = vmatmul.mubr.bf16.gmra.mrb[8].mxu1 %v1669_v27 }
  0x38   : > { %712 = vmatprep.mubr.bf16.mxu0 %v1670_v28  ;;  %776 = vmatprep.mubr.bf16.mxu1 %v1672_v29 }
  0x3f   : > { %713 = vmatmul.mubr.bf16.gmra.mrb[12].mxu0 %v1674_v30  ;;  %777 = vmatmul.mubr.bf16.gmra.mrb[12].mxu1 %v1675_v31 }
  0x40   : > { %720 = vmatprep.mubr.bf16.mxu0 %v1676_v32  ;;  %784 = vmatprep.mubr.bf16.mxu1 %v1678_v33 }
  0x47   : > { %721 = vmatmul.mubr.bf16.gmra.mrb[16].mxu0 %v1680_v34  ;;  %785 = vmatmul.mubr.bf16.gmra.mrb[16].mxu1 %v1681_v35 }
  0x48   : > { %728 = vmatprep.mubr.bf16.mxu0 %v1682_v36  ;;  %792 = vmatprep.mubr.bf16.mxu1 %v1684_v37 }
  0x4f   : > { %729 = vmatmul.mubr.bf16.gmra.mrb[20].mxu0 %v1686_v38  ;;  %793 = vmatmul.mubr.bf16.gmra.mrb[20].mxu1 %v1687_v39 }
  0x50   : > { %736 = vmatprep.mubr.bf16.mxu0 %v1688_v40  ;;  %800 = vmatprep.mubr.bf16.mxu1 %v1690_v41 }
  0x57   : > { %737 = vmatmul.mubr.bf16.gmra.mrb[24].mxu0 %v1692_v42  ;;  %801 = vmatmul.mubr.bf16.gmra.mrb[24].mxu1 %v1693_v43 }
  0x58   : > { %744 = vmatprep.mubr.bf16.mxu0 %v1694_v44  ;;  %808 = vmatprep.mubr.bf16.mxu1 %v1696_v45 }
  0x5f   : > { %745 = vmatmul.mubr.bf16.gmra.mrb[28].mxu0 %v1698_v46  ;;  %809 = vmatmul.mubr.bf16.gmra.mrb[28].mxu1 %v1699_v47 }
  0xfa   : > { %v1500_v48 = vpop.f32.mrb[0].mxu0  ;;  %v1548_v49 = vpop.f32.mrb[0].mxu1 }
  0xfb   : > { %v1501_v50 = vpop.f32.mrb[1].mxu0  ;;  %v1549_v52 = vpop.f32.mrb[1].mxu1 }
  0xfc   : > { %v1502_v53 = vadd.f32 %v1501_v50, %v1500_v48  ;;  %v1550_v54 = vadd.f32 %v1549_v52, %v1548_v49  ;;  %v1503_v55 = vpop.f32.mrb[2].mxu0  ;;  %v1551_v56 = vpop.f32.mrb[2].mxu1 }
  0xfd   : > { %v1504_v57 = vpop.f32.mrb[3].mxu0  ;;  %v1552_v58 = vpop.f32.mrb[3].mxu1 }
  0xfe   : > { %v923_v59 = vadd.f32 %v1502_v53, %v1853_v51  ;;  %v939_v60 = vadd.f32 %v1550_v54, %v1853_v51  ;;  %v1505_v61 = vadd.f32 %v1504_v57, %v1503_v55  ;;  %v1553_v62 = vadd.f32 %v1552_v58, %v1551_v56 }
 0x100   : > { %v924_v63 = vadd.f32 %v1505_v61, %v1853_v51  ;;  %v940_v0 = vadd.f32 %v1553_v62, %v1853_v51  ;;  %v955_v1 = vmax.f32 %v923_v59, 0.0  ;;  %v971_v2 = vmax.f32 %v939_v60, 0.0 }
 0x102   : > { %v956_v3 = vmax.f32 %v924_v63, 0.0  ;;  %v972_v4 = vmax.f32 %v940_v0, 0.0  ;;  %v1506_v5 = vpop.f32.mrb[4].mxu0  ;;  %v1554_v6 = vpop.f32.mrb[4].mxu1 }
 0x103   : > { %v1507_v7 = vpop.f32.mrb[5].mxu0  ;;  %v1555_v8 = vpop.f32.mrb[5].mxu1 }
 0x104   : > { %v1392_v9 = vpack.c.bf16 %v956_v3, %v955_v1  ;;  %v1432_v10 = vpack.c.bf16 %v972_v4, %v971_v2  ;;  %v1508_v11 = vadd.f32 %v1507_v7, %v1506_v5  ;;  %v1556_v12 = vadd.f32 %v1555_v8, %v1554_v6  ;;  %v1509_v13 = vpop.f32.mrb[6].mxu0  ;;  %v1557_v14 = vpop.f32.mrb[6].mxu1 }
 0x105   : > { %v1510_v15 = vpop.f32.mrb[7].mxu0  ;;  %v1558_v16 = vpop.f32.mrb[7].mxu1 }
 0x106   : > { %1393 = vst [vmem:[%s1863_s8] sm:$0xff] %v1392_v9   ;;  %1476 = vst [vmem:[%s1863_s8 + $0x40] sm:$0xff] %v1432_v10   ;;  %v925_v17 = vadd.f32 %v1508_v11, %v1853_v51  ;;  %v941_v18 = vadd.f32 %v1556_v12, %v1853_v51  ;;  %v1511_v19 = vadd.f32 %v1510_v15, %v1509_v13 }
 0x107   : > { %v1559_v20 = vadd.f32 %v1558_v16, %v1557_v14 }
 0x108   : > { %v926_v21 = vadd.f32 %v1511_v19, %v1853_v51  ;;  %v957_v23 = vmax.f32 %v925_v17, 0.0  ;;  %v973_v24 = vmax.f32 %v941_v18, 0.0 }
 0x109   : > { %v942_v22 = vadd.f32 %v1559_v20, %v1853_v51 }
 0x10a   : > { %v958_v25 = vmax.f32 %v926_v21, 0.0  ;;  %v1512_v27 = vpop.f32.mrb[8].mxu0  ;;  %v1560_v28 = vpop.f32.mrb[8].mxu1 }
 0x10b   : > { %v974_v26 = vmax.f32 %v942_v22, 0.0  ;;  %v1513_v29 = vpop.f32.mrb[9].mxu0  ;;  %v1561_v30 = vpop.f32.mrb[9].mxu1 }
 0x10c   : > { %v1397_v31 = vpack.c.bf16 %v958_v25, %v957_v23  ;;  %v1514_v33 = vadd.f32 %v1513_v29, %v1512_v27  ;;  %v1562_v34 = vadd.f32 %v1561_v30, %v1560_v28  ;;  %v1515_v35 = vpop.f32.mrb[10].mxu0  ;;  %v1563_v36 = vpop.f32.mrb[10].mxu1 }
 0x10d   : > { %v1437_v32 = vpack.c.bf16 %v974_v26, %v973_v24  ;;  %v1516_v37 = vpop.f32.mrb[11].mxu0  ;;  %v1564_v38 = vpop.f32.mrb[11].mxu1 }
 0x10e   : > { %1469 = vst [vmem:[%s1863_s8 + $0x8] sm:$0xff] %v1397_v31   ;;  %v927_v39 = vadd.f32 %v1514_v33, %v1853_v51  ;;  %v943_v40 = vadd.f32 %v1562_v34, %v1853_v51  ;;  %v1517_v41 = vadd.f32 %v1516_v37, %v1515_v35  ;;  %v1565_v42 = vadd.f32 %v1564_v38, %v1563_v36 }
 0x10f   : > { %1477 = vst [vmem:[%s1863_s8 + $0x48] sm:$0xff] %v1437_v32  }
 0x110   : > { %v928_v43 = vadd.f32 %v1517_v41, %v1853_v51  ;;  %v944_v44 = vadd.f32 %v1565_v42, %v1853_v51  ;;  %v959_v45 = vmax.f32 %v927_v39, 0.0  ;;  %v975_v46 = vmax.f32 %v943_v40, 0.0 }
 0x112   : > { %v960_v47 = vmax.f32 %v928_v43, 0.0  ;;  %v976_v48 = vmax.f32 %v944_v44, 0.0  ;;  %v1518_v49 = vpop.f32.mrb[12].mxu0  ;;  %v1566_v50 = vpop.f32.mrb[12].mxu1 }
 0x113   : > { %v1519_v52 = vpop.f32.mrb[13].mxu0  ;;  %v1567_v53 = vpop.f32.mrb[13].mxu1 }
 0x114   : > { %v1402_v54 = vpack.c.bf16 %v960_v47, %v959_v45  ;;  %v1442_v55 = vpack.c.bf16 %v976_v48, %v975_v46  ;;  %v1520_v56 = vadd.f32 %v1519_v52, %v1518_v49  ;;  %v1568_v57 = vadd.f32 %v1567_v53, %v1566_v50  ;;  %v1521_v58 = vpop.f32.mrb[14].mxu0  ;;  %v1569_v59 = vpop.f32.mrb[14].mxu1 }
 0x115   : > { %v1522_v60 = vpop.f32.mrb[15].mxu0  ;;  %v1570_v61 = vpop.f32.mrb[15].mxu1 }
 0x116   : > { %1470 = vst [vmem:[%s1863_s8 + $0x10] sm:$0xff] %v1402_v54   ;;  %1478 = vst [vmem:[%s1863_s8 + $0x50] sm:$0xff] %v1442_v55   ;;  %v929_v62 = vadd.f32 %v1520_v56, %v1853_v51  ;;  %v945_v63 = vadd.f32 %v1568_v57, %v1853_v51  ;;  %v1523_v0 = vadd.f32 %v1522_v60, %v1521_v58 }
 0x117   : > { %v1571_v1 = vadd.f32 %v1570_v61, %v1569_v59 }
 0x118   : > { %v930_v2 = vadd.f32 %v1523_v0, %v1853_v51  ;;  %v961_v4 = vmax.f32 %v929_v62, 0.0  ;;  %v977_v5 = vmax.f32 %v945_v63, 0.0 }
 0x119   : > { %v946_v3 = vadd.f32 %v1571_v1, %v1853_v51 }
 0x11a   : > { %v962_v6 = vmax.f32 %v930_v2, 0.0  ;;  %v1524_v8 = vpop.f32.mrb[16].mxu0  ;;  %v1572_v9 = vpop.f32.mrb[16].mxu1 }
 0x11b   : > { %v978_v7 = vmax.f32 %v946_v3, 0.0  ;;  %v1525_v10 = vpop.f32.mrb[17].mxu0  ;;  %v1573_v11 = vpop.f32.mrb[17].mxu1 }
 0x11c   : > { %v1407_v12 = vpack.c.bf16 %v962_v6, %v961_v4  ;;  %v1526_v14 = vadd.f32 %v1525_v10, %v1524_v8  ;;  %v1574_v15 = vadd.f32 %v1573_v11, %v1572_v9  ;;  %v1527_v16 = vpop.f32.mrb[18].mxu0  ;;  %v1575_v17 = vpop.f32.mrb[18].mxu1 }
 0x11d   : > { %v1447_v13 = vpack.c.bf16 %v978_v7, %v977_v5  ;;  %v1528_v18 = vpop.f32.mrb[19].mxu0  ;;  %v1576_v19 = vpop.f32.mrb[19].mxu1 }
 0x11e   : > { %1471 = vst [vmem:[%s1863_s8 + $0x18] sm:$0xff] %v1407_v12   ;;  %v931_v20 = vadd.f32 %v1526_v14, %v1853_v51  ;;  %v947_v21 = vadd.f32 %v1574_v15, %v1853_v51  ;;  %v1529_v22 = vadd.f32 %v1528_v18, %v1527_v16  ;;  %v1577_v23 = vadd.f32 %v1576_v19, %v1575_v17 }
 0x11f   : > { %1479 = vst [vmem:[%s1863_s8 + $0x58] sm:$0xff] %v1447_v13  }
 0x120   : > { %v932_v24 = vadd.f32 %v1529_v22, %v1853_v51  ;;  %v948_v25 = vadd.f32 %v1577_v23, %v1853_v51  ;;  %v963_v26 = vmax.f32 %v931_v20, 0.0  ;;  %v979_v27 = vmax.f32 %v947_v21, 0.0 }
 0x122   : > { %v964_v28 = vmax.f32 %v932_v24, 0.0  ;;  %v980_v29 = vmax.f32 %v948_v25, 0.0  ;;  %v1530_v30 = vpop.f32.mrb[20].mxu0  ;;  %v1578_v31 = vpop.f32.mrb[20].mxu1 }
 0x123   : > { %v1531_v32 = vpop.f32.mrb[21].mxu0  ;;  %v1579_v33 = vpop.f32.mrb[21].mxu1 }
 0x124   : > { %v1412_v34 = vpack.c.bf16 %v964_v28, %v963_v26  ;;  %v1452_v35 = vpack.c.bf16 %v980_v29, %v979_v27  ;;  %v1532_v36 = vadd.f32 %v1531_v32, %v1530_v30  ;;  %v1580_v37 = vadd.f32 %v1579_v33, %v1578_v31  ;;  %v1533_v38 = vpop.f32.mrb[22].mxu0  ;;  %v1581_v39 = vpop.f32.mrb[22].mxu1 }
 0x125   : > { %v1534_v40 = vpop.f32.mrb[23].mxu0  ;;  %v1582_v41 = vpop.f32.mrb[23].mxu1 }
 0x126   : > { %1472 = vst [vmem:[%s1863_s8 + $0x20] sm:$0xff] %v1412_v34   ;;  %1480 = vst [vmem:[%s1863_s8 + $0x60] sm:$0xff] %v1452_v35   ;;  %v933_v42 = vadd.f32 %v1532_v36, %v1853_v51  ;;  %v949_v43 = vadd.f32 %v1580_v37, %v1853_v51  ;;  %v1535_v44 = vadd.f32 %v1534_v40, %v1533_v38 }
 0x127   : > { %v1583_v45 = vadd.f32 %v1582_v41, %v1581_v39 }
 0x128   : > { %v934_v46 = vadd.f32 %v1535_v44, %v1853_v51  ;;  %v965_v48 = vmax.f32 %v933_v42, 0.0  ;;  %v981_v49 = vmax.f32 %v949_v43, 0.0 }
 0x129   : > { %v950_v47 = vadd.f32 %v1583_v45, %v1853_v51 }
 0x12a   : > { %v966_v50 = vmax.f32 %v934_v46, 0.0  ;;  %v1536_v53 = vpop.f32.mrb[24].mxu0  ;;  %v1584_v54 = vpop.f32.mrb[24].mxu1 }
 0x12b   : > { %v982_v52 = vmax.f32 %v950_v47, 0.0  ;;  %v1537_v55 = vpop.f32.mrb[25].mxu0  ;;  %v1585_v56 = vpop.f32.mrb[25].mxu1 }
 0x12c   : > { %v1417_v57 = vpack.c.bf16 %v966_v50, %v965_v48  ;;  %v1538_v59 = vadd.f32 %v1537_v55, %v1536_v53  ;;  %v1586_v60 = vadd.f32 %v1585_v56, %v1584_v54  ;;  %v1539_v61 = vpop.f32.mrb[26].mxu0  ;;  %v1587_v62 = vpop.f32.mrb[26].mxu1 }
 0x12d   : > { %v1457_v58 = vpack.c.bf16 %v982_v52, %v981_v49  ;;  %v1540_v63 = vpop.f32.mrb[27].mxu0  ;;  %v1588_v0 = vpop.f32.mrb[27].mxu1 }
 0x12e   : > { %1473 = vst [vmem:[%s1863_s8 + $0x28] sm:$0xff] %v1417_v57   ;;  %v935_v1 = vadd.f32 %v1538_v59, %v1853_v51  ;;  %v951_v2 = vadd.f32 %v1586_v60, %v1853_v51  ;;  %v1541_v3 = vadd.f32 %v1540_v63, %v1539_v61  ;;  %v1589_v4 = vadd.f32 %v1588_v0, %v1587_v62 }
 0x12f   : > { %1481 = vst [vmem:[%s1863_s8 + $0x68] sm:$0xff] %v1457_v58  }
 0x130   : > { %v936_v5 = vadd.f32 %v1541_v3, %v1853_v51  ;;  %v952_v6 = vadd.f32 %v1589_v4, %v1853_v51  ;;  %v967_v7 = vmax.f32 %v935_v1, 0.0  ;;  %v983_v8 = vmax.f32 %v951_v2, 0.0 }
 0x132   : > { %v968_v9 = vmax.f32 %v936_v5, 0.0  ;;  %v984_v10 = vmax.f32 %v952_v6, 0.0  ;;  %v1542_v11 = vpop.f32.mrb[28].mxu0  ;;  %v1590_v12 = vpop.f32.mrb[28].mxu1 }
 0x133   : > { %v1543_v13 = vpop.f32.mrb[29].mxu0  ;;  %v1591_v14 = vpop.f32.mrb[29].mxu1 }
 0x134   : > { %v1422_v15 = vpack.c.bf16 %v968_v9, %v967_v7  ;;  %v1462_v16 = vpack.c.bf16 %v984_v10, %v983_v8  ;;  %v1544_v17 = vadd.f32 %v1543_v13, %v1542_v11  ;;  %v1592_v18 = vadd.f32 %v1591_v14, %v1590_v12  ;;  %v1545_v19 = vpop.f32.mrb[30].mxu0  ;;  %v1593_v20 = vpop.f32.mrb[30].mxu1 }
 0x135   : > { %v1546_v21 = vpop.f32.mrb[31].mxu0  ;;  %v1594_v22 = vpop.f32.mrb[31].mxu1 }
 0x136   : > { %1474 = vst [vmem:[%s1863_s8 + $0x30] sm:$0xff] %v1422_v15   ;;  %1482 = vst [vmem:[%s1863_s8 + $0x70] sm:$0xff] %v1462_v16   ;;  %v937_v23 = vadd.f32 %v1544_v17, %v1853_v51  ;;  %v953_v24 = vadd.f32 %v1592_v18, %v1853_v51  ;;  %v1547_v25 = vadd.f32 %v1546_v21, %v1545_v19 }
 0x137   : > { %v1595_v26 = vadd.f32 %v1594_v22, %v1593_v20 }
 0x138   : > { %v938_v27 = vadd.f32 %v1547_v25, %v1853_v51  ;;  %v969_v29 = vmax.f32 %v937_v23, 0.0  ;;  %v985_v30 = vmax.f32 %v953_v24, 0.0 }
 0x139   : > { %v954_v28 = vadd.f32 %v1595_v26, %v1853_v51 }
 0x13a   : > { %v970_v31 = vmax.f32 %v938_v27, 0.0 }
 0x13b   : > { %v986_v32 = vmax.f32 %v954_v28, 0.0 }
 0x13c   : > { %v1427_v33 = vpack.c.bf16 %v970_v31, %v969_v29 }
 0x13d   : > { %v1467_v34 = vpack.c.bf16 %v986_v32, %v985_v30 }
 0x13e   : > { %1475 = vst [vmem:[%s1863_s8 + $0x38] sm:$0xff] %v1427_v33  }
 0x13f   : > { %1483 = vst [vmem:[%s1863_s8 + $0x78] sm:$0xff] %v1467_v34  }
 0x140 PF: > { %s13_s14 = sadd.s32 1, %s1722_s14   ;;  %s1922_s12 = smov %s1718_s13 }
 0x141   : > { %p10_p5 = scmp.ge.s32.totalorder %s13_s14, 4   ;;  %s1923_s13 = smov %s1925_s15 }
 0x143   :  { %12 = sbr.rel (!%p10_p5) target bundleno = 2 (0x2), region = 76 }

// kernel: isuei_d2_forward.11
= control target key start
LH: loop header
LB: loop body
LE: loop exit
PB: predicated region body
PF: predicated region fallthrough
CT: control target
= control target key end

     0   :  { %s1476_s1 = inlined_call_operand.vmem [shape: bf16[512,128], index: 1, kind: input, shape index: {}]   ;;  %s1477_s0 = inlined_call_operand.vmem [shape: bf16[128,512], index: 0, kind: input, shape index: {}]   ;;  %s1478_s2 = inlined_call_operand.vmem [shape: f32[1,128], index: 2, kind: input, shape index: {}]   ;;  %s1479_s3 = inlined_call_operand.vmem [shape: bf16[128,128], index: 3, kind: output, shape index: {}]  }
   0x1   :  { %v1139_v0 = vld [vmem:[%s1476_s1 + $0x40] sm:$0xff]   ;;  %v1143_v4 = vld [vmem:[%s1476_s1 + $0x48] sm:$0xff]   ;;  %v1147_v8 = vld [vmem:[%s1476_s1 + $0x50] sm:$0xff]  }
   0x2   :  { %v1140_v1 = vld [vmem:[%s1476_s1 + $0xc0] sm:$0xff]   ;;  %1011 = vmatprep.subr.bf16.mxu0 %v1139_v0  ;;  %v1144_v5 = vld [vmem:[%s1476_s1 + $0xc8] sm:$0xff]   ;;  %v1148_v9 = vld [vmem:[%s1476_s1 + $0xd0] sm:$0xff]  }
   0x3   :  { %v1141_v2 = vld [vmem:[%s1476_s1] sm:$0xff]   ;;  %1075 = vmatprep.subr.bf16.mxu1 %v1140_v1  ;;  %v1145_v6 = vld [vmem:[%s1476_s1 + $0x8] sm:$0xff]   ;;  %v1149_v10 = vld [vmem:[%s1476_s1 + $0x10] sm:$0xff]  }
   0x4   :  { %v1142_v3 = vld [vmem:[%s1476_s1 + $0x80] sm:$0xff]   ;;  %1012 = vmatpush3.bf16.msra.mxu0 %v1141_v2  ;;  %v1146_v7 = vld [vmem:[%s1476_s1 + $0x88] sm:$0xff]   ;;  %v1150_v11 = vld [vmem:[%s1476_s1 + $0x90] sm:$0xff]  }
   0x5   :  { %1076 = vmatpush3.bf16.msra.mxu1 %v1142_v3  ;;  %1013 = vmatprep.subr.bf16.mxu0 %v1143_v4  ;;  %v1151_v12 = vld [vmem:[%s1476_s1 + $0x58] sm:$0xff]   ;;  %v1155_v16 = vld [vmem:[%s1476_s1 + $0x60] sm:$0xff]   ;;  %v1159_v20 = vld [vmem:[%s1476_s1 + $0x68] sm:$0xff]  }
   0x6   :  { %1077 = vmatprep.subr.bf16.mxu1 %v1144_v5  ;;  %v1152_v13 = vld [vmem:[%s1476_s1 + $0xd8] sm:$0xff]   ;;  %v1156_v17 = vld [vmem:[%s1476_s1 + $0xe0] sm:$0xff]   ;;  %v1160_v21 = vld [vmem:[%s1476_s1 + $0xe8] sm:$0xff]  }
   0x7   :  { %v1153_v14 = vld [vmem:[%s1476_s1 + $0x18] sm:$0xff]   ;;  %v1157_v18 = vld [vmem:[%s1476_s1 + $0x20] sm:$0xff]   ;;  %v1161_v22 = vld [vmem:[%s1476_s1 + $0x28] sm:$0xff]  }
   0x8   :  { %1014 = vmatpush3.bf16.msra.mxu0 %v1145_v6  ;;  %v1154_v15 = vld [vmem:[%s1476_s1 + $0x98] sm:$0xff]   ;;  %v1158_v19 = vld [vmem:[%s1476_s1 + $0xa0] sm:$0xff]   ;;  %v1162_v23 = vld [vmem:[%s1476_s1 + $0xa8] sm:$0xff]  }
   0x9   :  { %1078 = vmatpush3.bf16.msra.mxu1 %v1146_v7  ;;  %1015 = vmatprep.subr.bf16.mxu0 %v1147_v8  ;;  %v1163_v24 = vld [vmem:[%s1476_s1 + $0x70] sm:$0xff]   ;;  %v1167_v28 = vld [vmem:[%s1476_s1 + $0x78] sm:$0xff]  }
   0xa   :  { %1079 = vmatprep.subr.bf16.mxu1 %v1148_v9  ;;  %v1164_v25 = vld [vmem:[%s1476_s1 + $0xf0] sm:$0xff]   ;;  %v1168_v29 = vld [vmem:[%s1476_s1 + $0xf8] sm:$0xff]   ;;  %v1434_v9 = vld [vmem:[%s1478_s2] ss:$0 sm:$0xff] }
   0xb   :  { %v1165_v26 = vld [vmem:[%s1476_s1 + $0x30] sm:$0xff]   ;;  %v1169_v30 = vld [vmem:[%s1476_s1 + $0x38] sm:$0xff]  }
   0xc   :  { %1016 = vmatpush3.bf16.msra.mxu0 %v1149_v10  ;;  %v1166_v27 = vld [vmem:[%s1476_s1 + $0xb0] sm:$0xff]   ;;  %v1170_v31 = vld [vmem:[%s1476_s1 + $0xb8] sm:$0xff]  }
   0xd   :  { %1080 = vmatpush3.bf16.msra.mxu1 %v1150_v11  ;;  %1017 = vmatprep.subr.bf16.mxu0 %v1151_v12  ;;  %v1171_v32 = vld [vmem:[%s1477_s0] ss:$16 sps:$4 sm:$0xff]   ;;  %v1173_v33 = vld [vmem:[%s1477_s0 + $0x4] ss:$16 sps:$4 sm:$0xff]   ;;  %v1174_v34 = vld [vmem:[%s1477_s0 + $0x8] ss:$16 sps:$4 sm:$0xff]  }
   0xe   :  { %1081 = vmatprep.subr.bf16.mxu1 %v1152_v13  ;;  %v1176_v35 = vld [vmem:[%s1477_s0 + $0xc] ss:$16 sps:$4 sm:$0xff]   ;;  %531 = vmatprep.mubr.bf16.mxu0 %v1173_v33  ;;  %v1177_v36 = vld [vmem:[%s1477_s0 + $0x24] ss:$16 sps:$4 sm:$0xff]   ;;  %v1181_v38 = vld [vmem:[%s1477_s0 + $0x20] ss:$16 sps:$4 sm:$0xff]  }
   0xf   :  { %628 = vmatprep.mubr.bf16.mxu1 %v1176_v35  ;;  %v1179_v37 = vld [vmem:[%s1477_s0 + $0x2c] ss:$16 sps:$4 sm:$0xff]   ;;  %v1182_v39 = vld [vmem:[%s1477_s0 + $0x28] ss:$16 sps:$4 sm:$0xff]   ;;  %v1183_v40 = vld [vmem:[%s1477_s0 + $0x44] ss:$16 sps:$4 sm:$0xff]  }
  0x10   :  { %1018 = vmatpush3.bf16.msra.mxu0 %v1153_v14  ;;  %v1185_v41 = vld [vmem:[%s1477_s0 + $0x4c] ss:$16 sps:$4 sm:$0xff]   ;;  %v1187_v42 = vld [vmem:[%s1477_s0 + $0x40] ss:$16 sps:$4 sm:$0xff]   ;;  %v1188_v43 = vld [vmem:[%s1477_s0 + $0x48] ss:$16 sps:$4 sm:$0xff]  }
  0x11   :  { %1082 = vmatpush3.bf16.msra.mxu1 %v1154_v15  ;;  %1019 = vmatprep.subr.bf16.mxu0 %v1155_v16  ;;  %v1189_v44 = vld [vmem:[%s1477_s0 + $0x64] ss:$16 sps:$4 sm:$0xff]   ;;  %v1191_v45 = vld [vmem:[%s1477_s0 + $0x6c] ss:$16 sps:$4 sm:$0xff]   ;;  %v1193_v46 = vld [vmem:[%s1477_s0 + $0x60] ss:$16 sps:$4 sm:$0xff]  }
  0x12   :  { %1083 = vmatprep.subr.bf16.mxu1 %v1156_v17  ;;  %v1194_v47 = vld [vmem:[%s1477_s0 + $0x68] ss:$16 sps:$4 sm:$0xff]   ;;  %v1195_v48 = vld [vmem:[%s1477_s0 + $0x84] ss:$16 sps:$4 sm:$0xff]   ;;  %v1197_v49 = vld [vmem:[%s1477_s0 + $0x8c] ss:$16 sps:$4 sm:$0xff]  }
  0x13   :  { %v1199_v50 = vld [vmem:[%s1477_s0 + $0x80] ss:$16 sps:$4 sm:$0xff]   ;;  %v1200_v51 = vld [vmem:[%s1477_s0 + $0x88] ss:$16 sps:$4 sm:$0xff]   ;;  %v1201_v52 = vld [vmem:[%s1477_s0 + $0xa4] ss:$16 sps:$4 sm:$0xff]  }
  0x14   :  { %1020 = vmatpush3.bf16.msra.mxu0 %v1157_v18  ;;  %v1203_v53 = vld [vmem:[%s1477_s0 + $0xac] ss:$16 sps:$4 sm:$0xff]   ;;  %v1205_v54 = vld [vmem:[%s1477_s0 + $0xa0] ss:$16 sps:$4 sm:$0xff]   ;;  %v1206_v55 = vld [vmem:[%s1477_s0 + $0xa8] ss:$16 sps:$4 sm:$0xff]  }
  0x15   :  { %1084 = vmatpush3.bf16.msra.mxu1 %v1158_v19  ;;  %1021 = vmatprep.subr.bf16.mxu0 %v1159_v20  ;;  %v1207_v56 = vld [vmem:[%s1477_s0 + $0xc4] ss:$16 sps:$4 sm:$0xff]   ;;  %v1209_v57 = vld [vmem:[%s1477_s0 + $0xcc] ss:$16 sps:$4 sm:$0xff]   ;;  %v1211_v58 = vld [vmem:[%s1477_s0 + $0xc0] ss:$16 sps:$4 sm:$0xff]  }
  0x16   :  { %1085 = vmatprep.subr.bf16.mxu1 %v1160_v21  ;;  %v1212_v59 = vld [vmem:[%s1477_s0 + $0xc8] ss:$16 sps:$4 sm:$0xff]   ;;  %v1213_v60 = vld [vmem:[%s1477_s0 + $0xe4] ss:$16 sps:$4 sm:$0xff]   ;;  %v1215_v61 = vld [vmem:[%s1477_s0 + $0xec] ss:$16 sps:$4 sm:$0xff]  }
  0x17   :  { %v1217_v62 = vld [vmem:[%s1477_s0 + $0xe0] ss:$16 sps:$4 sm:$0xff]   ;;  %v1218_v63 = vld [vmem:[%s1477_s0 + $0xe8] ss:$16 sps:$4 sm:$0xff]  }
  0x18   :  { %1022 = vmatpush3.bf16.msra.mxu0 %v1161_v22 }
  0x19   :  { %1086 = vmatpush3.bf16.msra.mxu1 %v1162_v23  ;;  %1023 = vmatprep.subr.bf16.mxu0 %v1163_v24 }
  0x1a   :  { %1087 = vmatprep.subr.bf16.mxu1 %v1164_v25 }
  0x1c   :  { %1024 = vmatpush3.bf16.msra.mxu0 %v1165_v26 }
  0x1d   :  { %1088 = vmatpush3.bf16.msra.mxu1 %v1166_v27  ;;  %1025 = vmatprep.subr.bf16.mxu0 %v1167_v28 }
  0x1e   :  { %1089 = vmatprep.subr.bf16.mxu1 %v1168_v29 }
  0x20   :  { %1026 = vmatpush3.bf16.msra.mxu0 %v1169_v30 }
  0x21   :  { %1090 = vmatpush3.bf16.msra.mxu1 %v1170_v31 }
  0x23   :  { %532 = vmatmul.mubr.bf16.vlgmr.msra.gmra.mrb[0].mxu0 %v1171_v32 }
  0x24   :  { %629 = vmatmul.mubr.bf16.vlgmr.msra.gmra.mrb[0].mxu1 %v1174_v34  ;;  %539 = vmatprep.mubr.bf16.mxu0 %v1177_v36 }
  0x25   :  { %636 = vmatprep.mubr.bf16.mxu1 %v1179_v37 }
  0x2b   :  { %540 = vmatmul.mubr.bf16.gmra.mrb[4].mxu0 %v1181_v38 }
  0x2c   :  { %637 = vmatmul.mubr.bf16.gmra.mrb[4].mxu1 %v1182_v39  ;;  %547 = vmatprep.mubr.bf16.mxu0 %v1183_v40 }
  0x2d   :  { %644 = vmatprep.mubr.bf16.mxu1 %v1185_v41 }
  0x33   :  { %548 = vmatmul.mubr.bf16.gmra.mrb[8].mxu0 %v1187_v42 }
  0x34   :  { %645 = vmatmul.mubr.bf16.gmra.mrb[8].mxu1 %v1188_v43  ;;  %555 = vmatprep.mubr.bf16.mxu0 %v1189_v44 }
  0x35   :  { %652 = vmatprep.mubr.bf16.mxu1 %v1191_v45 }
  0x3b   :  { %556 = vmatmul.mubr.bf16.gmra.mrb[12].mxu0 %v1193_v46 }
  0x3c   :  { %653 = vmatmul.mubr.bf16.gmra.mrb[12].mxu1 %v1194_v47  ;;  %563 = vmatprep.mubr.bf16.mxu0 %v1195_v48 }
  0x3d   :  { %660 = vmatprep.mubr.bf16.mxu1 %v1197_v49 }
  0x43   :  { %564 = vmatmul.mubr.bf16.gmra.mrb[16].mxu0 %v1199_v50 }
  0x44   :  { %661 = vmatmul.mubr.bf16.gmra.mrb[16].mxu1 %v1200_v51  ;;  %571 = vmatprep.mubr.bf16.mxu0 %v1201_v52 }
  0x45   :  { %668 = vmatprep.mubr.bf16.mxu1 %v1203_v53 }
  0x4b   :  { %572 = vmatmul.mubr.bf16.gmra.mrb[20].mxu0 %v1205_v54 }
  0x4c   :  { %669 = vmatmul.mubr.bf16.gmra.mrb[20].mxu1 %v1206_v55  ;;  %579 = vmatprep.mubr.bf16.mxu0 %v1207_v56 }
  0x4d   :  { %676 = vmatprep.mubr.bf16.mxu1 %v1209_v57 }
  0x53   :  { %580 = vmatmul.mubr.bf16.gmra.mrb[24].mxu0 %v1211_v58 }
  0x54   :  { %677 = vmatmul.mubr.bf16.gmra.mrb[24].mxu1 %v1212_v59  ;;  %587 = vmatprep.mubr.bf16.mxu0 %v1213_v60 }
  0x55   :  { %684 = vmatprep.mubr.bf16.mxu1 %v1215_v61 }
  0x5b   :  { %588 = vmatmul.mubr.bf16.gmra.mrb[28].mxu0 %v1217_v62 }
  0x5c   :  { %685 = vmatmul.mubr.bf16.gmra.mrb[28].mxu1 %v1218_v63 }
  0xf6   :  { %v1027_v0 = vpop.f32.mrb[0].mxu0 }
  0xf7   :  { %v1091_v1 = vpop.f32.mrb[0].mxu1  ;;  %v1028_v2 = vpop.f32.mrb[1].mxu0 }
  0xf8   :  { %v1029_v3 = vadd.f32 %v1028_v2, %v1027_v0  ;;  %v1092_v4 = vpop.f32.mrb[1].mxu1  ;;  %v1030_v5 = vpop.f32.mrb[2].mxu0 }
  0xf9   :  { %v1093_v6 = vadd.f32 %v1092_v4, %v1091_v1  ;;  %v1094_v7 = vpop.f32.mrb[2].mxu1  ;;  %v1031_v8 = vpop.f32.mrb[3].mxu0 }
  0xfa   :  { %v1032_v10 = vadd.f32 %v1031_v8, %v1030_v5  ;;  %v1095_v11 = vpop.f32.mrb[3].mxu1 }
  0xfb   :  { %v631_v12 = vadd.f32 %v1093_v6, %v1029_v3  ;;  %v1096_v13 = vadd.f32 %v1095_v11, %v1094_v7 }
  0xfd   :  { %v751_v14 = vadd.f32 %v1434_v9, %v631_v12  ;;  %v634_v15 = vadd.f32 %v1096_v13, %v1032_v10 }
  0xfe   :  { %v1033_v16 = vpop.f32.mrb[4].mxu0 }
  0xff   :  { %v752_v17 = vadd.f32 %v1434_v9, %v634_v15  ;;  %v1097_v18 = vpop.f32.mrb[4].mxu1  ;;  %v1034_v19 = vpop.f32.mrb[5].mxu0  ;;  %v767_v23 = vmax.f32 %v751_v14, 0.0 }
 0x100   :  { %v1035_v20 = vadd.f32 %v1034_v19, %v1033_v16  ;;  %v1098_v21 = vpop.f32.mrb[5].mxu1  ;;  %v1036_v22 = vpop.f32.mrb[6].mxu0 }
 0x101   :  { %v768_v24 = vmax.f32 %v752_v17, 0.0  ;;  %v1099_v25 = vadd.f32 %v1098_v21, %v1097_v18  ;;  %v1100_v26 = vpop.f32.mrb[6].mxu1  ;;  %v1037_v27 = vpop.f32.mrb[7].mxu0 }
 0x102   :  { %v1038_v28 = vadd.f32 %v1037_v27, %v1036_v22  ;;  %v1101_v29 = vpop.f32.mrb[7].mxu1 }
 0x103   :  { %v967_v30 = vpack.c.bf16 %v768_v24, %v767_v23  ;;  %v639_v31 = vadd.f32 %v1099_v25, %v1035_v20  ;;  %v1102_v32 = vadd.f32 %v1101_v29, %v1100_v26 }
 0x105   :  { %968 = vst [vmem:[%s1479_s3] sm:$0xff] %v967_v30   ;;  %v753_v33 = vadd.f32 %v1434_v9, %v639_v31  ;;  %v642_v34 = vadd.f32 %v1102_v32, %v1038_v28 }
 0x106   :  { %v1039_v35 = vpop.f32.mrb[8].mxu0 }
 0x107   :  { %v754_v36 = vadd.f32 %v1434_v9, %v642_v34  ;;  %v1103_v37 = vpop.f32.mrb[8].mxu1  ;;  %v1040_v38 = vpop.f32.mrb[9].mxu0  ;;  %v769_v42 = vmax.f32 %v753_v33, 0.0 }
 0x108   :  { %v1041_v39 = vadd.f32 %v1040_v38, %v1039_v35  ;;  %v1104_v40 = vpop.f32.mrb[9].mxu1  ;;  %v1042_v41 = vpop.f32.mrb[10].mxu0 }
 0x109   :  { %v770_v43 = vmax.f32 %v754_v36, 0.0  ;;  %v1105_v44 = vadd.f32 %v1104_v40, %v1103_v37  ;;  %v1106_v45 = vpop.f32.mrb[10].mxu1  ;;  %v1043_v46 = vpop.f32.mrb[11].mxu0 }
 0x10a   :  { %v1044_v47 = vadd.f32 %v1043_v46, %v1042_v41  ;;  %v1107_v48 = vpop.f32.mrb[11].mxu1 }
 0x10b   :  { %v972_v49 = vpack.c.bf16 %v770_v43, %v769_v42  ;;  %v647_v50 = vadd.f32 %v1105_v44, %v1041_v39  ;;  %v1108_v51 = vadd.f32 %v1107_v48, %v1106_v45 }
 0x10d   :  { %1004 = vst [vmem:[%s1479_s3 + $0x8] sm:$0xff] %v972_v49   ;;  %v755_v52 = vadd.f32 %v1434_v9, %v647_v50  ;;  %v650_v53 = vadd.f32 %v1108_v51, %v1044_v47 }
 0x10e   :  { %v1045_v54 = vpop.f32.mrb[12].mxu0 }
 0x10f   :  { %v756_v55 = vadd.f32 %v1434_v9, %v650_v53  ;;  %v1109_v56 = vpop.f32.mrb[12].mxu1  ;;  %v1046_v57 = vpop.f32.mrb[13].mxu0  ;;  %v771_v61 = vmax.f32 %v755_v52, 0.0 }
 0x110   :  { %v1047_v58 = vadd.f32 %v1046_v57, %v1045_v54  ;;  %v1110_v59 = vpop.f32.mrb[13].mxu1  ;;  %v1048_v60 = vpop.f32.mrb[14].mxu0 }
 0x111   :  { %v772_v62 = vmax.f32 %v756_v55, 0.0  ;;  %v1111_v63 = vadd.f32 %v1110_v59, %v1109_v56  ;;  %v1112_v0 = vpop.f32.mrb[14].mxu1  ;;  %v1049_v1 = vpop.f32.mrb[15].mxu0 }
 0x112   :  { %v1050_v2 = vadd.f32 %v1049_v1, %v1048_v60  ;;  %v1113_v3 = vpop.f32.mrb[15].mxu1 }
 0x113   :  { %v977_v4 = vpack.c.bf16 %v772_v62, %v771_v61  ;;  %v655_v5 = vadd.f32 %v1111_v63, %v1047_v58  ;;  %v1114_v6 = vadd.f32 %v1113_v3, %v1112_v0 }
 0x115   :  { %1005 = vst [vmem:[%s1479_s3 + $0x10] sm:$0xff] %v977_v4   ;;  %v757_v7 = vadd.f32 %v1434_v9, %v655_v5  ;;  %v658_v8 = vadd.f32 %v1114_v6, %v1050_v2 }
 0x116   :  { %v1051_v10 = vpop.f32.mrb[16].mxu0 }
 0x117   :  { %v758_v11 = vadd.f32 %v1434_v9, %v658_v8  ;;  %v1115_v12 = vpop.f32.mrb[16].mxu1  ;;  %v1052_v13 = vpop.f32.mrb[17].mxu0  ;;  %v773_v17 = vmax.f32 %v757_v7, 0.0 }
 0x118   :  { %v1053_v14 = vadd.f32 %v1052_v13, %v1051_v10  ;;  %v1116_v15 = vpop.f32.mrb[17].mxu1  ;;  %v1054_v16 = vpop.f32.mrb[18].mxu0 }
 0x119   :  { %v774_v18 = vmax.f32 %v758_v11, 0.0  ;;  %v1117_v19 = vadd.f32 %v1116_v15, %v1115_v12  ;;  %v1118_v20 = vpop.f32.mrb[18].mxu1  ;;  %v1055_v21 = vpop.f32.mrb[19].mxu0 }
 0x11a   :  { %v1056_v22 = vadd.f32 %v1055_v21, %v1054_v16  ;;  %v1119_v23 = vpop.f32.mrb[19].mxu1 }
 0x11b   :  { %v982_v24 = vpack.c.bf16 %v774_v18, %v773_v17  ;;  %v663_v25 = vadd.f32 %v1117_v19, %v1053_v14  ;;  %v1120_v26 = vadd.f32 %v1119_v23, %v1118_v20 }
 0x11d   :  { %1006 = vst [vmem:[%s1479_s3 + $0x18] sm:$0xff] %v982_v24   ;;  %v759_v27 = vadd.f32 %v1434_v9, %v663_v25  ;;  %v666_v28 = vadd.f32 %v1120_v26, %v1056_v22 }
 0x11e   :  { %v1057_v29 = vpop.f32.mrb[20].mxu0 }
 0x11f   :  { %v760_v30 = vadd.f32 %v1434_v9, %v666_v28  ;;  %v1121_v31 = vpop.f32.mrb[20].mxu1  ;;  %v1058_v32 = vpop.f32.mrb[21].mxu0  ;;  %v775_v36 = vmax.f32 %v759_v27, 0.0 }
 0x120   :  { %v1059_v33 = vadd.f32 %v1058_v32, %v1057_v29  ;;  %v1122_v34 = vpop.f32.mrb[21].mxu1  ;;  %v1060_v35 = vpop.f32.mrb[22].mxu0 }
 0x121   :  { %v776_v37 = vmax.f32 %v760_v30, 0.0  ;;  %v1123_v38 = vadd.f32 %v1122_v34, %v1121_v31  ;;  %v1124_v39 = vpop.f32.mrb[22].mxu1  ;;  %v1061_v40 = vpop.f32.mrb[23].mxu0 }
 0x122   :  { %v1062_v41 = vadd.f32 %v1061_v40, %v1060_v35  ;;  %v1125_v42 = vpop.f32.mrb[23].mxu1 }
 0x123   :  { %v987_v43 = vpack.c.bf16 %v776_v37, %v775_v36  ;;  %v671_v44 = vadd.f32 %v1123_v38, %v1059_v33  ;;  %v1126_v45 = vadd.f32 %v1125_v42, %v1124_v39 }
 0x125   :  { %1007 = vst [vmem:[%s1479_s3 + $0x20] sm:$0xff] %v987_v43   ;;  %v761_v46 = vadd.f32 %v1434_v9, %v671_v44  ;;  %v674_v47 = vadd.f32 %v1126_v45, %v1062_v41 }
 0x126   :  { %v1063_v48 = vpop.f32.mrb[24].mxu0 }
 0x127   :  { %v762_v49 = vadd.f32 %v1434_v9, %v674_v47  ;;  %v1127_v50 = vpop.f32.mrb[24].mxu1  ;;  %v1064_v51 = vpop.f32.mrb[25].mxu0  ;;  %v777_v55 = vmax.f32 %v761_v46, 0.0 }
 0x128   :  { %v1065_v52 = vadd.f32 %v1064_v51, %v1063_v48  ;;  %v1128_v53 = vpop.f32.mrb[25].mxu1  ;;  %v1066_v54 = vpop.f32.mrb[26].mxu0 }
 0x129   :  { %v778_v56 = vmax.f32 %v762_v49, 0.0  ;;  %v1129_v57 = vadd.f32 %v1128_v53, %v1127_v50  ;;  %v1130_v58 = vpop.f32.mrb[26].mxu1  ;;  %v1067_v59 = vpop.f32.mrb[27].mxu0 }
 0x12a   :  { %v1068_v60 = vadd.f32 %v1067_v59, %v1066_v54  ;;  %v1131_v61 = vpop.f32.mrb[27].mxu1 }
 0x12b   :  { %v992_v62 = vpack.c.bf16 %v778_v56, %v777_v55  ;;  %v679_v63 = vadd.f32 %v1129_v57, %v1065_v52  ;;  %v1132_v0 = vadd.f32 %v1131_v61, %v1130_v58 }
 0x12d   :  { %1008 = vst [vmem:[%s1479_s3 + $0x28] sm:$0xff] %v992_v62   ;;  %v763_v1 = vadd.f32 %v1434_v9, %v679_v63  ;;  %v682_v2 = vadd.f32 %v1132_v0, %v1068_v60 }
 0x12e   :  { %v1069_v3 = vpop.f32.mrb[28].mxu0 }
 0x12f   :  { %v764_v4 = vadd.f32 %v1434_v9, %v682_v2  ;;  %v1133_v5 = vpop.f32.mrb[28].mxu1  ;;  %v1070_v6 = vpop.f32.mrb[29].mxu0  ;;  %v779_v11 = vmax.f32 %v763_v1, 0.0 }
 0x130   :  { %v1071_v7 = vadd.f32 %v1070_v6, %v1069_v3  ;;  %v1134_v8 = vpop.f32.mrb[29].mxu1  ;;  %v1072_v10 = vpop.f32.mrb[30].mxu0 }
 0x131   :  { %v780_v12 = vmax.f32 %v764_v4, 0.0  ;;  %v1135_v13 = vadd.f32 %v1134_v8, %v1133_v5  ;;  %v1136_v14 = vpop.f32.mrb[30].mxu1  ;;  %v1073_v15 = vpop.f32.mrb[31].mxu0 }
 0x132   :  { %v1074_v16 = vadd.f32 %v1073_v15, %v1072_v10  ;;  %v1137_v17 = vpop.f32.mrb[31].mxu1 }
 0x133   :  { %v997_v18 = vpack.c.bf16 %v780_v12, %v779_v11  ;;  %v687_v19 = vadd.f32 %v1135_v13, %v1071_v7  ;;  %v1138_v20 = vadd.f32 %v1137_v17, %v1136_v14 }
 0x135   :  { %1009 = vst [vmem:[%s1479_s3 + $0x30] sm:$0xff] %v997_v18   ;;  %v765_v21 = vadd.f32 %v1434_v9, %v687_v19  ;;  %v690_v22 = vadd.f32 %v1138_v20, %v1074_v16 }
 0x137   :  { %v766_v23 = vadd.f32 %v1434_v9, %v690_v22  ;;  %v781_v24 = vmax.f32 %v765_v21, 0.0 }
 0x139   :  { %v782_v25 = vmax.f32 %v766_v23, 0.0 }
 0x13b   :  { %v1002_v26 = vpack.c.bf16 %v782_v25, %v781_v24 }
 0x13d   :  { %1010 = vst [vmem:[%s1479_s3 + $0x38] sm:$0xff] %v1002_v26  }

// kernel: isuei_d2_forward.12
= control target key start
LH: loop header
LB: loop body
LE: loop exit
PB: predicated region body
PF: predicated region fallthrough
CT: control target
= control target key end

     0   :  { %s792_s1 = inlined_call_operand.vmem [shape: bf16[512,128], index: 1, kind: input, shape index: {}]   ;;  %s793_s0 = inlined_call_operand.vmem [shape: bf16[32,512], index: 0, kind: input, shape index: {}]   ;;  %s794_s2 = inlined_call_operand.vmem [shape: f32[1,128], index: 2, kind: input, shape index: {}]   ;;  %s795_s3 = inlined_call_operand.vmem [shape: bf16[32,128], index: 3, kind: output, shape index: {}]  }
   0x1   :  { %v599_v0 = vld [vmem:[%s792_s1 + $0x40] sm:$0xff]   ;;  %v603_v4 = vld [vmem:[%s792_s1 + $0x48] sm:$0xff]   ;;  %v607_v8 = vld [vmem:[%s792_s1 + $0x50] sm:$0xff]  }
   0x2   :  { %v600_v1 = vld [vmem:[%s792_s1 + $0xc0] sm:$0xff]   ;;  %543 = vmatprep.subr.bf16.mxu0 %v599_v0  ;;  %v604_v5 = vld [vmem:[%s792_s1 + $0xc8] sm:$0xff]   ;;  %v608_v9 = vld [vmem:[%s792_s1 + $0xd0] sm:$0xff]  }
   0x3   :  { %v601_v2 = vld [vmem:[%s792_s1] sm:$0xff]   ;;  %571 = vmatprep.subr.bf16.mxu1 %v600_v1  ;;  %v605_v6 = vld [vmem:[%s792_s1 + $0x8] sm:$0xff]   ;;  %v609_v10 = vld [vmem:[%s792_s1 + $0x10] sm:$0xff]  }
   0x4   :  { %v602_v3 = vld [vmem:[%s792_s1 + $0x80] sm:$0xff]   ;;  %544 = vmatpush3.bf16.msra.mxu0 %v601_v2  ;;  %v606_v7 = vld [vmem:[%s792_s1 + $0x88] sm:$0xff]   ;;  %v610_v11 = vld [vmem:[%s792_s1 + $0x90] sm:$0xff]  }
   0x5   :  { %572 = vmatpush3.bf16.msra.mxu1 %v602_v3  ;;  %545 = vmatprep.subr.bf16.mxu0 %v603_v4  ;;  %v611_v12 = vld [vmem:[%s792_s1 + $0x58] sm:$0xff]   ;;  %v615_v16 = vld [vmem:[%s792_s1 + $0x60] sm:$0xff]   ;;  %v619_v20 = vld [vmem:[%s792_s1 + $0x68] sm:$0xff]  }
   0x6   :  { %573 = vmatprep.subr.bf16.mxu1 %v604_v5  ;;  %v612_v13 = vld [vmem:[%s792_s1 + $0xd8] sm:$0xff]   ;;  %v616_v17 = vld [vmem:[%s792_s1 + $0xe0] sm:$0xff]   ;;  %v620_v21 = vld [vmem:[%s792_s1 + $0xe8] sm:$0xff]  }
   0x7   :  { %v613_v14 = vld [vmem:[%s792_s1 + $0x18] sm:$0xff]   ;;  %v617_v18 = vld [vmem:[%s792_s1 + $0x20] sm:$0xff]   ;;  %v621_v22 = vld [vmem:[%s792_s1 + $0x28] sm:$0xff]  }
   0x8   :  { %546 = vmatpush3.bf16.msra.mxu0 %v605_v6  ;;  %v614_v15 = vld [vmem:[%s792_s1 + $0x98] sm:$0xff]   ;;  %v618_v19 = vld [vmem:[%s792_s1 + $0xa0] sm:$0xff]   ;;  %v622_v23 = vld [vmem:[%s792_s1 + $0xa8] sm:$0xff]  }
   0x9   :  { %574 = vmatpush3.bf16.msra.mxu1 %v606_v7  ;;  %547 = vmatprep.subr.bf16.mxu0 %v607_v8  ;;  %v623_v24 = vld [vmem:[%s792_s1 + $0x70] sm:$0xff]   ;;  %v627_v28 = vld [vmem:[%s792_s1 + $0x78] sm:$0xff]   ;;  %v523_v49 = vld [vmem:[%s794_s2] ss:$0 sm:$0xff] }
   0xa   :  { %575 = vmatprep.subr.bf16.mxu1 %v608_v9  ;;  %v624_v25 = vld [vmem:[%s792_s1 + $0xf0] sm:$0xff]   ;;  %v628_v29 = vld [vmem:[%s792_s1 + $0xf8] sm:$0xff]  }
   0xb   :  { %v625_v26 = vld [vmem:[%s792_s1 + $0x30] sm:$0xff]   ;;  %v629_v30 = vld [vmem:[%s792_s1 + $0x38] sm:$0xff]  }
   0xc   :  { %548 = vmatpush3.bf16.msra.mxu0 %v609_v10  ;;  %v626_v27 = vld [vmem:[%s792_s1 + $0xb0] sm:$0xff]   ;;  %v630_v31 = vld [vmem:[%s792_s1 + $0xb8] sm:$0xff]  }
   0xd   :  { %576 = vmatpush3.bf16.msra.mxu1 %v610_v11  ;;  %549 = vmatprep.subr.bf16.mxu0 %v611_v12  ;;  %v631_v32 = vld [vmem:[%s793_s0] ss:$16 sps:$4 sm:$0xff]   ;;  %v633_v33 = vld [vmem:[%s793_s0 + $0x4] ss:$16 sps:$4 sm:$0xff]   ;;  %v634_v34 = vld [vmem:[%s793_s0 + $0x8] ss:$16 sps:$4 sm:$0xff]  }
   0xe   :  { %577 = vmatprep.subr.bf16.mxu1 %v612_v13  ;;  %v636_v35 = vld [vmem:[%s793_s0 + $0xc] ss:$16 sps:$4 sm:$0xff]   ;;  %363 = vmatprep.mubr.bf16.mxu0 %v633_v33  ;;  %v637_v36 = vld [vmem:[%s793_s0 + $0x24] ss:$16 sps:$4 sm:$0xff]   ;;  %v641_v38 = vld [vmem:[%s793_s0 + $0x20] ss:$16 sps:$4 sm:$0xff]  }
   0xf   :  { %412 = vmatprep.mubr.bf16.mxu1 %v636_v35  ;;  %v639_v37 = vld [vmem:[%s793_s0 + $0x2c] ss:$16 sps:$4 sm:$0xff]   ;;  %v642_v39 = vld [vmem:[%s793_s0 + $0x28] ss:$16 sps:$4 sm:$0xff]  }
  0x10   :  { %550 = vmatpush3.bf16.msra.mxu0 %v613_v14 }
  0x11   :  { %578 = vmatpush3.bf16.msra.mxu1 %v614_v15  ;;  %551 = vmatprep.subr.bf16.mxu0 %v615_v16 }
  0x12   :  { %579 = vmatprep.subr.bf16.mxu1 %v616_v17 }
  0x14   :  { %552 = vmatpush3.bf16.msra.mxu0 %v617_v18 }
  0x15   :  { %580 = vmatpush3.bf16.msra.mxu1 %v618_v19  ;;  %553 = vmatprep.subr.bf16.mxu0 %v619_v20 }
  0x16   :  { %581 = vmatprep.subr.bf16.mxu1 %v620_v21 }
  0x18   :  { %554 = vmatpush3.bf16.msra.mxu0 %v621_v22 }
  0x19   :  { %582 = vmatpush3.bf16.msra.mxu1 %v622_v23  ;;  %555 = vmatprep.subr.bf16.mxu0 %v623_v24 }
  0x1a   :  { %583 = vmatprep.subr.bf16.mxu1 %v624_v25 }
  0x1c   :  { %556 = vmatpush3.bf16.msra.mxu0 %v625_v26 }
  0x1d   :  { %584 = vmatpush3.bf16.msra.mxu1 %v626_v27  ;;  %557 = vmatprep.subr.bf16.mxu0 %v627_v28 }
  0x1e   :  { %585 = vmatprep.subr.bf16.mxu1 %v628_v29 }
  0x20   :  { %558 = vmatpush3.bf16.msra.mxu0 %v629_v30 }
  0x21   :  { %586 = vmatpush3.bf16.msra.mxu1 %v630_v31 }
  0x23   :  { %364 = vmatmul.mubr.bf16.vlgmr.msra.gmra.mrb[0].mxu0 %v631_v32 }
  0x24   :  { %413 = vmatmul.mubr.bf16.vlgmr.msra.gmra.mrb[0].mxu1 %v634_v34  ;;  %371 = vmatprep.mubr.bf16.mxu0 %v637_v36 }
  0x25   :  { %420 = vmatprep.mubr.bf16.mxu1 %v639_v37 }
  0x2b   :  { %372 = vmatmul.mubr.bf16.gmra.mrb[4].mxu0 %v641_v38 }
  0x2c   :  { %421 = vmatmul.mubr.bf16.gmra.mrb[4].mxu1 %v642_v39 }
  0xf6   :  { %v559_v40 = vpop.f32.mrb[0].mxu0 }
  0xf7   :  { %v587_v41 = vpop.f32.mrb[0].mxu1  ;;  %v560_v42 = vpop.f32.mrb[1].mxu0 }
  0xf8   :  { %v561_v43 = vadd.f32 %v560_v42, %v559_v40  ;;  %v588_v44 = vpop.f32.mrb[1].mxu1  ;;  %v562_v45 = vpop.f32.mrb[2].mxu0 }
  0xf9   :  { %v589_v46 = vadd.f32 %v588_v44, %v587_v41  ;;  %v590_v47 = vpop.f32.mrb[2].mxu1  ;;  %v563_v48 = vpop.f32.mrb[3].mxu0 }
  0xfa   :  { %v564_v50 = vadd.f32 %v563_v48, %v562_v45  ;;  %v591_v51 = vpop.f32.mrb[3].mxu1 }
  0xfb   :  { %v415_v52 = vadd.f32 %v589_v46, %v561_v43  ;;  %v592_v53 = vadd.f32 %v591_v51, %v590_v47 }
  0xfd   :  { %v451_v54 = vadd.f32 %v523_v49, %v415_v52  ;;  %v418_v55 = vadd.f32 %v592_v53, %v564_v50 }
  0xfe   :  { %v565_v56 = vpop.f32.mrb[4].mxu0 }
  0xff   :  { %v452_v57 = vadd.f32 %v523_v49, %v418_v55  ;;  %v593_v58 = vpop.f32.mrb[4].mxu1  ;;  %v566_v59 = vpop.f32.mrb[5].mxu0  ;;  %v455_v63 = vmax.f32 %v451_v54, 0.0 }
 0x100   :  { %v567_v60 = vadd.f32 %v566_v59, %v565_v56  ;;  %v594_v61 = vpop.f32.mrb[5].mxu1  ;;  %v568_v62 = vpop.f32.mrb[6].mxu0 }
 0x101   :  { %v456_v0 = vmax.f32 %v452_v57, 0.0  ;;  %v595_v1 = vadd.f32 %v594_v61, %v593_v58  ;;  %v596_v2 = vpop.f32.mrb[6].mxu1  ;;  %v569_v3 = vpop.f32.mrb[7].mxu0 }
 0x102   :  { %v570_v4 = vadd.f32 %v569_v3, %v568_v62  ;;  %v597_v5 = vpop.f32.mrb[7].mxu1 }
 0x103   :  { %v535_v6 = vpack.c.bf16 %v456_v0, %v455_v63  ;;  %v423_v7 = vadd.f32 %v595_v1, %v567_v60  ;;  %v598_v8 = vadd.f32 %v597_v5, %v596_v2 }
 0x105   :  { %536 = vst [vmem:[%s795_s3] sm:$0xff] %v535_v6   ;;  %v453_v9 = vadd.f32 %v523_v49, %v423_v7  ;;  %v426_v10 = vadd.f32 %v598_v8, %v570_v4 }
 0x107   :  { %v454_v11 = vadd.f32 %v523_v49, %v426_v10  ;;  %v457_v12 = vmax.f32 %v453_v9, 0.0 }
 0x109   :  { %v458_v13 = vmax.f32 %v454_v11, 0.0 }
 0x10b   :  { %v540_v14 = vpack.c.bf16 %v458_v13, %v457_v12 }
 0x10d   :  { %542 = vst [vmem:[%s795_s3 + $0x8] sm:$0xff] %v540_v14  }

// kernel: isuei_d2_forward.13
= control target key start
LH: loop header
LB: loop body
LE: loop exit
PB: predicated region body
PF: predicated region fallthrough
CT: control target
= control target key end

     0   :  { %s639_s1 = inlined_call_operand.vmem [shape: bf16[512,128], index: 1, kind: input, shape index: {}]   ;;  %s640_s0 = inlined_call_operand.vmem [shape: bf16[8,512], index: 0, kind: input, shape index: {}]   ;;  %s641_s2 = inlined_call_operand.vmem [shape: f32[1,128], index: 2, kind: input, shape index: {}]   ;;  %s642_s3 = inlined_call_operand.vmem [shape: bf16[8,128], index: 3, kind: output, shape index: {}]  }
   0x1   :  { %v475_v0 = vld [vmem:[%s639_s1 + $0x40] sm:$0xff]   ;;  %v479_v4 = vld [vmem:[%s639_s1 + $0x48] sm:$0xff]   ;;  %v483_v8 = vld [vmem:[%s639_s1 + $0x50] sm:$0xff]  }
   0x2   :  { %v476_v1 = vld [vmem:[%s639_s1 + $0xc0] sm:$0xff]   ;;  %431 = vmatprep.subr.bf16.mxu0 %v475_v0  ;;  %v480_v5 = vld [vmem:[%s639_s1 + $0xc8] sm:$0xff]   ;;  %v484_v9 = vld [vmem:[%s639_s1 + $0xd0] sm:$0xff]  }
   0x3   :  { %v477_v2 = vld [vmem:[%s639_s1] sm:$0xff]   ;;  %453 = vmatprep.subr.bf16.mxu1 %v476_v1  ;;  %v481_v6 = vld [vmem:[%s639_s1 + $0x8] sm:$0xff]   ;;  %v485_v10 = vld [vmem:[%s639_s1 + $0x10] sm:$0xff]  }
   0x4   :  { %v478_v3 = vld [vmem:[%s639_s1 + $0x80] sm:$0xff]   ;;  %432 = vmatpush3.bf16.msra.mxu0 %v477_v2  ;;  %v482_v7 = vld [vmem:[%s639_s1 + $0x88] sm:$0xff]   ;;  %v486_v11 = vld [vmem:[%s639_s1 + $0x90] sm:$0xff]  }
   0x5   :  { %454 = vmatpush3.bf16.msra.mxu1 %v478_v3  ;;  %433 = vmatprep.subr.bf16.mxu0 %v479_v4  ;;  %v487_v12 = vld [vmem:[%s639_s1 + $0x58] sm:$0xff]   ;;  %v491_v16 = vld [vmem:[%s639_s1 + $0x60] sm:$0xff]   ;;  %v495_v20 = vld [vmem:[%s639_s1 + $0x68] sm:$0xff]  }
   0x6   :  { %455 = vmatprep.subr.bf16.mxu1 %v480_v5  ;;  %v488_v13 = vld [vmem:[%s639_s1 + $0xd8] sm:$0xff]   ;;  %v492_v17 = vld [vmem:[%s639_s1 + $0xe0] sm:$0xff]   ;;  %v496_v21 = vld [vmem:[%s639_s1 + $0xe8] sm:$0xff]  }
   0x7   :  { %v489_v14 = vld [vmem:[%s639_s1 + $0x18] sm:$0xff]   ;;  %v493_v18 = vld [vmem:[%s639_s1 + $0x20] sm:$0xff]   ;;  %v497_v22 = vld [vmem:[%s639_s1 + $0x28] sm:$0xff]  }
   0x8   :  { %434 = vmatpush3.bf16.msra.mxu0 %v481_v6  ;;  %v490_v15 = vld [vmem:[%s639_s1 + $0x98] sm:$0xff]   ;;  %v494_v19 = vld [vmem:[%s639_s1 + $0xa0] sm:$0xff]   ;;  %v498_v23 = vld [vmem:[%s639_s1 + $0xa8] sm:$0xff]  }
   0x9   :  { %456 = vmatpush3.bf16.msra.mxu1 %v482_v7  ;;  %435 = vmatprep.subr.bf16.mxu0 %v483_v8  ;;  %v499_v24 = vld [vmem:[%s639_s1 + $0x70] sm:$0xff]   ;;  %v503_v28 = vld [vmem:[%s639_s1 + $0x78] sm:$0xff]   ;;  %v21_v32 = vld [vmem:[%s640_s0] sm:$0xff] }
   0xa   :  { %457 = vmatprep.subr.bf16.mxu1 %v484_v9  ;;  %v500_v25 = vld [vmem:[%s639_s1 + $0xf0] sm:$0xff]   ;;  %v504_v29 = vld [vmem:[%s639_s1 + $0xf8] sm:$0xff]   ;;  %v22_v33 = vld [vmem:[%s640_s0 + $0x8] sm:$0xff]  ;;  %v394_v34 = vcombine.low %v21_v32, %v21_v32  ;;  %v395_v35 = vcombine.high %v21_v32, %v21_v32 }
   0xb   :  { %v501_v26 = vld [vmem:[%s639_s1 + $0x30] sm:$0xff]   ;;  %v505_v30 = vld [vmem:[%s639_s1 + $0x38] sm:$0xff]   ;;  %v396_v36 = vcombine.low %v22_v33, %v22_v33  ;;  %v397_v37 = vcombine.high %v22_v33, %v22_v33  ;;  %v430_v46 = vld [vmem:[%s641_s2] ss:$0 sm:$0xff] }
   0xc   :  { %436 = vmatpush3.bf16.msra.mxu0 %v485_v10  ;;  %v502_v27 = vld [vmem:[%s639_s1 + $0xb0] sm:$0xff]   ;;  %v506_v31 = vld [vmem:[%s639_s1 + $0xb8] sm:$0xff]   ;;  %325 = vmatprep.mubr.bf16.mxu0 %v395_v35 }
   0xd   :  { %458 = vmatpush3.bf16.msra.mxu1 %v486_v11  ;;  %437 = vmatprep.subr.bf16.mxu0 %v487_v12 }
   0xe   :  { %459 = vmatprep.subr.bf16.mxu1 %v488_v13  ;;  %365 = vmatprep.mubr.bf16.mxu1 %v397_v37 }
  0x10   :  { %438 = vmatpush3.bf16.msra.mxu0 %v489_v14 }
  0x11   :  { %460 = vmatpush3.bf16.msra.mxu1 %v490_v15  ;;  %439 = vmatprep.subr.bf16.mxu0 %v491_v16 }
  0x12   :  { %461 = vmatprep.subr.bf16.mxu1 %v492_v17 }
  0x14   :  { %440 = vmatpush3.bf16.msra.mxu0 %v493_v18 }
  0x15   :  { %462 = vmatpush3.bf16.msra.mxu1 %v494_v19  ;;  %441 = vmatprep.subr.bf16.mxu0 %v495_v20 }
  0x16   :  { %463 = vmatprep.subr.bf16.mxu1 %v496_v21 }
  0x18   :  { %442 = vmatpush3.bf16.msra.mxu0 %v497_v22 }
  0x19   :  { %464 = vmatpush3.bf16.msra.mxu1 %v498_v23  ;;  %443 = vmatprep.subr.bf16.mxu0 %v499_v24 }
  0x1a   :  { %465 = vmatprep.subr.bf16.mxu1 %v500_v25 }
  0x1c   :  { %444 = vmatpush3.bf16.msra.mxu0 %v501_v26 }
  0x1d   :  { %466 = vmatpush3.bf16.msra.mxu1 %v502_v27  ;;  %445 = vmatprep.subr.bf16.mxu0 %v503_v28 }
  0x1e   :  { %467 = vmatprep.subr.bf16.mxu1 %v504_v29 }
  0x20   :  { %446 = vmatpush3.bf16.msra.mxu0 %v505_v30 }
  0x21   :  { %468 = vmatpush3.bf16.msra.mxu1 %v506_v31 }
  0x23   :  { %326 = vmatmul.mubr.bf16.vlgmr.msra.gmra.mrb[0].mxu0 %v394_v34 }
  0x24   :  { %366 = vmatmul.mubr.bf16.vlgmr.msra.gmra.mrb[0].mxu1 %v396_v36 }
  0xf6   :  { %v447_v38 = vpop.f32.mrb[0].mxu0 }
  0xf7   :  { %v469_v39 = vpop.f32.mrb[0].mxu1  ;;  %v448_v40 = vpop.f32.mrb[1].mxu0 }
  0xf8   :  { %v470_v41 = vpop.f32.mrb[1].mxu1  ;;  %v449_v42 = vadd.f32 %v448_v40, %v447_v38  ;;  %v450_v44 = vpop.f32.mrb[2].mxu0 }
  0xf9   :  { %v471_v43 = vadd.f32 %v470_v41, %v469_v39  ;;  %v472_v45 = vpop.f32.mrb[2].mxu1  ;;  %v451_v47 = vpop.f32.mrb[3].mxu0 }
  0xfa   :  { %v473_v48 = vpop.f32.mrb[3].mxu1 }
  0xfb   :  { %v368_v49 = vadd.f32 %v471_v43, %v449_v42 }
  0xfd   :  { %v386_v50 = vadd.f32 %v430_v46, %v368_v49 }
  0xff   :  { %v387_v51 = vmax.f32 %v386_v50, 0.0 }
 0x101   :  { %v388_v52 = vpack.c.bf16 %v387_v51, %v387_v51 }
 0x103   :  { %389 = vst [vmem:[%s642_s3] sm:$0xf] %v388_v52 }

// kernel: isuei_d2_forward.17
= control target key start
LH: loop header
LB: loop body
LE: loop exit
PB: predicated region body
PF: predicated region fallthrough
CT: control target
= control target key end

     0   :  { %s1180_s12 = smov 0   ;;  %s1182_s13 = smov 0   ;;  %s1330_s0 = inlined_call_operand.vmem [shape: bf16[512,128], index: 0, kind: input, shape index: {}]   ;;  %s1331_s1 = inlined_call_operand.vmem [shape: bf16[128,128], index: 1, kind: input, shape index: {}]   ;;  %s1332_s2 = inlined_call_operand.vmem [shape: f32[1,128], index: 2, kind: input, shape index: {}]   ;;  %s1333_s3 = inlined_call_operand.vmem [shape: f32[512,128], index: 3, kind: output, shape index: {}]  }
   0x1   :  { %s1184_s14 = smov 0  }
   0x2 LB: > { %s32_s15 = sadd.s32 1, %s1154_s13  ;;  %p968_p0 = scmp.ge.s32.totalorder %s1158_s14, 1  ;;  %s1158_s14 = sphi %s1184_s14, %s13_s14   ;;  %s1154_s13 = sphi %s1182_s13, %s1335_s13   ;;  %s1150_s12 = sphi %s1180_s12, %s1334_s12  }
   0x3   : > { %p34_p1 = scmp.ge.s32.totalorder %s32_s15, 2  ;;  %p188_p2 = scmp.lt.s32.totalorder %s1158_s14, 3 }
   0x5   : > { %s1337_s15 = smov (%p34_p1, %s32_s15), 0  ;;  %p189_p3 = pnand %p968_p0, %p188_p2 }
   0x6   : > { %v1112_v0 = vld [vmem:[%s1331_s1] sm:$0xff] (!%p189_p3)   ;;  %s969_s18 = sshll.u32 (!%p189_p3), %s1150_s12, 5  ;;  %v1113_v1 = vld [vmem:[%s1331_s1 + $0x8] sm:$0xff] (!%p189_p3)   ;;  %v1114_v2 = vld [vmem:[%s1331_s1 + $0x10] sm:$0xff] (!%p189_p3)  }
   0x7   : > { %192 = sbr.rel (%p189_p3) target bundleno = 281 (0x119), region = 32  ;;  %p230_p4 = scmp.lt.s32.totalorder (!%p189_p3), %s969_s18, 63  ;;  %1024 = vmatprep.subr.bf16.mxu0 (!%p189_p3), %v1112_v0  ;;  %1072 = vmatprep.subr.bf16.mxu1 (!%p189_p3), %v1112_v0  ;;  %v1115_v3 = vld [vmem:[%s1331_s1 + $0x18] sm:$0xff] (!%p189_p3)   ;;  %v1116_v6 = vld [vmem:[%s1331_s1 + $0x20] sm:$0xff] (!%p189_p3)   ;;  %v1117_v7 = vld [vmem:[%s1331_s1 + $0x28] sm:$0xff] (!%p189_p3)  }
   0x8   : > { %1025 = vmatpush3.bf16.msra.mxu0 (!%p189_p3), %v1112_v0  ;;  %1080 = vmatpush3.bf16.msra.mxu1 (!%p189_p3), %v1112_v0  ;;  %v1118_v8 = vld [vmem:[%s1331_s1 + $0x30] sm:$0xff] (!%p189_p3)   ;;  %v1119_v9 = vld [vmem:[%s1331_s1 + $0x38] sm:$0xff] (!%p189_p3)   ;;  %v1250_v24 = vld [vmem:[%s1332_s2] ss:$0 sm:$0xff] (!%p189_p3) }
   0x9   : > { %1026 = vmatprep.subr.bf16.mxu0 (!%p189_p3), %v1113_v1  ;;  %1073 = vmatprep.subr.bf16.mxu1 (!%p189_p3), %v1113_v1 }
   0xc   : > { %1027 = vmatpush3.bf16.msra.mxu0 (!%p189_p3), %v1113_v1  ;;  %1081 = vmatpush3.bf16.msra.mxu1 (!%p189_p3), %v1113_v1 }
   0xd   : > { %1028 = vmatprep.subr.bf16.mxu0 (!%p189_p3), %v1114_v2  ;;  %1074 = vmatprep.subr.bf16.mxu1 (!%p189_p3), %v1114_v2 }
   0xe   : > { %s1339_s18 = smov (!%p230_p4, %s969_s18), 63 }
   0xf   : > { %s970_s23 = sshll.u32 %s1339_s18, 2  ;;  %s972_s10 = sshll.u32 %s1339_s18, 3 }
  0x10   : > { %s1213_s26 = scalar_lea.vmem %s1330_s0, %s970_s23  ;;  %1029 = vmatpush3.bf16.msra.mxu0 %v1114_v2  ;;  %1082 = vmatpush3.bf16.msra.mxu1 %v1114_v2  ;;  %s1255_s19 = scalar_lea.vmem %s1333_s3, %s972_s10 }
  0x11   : > { %v1120_v4 = vld [vmem:[%s1213_s26] sm:$0xff]   ;;  %1030 = vmatprep.subr.bf16.mxu0 %v1115_v3  ;;  %1075 = vmatprep.subr.bf16.mxu1 %v1115_v3  ;;  %v1122_v10 = vld [vmem:[%s1213_s26 + $0x8] sm:$0xff]   ;;  %v1124_v12 = vld [vmem:[%s1213_s26 + $0x10] sm:$0xff]  }
  0x12   : > { %v1121_v5 = vld [vmem:[%s1213_s26 + $0x40] sm:$0xff]   ;;  %1040 = vmatprep.mubr.bf16.mxu0 %v1120_v4  ;;  %v1123_v11 = vld [vmem:[%s1213_s26 + $0x48] sm:$0xff]   ;;  %v1125_v13 = vld [vmem:[%s1213_s26 + $0x50] sm:$0xff]  }
  0x13   : > { %1056 = vmatprep.mubr.bf16.mxu1 %v1121_v5  ;;  %v1126_v14 = vld [vmem:[%s1213_s26 + $0x18] sm:$0xff]   ;;  %v1128_v16 = vld [vmem:[%s1213_s26 + $0x20] sm:$0xff]   ;;  %v1130_v18 = vld [vmem:[%s1213_s26 + $0x28] sm:$0xff]  }
  0x14   : > { %1031 = vmatpush3.bf16.msra.mxu0 %v1115_v3  ;;  %1083 = vmatpush3.bf16.msra.mxu1 %v1115_v3  ;;  %v1127_v15 = vld [vmem:[%s1213_s26 + $0x58] sm:$0xff]   ;;  %v1129_v17 = vld [vmem:[%s1213_s26 + $0x60] sm:$0xff]   ;;  %v1131_v19 = vld [vmem:[%s1213_s26 + $0x68] sm:$0xff]  }
  0x15   : > { %1032 = vmatprep.subr.bf16.mxu0 %v1116_v6  ;;  %1076 = vmatprep.subr.bf16.mxu1 %v1116_v6  ;;  %v1132_v20 = vld [vmem:[%s1213_s26 + $0x30] sm:$0xff]   ;;  %v1134_v22 = vld [vmem:[%s1213_s26 + $0x38] sm:$0xff]  }
  0x16   : > { %v1133_v21 = vld [vmem:[%s1213_s26 + $0x70] sm:$0xff]   ;;  %v1135_v23 = vld [vmem:[%s1213_s26 + $0x78] sm:$0xff]  }
  0x18   : > { %1033 = vmatpush3.bf16.msra.mxu0 %v1116_v6  ;;  %1084 = vmatpush3.bf16.msra.mxu1 %v1116_v6 }
  0x19   : > { %1034 = vmatprep.subr.bf16.mxu0 %v1117_v7  ;;  %1077 = vmatprep.subr.bf16.mxu1 %v1117_v7 }
  0x1c   : > { %1035 = vmatpush3.bf16.msra.mxu0 %v1117_v7  ;;  %1085 = vmatpush3.bf16.msra.mxu1 %v1117_v7 }
  0x1d   : > { %1036 = vmatprep.subr.bf16.mxu0 %v1118_v8  ;;  %1078 = vmatprep.subr.bf16.mxu1 %v1118_v8 }
  0x20   : > { %1037 = vmatpush3.bf16.msra.mxu0 %v1118_v8  ;;  %1086 = vmatpush3.bf16.msra.mxu1 %v1118_v8 }
  0x21   : > { %1038 = vmatprep.subr.bf16.mxu0 %v1119_v9  ;;  %1079 = vmatprep.subr.bf16.mxu1 %v1119_v9 }
  0x24   : > { %1039 = vmatpush3.bf16.msra.mxu0 %v1119_v9  ;;  %1087 = vmatpush3.bf16.msra.mxu1 %v1119_v9 }
  0x27   : > { %1041 = vmatmul.mubr.bf16.vlgmr.msra.gmra.mrb[0].mxu0 %v1122_v10  ;;  %1057 = vmatmul.mubr.bf16.vlgmr.msra.gmra.mrb[0].mxu1 %v1123_v11 }
  0x28   : > { %1044 = vmatprep.mubr.bf16.mxu0 %v1124_v12  ;;  %1060 = vmatprep.mubr.bf16.mxu1 %v1125_v13 }
  0x2f   : > { %1045 = vmatmul.mubr.bf16.gmra.mrb[4].mxu0 %v1126_v14  ;;  %1061 = vmatmul.mubr.bf16.gmra.mrb[4].mxu1 %v1127_v15 }
  0x30   : > { %1048 = vmatprep.mubr.bf16.mxu0 %v1128_v16  ;;  %1064 = vmatprep.mubr.bf16.mxu1 %v1129_v17 }
  0x37   : > { %1049 = vmatmul.mubr.bf16.gmra.mrb[8].mxu0 %v1130_v18  ;;  %1065 = vmatmul.mubr.bf16.gmra.mrb[8].mxu1 %v1131_v19 }
  0x38   : > { %1052 = vmatprep.mubr.bf16.mxu0 %v1132_v20  ;;  %1068 = vmatprep.mubr.bf16.mxu1 %v1133_v21 }
  0x3f   : > { %1053 = vmatmul.mubr.bf16.gmra.mrb[12].mxu0 %v1134_v22  ;;  %1069 = vmatmul.mubr.bf16.gmra.mrb[12].mxu1 %v1135_v23 }
  0xfa   : > { %v1042_v25 = vpop.f32.mrb[0].mxu0  ;;  %v1058_v26 = vpop.f32.mrb[0].mxu1 }
  0xfb   : > { %v789_v27 = vadd.f32 %v1042_v25, %v1250_v24  ;;  %v805_v28 = vadd.f32 %v1058_v26, %v1250_v24  ;;  %v554_v29 = vpop.f32.mrb[1].mxu0  ;;  %v618_v30 = vpop.f32.mrb[1].mxu1 }
  0xfc   : > { %v787_v31 = vadd.f32 %v1250_v24, %v554_v29  ;;  %v803_v32 = vadd.f32 %v1250_v24, %v618_v30  ;;  %v1043_v33 = vpop.f32.mrb[2].mxu0  ;;  %v1059_v34 = vpop.f32.mrb[2].mxu1 }
  0xfd   : > { %821 = vst [vmem:[%s1255_s19 + $0x10] sm:$0xff] %v789_v27  ;;  %837 = vst [vmem:[%s1255_s19 + $0x90] sm:$0xff] %v805_v28  ;;  %v790_v35 = vadd.f32 %v1043_v33, %v1250_v24  ;;  %v806_v36 = vadd.f32 %v1059_v34, %v1250_v24  ;;  %v557_v37 = vpop.f32.mrb[3].mxu0  ;;  %v621_v38 = vpop.f32.mrb[3].mxu1 }
  0xfe   : > { %819 = vst [vmem:[%s1255_s19] sm:$0xff] %v787_v31  ;;  %835 = vst [vmem:[%s1255_s19 + $0x80] sm:$0xff] %v803_v32  ;;  %v788_v39 = vadd.f32 %v1250_v24, %v557_v37  ;;  %v804_v40 = vadd.f32 %v1250_v24, %v621_v38 }
  0xff   : > { %822 = vst [vmem:[%s1255_s19 + $0x18] sm:$0xff] %v790_v35  ;;  %838 = vst [vmem:[%s1255_s19 + $0x98] sm:$0xff] %v806_v36 }
 0x100   : > { %820 = vst [vmem:[%s1255_s19 + $0x8] sm:$0xff] %v788_v39  ;;  %836 = vst [vmem:[%s1255_s19 + $0x88] sm:$0xff] %v804_v40 }
 0x102   : > { %v1046_v41 = vpop.f32.mrb[4].mxu0  ;;  %v1062_v42 = vpop.f32.mrb[4].mxu1 }
 0x103   : > { %v793_v43 = vadd.f32 %v1046_v41, %v1250_v24  ;;  %v809_v44 = vadd.f32 %v1062_v42, %v1250_v24  ;;  %v570_v45 = vpop.f32.mrb[5].mxu0  ;;  %v634_v46 = vpop.f32.mrb[5].mxu1 }
 0x104   : > { %v791_v47 = vadd.f32 %v1250_v24, %v570_v45  ;;  %v807_v48 = vadd.f32 %v1250_v24, %v634_v46  ;;  %v1047_v49 = vpop.f32.mrb[6].mxu0  ;;  %v1063_v50 = vpop.f32.mrb[6].mxu1 }
 0x105   : > { %825 = vst [vmem:[%s1255_s19 + $0x30] sm:$0xff] %v793_v43  ;;  %841 = vst [vmem:[%s1255_s19 + $0xb0] sm:$0xff] %v809_v44  ;;  %v794_v51 = vadd.f32 %v1047_v49, %v1250_v24  ;;  %v810_v52 = vadd.f32 %v1063_v50, %v1250_v24  ;;  %v573_v53 = vpop.f32.mrb[7].mxu0  ;;  %v637_v54 = vpop.f32.mrb[7].mxu1 }
 0x106   : > { %823 = vst [vmem:[%s1255_s19 + $0x20] sm:$0xff] %v791_v47  ;;  %839 = vst [vmem:[%s1255_s19 + $0xa0] sm:$0xff] %v807_v48  ;;  %v792_v55 = vadd.f32 %v1250_v24, %v573_v53  ;;  %v808_v56 = vadd.f32 %v1250_v24, %v637_v54 }
 0x107   : > { %826 = vst [vmem:[%s1255_s19 + $0x38] sm:$0xff] %v794_v51  ;;  %842 = vst [vmem:[%s1255_s19 + $0xb8] sm:$0xff] %v810_v52 }
 0x108   : > { %824 = vst [vmem:[%s1255_s19 + $0x28] sm:$0xff] %v792_v55  ;;  %840 = vst [vmem:[%s1255_s19 + $0xa8] sm:$0xff] %v808_v56 }
 0x10a   : > { %v1050_v57 = vpop.f32.mrb[8].mxu0  ;;  %v1066_v58 = vpop.f32.mrb[8].mxu1 }
 0x10b   : > { %v797_v59 = vadd.f32 %v1050_v57, %v1250_v24  ;;  %v813_v60 = vadd.f32 %v1066_v58, %v1250_v24  ;;  %v586_v61 = vpop.f32.mrb[9].mxu0  ;;  %v650_v62 = vpop.f32.mrb[9].mxu1 }
 0x10c   : > { %v795_v63 = vadd.f32 %v1250_v24, %v586_v61  ;;  %v811_v0 = vadd.f32 %v1250_v24, %v650_v62  ;;  %v1051_v1 = vpop.f32.mrb[10].mxu0  ;;  %v1067_v2 = vpop.f32.mrb[10].mxu1 }
 0x10d   : > { %829 = vst [vmem:[%s1255_s19 + $0x50] sm:$0xff] %v797_v59  ;;  %845 = vst [vmem:[%s1255_s19 + $0xd0] sm:$0xff] %v813_v60  ;;  %v798_v3 = vadd.f32 %v1051_v1, %v1250_v24  ;;  %v814_v4 = vadd.f32 %v1067_v2, %v1250_v24  ;;  %v589_v5 = vpop.f32.mrb[11].mxu0  ;;  %v653_v6 = vpop.f32.mrb[11].mxu1 }
 0x10e   : > { %827 = vst [vmem:[%s1255_s19 + $0x40] sm:$0xff] %v795_v63  ;;  %843 = vst [vmem:[%s1255_s19 + $0xc0] sm:$0xff] %v811_v0  ;;  %v796_v7 = vadd.f32 %v1250_v24, %v589_v5  ;;  %v812_v8 = vadd.f32 %v1250_v24, %v653_v6 }
 0x10f   : > { %830 = vst [vmem:[%s1255_s19 + $0x58] sm:$0xff] %v798_v3  ;;  %846 = vst [vmem:[%s1255_s19 + $0xd8] sm:$0xff] %v814_v4 }
 0x110   : > { %828 = vst [vmem:[%s1255_s19 + $0x48] sm:$0xff] %v796_v7  ;;  %844 = vst [vmem:[%s1255_s19 + $0xc8] sm:$0xff] %v812_v8 }
 0x112   : > { %v1054_v9 = vpop.f32.mrb[12].mxu0  ;;  %v1070_v10 = vpop.f32.mrb[12].mxu1 }
 0x113   : > { %v801_v11 = vadd.f32 %v1054_v9, %v1250_v24  ;;  %v817_v12 = vadd.f32 %v1070_v10, %v1250_v24  ;;  %v602_v13 = vpop.f32.mrb[13].mxu0  ;;  %v666_v14 = vpop.f32.mrb[13].mxu1 }
 0x114   : > { %v799_v15 = vadd.f32 %v1250_v24, %v602_v13  ;;  %v815_v16 = vadd.f32 %v1250_v24, %v666_v14  ;;  %v1055_v17 = vpop.f32.mrb[14].mxu0  ;;  %v1071_v18 = vpop.f32.mrb[14].mxu1 }
 0x115   : > { %833 = vst [vmem:[%s1255_s19 + $0x70] sm:$0xff] %v801_v11  ;;  %849 = vst [vmem:[%s1255_s19 + $0xf0] sm:$0xff] %v817_v12  ;;  %v802_v19 = vadd.f32 %v1055_v17, %v1250_v24  ;;  %v818_v20 = vadd.f32 %v1071_v18, %v1250_v24  ;;  %v605_v21 = vpop.f32.mrb[15].mxu0  ;;  %v669_v22 = vpop.f32.mrb[15].mxu1 }
 0x116   : > { %831 = vst [vmem:[%s1255_s19 + $0x60] sm:$0xff] %v799_v15  ;;  %847 = vst [vmem:[%s1255_s19 + $0xe0] sm:$0xff] %v815_v16  ;;  %v800_v23 = vadd.f32 %v1250_v24, %v605_v21  ;;  %v816_v25 = vadd.f32 %v1250_v24, %v669_v22 }
 0x117   : > { %834 = vst [vmem:[%s1255_s19 + $0x78] sm:$0xff] %v802_v19  ;;  %850 = vst [vmem:[%s1255_s19 + $0xf8] sm:$0xff] %v818_v20 }
 0x118   : > { %832 = vst [vmem:[%s1255_s19 + $0x68] sm:$0xff] %v800_v23  ;;  %848 = vst [vmem:[%s1255_s19 + $0xe8] sm:$0xff] %v816_v25 }
 0x119 PF: > { %s13_s14 = sadd.s32 1, %s1158_s14   ;;  %s1334_s12 = smov %s1154_s13 }
 0x11a   : > { %p10_p5 = scmp.ge.s32.totalorder %s13_s14, 4   ;;  %s1335_s13 = smov %s1337_s15 }
 0x11c   :  { %12 = sbr.rel (!%p10_p5) target bundleno = 2 (0x2), region = 76 }

// kernel: isuei_d2_forward.18
= control target key start
LH: loop header
LB: loop body
LE: loop exit
PB: predicated region body
PF: predicated region fallthrough
CT: control target
= control target key end

     0   :  { %s551_s1 = inlined_call_operand.vmem [shape: bf16[128,128], index: 1, kind: input, shape index: {}]   ;;  %s552_s0 = inlined_call_operand.vmem [shape: bf16[128,128], index: 0, kind: input, shape index: {}]   ;;  %s553_s2 = inlined_call_operand.vmem [shape: f32[128,128], index: 2, kind: output, shape index: {}]  }
   0x1   :  { %v424_v0 = vld [vmem:[%s551_s1] sm:$0xff]   ;;  %v425_v1 = vld [vmem:[%s551_s1 + $0x8] sm:$0xff]   ;;  %v426_v2 = vld [vmem:[%s551_s1 + $0x10] sm:$0xff]  }
   0x2   :  { %376 = vmatprep.subr.bf16.mxu0 %v424_v0  ;;  %408 = vmatprep.subr.bf16.mxu1 %v424_v0  ;;  %v427_v3 = vld [vmem:[%s551_s1 + $0x18] sm:$0xff]   ;;  %v432_v4 = vld [vmem:[%s552_s0] sm:$0xff]   ;;  %v429_v7 = vld [vmem:[%s551_s1 + $0x28] sm:$0xff]  }
   0x3   :  { %377 = vmatpush3.bf16.msra.mxu0 %v424_v0  ;;  %416 = vmatpush3.bf16.msra.mxu1 %v424_v0  ;;  %v433_v5 = vld [vmem:[%s552_s0 + $0x20] sm:$0xff]   ;;  %v430_v8 = vld [vmem:[%s551_s1 + $0x30] sm:$0xff]   ;;  %v431_v9 = vld [vmem:[%s551_s1 + $0x38] sm:$0xff]  }
   0x4   :  { %378 = vmatprep.subr.bf16.mxu0 %v425_v1  ;;  %409 = vmatprep.subr.bf16.mxu1 %v425_v1  ;;  %v428_v6 = vld [vmem:[%s551_s1 + $0x20] sm:$0xff]   ;;  %v434_v10 = vld [vmem:[%s552_s0 + $0x8] sm:$0xff]   ;;  %v436_v12 = vld [vmem:[%s552_s0 + $0x10] sm:$0xff]  }
   0x5   :  { %392 = vmatprep.mubr.bf16.mxu0 %v432_v4  ;;  %400 = vmatprep.mubr.bf16.mxu1 %v433_v5  ;;  %v435_v11 = vld [vmem:[%s552_s0 + $0x28] sm:$0xff]   ;;  %v437_v13 = vld [vmem:[%s552_s0 + $0x30] sm:$0xff]   ;;  %v438_v14 = vld [vmem:[%s552_s0 + $0x18] sm:$0xff]  }
   0x6   :  { %v439_v15 = vld [vmem:[%s552_s0 + $0x38] sm:$0xff]  }
   0x7   :  { %379 = vmatpush3.bf16.msra.mxu0 %v425_v1  ;;  %417 = vmatpush3.bf16.msra.mxu1 %v425_v1 }
   0x8   :  { %380 = vmatprep.subr.bf16.mxu0 %v426_v2  ;;  %410 = vmatprep.subr.bf16.mxu1 %v426_v2 }
   0xb   :  { %381 = vmatpush3.bf16.msra.mxu0 %v426_v2  ;;  %418 = vmatpush3.bf16.msra.mxu1 %v426_v2 }
   0xc   :  { %382 = vmatprep.subr.bf16.mxu0 %v427_v3  ;;  %411 = vmatprep.subr.bf16.mxu1 %v427_v3 }
   0xf   :  { %383 = vmatpush3.bf16.msra.mxu0 %v427_v3  ;;  %419 = vmatpush3.bf16.msra.mxu1 %v427_v3 }
  0x10   :  { %384 = vmatprep.subr.bf16.mxu0 %v428_v6  ;;  %412 = vmatprep.subr.bf16.mxu1 %v428_v6 }
  0x13   :  { %385 = vmatpush3.bf16.msra.mxu0 %v428_v6  ;;  %420 = vmatpush3.bf16.msra.mxu1 %v428_v6 }
  0x14   :  { %386 = vmatprep.subr.bf16.mxu0 %v429_v7  ;;  %413 = vmatprep.subr.bf16.mxu1 %v429_v7 }
  0x17   :  { %387 = vmatpush3.bf16.msra.mxu0 %v429_v7  ;;  %421 = vmatpush3.bf16.msra.mxu1 %v429_v7 }
  0x18   :  { %388 = vmatprep.subr.bf16.mxu0 %v430_v8  ;;  %414 = vmatprep.subr.bf16.mxu1 %v430_v8 }
  0x1b   :  { %389 = vmatpush3.bf16.msra.mxu0 %v430_v8  ;;  %422 = vmatpush3.bf16.msra.mxu1 %v430_v8 }
  0x1c   :  { %390 = vmatprep.subr.bf16.mxu0 %v431_v9  ;;  %415 = vmatprep.subr.bf16.mxu1 %v431_v9 }
  0x1f   :  { %391 = vmatpush3.bf16.msra.mxu0 %v431_v9  ;;  %423 = vmatpush3.bf16.msra.mxu1 %v431_v9 }
  0x22   :  { %393 = vmatmul.mubr.bf16.vlgmr.msra.gmra.mrb[0].mxu0 %v434_v10  ;;  %401 = vmatmul.mubr.bf16.vlgmr.msra.gmra.mrb[0].mxu1 %v435_v11 }
  0x23   :  { %396 = vmatprep.mubr.bf16.mxu0 %v436_v12  ;;  %404 = vmatprep.mubr.bf16.mxu1 %v437_v13 }
  0x2a   :  { %397 = vmatmul.mubr.bf16.gmra.mrb[4].mxu0 %v438_v14  ;;  %405 = vmatmul.mubr.bf16.gmra.mrb[4].mxu1 %v439_v15 }
  0xf5   :  { %v394_v16 = vpop.f32.mrb[0].mxu0  ;;  %v402_v17 = vpop.f32.mrb[0].mxu1 }
  0xf6   :  { %326 = vst [vmem:[%s553_s2 + $0x10] sm:$0xff] %v394_v16  ;;  %334 = vst [vmem:[%s553_s2 + $0x50] sm:$0xff] %v402_v17  ;;  %v210_v18 = vpop.f32.mrb[1].mxu0  ;;  %v242_v19 = vpop.f32.mrb[1].mxu1 }
  0xf7   :  { %324 = vst [vmem:[%s553_s2] sm:$0xff] %v210_v18  ;;  %332 = vst [vmem:[%s553_s2 + $0x40] sm:$0xff] %v242_v19  ;;  %v395_v20 = vpop.f32.mrb[2].mxu0  ;;  %v403_v21 = vpop.f32.mrb[2].mxu1 }
  0xf8   :  { %327 = vst [vmem:[%s553_s2 + $0x18] sm:$0xff] %v395_v20  ;;  %335 = vst [vmem:[%s553_s2 + $0x58] sm:$0xff] %v403_v21  ;;  %v213_v22 = vpop.f32.mrb[3].mxu0  ;;  %v245_v23 = vpop.f32.mrb[3].mxu1 }
  0xf9   :  { %325 = vst [vmem:[%s553_s2 + $0x8] sm:$0xff] %v213_v22  ;;  %333 = vst [vmem:[%s553_s2 + $0x48] sm:$0xff] %v245_v23 }
  0xfd   :  { %v398_v24 = vpop.f32.mrb[4].mxu0  ;;  %v406_v25 = vpop.f32.mrb[4].mxu1 }
  0xfe   :  { %330 = vst [vmem:[%s553_s2 + $0x30] sm:$0xff] %v398_v24  ;;  %338 = vst [vmem:[%s553_s2 + $0x70] sm:$0xff] %v406_v25  ;;  %v226_v26 = vpop.f32.mrb[5].mxu0  ;;  %v258_v27 = vpop.f32.mrb[5].mxu1 }
  0xff   :  { %328 = vst [vmem:[%s553_s2 + $0x20] sm:$0xff] %v226_v26  ;;  %336 = vst [vmem:[%s553_s2 + $0x60] sm:$0xff] %v258_v27  ;;  %v399_v28 = vpop.f32.mrb[6].mxu0  ;;  %v407_v29 = vpop.f32.mrb[6].mxu1 }
 0x100   :  { %331 = vst [vmem:[%s553_s2 + $0x38] sm:$0xff] %v399_v28  ;;  %339 = vst [vmem:[%s553_s2 + $0x78] sm:$0xff] %v407_v29  ;;  %v229_v30 = vpop.f32.mrb[7].mxu0  ;;  %v261_v31 = vpop.f32.mrb[7].mxu1 }
 0x101   :  { %329 = vst [vmem:[%s553_s2 + $0x28] sm:$0xff] %v229_v30  ;;  %337 = vst [vmem:[%s553_s2 + $0x68] sm:$0xff] %v261_v31 }

// kernel: isuei_d2_forward.15
= control target key start
LH: loop header
LB: loop body
LE: loop exit
PB: predicated region body
PF: predicated region fallthrough
CT: control target
= control target key end

     0   :  { %s11041_s27 = smov 0   ;;  %s13780_s0 = inlined_call_operand.vmem [shape: bf16[3,2,18,16,640], index: 0, kind: input, shape index: {}]   ;;  %s13781_s1 = inlined_call_operand.vmem [shape: bf16[3,3,640,128], index: 1, kind: input, shape index: {}]   ;;  %s13782_s2 = inlined_call_operand.vmem [shape: f32[1,128], index: 2, kind: input, shape index: {}]   ;;  %s13783_s3 = inlined_call_operand.vmem [shape: f32[128,16], index: 3, kind: input, shape index: {}]   ;;  %s13784_s4 = inlined_call_operand.vmem [shape: f32[1,16], index: 4, kind: input, shape index: {}]   ;;  %s13785_s5 = inlined_call_operand.vmem [shape: f32[16,128], index: 5, kind: input, shape index: {}]   ;;  %s13786_s6 = inlined_call_operand.vmem [shape: f32[1,128], index: 6, kind: input, shape index: {}]   ;;  %s13787_s7 = inlined_call_operand.vmem [shape: f32[2,16,16,128], index: 7, kind: output, shape index: {0}]   ;;  %s13788_s8 = inlined_call_operand.vmem [shape: f32[2,128], index: 8, kind: output, shape index: {1}]  }
   0x1 LB: > { %s11047_s28 = sadd.s32 4294967295, %s10988_s27   ;;  %p8354_p0 = scmp.ge.s32.totalorder %s10988_s27, 1  ;;  %s10988_s27 = sphi %s11041_s27, %s19_s27  }
   0x2   : > { %p265_p1 = scmp.lt.s32.totalorder %s10988_s27, 4 }
   0x4   : > { %p266_p2 = pnand %p8354_p0, %p265_p1 }
   0x6   : > { %269 = sbr.rel (%p266_p2) target bundleno = 1863 (0x747), region = 48 }
   0xd   : > { %p299_p3 = scmp.lt.s32.totalorder %s11047_s28, 2  ;;  %p8357_p4 = scmp.ne.s32.totalorder %s11047_s28, 0 }
   0xe   : > { %v10990_v0 = vmov (!%p8357_p4), 0.0  }
   0xf   : > { %s300_s29 = scalar_select %p299_p3, %s11047_s28, 2 }
  0x10   : > { %313 = sbr.rel (%p8357_p4) target bundleno = 48 (0x30), region = 52  ;;  %314 = vst [vmem:[#allocation2] sm:$0xff] (!%p8357_p4), %v10990_v0  ;;  %315 = vst [vmem:[#allocation2 + $0x8] sm:$0xff] (!%p8357_p4), %v10990_v0 }
  0x11   : > { %s10331_s30 = smul.u32 1440, %s300_s29  ;;  %316 = vst [vmem:[#allocation2 + $0x10] sm:$0xff] (!%p8357_p4), %v10990_v0  ;;  %317 = vst [vmem:[#allocation2 + $0x18] sm:$0xff] (!%p8357_p4), %v10990_v0 }
  0x12   : > { %s10332_s9 = smul.u32 960, %s300_s29  ;;  %318 = vst [vmem:[#allocation2 + $0x20] sm:$0xff] (!%p8357_p4), %v10990_v0  ;;  %319 = vst [vmem:[#allocation2 + $0x28] sm:$0xff] (!%p8357_p4), %v10990_v0 }
  0x13   : > { %s11056_s12 = scalar_lea.vmem %s13780_s0, %s10331_s30  ;;  %320 = vst [vmem:[#allocation2 + $0x30] sm:$0xff] (!%p8357_p4), %v10990_v0  ;;  %321 = vst [vmem:[#allocation2 + $0x38] sm:$0xff] (!%p8357_p4), %v10990_v0 }
  0x14   : > { %s11061_s15 = scalar_lea.vmem %s13781_s1, %s10332_s9  ;;  %322 = vst [vmem:[#allocation2 + $0x40] sm:$0xff] (!%p8357_p4), %v10990_v0  ;;  %323 = vst [vmem:[#allocation2 + $0x48] sm:$0xff] (!%p8357_p4), %v10990_v0 }
  0x15   : > { %324 = vst [vmem:[#allocation2 + $0x50] sm:$0xff] (!%p8357_p4), %v10990_v0  ;;  %325 = vst [vmem:[#allocation2 + $0x58] sm:$0xff] (!%p8357_p4), %v10990_v0 }
  0x16   : > { %326 = vst [vmem:[#allocation2 + $0x60] sm:$0xff] (!%p8357_p4), %v10990_v0  ;;  %327 = vst [vmem:[#allocation2 + $0x68] sm:$0xff] (!%p8357_p4), %v10990_v0 }
  0x17   : > { %328 = vst [vmem:[#allocation2 + $0x70] sm:$0xff] %v10990_v0  ;;  %329 = vst [vmem:[#allocation2 + $0x78] sm:$0xff] %v10990_v0 }
  0x18   : > { %330 = vst [vmem:[#allocation2 + $0x80] sm:$0xff] %v10990_v0  ;;  %331 = vst [vmem:[#allocation2 + $0x88] sm:$0xff] %v10990_v0 }
  0x19   : > { %332 = vst [vmem:[#allocation2 + $0x90] sm:$0xff] %v10990_v0  ;;  %333 = vst [vmem:[#allocation2 + $0x98] sm:$0xff] %v10990_v0 }
  0x1a   : > { %334 = vst [vmem:[#allocation2 + $0xa0] sm:$0xff] %v10990_v0  ;;  %335 = vst [vmem:[#allocation2 + $0xa8] sm:$0xff] %v10990_v0 }
  0x1b   : > { %336 = vst [vmem:[#allocation2 + $0xb0] sm:$0xff] %v10990_v0  ;;  %337 = vst [vmem:[#allocation2 + $0xb8] sm:$0xff] %v10990_v0 }
  0x1c   : > { %338 = vst [vmem:[#allocation2 + $0xc0] sm:$0xff] %v10990_v0  ;;  %339 = vst [vmem:[#allocation2 + $0xc8] sm:$0xff] %v10990_v0 }
  0x1d   : > { %340 = vst [vmem:[#allocation2 + $0xd0] sm:$0xff] %v10990_v0  ;;  %341 = vst [vmem:[#allocation2 + $0xd8] sm:$0xff] %v10990_v0 }
  0x1e   : > { %342 = vst [vmem:[#allocation2 + $0xe0] sm:$0xff] %v10990_v0  ;;  %343 = vst [vmem:[#allocation2 + $0xe8] sm:$0xff] %v10990_v0 }
  0x1f   : > { %344 = vst [vmem:[#allocation2 + $0xf0] sm:$0xff] %v10990_v0  ;;  %345 = vst [vmem:[#allocation2 + $0xf8] sm:$0xff] %v10990_v0 }
  0x20   : > { %346 = vst [vmem:[#allocation2 + $0x100] sm:$0xff] %v10990_v0  ;;  %347 = vst [vmem:[#allocation2 + $0x108] sm:$0xff] %v10990_v0 }
  0x21   : > { %348 = vst [vmem:[#allocation2 + $0x110] sm:$0xff] %v10990_v0  ;;  %349 = vst [vmem:[#allocation2 + $0x118] sm:$0xff] %v10990_v0 }
  0x22   : > { %350 = vst [vmem:[#allocation2 + $0x120] sm:$0xff] %v10990_v0  ;;  %351 = vst [vmem:[#allocation2 + $0x128] sm:$0xff] %v10990_v0 }
  0x23   : > { %352 = vst [vmem:[#allocation2 + $0x130] sm:$0xff] %v10990_v0  ;;  %353 = vst [vmem:[#allocation2 + $0x138] sm:$0xff] %v10990_v0 }
  0x24   : > { %354 = vst [vmem:[#allocation2 + $0x140] sm:$0xff] %v10990_v0  ;;  %355 = vst [vmem:[#allocation2 + $0x148] sm:$0xff] %v10990_v0 }
  0x25   : > { %356 = vst [vmem:[#allocation2 + $0x150] sm:$0xff] %v10990_v0  ;;  %357 = vst [vmem:[#allocation2 + $0x158] sm:$0xff] %v10990_v0 }
  0x26   : > { %358 = vst [vmem:[#allocation2 + $0x160] sm:$0xff] %v10990_v0  ;;  %359 = vst [vmem:[#allocation2 + $0x168] sm:$0xff] %v10990_v0 }
  0x27   : > { %360 = vst [vmem:[#allocation2 + $0x170] sm:$0xff] %v10990_v0  ;;  %361 = vst [vmem:[#allocation2 + $0x178] sm:$0xff] %v10990_v0 }
  0x28   : > { %362 = vst [vmem:[#allocation2 + $0x180] sm:$0xff] %v10990_v0  ;;  %363 = vst [vmem:[#allocation2 + $0x188] sm:$0xff] %v10990_v0 }
  0x29   : > { %364 = vst [vmem:[#allocation2 + $0x190] sm:$0xff] %v10990_v0  ;;  %365 = vst [vmem:[#allocation2 + $0x198] sm:$0xff] %v10990_v0 }
  0x2a   : > { %366 = vst [vmem:[#allocation2 + $0x1a0] sm:$0xff] %v10990_v0  ;;  %367 = vst [vmem:[#allocation2 + $0x1a8] sm:$0xff] %v10990_v0 }
  0x2b   : > { %368 = vst [vmem:[#allocation2 + $0x1b0] sm:$0xff] %v10990_v0  ;;  %369 = vst [vmem:[#allocation2 + $0x1b8] sm:$0xff] %v10990_v0 }
  0x2c   : > { %370 = vst [vmem:[#allocation2 + $0x1c0] sm:$0xff] %v10990_v0  ;;  %371 = vst [vmem:[#allocation2 + $0x1c8] sm:$0xff] %v10990_v0 }
  0x2d   : > { %372 = vst [vmem:[#allocation2 + $0x1d0] sm:$0xff] %v10990_v0  ;;  %373 = vst [vmem:[#allocation2 + $0x1d8] sm:$0xff] %v10990_v0 }
  0x2e   : > { %374 = vst [vmem:[#allocation2 + $0x1e0] sm:$0xff] %v10990_v0  ;;  %375 = vst [vmem:[#allocation2 + $0x1e8] sm:$0xff] %v10990_v0 }
  0x2f   : > { %376 = vst [vmem:[#allocation2 + $0x1f0] sm:$0xff] %v10990_v0  ;;  %377 = vst [vmem:[#allocation2 + $0x1f8] sm:$0xff] %v10990_v0 }
  0x30 PF: > { %v10347_v1 = vld [vmem:[%s11061_s15] sm:$0xff]   ;;  %v13789_v2 = vmov 0   ;;  %v10349_v4 = vld [vmem:[%s11061_s15 + $0x8] sm:$0xff]   ;;  %v10352_v6 = vld [vmem:[%s11061_s15 + $0x110] sm:$0xff]   ;;  %p9502_p5 = scmp.ne.s32.totalorder %s11047_s28, 2 }
  0x31   : > { %1786 = vmatprep.subr.bf16.mxu0 %v13789_v2  ;;  %v10348_v3 = vld [vmem:[%s11061_s15 + $0x100] sm:$0xff]   ;;  %v10350_v5 = vld [vmem:[%s11061_s15 + $0x108] sm:$0xff]   ;;  %v10351_v7 = vld [vmem:[%s11061_s15 + $0x10] sm:$0xff]  }
  0x32   : > { %1787 = vmatpush1.bf16.msra.mxu0 %v10347_v1  ;;  %9650 = vmatprep.subr.bf16.mxu1 %v10348_v3  ;;  %v10354_v8 = vld [vmem:[%s11061_s15 + $0x118] sm:$0xff]   ;;  %v10356_v10 = vld [vmem:[%s11061_s15 + $0x120] sm:$0xff]   ;;  %v10358_v13 = vld [vmem:[%s11061_s15 + $0x128] sm:$0xff]  }
  0x33   : > { %1788 = vmatprep.subr.bf16.mxu0 %v13789_v2  ;;  %9651 = vmatpush3.bf16.msra.mxu1 %v10348_v3  ;;  %v10353_v9 = vld [vmem:[%s11061_s15 + $0x18] sm:$0xff]   ;;  %v10355_v11 = vld [vmem:[%s11061_s15 + $0x20] sm:$0xff]   ;;  %v10357_v14 = vld [vmem:[%s11061_s15 + $0x28] sm:$0xff]  }
  0x34   : > { %9652 = vmatprep.subr.bf16.mxu1 %v10350_v5  ;;  %v10363_v12 = vld [vmem:[%s11056_s12 + $0x10] ss:$20 sps:$4 sm:$0xff]   ;;  %v10362_v17 = vld [vmem:[%s11061_s15 + $0x138] sm:$0xff]   ;;  %v10368_v22 = vld [vmem:[%s11056_s12 + $0x60] ss:$20 sps:$4 sm:$0xff]  }
  0x35   : > { %9666 = vmatprep.mubr.bf16.mxu1 %v10363_v12  ;;  %v10360_v15 = vld [vmem:[%s11061_s15 + $0x130] sm:$0xff]   ;;  %v10361_v18 = vld [vmem:[%s11061_s15 + $0x38] sm:$0xff]   ;;  %v10364_v19 = vld [vmem:[%s11061_s15 + $0x40] sm:$0xff]  }
  0x36   : > { %1789 = vmatpush1.bf16.msra.mxu0 %v10349_v4  ;;  %v10359_v16 = vld [vmem:[%s11061_s15 + $0x30] sm:$0xff]   ;;  %v10365_v20 = vld [vmem:[%s11056_s12 + $0x38] ss:$20 sps:$4 sm:$0xff]   ;;  %v10366_v21 = vld [vmem:[%s11061_s15 + $0x140] sm:$0xff]  }
  0x37   : > { %1790 = vmatprep.subr.bf16.mxu0 %v13789_v2  ;;  %9653 = vmatpush3.bf16.msra.mxu1 %v10350_v5  ;;  %v10367_v23 = vld [vmem:[%s11061_s15 + $0x48] sm:$0xff]   ;;  %v10369_v24 = vld [vmem:[%s11061_s15 + $0x50] sm:$0xff]   ;;  %v10385_v26 = vld [vmem:[%s11056_s12 + $0x4] ss:$20 sps:$4 sm:$0xff]  }
  0x38   : > { %9654 = vmatprep.subr.bf16.mxu1 %v10352_v6  ;;  %v10371_v25 = vld [vmem:[%s11061_s15 + $0x148] sm:$0xff]   ;;  %v10373_v28 = vld [vmem:[%s11056_s12 + $0xb0] ss:$20 sps:$4 sm:$0xff]   ;;  %1818 = vmatprep.mubr.bf16.mxu0 %v10385_v26  ;;  %v10372_v30 = vld [vmem:[%s11061_s15 + $0x58] sm:$0xff]  }
  0x39   : > { %v10370_v27 = vld [vmem:[%s11056_s12 + $0x88] ss:$20 sps:$4 sm:$0xff]   ;;  %v10376_v29 = vld [vmem:[%s11061_s15 + $0x150] sm:$0xff]   ;;  %v10374_v32 = vld [vmem:[%s11061_s15 + $0x60] sm:$0xff]  }
  0x3a   : > { %1791 = vmatpush1.bf16.msra.mxu0 %v10351_v7  ;;  %v10381_v31 = vld [vmem:[%s11061_s15 + $0x158] sm:$0xff]   ;;  %v10378_v34 = vld [vmem:[%s11056_s12 + $0x100] ss:$20 sps:$4 sm:$0xff]   ;;  %v10377_v36 = vld [vmem:[%s11061_s15 + $0x68] sm:$0xff]  }
  0x3b   : > { %1792 = vmatprep.subr.bf16.mxu0 %v13789_v2  ;;  %9655 = vmatpush3.bf16.msra.mxu1 %v10352_v6  ;;  %v10375_v33 = vld [vmem:[%s11056_s12 + $0xd8] ss:$20 sps:$4 sm:$0xff]   ;;  %v10389_v35 = vld [vmem:[%s11061_s15 + $0x160] sm:$0xff]   ;;  %v10379_v38 = vld [vmem:[%s11061_s15 + $0x70] sm:$0xff]  }
  0x3c   : > { %9656 = vmatprep.subr.bf16.mxu1 %v10354_v8  ;;  %v10395_v37 = vld [vmem:[%s11061_s15 + $0x168] sm:$0xff]   ;;  %v10386_v40 = vld [vmem:[%s11056_s12 + $0x150] ss:$20 sps:$4 sm:$0xff]   ;;  %v10382_v42 = vld [vmem:[%s11061_s15 + $0x78] sm:$0xff]  }
  0x3d   : > { %v10380_v39 = vld [vmem:[%s11056_s12 + $0x128] ss:$20 sps:$4 sm:$0xff]   ;;  %v10402_v41 = vld [vmem:[%s11061_s15 + $0x170] sm:$0xff]   ;;  %v10387_v45 = vld [vmem:[%s11061_s15 + $0x80] sm:$0xff]  }
  0x3e   : > { %1793 = vmatpush1.bf16.msra.mxu0 %v10353_v9  ;;  %v10383_v43 = vld [vmem:[%s11056_s12] ss:$20 sps:$4 sm:$0xff]   ;;  %v10408_v44 = vld [vmem:[%s11061_s15 + $0x178] sm:$0xff]   ;;  %v10400_v50 = vld [vmem:[%s11061_s15 + $0x88] sm:$0xff]  }
  0x3f   : > { %1794 = vmatprep.subr.bf16.mxu0 %v13789_v2  ;;  %9657 = vmatpush3.bf16.msra.mxu1 %v10354_v8  ;;  %v10388_v46 = vld [vmem:[%s11056_s12 + $0x178] ss:$20 sps:$4 sm:$0xff]   ;;  %v10393_v48 = vld [vmem:[%s11056_s12 + $0x1a0] ss:$20 sps:$4 sm:$0xff]   ;;  %v10392_v51 = vld [vmem:[%s11056_s12 + $0x28] ss:$20 sps:$4 sm:$0xff]  }
  0x40   : > { %9658 = vmatprep.subr.bf16.mxu1 %v10356_v10  ;;  %v10390_v47 = vld [vmem:[%s11056_s12 + $0x2c] ss:$20 sps:$4 sm:$0xff]   ;;  %v10396_v53 = vld [vmem:[%s11056_s12 + $0x54] ss:$20 sps:$4 sm:$0xff]   ;;  %v10399_v56 = vld [vmem:[%s11056_s12 + $0x1f0] ss:$20 sps:$4 sm:$0xff]  }
  0x41   : > { %v10415_v49 = vld [vmem:[%s11061_s15 + $0x180] sm:$0xff]   ;;  %v10421_v52 = vld [vmem:[%s11061_s15 + $0x188] sm:$0xff]   ;;  %v10413_v54 = vld [vmem:[%s11061_s15 + $0x90] sm:$0xff]  }
  0x42   : > { %1795 = vmatpush1.bf16.msra.mxu0 %v10355_v11  ;;  %v10394_v55 = vld [vmem:[%s11056_s12 + $0x1c8] ss:$20 sps:$4 sm:$0xff]   ;;  %v10428_v57 = vld [vmem:[%s11061_s15 + $0x190] sm:$0xff]   ;;  %v10401_v61 = vld [vmem:[%s11056_s12 + $0x218] ss:$20 sps:$4 sm:$0xff]  }
  0x43   : > { %1796 = vmatprep.subr.bf16.mxu0 %v13789_v2  ;;  %9659 = vmatpush3.bf16.msra.mxu1 %v10356_v10  ;;  %v10426_v58 = vld [vmem:[%s11061_s15 + $0x98] sm:$0xff]   ;;  %v10398_v59 = vld [vmem:[%s11056_s12 + $0x50] ss:$20 sps:$4 sm:$0xff]   ;;  %v10406_v0 = vld [vmem:[%s11056_s12 + $0x240] ss:$20 sps:$4 sm:$0xff]  }
  0x44   : > { %9660 = vmatprep.subr.bf16.mxu1 %v10358_v13  ;;  %v10434_v60 = vld [vmem:[%s11061_s15 + $0x198] sm:$0xff]   ;;  %v10439_v63 = vld [vmem:[%s11061_s15 + $0xa0] sm:$0xff]   ;;  %v10447_v3 = vld [vmem:[%s11061_s15 + $0x1a8] sm:$0xff]  }
  0x45   : > { %v10403_v62 = vld [vmem:[%s11056_s12 + $0x7c] ss:$20 sps:$4 sm:$0xff]   ;;  %v10441_v1 = vld [vmem:[%s11061_s15 + $0x1a0] sm:$0xff]   ;;  %v10405_v4 = vld [vmem:[%s11056_s12 + $0x78] ss:$20 sps:$4 sm:$0xff]  }
  0x46   : > { %1797 = vmatpush1.bf16.msra.mxu0 %v10357_v14  ;;  %v10407_v5 = vld [vmem:[%s11056_s12 + $0x268] ss:$20 sps:$4 sm:$0xff]   ;;  %v10409_v6 = vld [vmem:[%s11056_s12 + $0xa4] ss:$20 sps:$4 sm:$0xff]   ;;  %v10412_v8 = vld [vmem:[%s11056_s12 + $0x2e0] ss:$20 sps:$4 sm:$0xff]  }
  0x47   : > { %1798 = vmatprep.subr.bf16.mxu0 %v13789_v2  ;;  %9661 = vmatpush3.bf16.msra.mxu1 %v10358_v13  ;;  %v10452_v7 = vld [vmem:[%s11061_s15 + $0xa8] sm:$0xff]   ;;  %v10454_v9 = vld [vmem:[%s11061_s15 + $0x1b0] sm:$0xff]   ;;  %v10460_v11 = vld [vmem:[%s11061_s15 + $0x1b8] sm:$0xff]  }
  0x48   : > { %9662 = vmatprep.subr.bf16.mxu1 %v10360_v15  ;;  %v10411_v10 = vld [vmem:[%s11056_s12 + $0xa0] ss:$20 sps:$4 sm:$0xff]   ;;  %v10414_v13 = vld [vmem:[%s11056_s12 + $0x308] ss:$20 sps:$4 sm:$0xff]   ;;  %v10419_v14 = vld [vmem:[%s11056_s12 + $0x330] ss:$20 sps:$4 sm:$0xff]  }
  0x49   : > { %v10416_v12 = vld [vmem:[%s11056_s12 + $0xcc] ss:$20 sps:$4 sm:$0xff]  }
  0x4a   : > { %1799 = vmatpush1.bf16.msra.mxu0 %v10359_v16  ;;  %v10418_v16 = vld [vmem:[%s11056_s12 + $0xc8] ss:$20 sps:$4 sm:$0xff]   ;;  %v10431_v26 = vld [vmem:[%s11056_s12 + $0x118] ss:$20 sps:$4 sm:$0xff]  }
  0x4b   : > { %1800 = vmatprep.subr.bf16.mxu0 %v13789_v2  ;;  %9663 = vmatpush3.bf16.msra.mxu1 %v10360_v15  ;;  %v10467_v15 = vld [vmem:[%s11061_s15 + $0xb0] sm:$0xff]  }
  0x4c   : > { %9664 = vmatprep.subr.bf16.mxu1 %v10362_v17 }
  0x4e   : > { %1801 = vmatpush1.bf16.msra.mxu0 %v10361_v18  ;;  %v10420_v18 = vld [vmem:[%s11056_s12 + $0x358] ss:$20 sps:$4 sm:$0xff]  }
  0x4f   : > { %1802 = vmatprep.subr.bf16.mxu0 %v13789_v2  ;;  %9665 = vmatpush3.bf16.msra.mxu1 %v10362_v17  ;;  %v10422_v17 = vld [vmem:[%s11056_s12 + $0xf4] ss:$20 sps:$4 sm:$0xff]  }
  0x50   : > { %9959 = vmatprep.subr.bf16.mxu1 %v13789_v2 }
  0x52   : > { %1803 = vmatpush1.bf16.msra.mxu0 %v10364_v19  ;;  %9667 = vmatmul.mubr.bf16.vlgmr.msra.gmra.mrb[0].mxu1 %v10365_v20  ;;  %v10425_v19 = vld [vmem:[%s11056_s12 + $0x380] ss:$20 sps:$4 sm:$0xff]   ;;  %v10482_v20 = vld [vmem:[%s11061_s15 + $0xb8] sm:$0xff]  }
  0x53   : > { %1804 = vmatprep.subr.bf16.mxu0 %v13789_v2  ;;  %9975 = vmatpush1.bf16.msra.mxu1 %v10366_v21  ;;  %v10424_v21 = vld [vmem:[%s11056_s12 + $0xf0] ss:$20 sps:$4 sm:$0xff]  }
  0x54   : > { %9670 = vmatprep.mubr.bf16.mxu1 %v10368_v22  ;;  %9960 = vmatprep.subr.bf16.mxu1 %v13789_v2  ;;  %v10429_v22 = vld [vmem:[%s11056_s12 + $0x11c] ss:$20 sps:$4 sm:$0xff]  }
  0x56   : > { %1805 = vmatpush1.bf16.msra.mxu0 %v10367_v23  ;;  %v10427_v23 = vld [vmem:[%s11056_s12 + $0x3a8] ss:$20 sps:$4 sm:$0xff]  }
  0x57   : > { %1806 = vmatprep.subr.bf16.mxu0 %v13789_v2  ;;  %9976 = vmatpush1.bf16.msra.mxu1 %v10371_v25  ;;  %v10499_v25 = vld [vmem:[%s11061_s15 + $0xc0] sm:$0xff]  }
  0x58   : > { %9961 = vmatprep.subr.bf16.mxu1 %v13789_v2 }
  0x5a   : > { %1807 = vmatpush1.bf16.msra.mxu0 %v10369_v24  ;;  %9671 = vmatmul.mubr.bf16.gmra.mrb[4].mxu1 %v10370_v27  ;;  %v10432_v24 = vld [vmem:[%s11056_s12 + $0x3d0] ss:$20 sps:$4 sm:$0xff]  }
  0x5b   : > { %1808 = vmatprep.subr.bf16.mxu0 %v13789_v2  ;;  %9674 = vmatprep.mubr.bf16.mxu1 %v10373_v28  ;;  %v10435_v27 = vld [vmem:[%s11056_s12 + $0x144] ss:$20 sps:$4 sm:$0xff]  }
  0x5c   : > { %9977 = vmatpush1.bf16.msra.mxu1 %v10376_v29  ;;  %v10433_v28 = vld [vmem:[%s11056_s12 + $0x3f8] ss:$20 sps:$4 sm:$0xff]   ;;  %v10438_v29 = vld [vmem:[%s11056_s12 + $0x420] ss:$20 sps:$4 sm:$0xff]  }
  0x5d   : > { %9962 = vmatprep.subr.bf16.mxu1 %v13789_v2 }
  0x5e   : > { %1809 = vmatpush1.bf16.msra.mxu0 %v10372_v30  ;;  %v10437_v30 = vld [vmem:[%s11056_s12 + $0x140] ss:$20 sps:$4 sm:$0xff]  }
  0x5f   : > { %1810 = vmatprep.subr.bf16.mxu0 %v13789_v2 }
  0x60   : > { %9978 = vmatpush1.bf16.msra.mxu1 %v10381_v31  ;;  %v10442_v31 = vld [vmem:[%s11056_s12 + $0x16c] ss:$20 sps:$4 sm:$0xff]  }
  0x61   : > { %9963 = vmatprep.subr.bf16.mxu1 %v13789_v2 }
  0x62   : > { %1811 = vmatpush1.bf16.msra.mxu0 %v10374_v32  ;;  %9675 = vmatmul.mubr.bf16.gmra.mrb[8].mxu1 %v10375_v33  ;;  %v10515_v32 = vld [vmem:[%s11061_s15 + $0xc8] sm:$0xff]  }
  0x63   : > { %1812 = vmatprep.subr.bf16.mxu0 %v13789_v2  ;;  %9678 = vmatprep.mubr.bf16.mxu1 %v10378_v34  ;;  %v10440_v33 = vld [vmem:[%s11056_s12 + $0x448] ss:$20 sps:$4 sm:$0xff]   ;;  %v10445_v34 = vld [vmem:[%s11056_s12 + $0x470] ss:$20 sps:$4 sm:$0xff]  }
  0x64   : > { %9979 = vmatpush1.bf16.msra.mxu1 %v10389_v35  ;;  %v10444_v35 = vld [vmem:[%s11056_s12 + $0x168] ss:$20 sps:$4 sm:$0xff]  }
  0x65   : > { %9964 = vmatprep.subr.bf16.mxu1 %v13789_v2 }
  0x66   : > { %1813 = vmatpush1.bf16.msra.mxu0 %v10377_v36  ;;  %v10448_v36 = vld [vmem:[%s11056_s12 + $0x194] ss:$20 sps:$4 sm:$0xff]  }
  0x67   : > { %1814 = vmatprep.subr.bf16.mxu0 %v13789_v2 }
  0x68   : > { %9980 = vmatpush1.bf16.msra.mxu1 %v10395_v37  ;;  %v10446_v37 = vld [vmem:[%s11056_s12 + $0x498] ss:$20 sps:$4 sm:$0xff]  }
  0x69   : > { %9965 = vmatprep.subr.bf16.mxu1 %v13789_v2 }
  0x6a   : > { %1815 = vmatpush1.bf16.msra.mxu0 %v10379_v38  ;;  %9679 = vmatmul.mubr.bf16.gmra.mrb[12].mxu1 %v10380_v39  ;;  %v10531_v38 = vld [vmem:[%s11061_s15 + $0xd0] sm:$0xff]  }
  0x6b   : > { %1816 = vmatprep.subr.bf16.mxu0 %v13789_v2  ;;  %9682 = vmatprep.mubr.bf16.mxu1 %v10386_v40  ;;  %v10451_v39 = vld [vmem:[%s11056_s12 + $0x4c0] ss:$20 sps:$4 sm:$0xff]   ;;  %v10450_v40 = vld [vmem:[%s11056_s12 + $0x190] ss:$20 sps:$4 sm:$0xff]  }
  0x6c   : > { %9981 = vmatpush1.bf16.msra.mxu1 %v10402_v41  ;;  %v10455_v41 = vld [vmem:[%s11056_s12 + $0x1bc] ss:$20 sps:$4 sm:$0xff]  }
  0x6d   : > { %9966 = vmatprep.subr.bf16.mxu1 %v13789_v2 }
  0x6e   : > { %1817 = vmatpush1.bf16.msra.mxu0 %v10382_v42  ;;  %v10453_v42 = vld [vmem:[%s11056_s12 + $0x4e8] ss:$20 sps:$4 sm:$0xff]  }
  0x6f   : > { %2075 = vmatprep.subr.bf16.mxu0 %v13789_v2 }
  0x70   : > { %9982 = vmatpush1.bf16.msra.mxu1 %v10408_v44  ;;  %v10548_v44 = vld [vmem:[%s11061_s15 + $0xd8] sm:$0xff]  }
  0x71   : > { %1819 = vmatmul.mubr.bf16.vlgmr.msra.gmra.mrb[0].mxu0 %v10383_v43  ;;  %9967 = vmatprep.subr.bf16.mxu1 %v13789_v2  ;;  %v10458_v43 = vld [vmem:[%s11056_s12 + $0x510] ss:$20 sps:$4 sm:$0xff]  }
  0x72   : > { %2076 = vmatpush1.bf16.msra.mxu0 %v10387_v45  ;;  %1826 = vmatprep.mubr.bf16.mxu0 %v10390_v47  ;;  %v10457_v45 = vld [vmem:[%s11056_s12 + $0x1b8] ss:$20 sps:$4 sm:$0xff]  }
  0x73   : > { %9683 = vmatmul.mubr.bf16.gmra.mrb[16].mxu1 %v10388_v46  ;;  %2077 = vmatprep.subr.bf16.mxu0 %v13789_v2  ;;  %v10555_v46 = vld [vmem:[%s11061_s15 + $0xe0] sm:$0xff]  }
  0x74   : > { %9686 = vmatprep.mubr.bf16.mxu1 %v10393_v48  ;;  %9983 = vmatpush1.bf16.msra.mxu1 %v10415_v49  ;;  %v10461_v47 = vld [vmem:[%s11056_s12 + $0x1e4] ss:$20 sps:$4 sm:$0xff]   ;;  %v11285_v49 = vld [vmem:[%s11056_s12 + $0x3ec] ss:$20 sps:$4 sm:$0xff]  }
  0x75   : > { %9968 = vmatprep.subr.bf16.mxu1 %v13789_v2  ;;  %v10459_v48 = vld [vmem:[%s11056_s12 + $0x538] ss:$20 sps:$4 sm:$0xff]  }
  0x76   : > { %2078 = vmatpush1.bf16.msra.mxu0 %v10400_v50  ;;  %v10563_v50 = vld [vmem:[%s11061_s15 + $0xe8] sm:$0xff]  }
  0x77   : > { %2079 = vmatprep.subr.bf16.mxu0 %v13789_v2 }
  0x78   : > { %9984 = vmatpush1.bf16.msra.mxu1 %v10421_v52  ;;  %v10469_v52 = vld [vmem:[%s11056_s12 + $0x20c] ss:$20 sps:$4 sm:$0xff]  }
  0x79   : > { %1827 = vmatmul.mubr.bf16.gmra.mrb[4].mxu0 %v10392_v51  ;;  %9969 = vmatprep.subr.bf16.mxu1 %v13789_v2  ;;  %v10463_v51 = vld [vmem:[%s11056_s12 + $0x1e0] ss:$20 sps:$4 sm:$0xff]  }
  0x7a   : > { %1834 = vmatprep.mubr.bf16.mxu0 %v10396_v53  ;;  %2080 = vmatpush1.bf16.msra.mxu0 %v10413_v54  ;;  %v11293_v53 = vld [vmem:[%s11056_s12 + $0x3e8] ss:$20 sps:$4 sm:$0xff]   ;;  %v10468_v54 = vld [vmem:[%s11061_s15 + $0x1c0] sm:$0xff]  }
  0x7b   : > { %9687 = vmatmul.mubr.bf16.gmra.mrb[20].mxu1 %v10394_v55  ;;  %2081 = vmatprep.subr.bf16.mxu0 %v13789_v2  ;;  %v11298_v55 = vld [vmem:[%s11056_s12 + $0x414] ss:$20 sps:$4 sm:$0xff]  }
  0x7c   : > { %9690 = vmatprep.mubr.bf16.mxu1 %v10399_v56  ;;  %9985 = vmatpush1.bf16.msra.mxu1 %v10428_v57  ;;  %v10571_v56 = vld [vmem:[%s11061_s15 + $0xf0] sm:$0xff]   ;;  %v10471_v57 = vld [vmem:[%s11061_s15 + $0x1c8] sm:$0xff]  }
  0x7d   : > { %9970 = vmatprep.subr.bf16.mxu1 %v13789_v2 }
  0x7e   : > { %2082 = vmatpush1.bf16.msra.mxu0 %v10426_v58  ;;  %v10472_v58 = vld [vmem:[%s11056_s12 + $0x208] ss:$20 sps:$4 sm:$0xff]  }
  0x7f   : > { %2083 = vmatprep.subr.bf16.mxu0 %v13789_v2 }
  0x80   : > { %9986 = vmatpush1.bf16.msra.mxu1 %v10434_v60  ;;  %v11308_v60 = vld [vmem:[%s11056_s12 + $0x410] ss:$20 sps:$4 sm:$0xff]  }
  0x81   : > { %1835 = vmatmul.mubr.bf16.gmra.mrb[8].mxu0 %v10398_v59  ;;  %9971 = vmatprep.subr.bf16.mxu1 %v13789_v2  ;;  %v10477_v59 = vld [vmem:[%s11056_s12 + $0x234] ss:$20 sps:$4 sm:$0xff]  }
  0x82   : > { %1842 = vmatprep.mubr.bf16.mxu0 %v10403_v62  ;;  %2084 = vmatpush1.bf16.msra.mxu0 %v10439_v63  ;;  %v11313_v62 = vld [vmem:[%s11056_s12 + $0x43c] ss:$20 sps:$4 sm:$0xff]  }
  0x83   : > { %9691 = vmatmul.mubr.bf16.gmra.mrb[24].mxu1 %v10401_v61  ;;  %2085 = vmatprep.subr.bf16.mxu0 %v13789_v2  ;;  %v10476_v61 = vld [vmem:[%s11061_s15 + $0x1d0] sm:$0xff]   ;;  %v10484_v63 = vld [vmem:[%s11061_s15 + $0x1d8] sm:$0xff]  }
  0x84   : > { %9694 = vmatprep.mubr.bf16.mxu1 %v10406_v0  ;;  %9987 = vmatpush1.bf16.msra.mxu1 %v10441_v1  ;;  %v10479_v0 = vld [vmem:[%s11056_s12 + $0x230] ss:$20 sps:$4 sm:$0xff]  }
  0x85   : > { %9972 = vmatprep.subr.bf16.mxu1 %v13789_v2  ;;  %v10486_v1 = vld [vmem:[%s11056_s12 + $0x25c] ss:$20 sps:$4 sm:$0xff]  }
  0x86   : > { %2086 = vmatpush1.bf16.msra.mxu0 %v10452_v7  ;;  %v10488_v7 = vld [vmem:[%s11056_s12 + $0x258] ss:$20 sps:$4 sm:$0xff]  }
  0x87   : > { %2087 = vmatprep.subr.bf16.mxu0 %v13789_v2 }
  0x88   : > { %9988 = vmatpush1.bf16.msra.mxu1 %v10447_v3  ;;  %v11323_v3 = vld [vmem:[%s11056_s12 + $0x438] ss:$20 sps:$4 sm:$0xff]  }
  0x89   : > { %1843 = vmatmul.mubr.bf16.gmra.mrb[12].mxu0 %v10405_v4  ;;  %9973 = vmatprep.subr.bf16.mxu1 %v13789_v2  ;;  %v10485_v4 = vld [vmem:[%s11061_s15 + $0x1e0] sm:$0xff]  }
  0x8a   : > { %1850 = vmatprep.mubr.bf16.mxu0 %v10409_v6  ;;  %2088 = vmatpush1.bf16.msra.mxu0 %v10467_v15  ;;  %v10579_v6 = vld [vmem:[%s11061_s15 + $0xf8] sm:$0xff]  }
  0x8b   : > { %9695 = vmatmul.mubr.bf16.gmra.mrb[28].mxu1 %v10407_v5  ;;  %2089 = vmatprep.subr.bf16.mxu0 %v13789_v2  ;;  %v11327_v5 = vld [vmem:[%s11056_s12 + $0x464] ss:$20 sps:$4 sm:$0xff]   ;;  %v10502_v15 = vld [vmem:[%s11056_s12 + $0x2fc] ss:$20 sps:$4 sm:$0xff]  }
  0x8c   : > { %9698 = vmatprep.mubr.bf16.mxu1 %v10412_v8  ;;  %9989 = vmatpush1.bf16.msra.mxu1 %v10454_v9  ;;  %v10492_v8 = vld [vmem:[%s11061_s15 + $0x1e8] sm:$0xff]  }
  0x8d   : > { %9974 = vmatprep.subr.bf16.mxu1 %v13789_v2  ;;  %v10493_v9 = vld [vmem:[%s11056_s12 + $0x2d4] ss:$20 sps:$4 sm:$0xff]  }
  0x8e   : > { %2090 = vmatpush1.bf16.msra.mxu0 %v10482_v20  ;;  %v10511_v20 = vld [vmem:[%s11061_s15 + $0x208] sm:$0xff]  }
  0x8f   : > { %2091 = vmatprep.subr.bf16.mxu0 %v13789_v2 }
  0x90   : > { %9990 = vmatpush1.bf16.msra.mxu1 %v10460_v11  ;;  %v11342_v11 = vld [vmem:[%s11056_s12 + $0x48c] ss:$20 sps:$4 sm:$0xff]  }
  0x91   : > { %1851 = vmatmul.mubr.bf16.gmra.mrb[16].mxu0 %v10411_v10  ;;  %4480 = vmatprep.subr.bf16.mxu1 %v13789_v2  ;;  %v11337_v10 = vld [vmem:[%s11056_s12 + $0x460] ss:$20 sps:$4 sm:$0xff]  }
  0x92   : > { %1858 = vmatprep.mubr.bf16.mxu0 %v10416_v12  ;;  %2092 = vmatpush1.bf16.msra.mxu0 %v10499_v25  ;;  %v10498_v12 = vld [vmem:[%s11061_s15 + $0x1f0] sm:$0xff]   ;;  %v10524_v25 = vld [vmem:[%s11061_s15 + $0x218] sm:$0xff]  }
  0x93   : > { %9699 = vmatmul.mubr.bf16.gmra.mrb[32].mxu1 %v10414_v13  ;;  %2093 = vmatprep.subr.bf16.mxu0 %v13789_v2  ;;  %v10501_v13 = vld [vmem:[%s11061_s15 + $0x1f8] sm:$0xff]  }
  0x94   : > { %9702 = vmatprep.mubr.bf16.mxu1 %v10419_v14  ;;  %v10495_v14 = vld [vmem:[%s11056_s12 + $0x2d0] ss:$20 sps:$4 sm:$0xff]  }
  0x96   : > { %2094 = vmatpush1.bf16.msra.mxu0 %v10515_v32  ;;  %v10533_v32 = vld [vmem:[%s11061_s15 + $0x228] sm:$0xff]  }
  0x97   : > { %2095 = vmatprep.subr.bf16.mxu0 %v13789_v2 }
  0x99   : > { %1859 = vmatmul.mubr.bf16.gmra.mrb[20].mxu0 %v10418_v16  ;;  %v11353_v16 = vld [vmem:[%s11056_s12 + $0x488] ss:$20 sps:$4 sm:$0xff]  }
  0x9a   : > { %1866 = vmatprep.mubr.bf16.mxu0 %v10422_v17  ;;  %2096 = vmatpush1.bf16.msra.mxu0 %v10531_v38  ;;  %v11356_v17 = vld [vmem:[%s11056_s12 + $0x4b4] ss:$20 sps:$4 sm:$0xff]   ;;  %v10528_v38 = vld [vmem:[%s11056_s12 + $0x370] ss:$20 sps:$4 sm:$0xff]  }
  0x9b   : > { %9703 = vmatmul.mubr.bf16.gmra.mrb[36].mxu1 %v10420_v18  ;;  %2097 = vmatprep.subr.bf16.mxu0 %v13789_v2  ;;  %v10508_v18 = vld [vmem:[%s11061_s15 + $0x200] sm:$0xff]  }
  0x9c   : > { %9706 = vmatprep.mubr.bf16.mxu1 %v10425_v19  ;;  %v10504_v19 = vld [vmem:[%s11056_s12 + $0x2f8] ss:$20 sps:$4 sm:$0xff]  }
  0x9e   : > { %2098 = vmatpush1.bf16.msra.mxu0 %v10548_v44  ;;  %v10540_v44 = vld [vmem:[%s11056_s12 + $0x550] ss:$20 sps:$4 sm:$0xff]  }
  0x9f   : > { %2099 = vmatprep.subr.bf16.mxu0 %v13789_v2 }
  0xa1   : > { %1867 = vmatmul.mubr.bf16.gmra.mrb[24].mxu0 %v10424_v21  ;;  %v10509_v21 = vld [vmem:[%s11056_s12 + $0x324] ss:$20 sps:$4 sm:$0xff]  }
  0xa2   : > { %1874 = vmatprep.mubr.bf16.mxu0 %v10429_v22  ;;  %2100 = vmatpush1.bf16.msra.mxu0 %v10555_v46  ;;  %v11366_v22 = vld [vmem:[%s11056_s12 + $0x4b0] ss:$20 sps:$4 sm:$0xff]   ;;  %v10544_v46 = vld [vmem:[%s11056_s12 + $0x3c0] ss:$20 sps:$4 sm:$0xff]  }
  0xa3   : > { %9707 = vmatmul.mubr.bf16.gmra.mrb[40].mxu1 %v10427_v23  ;;  %2101 = vmatprep.subr.bf16.mxu0 %v13789_v2  ;;  %v11370_v23 = vld [vmem:[%s11056_s12 + $0x4dc] ss:$20 sps:$4 sm:$0xff]  }
  0xa4   : > { %9710 = vmatprep.mubr.bf16.mxu1 %v10432_v24  ;;  %v10517_v24 = vld [vmem:[%s11061_s15 + $0x210] sm:$0xff]  }
  0xa6   : > { %2102 = vmatpush1.bf16.msra.mxu0 %v10563_v50  ;;  %v11427_v50 = vld [vmem:[%s11056_s12 + $0x5c] ss:$20 sps:$4 sm:$0xff]  }
  0xa7   : > { %2103 = vmatprep.subr.bf16.mxu0 %v13789_v2 }
  0xa9   : > { %1875 = vmatmul.mubr.bf16.gmra.mrb[28].mxu0 %v10431_v26  ;;  %v10512_v26 = vld [vmem:[%s11056_s12 + $0x320] ss:$20 sps:$4 sm:$0xff]  }
  0xaa   : > { %1882 = vmatprep.mubr.bf16.mxu0 %v10435_v27  ;;  %2104 = vmatpush1.bf16.msra.mxu0 %v10571_v56  ;;  %v10518_v27 = vld [vmem:[%s11056_s12 + $0x34c] ss:$20 sps:$4 sm:$0xff]   ;;  %v11440_v56 = vld [vmem:[%s11056_s12 + $0x84] ss:$20 sps:$4 sm:$0xff]  }
  0xab   : > { %9711 = vmatmul.mubr.bf16.gmra.mrb[44].mxu1 %v10433_v28  ;;  %2105 = vmatprep.subr.bf16.mxu0 %v13789_v2  ;;  %v11380_v28 = vld [vmem:[%s11056_s12 + $0x4d8] ss:$20 sps:$4 sm:$0xff]  }
  0xac   : > { %9714 = vmatprep.mubr.bf16.mxu1 %v10438_v29  ;;  %v11384_v29 = vld [vmem:[%s11056_s12 + $0x504] ss:$20 sps:$4 sm:$0xff]  }
  0xae   : > { %2106 = vmatpush1.bf16.msra.mxu0 %v10579_v6 }
  0xaf   : > { %4191 = vmatprep.subr.bf16.mxu0 %v13789_v2 }
  0xb1   : > { %1883 = vmatmul.mubr.bf16.gmra.mrb[32].mxu0 %v10437_v30  ;;  %v10525_v30 = vld [vmem:[%s11061_s15 + $0x220] sm:$0xff]  }
  0xb2   : > { %1890 = vmatprep.mubr.bf16.mxu0 %v10442_v31  ;;  %v10520_v31 = vld [vmem:[%s11056_s12 + $0x348] ss:$20 sps:$4 sm:$0xff]  }
  0xb3   : > { %9715 = vmatmul.mubr.bf16.gmra.mrb[48].mxu1 %v10440_v33  ;;  %v10526_v33 = vld [vmem:[%s11056_s12 + $0x374] ss:$20 sps:$4 sm:$0xff]  }
  0xb4   : > { %9718 = vmatprep.mubr.bf16.mxu1 %v10445_v34  ;;  %v11394_v34 = vld [vmem:[%s11056_s12 + $0x500] ss:$20 sps:$4 sm:$0xff]  }
  0xb9   : > { %1891 = vmatmul.mubr.bf16.gmra.mrb[36].mxu0 %v10444_v35  ;;  %v11398_v35 = vld [vmem:[%s11056_s12 + $0x52c] ss:$20 sps:$4 sm:$0xff]  }
  0xba   : > { %1898 = vmatprep.mubr.bf16.mxu0 %v10448_v36  ;;  %v10539_v36 = vld [vmem:[%s11061_s15 + $0x230] sm:$0xff]  }
  0xbb   : > { %9719 = vmatmul.mubr.bf16.gmra.mrb[52].mxu1 %v10446_v37  ;;  %v10541_v37 = vld [vmem:[%s11061_s15 + $0x238] sm:$0xff]  }
  0xbc   : > { %9722 = vmatprep.mubr.bf16.mxu1 %v10451_v39  ;;  %v10534_v39 = vld [vmem:[%s11056_s12 + $0x39c] ss:$20 sps:$4 sm:$0xff]  }
  0xc1   : > { %1899 = vmatmul.mubr.bf16.gmra.mrb[40].mxu0 %v10450_v40  ;;  %v11408_v40 = vld [vmem:[%s11056_s12 + $0x528] ss:$20 sps:$4 sm:$0xff]  }
  0xc2   : > { %1906 = vmatprep.mubr.bf16.mxu0 %v10455_v41  ;;  %v10537_v41 = vld [vmem:[%s11056_s12 + $0x554] ss:$20 sps:$4 sm:$0xff]  }
  0xc3   : > { %9723 = vmatmul.mubr.bf16.gmra.mrb[56].mxu1 %v10453_v42  ;;  %v10536_v42 = vld [vmem:[%s11056_s12 + $0x398] ss:$20 sps:$4 sm:$0xff]  }
  0xc4   : > { %9726 = vmatprep.mubr.bf16.mxu1 %v10458_v43  ;;  %v10542_v43 = vld [vmem:[%s11056_s12 + $0x3c4] ss:$20 sps:$4 sm:$0xff]  }
  0xc9   : > { %1907 = vmatmul.mubr.bf16.gmra.mrb[44].mxu0 %v10457_v45  ;;  %v11418_v45 = vld [vmem:[%s11056_s12 + $0x34] ss:$20 sps:$4 sm:$0xff]  }
  0xca   : > { %1914 = vmatprep.mubr.bf16.mxu0 %v10461_v47  ;;  %v11423_v47 = vld [vmem:[%s11056_s12 + $0x30] ss:$20 sps:$4 sm:$0xff]  }
  0xcb   : > { %9727 = vmatmul.mubr.bf16.gmra.mrb[60].mxu1 %v10459_v48  ;;  %v10549_v48 = vld [vmem:[%s11061_s15 + $0x280] sm:$0xff]  }
  0xcc   : > { %4399 = vmatprep.mubr.bf16.mxu1 %v11285_v49 }
  0xd1   : > { %1915 = vmatmul.mubr.bf16.gmra.mrb[48].mxu0 %v10463_v51  ;;  %v10557_v51 = vld [vmem:[%s11061_s15 + $0x288] sm:$0xff]  }
  0xd2   : > { %1922 = vmatprep.mubr.bf16.mxu0 %v10469_v52  ;;  %v11434_v52 = vld [vmem:[%s11056_s12 + $0x58] ss:$20 sps:$4 sm:$0xff]  }
  0xd3   : > { %4400 = vmatmul.mubr.bf16.vlgmr.msra.gmra.mrb[64].mxu1 %v11293_v53 }
  0xd4   : > { %4481 = vmatpush1.bf16.msra.mxu1 %v10468_v54  ;;  %4407 = vmatprep.mubr.bf16.mxu1 %v11298_v55 }
  0xd5   : > { %4482 = vmatprep.subr.bf16.mxu1 %v13789_v2 }
  0xd8   : > { %4483 = vmatpush1.bf16.msra.mxu1 %v10471_v57 }
  0xd9   : > { %1923 = vmatmul.mubr.bf16.gmra.mrb[52].mxu0 %v10472_v58  ;;  %4484 = vmatprep.subr.bf16.mxu1 %v13789_v2  ;;  %v10565_v58 = vld [vmem:[%s11061_s15 + $0x290] sm:$0xff]  }
  0xda   : > { %1930 = vmatprep.mubr.bf16.mxu0 %v10477_v59 }
  0xdb   : > { %4408 = vmatmul.mubr.bf16.gmra.mrb[68].mxu1 %v11308_v60 }
  0xdc   : > { %4485 = vmatpush1.bf16.msra.mxu1 %v10476_v61  ;;  %4415 = vmatprep.mubr.bf16.mxu1 %v11313_v62  ;;  %v10573_v61 = vld [vmem:[%s11061_s15 + $0x298] sm:$0xff]  }
  0xdd   : > { %4486 = vmatprep.subr.bf16.mxu1 %v13789_v2 }
  0xe0   : > { %4487 = vmatpush1.bf16.msra.mxu1 %v10484_v63  ;;  %v11456_v63 = vld [vmem:[%s11056_s12 + $0x80] ss:$20 sps:$4 sm:$0xff]  }
  0xe1   : > { %1931 = vmatmul.mubr.bf16.gmra.mrb[56].mxu0 %v10479_v0  ;;  %4488 = vmatprep.subr.bf16.mxu1 %v13789_v2 }
  0xe2   : > { %1938 = vmatprep.mubr.bf16.mxu0 %v10486_v1  ;;  %v11462_v1 = vld [vmem:[%s11056_s12 + $0xac] ss:$20 sps:$4 sm:$0xff]  }
  0xe3   : > { %4416 = vmatmul.mubr.bf16.gmra.mrb[72].mxu1 %v11323_v3 }
  0xe4   : > { %4489 = vmatpush1.bf16.msra.mxu1 %v10485_v4  ;;  %4423 = vmatprep.mubr.bf16.mxu1 %v11327_v5  ;;  %v10581_v4 = vld [vmem:[%s11061_s15 + $0x2a0] sm:$0xff]  }
  0xe5   : > { %4490 = vmatprep.subr.bf16.mxu1 %v13789_v2 }
  0xe8   : > { %4491 = vmatpush1.bf16.msra.mxu1 %v10492_v8  ;;  %v11478_v8 = vld [vmem:[%s11056_s12 + $0xa8] ss:$20 sps:$4 sm:$0xff]  }
  0xe9   : > { %1939 = vmatmul.mubr.bf16.gmra.mrb[60].mxu0 %v10488_v7  ;;  %4492 = vmatprep.subr.bf16.mxu1 %v13789_v2  ;;  %v10591_v7 = vld [vmem:[%s11061_s15 + $0x2a8] sm:$0xff]  }
  0xea   : > { %1946 = vmatprep.mubr.bf16.mxu0 %v10493_v9 }
  0xeb   : > { %4424 = vmatmul.mubr.bf16.gmra.mrb[76].mxu1 %v11337_v10 }
  0xec   : > { %4431 = vmatprep.mubr.bf16.mxu1 %v11342_v11  ;;  %4493 = vmatpush1.bf16.msra.mxu1 %v10498_v12  ;;  %v11484_v12 = vld [vmem:[%s11056_s12 + $0xd4] ss:$20 sps:$4 sm:$0xff]  }
  0xed   : > { %4494 = vmatprep.subr.bf16.mxu1 %v13789_v2 }
  0xf0   : > { %4495 = vmatpush1.bf16.msra.mxu1 %v10501_v13  ;;  %v10598_v13 = vld [vmem:[%s11061_s15 + $0x2b0] sm:$0xff]  }
  0xf1   : > { %1947 = vmatmul.mubr.bf16.gmra.mrb[64].mxu0 %v10495_v14  ;;  %4496 = vmatprep.subr.bf16.mxu1 %v13789_v2 }
  0xf2   : > { %1954 = vmatprep.mubr.bf16.mxu0 %v10502_v15  ;;  %v10605_v15 = vld [vmem:[%s11061_s15 + $0x2b8] sm:$0xff]  }
  0xf3   : > { %4432 = vmatmul.mubr.bf16.gmra.mrb[80].mxu1 %v11353_v16 }
  0xf4   : > { %4439 = vmatprep.mubr.bf16.mxu1 %v11356_v17  ;;  %4497 = vmatpush1.bf16.msra.mxu1 %v10508_v18  ;;  %v11500_v18 = vld [vmem:[%s11056_s12 + $0xd0] ss:$20 sps:$4 sm:$0xff]  }
  0xf5   : > { %4498 = vmatprep.subr.bf16.mxu1 %v13789_v2 }
  0xf8   : > { %4499 = vmatpush1.bf16.msra.mxu1 %v10511_v20  ;;  %v11506_v20 = vld [vmem:[%s11056_s12 + $0xfc] ss:$20 sps:$4 sm:$0xff]  }
  0xf9   : > { %1955 = vmatmul.mubr.bf16.gmra.mrb[68].mxu0 %v10504_v19  ;;  %4500 = vmatprep.subr.bf16.mxu1 %v13789_v2 }
  0xfa   : > { %1962 = vmatprep.mubr.bf16.mxu0 %v10509_v21  ;;  %v10612_v21 = vld [vmem:[%s11061_s15 + $0x2c0] sm:$0xff]  }
  0xfb   : > { %4440 = vmatmul.mubr.bf16.gmra.mrb[84].mxu1 %v11366_v22 }
  0xfc   : > { %4447 = vmatprep.mubr.bf16.mxu1 %v11370_v23  ;;  %4501 = vmatpush1.bf16.msra.mxu1 %v10517_v24 }
  0xfd   : > { %4502 = vmatprep.subr.bf16.mxu1 %v13789_v2 }
 0x100   : > { %4503 = vmatpush1.bf16.msra.mxu1 %v10524_v25  ;;  %v10619_v25 = vld [vmem:[%s11061_s15 + $0x2c8] sm:$0xff]  }
 0x101   : > { %1963 = vmatmul.mubr.bf16.gmra.mrb[72].mxu0 %v10512_v26  ;;  %4504 = vmatprep.subr.bf16.mxu1 %v13789_v2  ;;  %v11522_v26 = vld [vmem:[%s11056_s12 + $0xf8] ss:$20 sps:$4 sm:$0xff]  }
 0x102   : > { %1970 = vmatprep.mubr.bf16.mxu0 %v10518_v27 }
 0x103   : > { %4448 = vmatmul.mubr.bf16.gmra.mrb[88].mxu1 %v11380_v28 }
 0x104   : > { %4455 = vmatprep.mubr.bf16.mxu1 %v11384_v29  ;;  %4505 = vmatpush1.bf16.msra.mxu1 %v10525_v30  ;;  %v11528_v30 = vld [vmem:[%s11056_s12 + $0x124] ss:$20 sps:$4 sm:$0xff]  }
 0x105   : > { %4506 = vmatprep.subr.bf16.mxu1 %v13789_v2 }
 0x108   : > { %4507 = vmatpush1.bf16.msra.mxu1 %v10533_v32 }
 0x109   : > { %1971 = vmatmul.mubr.bf16.gmra.mrb[76].mxu0 %v10520_v31  ;;  %4508 = vmatprep.subr.bf16.mxu1 %v13789_v2 }
 0x10a   : > { %1978 = vmatprep.mubr.bf16.mxu0 %v10526_v33  ;;  %v11543_v33 = vld [vmem:[%s11056_s12 + $0x120] ss:$20 sps:$4 sm:$0xff]  }
 0x10b   : > { %4456 = vmatmul.mubr.bf16.gmra.mrb[92].mxu1 %v11394_v34 }
 0x10c   : > { %4463 = vmatprep.mubr.bf16.mxu1 %v11398_v35  ;;  %4509 = vmatpush1.bf16.msra.mxu1 %v10539_v36 }
 0x10d   : > { %4510 = vmatprep.subr.bf16.mxu1 %v13789_v2 }
 0x110   : > { %4511 = vmatpush1.bf16.msra.mxu1 %v10541_v37 }
 0x111   : > { %1979 = vmatmul.mubr.bf16.gmra.mrb[80].mxu0 %v10528_v38  ;;  %6596 = vmatprep.subr.bf16.mxu1 %v13789_v2  ;;  %v11553_v38 = vld [vmem:[%s11056_s12 + $0x14c] ss:$20 sps:$4 sm:$0xff]  }
 0x112   : > { %1986 = vmatprep.mubr.bf16.mxu0 %v10534_v39  ;;  %v10633_v39 = vld [vmem:[%s11061_s15 + $0x2d8] sm:$0xff]  }
 0x113   : > { %4464 = vmatmul.mubr.bf16.gmra.mrb[96].mxu1 %v11408_v40 }
 0x114   : > { %4471 = vmatprep.mubr.bf16.mxu1 %v10537_v41  ;;  %v11563_v41 = vld [vmem:[%s11056_s12 + $0x148] ss:$20 sps:$4 sm:$0xff]  }
 0x119   : > { %1987 = vmatmul.mubr.bf16.gmra.mrb[84].mxu0 %v10536_v42 }
 0x11a   : > { %1994 = vmatprep.mubr.bf16.mxu0 %v10542_v43 }
 0x11b   : > { %4472 = vmatmul.mubr.bf16.gmra.mrb[100].mxu1 %v10540_v44 }
 0x11c   : > { %4512 = vmatprep.mubr.bf16.mxu1 %v11418_v45 }
 0x121   : > { %1995 = vmatmul.mubr.bf16.gmra.mrb[88].mxu0 %v10544_v46  ;;  %v11582_v46 = vld [vmem:[%s11056_s12 + $0x170] ss:$20 sps:$4 sm:$0xff]  }
 0x122   : > { %2002 = vmatprep.mubr.bf16.mxu0 %v11285_v49 }
 0x123   : > { %4513 = vmatmul.mubr.bf16.vlgmr.msra.gmra.mrb[104].mxu1 %v11423_v47 }
 0x124   : > { %6597 = vmatpush1.bf16.msra.mxu1 %v10549_v48  ;;  %4520 = vmatprep.mubr.bf16.mxu1 %v11427_v50 }
 0x125   : > { %6598 = vmatprep.subr.bf16.mxu1 %v13789_v2  ;;  %v11437_v54 = vpop.f32.mrb[0].mxu1 }
 0x126   : > { %v11442_v57 = vpop.f32.mrb[1].mxu1 }
 0x127   : > { %v11444_v49 = vpop.f32.mrb[2].mxu1 }
 0x128   : > { %6599 = vmatpush1.bf16.msra.mxu1 %v10557_v51  ;;  %v11447_v59 = vpop.f32.mrb[3].mxu1 }
 0x129   : > { %2003 = vmatmul.mubr.bf16.gmra.mrb[92].mxu0 %v11293_v53  ;;  %6600 = vmatprep.subr.bf16.mxu1 %v13789_v2 }
 0x12a   : > { %2010 = vmatprep.mubr.bf16.mxu0 %v11298_v55 }
 0x12b   : > { %4521 = vmatmul.mubr.bf16.gmra.mrb[108].mxu1 %v11434_v52 }
 0x12c   : > { %4528 = vmatprep.mubr.bf16.mxu1 %v11440_v56  ;;  %6601 = vmatpush1.bf16.msra.mxu1 %v10565_v58 }
 0x12d   : > { %6602 = vmatprep.subr.bf16.mxu1 %v13789_v2  ;;  %v11459_v0 = vpop.f32.mrb[4].mxu1 }
 0x12e   : > { %v11464_v53 = vpop.f32.mrb[5].mxu1 }
 0x12f   : > { %v11466_v55 = vpop.f32.mrb[6].mxu1 }
 0x130   : > { %6603 = vmatpush1.bf16.msra.mxu1 %v10573_v61  ;;  %v11469_v6 = vpop.f32.mrb[7].mxu1  ;;  %v11591_v61 = vld [vmem:[%s11056_s12 + $0x19c] ss:$20 sps:$4 sm:$0xff]  }
 0x131   : > { %2011 = vmatmul.mubr.bf16.gmra.mrb[96].mxu0 %v11308_v60  ;;  %6604 = vmatprep.subr.bf16.mxu1 %v13789_v2 }
 0x132   : > { %2018 = vmatprep.mubr.bf16.mxu0 %v11313_v62 }
 0x133   : > { %4529 = vmatmul.mubr.bf16.gmra.mrb[112].mxu1 %v11456_v63 }
 0x134   : > { %4536 = vmatprep.mubr.bf16.mxu1 %v11462_v1  ;;  %6605 = vmatpush1.bf16.msra.mxu1 %v10581_v4 }
 0x135   : > { %6606 = vmatprep.subr.bf16.mxu1 %v13789_v2  ;;  %v11481_v9 = vpop.f32.mrb[8].mxu1 }
 0x136   : > { %v11486_v60 = vpop.f32.mrb[9].mxu1 }
 0x137   : > { %v11488_v62 = vpop.f32.mrb[10].mxu1 }
 0x138   : > { %6607 = vmatpush1.bf16.msra.mxu1 %v10591_v7  ;;  %v11491_v14 = vpop.f32.mrb[11].mxu1 }
 0x139   : > { %2019 = vmatmul.mubr.bf16.gmra.mrb[100].mxu0 %v11323_v3  ;;  %6608 = vmatprep.subr.bf16.mxu1 %v13789_v2 }
 0x13a   : > { %2026 = vmatprep.mubr.bf16.mxu0 %v11327_v5 }
 0x13b   : > { %4537 = vmatmul.mubr.bf16.gmra.mrb[116].mxu1 %v11478_v8 }
 0x13c   : > { %4544 = vmatprep.mubr.bf16.mxu1 %v11484_v12  ;;  %6609 = vmatpush1.bf16.msra.mxu1 %v10598_v13 }
 0x13d   : > { %6610 = vmatprep.subr.bf16.mxu1 %v13789_v2  ;;  %v11503_v19 = vpop.f32.mrb[12].mxu1 }
 0x13e   : > { %v11508_v3 = vpop.f32.mrb[13].mxu1 }
 0x13f   : > { %v11510_v5 = vpop.f32.mrb[14].mxu1 }
 0x140   : > { %6611 = vmatpush1.bf16.msra.mxu1 %v10605_v15  ;;  %v11513_v24 = vpop.f32.mrb[15].mxu1  ;;  %v11607_v15 = vld [vmem:[%s11056_s12 + $0x198] ss:$20 sps:$4 sm:$0xff]  }
 0x141   : > { %2027 = vmatmul.mubr.bf16.gmra.mrb[104].mxu0 %v11337_v10  ;;  %6612 = vmatprep.subr.bf16.mxu1 %v13789_v2 }
 0x142   : > { %2034 = vmatprep.mubr.bf16.mxu0 %v11342_v11  ;;  %v10626_v11 = vld [vmem:[%s11061_s15 + $0x2d0] sm:$0xff]  }
 0x143   : > { %4545 = vmatmul.mubr.bf16.gmra.mrb[120].mxu1 %v11500_v18 }
 0x144   : > { %4552 = vmatprep.mubr.bf16.mxu1 %v11506_v20  ;;  %6613 = vmatpush1.bf16.msra.mxu1 %v10612_v21 }
 0x145   : > { %6614 = vmatprep.subr.bf16.mxu1 %v13789_v2 }
 0x146   : > { %v11525_v27 = vpop.f32.mrb[16].mxu1 }
 0x147   : > { %v11530_v10 = vpop.f32.mrb[17].mxu1 }
 0x148   : > { %v11532_v31 = vpop.f32.mrb[18].mxu1  ;;  %6615 = vmatpush1.bf16.msra.mxu1 %v10619_v25  ;;  %v10585_v25 = vld [vmem:[%s11056_s12 + $0x8] ss:$20 sps:$4 sm:$0xff]  }
 0x149   : > { %v11535_v32 = vpop.f32.mrb[19].mxu1  ;;  %2035 = vmatmul.mubr.bf16.gmra.mrb[108].mxu0 %v11353_v16  ;;  %6616 = vmatprep.subr.bf16.mxu1 %v13789_v2 }
 0x14a   : > { %2042 = vmatprep.mubr.bf16.mxu0 %v11356_v17 }
 0x14b   : > { %4553 = vmatmul.mubr.bf16.gmra.mrb[124].mxu1 %v11522_v26 }
 0x14c   : > { %4560 = vmatprep.mubr.bf16.mxu1 %v11528_v30  ;;  %6617 = vmatpush1.bf16.msra.mxu1 %v10626_v11 }
 0x14d   : > { %6618 = vmatprep.subr.bf16.mxu1 %v13789_v2 }
 0x14e   : > { %v11546_v36 = vpop.f32.mrb[20].mxu1 }
 0x14f   : > { %v11548_v37 = vpop.f32.mrb[21].mxu1 }
 0x150   : > { %v11550_v16 = vpop.f32.mrb[22].mxu1  ;;  %6619 = vmatpush1.bf16.msra.mxu1 %v10633_v39 }
 0x151   : > { %v11555_v17 = vpop.f32.mrb[23].mxu1  ;;  %2043 = vmatmul.mubr.bf16.gmra.mrb[112].mxu0 %v11366_v22  ;;  %6620 = vmatprep.subr.bf16.mxu1 %v13789_v2  ;;  %v11573_v22 = vld [vmem:[%s11056_s12 + $0x174] ss:$20 sps:$4 sm:$0xff]  }
 0x152   : > { %2050 = vmatprep.mubr.bf16.mxu0 %v11370_v23 }
 0x153   : > { %4561 = vmatmul.mubr.bf16.gmra.mrb[128].mxu1 %v11543_v33 }
 0x154   : > { %4568 = vmatprep.mubr.bf16.mxu1 %v11553_v38 }
 0x156   : > { %v11565_v42 = vpop.f32.mrb[24].mxu1 }
 0x157   : > { %v11568_v43 = vpop.f32.mrb[25].mxu1 }
 0x158   : > { %v11570_v44 = vpop.f32.mrb[26].mxu1 }
 0x159   : > { %13850 = vst [vmem:[#allocation3_spill] sm:$0xff] %v11570_v44  ;;  %v11575_v23 = vpop.f32.mrb[27].mxu1  ;;  %2051 = vmatmul.mubr.bf16.gmra.mrb[116].mxu0 %v11380_v28  ;;  %v10640_v28 = vld [vmem:[%s11061_s15 + $0x2e0] sm:$0xff]  }
 0x15a   : > { %2058 = vmatprep.mubr.bf16.mxu0 %v11384_v29  ;;  %v10587_v29 = vld [vmem:[%s11056_s12 + $0xc] ss:$20 sps:$4 sm:$0xff]   ;;  %6621 = vmatpush1.bf16.msra.mxu1 %v10640_v28 }
 0x15b   : > { %4569 = vmatmul.mubr.bf16.gmra.mrb[132].mxu1 %v11563_v41  ;;  %6622 = vmatprep.subr.bf16.mxu1 %v13789_v2  ;;  %v11625_v28 = vld [vmem:[%s11056_s12 + $0x1c0] ss:$20 sps:$4 sm:$0xff]  }
 0x15c   : > { %4576 = vmatprep.mubr.bf16.mxu1 %v11573_v22 }
 0x15e   : > { %v11584_v48 = vpop.f32.mrb[28].mxu1 }
 0x15f   : > { %13851 = vst [vmem:[#allocation4_spill] sm:$0xff] %v11584_v48  ;;  %v11586_v51 = vpop.f32.mrb[29].mxu1 }
 0x160   : > { %13852 = vst [vmem:[#allocation5_spill] sm:$0xff] %v11586_v51  ;;  %v11588_v58 = vpop.f32.mrb[30].mxu1  ;;  %v12038_v51 = vld [vmem:[%s11056_s12 + $0x118] ss:$20 sps:$4 sm:$0xff]  }
 0x161   : > { %13853 = vst [vmem:[#allocation6_spill] sm:$0xff] %v11588_v58  ;;  %v11593_v4 = vpop.f32.mrb[31].mxu1  ;;  %2059 = vmatmul.mubr.bf16.gmra.mrb[120].mxu0 %v11394_v34 }
 0x162   : > { %13854 = vst [vmem:[#allocation7_spill] sm:$0xff] %v11593_v4  ;;  %2066 = vmatprep.mubr.bf16.mxu0 %v11398_v35  ;;  %v11612_v35 = vld [vmem:[%s11056_s12 + $0x1c4] ss:$20 sps:$4 sm:$0xff]  }
 0x163   : > { %4577 = vmatmul.mubr.bf16.gmra.mrb[136].mxu1 %v11582_v46 }
 0x164   : > { %4584 = vmatprep.mubr.bf16.mxu1 %v11591_v61 }
 0x166   : > { %v11601_v7 = vpop.f32.mrb[32].mxu1 }
 0x167   : > { %13855 = vst [vmem:[#allocation8_spill] sm:$0xff] %v11601_v7  ;;  %v11604_v13 = vpop.f32.mrb[33].mxu1  ;;  %v10963_v7 = vld [vmem:[%s11061_s15 + $0x148] sm:$0xff]  }
 0x168   : > { %13856 = vst [vmem:[#allocation9_spill] sm:$0xff] %v11604_v13  ;;  %v11609_v34 = vpop.f32.mrb[34].mxu1 }
 0x169   : > { %13857 = vst [vmem:[#allocation10_spill] sm:$0xff] %v11609_v34  ;;  %v11614_v21 = vpop.f32.mrb[35].mxu1  ;;  %2067 = vmatmul.mubr.bf16.gmra.mrb[124].mxu0 %v11408_v40  ;;  %v11630_v34 = vld [vmem:[%s11056_s12 + $0x1ec] ss:$20 sps:$4 sm:$0xff]  }
 0x16a   : > { %13858 = vst [vmem:[#allocation11_spill] sm:$0xff] %v11614_v21  ;;  %2107 = vmatprep.mubr.bf16.mxu0 %v10587_v29  ;;  %v10962_v29 = vld [vmem:[%s11061_s15 + $0x140] sm:$0xff]  }
 0x16b   : > { %4585 = vmatmul.mubr.bf16.gmra.mrb[140].mxu1 %v11607_v15 }
 0x16c   : > { %4592 = vmatprep.mubr.bf16.mxu1 %v11612_v35 }
 0x16e   : > { %v11620_v11 = vpop.f32.mrb[36].mxu1 }
 0x16f   : > { %13859 = vst [vmem:[#allocation12_spill] sm:$0xff] %v11620_v11  ;;  %v11622_v39 = vpop.f32.mrb[37].mxu1  ;;  %v13863_v11 = vmov 0  }
 0x170   : > { %13860 = vst [vmem:[#allocation13_spill] sm:$0xff] %v11622_v39  ;;  %v11627_v2 = vpop.f32.mrb[38].mxu1  ;;  %v10650_v39 = vld [vmem:[%s11061_s15 + $0x2e8] sm:$0xff]  }
 0x171   : > { %13861 = vst [vmem:[#allocation14_spill] sm:$0xff] %v11627_v2  ;;  %v11632_v40 = vpop.f32.mrb[39].mxu1  ;;  %2108 = vmatmul.mubr.bf16.vlgmr.msra.gmra.mrb[0].mxu0 %v10585_v25  ;;  %6623 = vmatpush1.bf16.msra.mxu1 %v10650_v39 }
 0x172   : > { %13862 = vst [vmem:[#allocation15_spill] sm:$0xff] %v11632_v40  ;;  %4192 = vmatpush1.bf16.msra.mxu0 %v10962_v29  ;;  %2115 = vmatprep.mubr.bf16.mxu0 %v11418_v45  ;;  %v11647_v29 = vld [vmem:[%s11056_s12 + $0x1e8] ss:$20 sps:$4 sm:$0xff]  }
 0x173   : > { %4593 = vmatmul.mubr.bf16.gmra.mrb[144].mxu1 %v11625_v28  ;;  %4193 = vmatprep.subr.bf16.mxu0 %v13863_v11  ;;  %v11653_v40 = vld [vmem:[%s11056_s12 + $0x214] ss:$20 sps:$4 sm:$0xff]  }
 0x174   : > { %4600 = vmatprep.mubr.bf16.mxu1 %v11630_v34  ;;  %6624 = vmatprep.subr.bf16.mxu1 %v13863_v11 }
 0x176   : > { %v11640_v2 = vpop.f32.mrb[40].mxu1  ;;  %4194 = vmatpush1.bf16.msra.mxu0 %v10963_v7  ;;  %v10964_v7 = vld [vmem:[%s11061_s15 + $0x150] sm:$0xff]  }
 0x177   : > { %13864 = vst [vmem:[#allocation16_spill] sm:$0xff] %v11640_v2  ;;  %v11644_v25 = vpop.f32.mrb[41].mxu1  ;;  %4195 = vmatprep.subr.bf16.mxu0 %v13863_v11  ;;  %v10965_v2 = vld [vmem:[%s11061_s15 + $0x158] sm:$0xff]  }
 0x178   : > { %13865 = vst [vmem:[#allocation17_spill] sm:$0xff] %v11644_v25  ;;  %v11650_v45 = vpop.f32.mrb[42].mxu1 }
 0x179   : > { %13866 = vst [vmem:[#allocation18_spill] sm:$0xff] %v11650_v45  ;;  %v11655_v39 = vpop.f32.mrb[43].mxu1  ;;  %2116 = vmatmul.mubr.bf16.gmra.mrb[4].mxu0 %v11423_v47  ;;  %v11669_v47 = vld [vmem:[%s11056_s12 + $0x210] ss:$20 sps:$4 sm:$0xff]  }
 0x17a   : > { %13867 = vst [vmem:[#allocation19_spill] sm:$0xff] %v11655_v39  ;;  %2123 = vmatprep.mubr.bf16.mxu0 %v11427_v50  ;;  %4196 = vmatpush1.bf16.msra.mxu0 %v10964_v7  ;;  %v11675_v7 = vld [vmem:[%s11056_s12 + $0x23c] ss:$20 sps:$4 sm:$0xff]  }
 0x17b   : > { %4601 = vmatmul.mubr.bf16.gmra.mrb[148].mxu1 %v11647_v29  ;;  %4197 = vmatprep.subr.bf16.mxu0 %v13863_v11 }
 0x17c   : > { %4608 = vmatprep.mubr.bf16.mxu1 %v11653_v40 }
 0x17e   : > { %v11663_v45 = vpop.f32.mrb[44].mxu1  ;;  %4198 = vmatpush1.bf16.msra.mxu0 %v10965_v2  ;;  %v10966_v2 = vld [vmem:[%s11061_s15 + $0x160] sm:$0xff]  }
 0x17f   : > { %13868 = vst [vmem:[#allocation20_spill] sm:$0xff] %v11663_v45  ;;  %v11666_v25 = vpop.f32.mrb[45].mxu1  ;;  %4199 = vmatprep.subr.bf16.mxu0 %v13863_v11  ;;  %v10657_v45 = vld [vmem:[%s11061_s15 + $0x2f0] sm:$0xff]  }
 0x180   : > { %13869 = vst [vmem:[#allocation21_spill] sm:$0xff] %v11666_v25  ;;  %v11672_v50 = vpop.f32.mrb[46].mxu1  ;;  %6625 = vmatpush1.bf16.msra.mxu1 %v10657_v45  ;;  %v10967_v25 = vld [vmem:[%s11061_s15 + $0x168] sm:$0xff]  }
 0x181   : > { %13870 = vst [vmem:[#allocation22_spill] sm:$0xff] %v11672_v50  ;;  %v11677_v39 = vpop.f32.mrb[47].mxu1  ;;  %2124 = vmatmul.mubr.bf16.gmra.mrb[8].mxu0 %v11434_v52  ;;  %6626 = vmatprep.subr.bf16.mxu1 %v13863_v11 }
 0x182   : > { %13871 = vst [vmem:[#allocation23_spill] sm:$0xff] %v11677_v39  ;;  %2131 = vmatprep.mubr.bf16.mxu0 %v11440_v56  ;;  %4200 = vmatpush1.bf16.msra.mxu0 %v10966_v2  ;;  %v11693_v56 = vld [vmem:[%s11056_s12 + $0x238] ss:$20 sps:$4 sm:$0xff]  }
 0x183   : > { %4609 = vmatmul.mubr.bf16.gmra.mrb[152].mxu1 %v11669_v47  ;;  %4201 = vmatprep.subr.bf16.mxu0 %v13863_v11  ;;  %v11699_v39 = vld [vmem:[%s11056_s12 + $0x264] ss:$20 sps:$4 sm:$0xff]  }
 0x184   : > { %4616 = vmatprep.mubr.bf16.mxu1 %v11675_v7 }
 0x186   : > { %v11686_v50 = vpop.f32.mrb[48].mxu1  ;;  %4202 = vmatpush1.bf16.msra.mxu0 %v10967_v25  ;;  %v10968_v25 = vld [vmem:[%s11061_s15 + $0x170] sm:$0xff]  }
 0x187   : > { %13872 = vst [vmem:[#allocation24_spill] sm:$0xff] %v11686_v50  ;;  %v11690_v52 = vpop.f32.mrb[49].mxu1  ;;  %4203 = vmatprep.subr.bf16.mxu0 %v13863_v11  ;;  %v10969_v50 = vld [vmem:[%s11061_s15 + $0x178] sm:$0xff]  }
 0x188   : > { %13873 = vst [vmem:[#allocation25_spill] sm:$0xff] %v11690_v52  ;;  %v11696_v2 = vpop.f32.mrb[50].mxu1 }
 0x189   : > { %13874 = vst [vmem:[#allocation26_spill] sm:$0xff] %v11696_v2  ;;  %v11701_v45 = vpop.f32.mrb[51].mxu1  ;;  %2132 = vmatmul.mubr.bf16.gmra.mrb[12].mxu0 %v11456_v63  ;;  %v11715_v63 = vld [vmem:[%s11056_s12 + $0x260] ss:$20 sps:$4 sm:$0xff]  }
 0x18a   : > { %13875 = vst [vmem:[#allocation27_spill] sm:$0xff] %v11701_v45  ;;  %2139 = vmatprep.mubr.bf16.mxu0 %v11462_v1  ;;  %4204 = vmatpush1.bf16.msra.mxu0 %v10968_v25  ;;  %v10606_v25 = vld [vmem:[%s11056_s12 + $0x28c] ss:$20 sps:$4 sm:$0xff]  }
 0x18b   : > { %4617 = vmatmul.mubr.bf16.gmra.mrb[156].mxu1 %v11693_v56  ;;  %4205 = vmatprep.subr.bf16.mxu0 %v13863_v11 }
 0x18c   : > { %4624 = vmatprep.mubr.bf16.mxu1 %v11699_v39 }
 0x18e   : > { %v11709_v2 = vpop.f32.mrb[52].mxu1  ;;  %4206 = vmatpush1.bf16.msra.mxu0 %v10969_v50  ;;  %v10664_v50 = vld [vmem:[%s11061_s15 + $0x2f8] sm:$0xff]  }
 0x18f   : > { %13876 = vst [vmem:[#allocation28_spill] sm:$0xff] %v11709_v2  ;;  %v11712_v52 = vpop.f32.mrb[53].mxu1  ;;  %4207 = vmatprep.subr.bf16.mxu0 %v13863_v11  ;;  %v10970_v2 = vld [vmem:[%s11061_s15 + $0x180] sm:$0xff]   ;;  %6627 = vmatpush1.bf16.msra.mxu1 %v10664_v50 }
 0x190   : > { %13877 = vst [vmem:[#allocation29_spill] sm:$0xff] %v11712_v52  ;;  %v11718_v1 = vpop.f32.mrb[54].mxu1  ;;  %v10971_v52 = vld [vmem:[%s11061_s15 + $0x188] sm:$0xff]   ;;  %6885 = vmatprep.subr.bf16.mxu1 %v13863_v11 }
 0x191   : > { %13878 = vst [vmem:[#allocation30_spill] sm:$0xff] %v11718_v1  ;;  %v11721_v45 = vpop.f32.mrb[55].mxu1  ;;  %2140 = vmatmul.mubr.bf16.gmra.mrb[16].mxu0 %v11478_v8 }
 0x192   : > { %13879 = vst [vmem:[#allocation31_spill] sm:$0xff] %v11721_v45  ;;  %2147 = vmatprep.mubr.bf16.mxu0 %v11484_v12  ;;  %4208 = vmatpush1.bf16.msra.mxu0 %v10970_v2  ;;  %v10608_v12 = vld [vmem:[%s11056_s12 + $0x288] ss:$20 sps:$4 sm:$0xff]   ;;  %v11740_v45 = vld [vmem:[%s11056_s12 + $0x304] ss:$20 sps:$4 sm:$0xff]  }
 0x193   : > { %4625 = vmatmul.mubr.bf16.gmra.mrb[160].mxu1 %v11715_v63  ;;  %4209 = vmatprep.subr.bf16.mxu0 %v13863_v11 }
 0x194   : > { %4632 = vmatprep.mubr.bf16.mxu1 %v10606_v25 }
 0x196   : > { %v11729_v1 = vpop.f32.mrb[56].mxu1  ;;  %4210 = vmatpush1.bf16.msra.mxu0 %v10971_v52  ;;  %v10972_v52 = vld [vmem:[%s11061_s15 + $0x190] sm:$0xff]  }
 0x197   : > { %13880 = vst [vmem:[#allocation32_spill] sm:$0xff] %v11729_v1  ;;  %v11733_v8 = vpop.f32.mrb[57].mxu1  ;;  %4211 = vmatprep.subr.bf16.mxu0 %v13863_v11 }
 0x198   : > { %13881 = vst [vmem:[#allocation33_spill] sm:$0xff] %v11733_v8  ;;  %v11737_v2 = vpop.f32.mrb[58].mxu1 }
 0x199   : > { %13882 = vst [vmem:[#allocation34_spill] sm:$0xff] %v11737_v2  ;;  %v11742_v25 = vpop.f32.mrb[59].mxu1  ;;  %2148 = vmatmul.mubr.bf16.gmra.mrb[20].mxu0 %v11500_v18  ;;  %v10973_v2 = vld [vmem:[%s11061_s15 + $0x198] sm:$0xff]  }
 0x19a   : > { %13883 = vst [vmem:[#allocation35_spill] sm:$0xff] %v11742_v25  ;;  %2155 = vmatprep.mubr.bf16.mxu0 %v11506_v20  ;;  %4212 = vmatpush1.bf16.msra.mxu0 %v10972_v52  ;;  %v11755_v25 = vld [vmem:[%s11056_s12 + $0x300] ss:$20 sps:$4 sm:$0xff]   ;;  %v10975_v52 = vld [vmem:[%s11061_s15 + $0x1a8] sm:$0xff]  }
 0x19b   : > { %4633 = vmatmul.mubr.bf16.gmra.mrb[164].mxu1 %v10608_v12  ;;  %4213 = vmatprep.subr.bf16.mxu0 %v13863_v11  ;;  %v11761_v20 = vld [vmem:[%s11056_s12 + $0x32c] ss:$20 sps:$4 sm:$0xff]  }
 0x19c   : > { %4640 = vmatprep.mubr.bf16.mxu1 %v11740_v45 }
 0x19e   : > { %v11749_v50 = vpop.f32.mrb[60].mxu1  ;;  %4214 = vmatpush1.bf16.msra.mxu0 %v10973_v2  ;;  %v10974_v2 = vld [vmem:[%s11061_s15 + $0x1a0] sm:$0xff]  }
 0x19f   : > { %13884 = vst [vmem:[#allocation36_spill] sm:$0xff] %v11749_v50  ;;  %v11752_v1 = vpop.f32.mrb[61].mxu1  ;;  %4215 = vmatprep.subr.bf16.mxu0 %v13863_v11  ;;  %v11790_v50 = vld [vmem:[%s11056_s12 + $0x37c] ss:$20 sps:$4 sm:$0xff]  }
 0x1a0   : > { %13885 = vst [vmem:[#allocation37_spill] sm:$0xff] %v11752_v1  ;;  %v11758_v18 = vpop.f32.mrb[62].mxu1  ;;  %v11883_v1 = vld [vmem:[%s11056_s12 + $0x4b8] ss:$20 sps:$4 sm:$0xff]  }
 0x1a1   : > { %13886 = vst [vmem:[#allocation38_spill] sm:$0xff] %v11758_v18  ;;  %v11763_v12 = vpop.f32.mrb[63].mxu1  ;;  %2156 = vmatmul.mubr.bf16.gmra.mrb[24].mxu0 %v11522_v26  ;;  %v11773_v18 = vld [vmem:[%s11056_s12 + $0x328] ss:$20 sps:$4 sm:$0xff]  }
 0x1a2   : > { %13887 = vst [vmem:[#allocation39_spill] sm:$0xff] %v11763_v12  ;;  %2163 = vmatprep.mubr.bf16.mxu0 %v11528_v30  ;;  %4216 = vmatpush1.bf16.msra.mxu0 %v10974_v2  ;;  %v11777_v26 = vld [vmem:[%s11056_s12 + $0x354] ss:$20 sps:$4 sm:$0xff]   ;;  %v10977_v2 = vld [vmem:[%s11061_s15 + $0x1b8] sm:$0xff]   ;;  %v11876_v12 = vld [vmem:[%s11061_s15 + $0x240] sm:$0xff]  }
 0x1a3   : > { %4641 = vmatmul.mubr.bf16.gmra.mrb[168].mxu1 %v11755_v25  ;;  %4217 = vmatprep.subr.bf16.mxu0 %v13863_v11  ;;  %v10976_v30 = vld [vmem:[%s11061_s15 + $0x1b0] sm:$0xff]  }
 0x1a4   : > { %4648 = vmatprep.mubr.bf16.mxu1 %v11761_v20 }
 0x1a6   : > { %4218 = vmatpush1.bf16.msra.mxu0 %v10975_v52  ;;  %v11787_v52 = vld [vmem:[%s11056_s12 + $0x350] ss:$20 sps:$4 sm:$0xff]  }
 0x1a7   : > { %4219 = vmatprep.subr.bf16.mxu0 %v13863_v11 }
 0x1a9   : > { %2164 = vmatmul.mubr.bf16.gmra.mrb[28].mxu0 %v11543_v33  ;;  %v11797_v33 = vld [vmem:[%s11056_s12 + $0x378] ss:$20 sps:$4 sm:$0xff]  }
 0x1aa   : > { %2171 = vmatprep.mubr.bf16.mxu0 %v11553_v38  ;;  %4220 = vmatpush1.bf16.msra.mxu0 %v10976_v30  ;;  %v11800_v38 = vld [vmem:[%s11056_s12 + $0x3a4] ss:$20 sps:$4 sm:$0xff]   ;;  %v11861_v30 = vld [vmem:[%s11056_s12 + $0x494] ss:$20 sps:$4 sm:$0xff]  }
 0x1ab   : > { %4649 = vmatmul.mubr.bf16.gmra.mrb[172].mxu1 %v11773_v18  ;;  %4221 = vmatprep.subr.bf16.mxu0 %v13863_v11 }
 0x1ac   : > { %4656 = vmatprep.mubr.bf16.mxu1 %v11777_v26 }
 0x1ae   : > { %4222 = vmatpush1.bf16.msra.mxu0 %v10977_v2  ;;  %v11871_v2 = vld [vmem:[%s11056_s12 + $0x4bc] ss:$20 sps:$4 sm:$0xff]  }
 0x1af   : > { %9730 = vmatprep.subr.bf16.mxu0 %v11876_v12 }
 0x1b1   : > { %2172 = vmatmul.mubr.bf16.gmra.mrb[32].mxu0 %v11563_v41  ;;  %v11807_v41 = vld [vmem:[%s11056_s12 + $0x3a0] ss:$20 sps:$4 sm:$0xff]  }
 0x1b2   : > { %2179 = vmatprep.mubr.bf16.mxu0 %v11573_v22  ;;  %v11810_v22 = vld [vmem:[%s11056_s12 + $0x3cc] ss:$20 sps:$4 sm:$0xff]  }
 0x1b3   : > { %4657 = vmatmul.mubr.bf16.gmra.mrb[176].mxu1 %v11787_v52 }
 0x1b4   : > { %4664 = vmatprep.mubr.bf16.mxu1 %v11790_v50 }
 0x1b9   : > { %2180 = vmatmul.mubr.bf16.gmra.mrb[36].mxu0 %v11582_v46  ;;  %v11817_v46 = vld [vmem:[%s11056_s12 + $0x3c8] ss:$20 sps:$4 sm:$0xff]  }
 0x1ba   : > { %2187 = vmatprep.mubr.bf16.mxu0 %v11591_v61  ;;  %v11820_v61 = vld [vmem:[%s11056_s12 + $0x3f4] ss:$20 sps:$4 sm:$0xff]  }
 0x1bb   : > { %4665 = vmatmul.mubr.bf16.gmra.mrb[180].mxu1 %v11797_v33 }
 0x1bc   : > { %4672 = vmatprep.mubr.bf16.mxu1 %v11800_v38 }
 0x1c1   : > { %2188 = vmatmul.mubr.bf16.gmra.mrb[40].mxu0 %v11607_v15  ;;  %v11827_v15 = vld [vmem:[%s11056_s12 + $0x3f0] ss:$20 sps:$4 sm:$0xff]  }
 0x1c2   : > { %2195 = vmatprep.mubr.bf16.mxu0 %v11612_v35  ;;  %v11830_v35 = vld [vmem:[%s11056_s12 + $0x41c] ss:$20 sps:$4 sm:$0xff]  }
 0x1c3   : > { %4673 = vmatmul.mubr.bf16.gmra.mrb[184].mxu1 %v11807_v41 }
 0x1c4   : > { %4680 = vmatprep.mubr.bf16.mxu1 %v11810_v22 }
 0x1c9   : > { %2196 = vmatmul.mubr.bf16.gmra.mrb[44].mxu0 %v11625_v28  ;;  %v11840_v28 = vld [vmem:[%s11056_s12 + $0x444] ss:$20 sps:$4 sm:$0xff]  }
 0x1ca   : > { %2203 = vmatprep.mubr.bf16.mxu0 %v11630_v34  ;;  %v11837_v34 = vld [vmem:[%s11056_s12 + $0x418] ss:$20 sps:$4 sm:$0xff]  }
 0x1cb   : > { %4681 = vmatmul.mubr.bf16.gmra.mrb[188].mxu1 %v11817_v46 }
 0x1cc   : > { %4688 = vmatprep.mubr.bf16.mxu1 %v11820_v61 }
 0x1d1   : > { %2204 = vmatmul.mubr.bf16.gmra.mrb[48].mxu0 %v11647_v29  ;;  %v11850_v29 = vld [vmem:[%s11056_s12 + $0x46c] ss:$20 sps:$4 sm:$0xff]  }
 0x1d2   : > { %2211 = vmatprep.mubr.bf16.mxu0 %v11653_v40  ;;  %v11847_v40 = vld [vmem:[%s11056_s12 + $0x440] ss:$20 sps:$4 sm:$0xff]  }
 0x1d3   : > { %4689 = vmatmul.mubr.bf16.gmra.mrb[64].mxu1 %v11827_v15 }
 0x1d4   : > { %4696 = vmatprep.mubr.bf16.mxu1 %v11830_v35 }
 0x1d9   : > { %2212 = vmatmul.mubr.bf16.gmra.mrb[52].mxu0 %v11669_v47  ;;  %v10644_v47 = vld [vmem:[%s11056_s12 + $0x2dc] ss:$20 sps:$4 sm:$0xff]  }
 0x1da   : > { %2219 = vmatprep.mubr.bf16.mxu0 %v11675_v7  ;;  %v11858_v7 = vld [vmem:[%s11056_s12 + $0x468] ss:$20 sps:$4 sm:$0xff]  }
 0x1db   : > { %4697 = vmatmul.mubr.bf16.gmra.mrb[68].mxu1 %v11837_v34 }
 0x1dc   : > { %4704 = vmatprep.mubr.bf16.mxu1 %v11840_v28 }
 0x1e1   : > { %2220 = vmatmul.mubr.bf16.gmra.mrb[56].mxu0 %v11693_v56  ;;  %v11868_v56 = vld [vmem:[%s11056_s12 + $0x490] ss:$20 sps:$4 sm:$0xff]  }
 0x1e2   : > { %2227 = vmatprep.mubr.bf16.mxu0 %v11699_v39  ;;  %v10646_v39 = vld [vmem:[%s11056_s12 + $0x2d8] ss:$20 sps:$4 sm:$0xff]  }
 0x1e3   : > { %4705 = vmatmul.mubr.bf16.gmra.mrb[72].mxu1 %v11847_v40 }
 0x1e4   : > { %4712 = vmatprep.mubr.bf16.mxu1 %v11850_v29 }
 0x1e9   : > { %2228 = vmatmul.mubr.bf16.gmra.mrb[60].mxu0 %v11715_v63 }
 0x1ea   : > { %2235 = vmatprep.mubr.bf16.mxu0 %v10644_v47 }
 0x1eb   : > { %4713 = vmatmul.mubr.bf16.gmra.mrb[76].mxu1 %v11858_v7 }
 0x1ec   : > { %4720 = vmatprep.mubr.bf16.mxu1 %v11861_v30 }
 0x1f1   : > { %2236 = vmatmul.mubr.bf16.gmra.mrb[64].mxu0 %v10646_v39  ;;  %v11888_v39 = vld [vmem:[%s11056_s12 + $0x4e4] ss:$20 sps:$4 sm:$0xff]  }
 0x1f2   : > { %2243 = vmatprep.mubr.bf16.mxu0 %v11740_v45 }
 0x1f3   : > { %4721 = vmatmul.mubr.bf16.gmra.mrb[80].mxu1 %v11868_v56 }
 0x1f4   : > { %4728 = vmatprep.mubr.bf16.mxu1 %v11871_v2 }
 0x1f6   : > { %v11880_v63 = vpop.f32.mrb[104].mxu1 }
 0x1f7   : > { %13888 = vst [vmem:[#allocation40_spill] sm:$0xff] %v11880_v63  ;;  %v4516_v47 = vpop.f32.mrb[105].mxu1  ;;  %v11897_v63 = vld [vmem:[%s11056_s12 + $0x4e0] ss:$20 sps:$4 sm:$0xff]  }
 0x1f8   : > { %v11885_v8 = vpop.f32.mrb[106].mxu1 }
 0x1f9   : > { %13889 = vst [vmem:[#allocation41_spill] sm:$0xff] %v11885_v8  ;;  %v4519_v45 = vpop.f32.mrb[107].mxu1  ;;  %2244 = vmatmul.mubr.bf16.gmra.mrb[68].mxu0 %v11755_v25  ;;  %v11902_v8 = vld [vmem:[%s11056_s12 + $0x50c] ss:$20 sps:$4 sm:$0xff]  }
 0x1fa   : > { %2251 = vmatprep.mubr.bf16.mxu0 %v11761_v20 }
 0x1fb   : > { %4729 = vmatmul.mubr.bf16.gmra.mrb[84].mxu1 %v11883_v1 }
 0x1fc   : > { %4736 = vmatprep.mubr.bf16.mxu1 %v11888_v39 }
 0x1fe   : > { %v11894_v21 = vpop.f32.mrb[108].mxu1 }
 0x1ff   : > { %13890 = vst [vmem:[#allocation42_spill] sm:$0xff] %v11894_v21  ;;  %v4524_v47 = vpop.f32.mrb[109].mxu1 }
 0x200   : > { %v11899_v13 = vpop.f32.mrb[110].mxu1  ;;  %v11911_v47 = vld [vmem:[%s11056_s12 + $0x508] ss:$20 sps:$4 sm:$0xff]  }
 0x201   : > { %13891 = vst [vmem:[#allocation43_spill] sm:$0xff] %v11899_v13  ;;  %v4527_v45 = vpop.f32.mrb[111].mxu1  ;;  %2252 = vmatmul.mubr.bf16.gmra.mrb[72].mxu0 %v11773_v18  ;;  %v11916_v13 = vld [vmem:[%s11056_s12 + $0x534] ss:$20 sps:$4 sm:$0xff]  }
 0x202   : > { %2259 = vmatprep.mubr.bf16.mxu0 %v11777_v26 }
 0x203   : > { %4737 = vmatmul.mubr.bf16.gmra.mrb[88].mxu1 %v11897_v63 }
 0x204   : > { %4744 = vmatprep.mubr.bf16.mxu1 %v11902_v8 }
 0x206   : > { %v11908_v25 = vpop.f32.mrb[112].mxu1 }
 0x207   : > { %13892 = vst [vmem:[#allocation44_spill] sm:$0xff] %v11908_v25  ;;  %v4532_v20 = vpop.f32.mrb[113].mxu1 }
 0x208   : > { %v11913_v21 = vpop.f32.mrb[114].mxu1  ;;  %v11925_v20 = vld [vmem:[%s11056_s12 + $0x530] ss:$20 sps:$4 sm:$0xff]  }
 0x209   : > { %13893 = vst [vmem:[#allocation45_spill] sm:$0xff] %v11913_v21  ;;  %v4535_v45 = vpop.f32.mrb[115].mxu1  ;;  %2260 = vmatmul.mubr.bf16.gmra.mrb[76].mxu0 %v11787_v52  ;;  %v10665_v21 = vld [vmem:[%s11056_s12 + $0x55c] ss:$20 sps:$4 sm:$0xff]  }
 0x20a   : > { %2267 = vmatprep.mubr.bf16.mxu0 %v11790_v50  ;;  %v10667_v45 = vld [vmem:[%s11056_s12 + $0x558] ss:$20 sps:$4 sm:$0xff]  }
 0x20b   : > { %4745 = vmatmul.mubr.bf16.gmra.mrb[92].mxu1 %v11911_v47 }
 0x20c   : > { %4752 = vmatprep.mubr.bf16.mxu1 %v11916_v13 }
 0x20e   : > { %v11922_v18 = vpop.f32.mrb[116].mxu1 }
 0x20f   : > { %13894 = vst [vmem:[#allocation46_spill] sm:$0xff] %v11922_v18  ;;  %v4540_v26 = vpop.f32.mrb[117].mxu1  ;;  %v11939_v18 = vld [vmem:[%s11056_s12 + $0x54] ss:$20 sps:$4 sm:$0xff]  }
 0x210   : > { %v11927_v25 = vpop.f32.mrb[118].mxu1 }
 0x211   : > { %13895 = vst [vmem:[#allocation47_spill] sm:$0xff] %v11927_v25  ;;  %v4543_v58 = vpop.f32.mrb[119].mxu1  ;;  %2268 = vmatmul.mubr.bf16.gmra.mrb[80].mxu0 %v11797_v33  ;;  %v11947_v33 = vld [vmem:[%s11056_s12 + $0x50] ss:$20 sps:$4 sm:$0xff]  }
 0x212   : > { %2275 = vmatprep.mubr.bf16.mxu0 %v11800_v38 }
 0x213   : > { %4753 = vmatmul.mubr.bf16.gmra.mrb[96].mxu1 %v11925_v20 }
 0x214   : > { %4760 = vmatprep.mubr.bf16.mxu1 %v10665_v21 }
 0x216   : > { %v11933_v50 = vpop.f32.mrb[120].mxu1 }
 0x217   : > { %13896 = vst [vmem:[#allocation48_spill] sm:$0xff] %v11933_v50  ;;  %v4548_v52 = vpop.f32.mrb[121].mxu1 }
 0x218   : > { %v11936_v26 = vpop.f32.mrb[122].mxu1  ;;  %v10671_v52 = vld [vmem:[%s11061_s15 + $0x300] sm:$0xff]  }
 0x219   : > { %13897 = vst [vmem:[#allocation49_spill] sm:$0xff] %v11936_v26  ;;  %v4551_v25 = vpop.f32.mrb[123].mxu1  ;;  %2276 = vmatmul.mubr.bf16.gmra.mrb[84].mxu0 %v11807_v41 }
 0x21a   : > { %2283 = vmatprep.mubr.bf16.mxu0 %v11810_v22  ;;  %v11953_v25 = vld [vmem:[%s11056_s12 + $0x7c] ss:$20 sps:$4 sm:$0xff]   ;;  %v10678_v22 = vld [vmem:[%s11061_s15 + $0x308] sm:$0xff]  }
 0x21b   : > { %4761 = vmatmul.mubr.bf16.gmra.mrb[100].mxu1 %v10667_v45 }
 0x21c   : > { %6628 = vmatprep.mubr.bf16.mxu1 %v11939_v18 }
 0x21e   : > { %v11944_v58 = vpop.f32.mrb[124].mxu1 }
 0x21f   : > { %13898 = vst [vmem:[#allocation50_spill] sm:$0xff] %v11944_v58  ;;  %v4556_v21 = vpop.f32.mrb[125].mxu1 }
 0x220   : > { %v11949_v38 = vpop.f32.mrb[126].mxu1 }
 0x221   : > { %13899 = vst [vmem:[#allocation51_spill] sm:$0xff] %v11949_v38  ;;  %v4559_v41 = vpop.f32.mrb[127].mxu1  ;;  %2284 = vmatmul.mubr.bf16.gmra.mrb[88].mxu0 %v11817_v46  ;;  %v11964_v38 = vld [vmem:[%s11056_s12 + $0x78] ss:$20 sps:$4 sm:$0xff]  }
 0x222   : > { %2291 = vmatprep.mubr.bf16.mxu0 %v11820_v61  ;;  %v11969_v46 = vld [vmem:[%s11056_s12 + $0xa4] ss:$20 sps:$4 sm:$0xff]   ;;  %v10685_v61 = vld [vmem:[%s11061_s15 + $0x310] sm:$0xff]  }
 0x223   : > { %6629 = vmatmul.mubr.bf16.vlgmr.msra.gmra.mrb[192].mxu1 %v11947_v33 }
 0x224   : > { %6886 = vmatpush1.bf16.msra.mxu1 %v10671_v52  ;;  %6636 = vmatprep.mubr.bf16.mxu1 %v11953_v25 }
 0x225   : > { %6887 = vmatprep.subr.bf16.mxu1 %v13863_v11 }
 0x226   : > { %v11961_v45 = vpop.f32.mrb[128].mxu1 }
 0x227   : > { %13900 = vst [vmem:[#allocation52_spill] sm:$0xff] %v11961_v45  ;;  %v4564_v21 = vpop.f32.mrb[129].mxu1  ;;  %v11982_v45 = vld [vmem:[%s11056_s12 + $0xa0] ss:$20 sps:$4 sm:$0xff]  }
 0x228   : > { %v11966_v41 = vpop.f32.mrb[130].mxu1  ;;  %6888 = vmatpush1.bf16.msra.mxu1 %v10678_v22  ;;  %v10692_v21 = vld [vmem:[%s11061_s15 + $0x318] sm:$0xff]  }
 0x229   : > { %13901 = vst [vmem:[#allocation53_spill] sm:$0xff] %v11966_v41  ;;  %v4567_v52 = vpop.f32.mrb[131].mxu1  ;;  %2292 = vmatmul.mubr.bf16.gmra.mrb[92].mxu0 %v11827_v15  ;;  %6889 = vmatprep.subr.bf16.mxu1 %v13863_v11 }
 0x22a   : > { %2299 = vmatprep.mubr.bf16.mxu0 %v11830_v35  ;;  %v11987_v52 = vld [vmem:[%s11056_s12 + $0xcc] ss:$20 sps:$4 sm:$0xff]  }
 0x22b   : > { %6637 = vmatmul.mubr.bf16.gmra.mrb[196].mxu1 %v11964_v38  ;;  %v10699_v35 = vld [vmem:[%s11061_s15 + $0x320] sm:$0xff]  }
 0x22c   : > { %6644 = vmatprep.mubr.bf16.mxu1 %v11969_v46  ;;  %6890 = vmatpush1.bf16.msra.mxu1 %v10685_v61  ;;  %v10710_v61 = vld [vmem:[%s11061_s15 + $0x328] sm:$0xff]  }
 0x22d   : > { %6891 = vmatprep.subr.bf16.mxu1 %v13863_v11 }
 0x22e   : > { %v11979_v41 = vpop.f32.mrb[132].mxu1 }
 0x22f   : > { %13902 = vst [vmem:[#allocation54_spill] sm:$0xff] %v11979_v41  ;;  %v4572_v22 = vpop.f32.mrb[133].mxu1 }
 0x230   : > { %v11984_v15 = vpop.f32.mrb[134].mxu1  ;;  %6892 = vmatpush1.bf16.msra.mxu1 %v10692_v21 }
 0x231   : > { %13903 = vst [vmem:[#allocation55_spill] sm:$0xff] %v11984_v15  ;;  %v4575_v58 = vpop.f32.mrb[135].mxu1  ;;  %2300 = vmatmul.mubr.bf16.gmra.mrb[96].mxu0 %v11837_v34  ;;  %6893 = vmatprep.subr.bf16.mxu1 %v13863_v11  ;;  %v12000_v15 = vld [vmem:[%s11056_s12 + $0xc8] ss:$20 sps:$4 sm:$0xff]  }
 0x232   : > { %2307 = vmatprep.mubr.bf16.mxu0 %v11840_v28  ;;  %v12005_v58 = vld [vmem:[%s11056_s12 + $0xf4] ss:$20 sps:$4 sm:$0xff]  }
 0x233   : > { %6645 = vmatmul.mubr.bf16.gmra.mrb[200].mxu1 %v11982_v45  ;;  %v10717_v28 = vld [vmem:[%s11061_s15 + $0x330] sm:$0xff]  }
 0x234   : > { %6652 = vmatprep.mubr.bf16.mxu1 %v11987_v52  ;;  %6894 = vmatpush1.bf16.msra.mxu1 %v10699_v35  ;;  %v10725_v35 = vld [vmem:[%s11061_s15 + $0x338] sm:$0xff]  }
 0x235   : > { %6895 = vmatprep.subr.bf16.mxu1 %v13863_v11 }
 0x236   : > { %v11997_v22 = vpop.f32.mrb[136].mxu1 }
 0x237   : > { %13904 = vst [vmem:[#allocation56_spill] sm:$0xff] %v11997_v22  ;;  %v4580_v21 = vpop.f32.mrb[137].mxu1 }
 0x238   : > { %v12002_v34 = vpop.f32.mrb[138].mxu1  ;;  %6896 = vmatpush1.bf16.msra.mxu1 %v10710_v61 }
 0x239   : > { %13905 = vst [vmem:[#allocation57_spill] sm:$0xff] %v12002_v34  ;;  %v4583_v41 = vpop.f32.mrb[139].mxu1  ;;  %2308 = vmatmul.mubr.bf16.gmra.mrb[100].mxu0 %v11847_v40  ;;  %6897 = vmatprep.subr.bf16.mxu1 %v13863_v11  ;;  %v12018_v34 = vld [vmem:[%s11056_s12 + $0xf0] ss:$20 sps:$4 sm:$0xff]  }
 0x23a   : > { %2315 = vmatprep.mubr.bf16.mxu0 %v11850_v29  ;;  %v12023_v40 = vld [vmem:[%s11056_s12 + $0x11c] ss:$20 sps:$4 sm:$0xff]   ;;  %v10733_v29 = vld [vmem:[%s11061_s15 + $0x340] sm:$0xff]  }
 0x23b   : > { %6653 = vmatmul.mubr.bf16.gmra.mrb[204].mxu1 %v12000_v15 }
 0x23c   : > { %6660 = vmatprep.mubr.bf16.mxu1 %v12005_v58  ;;  %6898 = vmatpush1.bf16.msra.mxu1 %v10717_v28  ;;  %v570_v28 = vld [vmem:[#allocation2] sm:$0xff] }
 0x23d   : > { %6899 = vmatprep.subr.bf16.mxu1 %v13863_v11 }
 0x23e   : > { %v12015_v21 = vpop.f32.mrb[140].mxu1 }
 0x23f   : > { %13906 = vst [vmem:[#allocation58_spill] sm:$0xff] %v12015_v21  ;;  %v4588_v61 = vpop.f32.mrb[141].mxu1  ;;  %v571_v21 = vld [vmem:[#allocation2 + $0x8] sm:$0xff] }
 0x240   : > { %v12020_v41 = vpop.f32.mrb[142].mxu1  ;;  %6900 = vmatpush1.bf16.msra.mxu1 %v10725_v35 }
 0x241   : > { %13907 = vst [vmem:[#allocation59_spill] sm:$0xff] %v12020_v41  ;;  %v4591_v22 = vpop.f32.mrb[143].mxu1  ;;  %2316 = vmatmul.mubr.bf16.gmra.mrb[104].mxu0 %v11858_v7  ;;  %6901 = vmatprep.subr.bf16.mxu1 %v13863_v11  ;;  %v10741_v41 = vld [vmem:[%s11061_s15 + $0x348] sm:$0xff]  }
 0x242   : > { %2323 = vmatprep.mubr.bf16.mxu0 %v11861_v30 }
 0x243   : > { %6661 = vmatmul.mubr.bf16.gmra.mrb[208].mxu1 %v12018_v34 }
 0x244   : > { %v2109_v61 = vpop.f32.mrb[0].mxu0  ;;  %6668 = vmatprep.mubr.bf16.mxu1 %v12023_v40  ;;  %6902 = vmatpush1.bf16.msra.mxu1 %v10733_v29  ;;  %v12043_v29 = vld [vmem:[%s11056_s12 + $0x144] ss:$20 sps:$4 sm:$0xff]  }
 0x245   : > { %v2399_v35 = vadd.f32 %v11442_v57, %v2109_v61  ;;  %v2111_v22 = vpop.f32.mrb[1].mxu0  ;;  %6903 = vmatprep.subr.bf16.mxu1 %v13863_v11  ;;  %v10748_v57 = vld [vmem:[%s11061_s15 + $0x350] sm:$0xff]  }
 0x246   : > { %v12034_v7 = vpop.f32.mrb[144].mxu1  ;;  %v2112_v30 = vpop.f32.mrb[2].mxu0 }
 0x247   : > { %v2653_v26 = vadd.f32 %v2399_v35, %v570_v28  ;;  %v2402_v50 = vadd.f32 %v11447_v59, %v2112_v30  ;;  %v4596_v48 = vpop.f32.mrb[145].mxu1  ;;  %v2114_v4 = vpop.f32.mrb[3].mxu0  ;;  %v572_v59 = vld [vmem:[#allocation2 + $0x10] sm:$0xff] }
 0x248   : > { %v12040_v44 = vpop.f32.mrb[146].mxu1  ;;  %6904 = vmatpush1.bf16.msra.mxu1 %v10741_v41  ;;  %v12057_v30 = vld [vmem:[%s11056_s12 + $0x140] ss:$20 sps:$4 sm:$0xff]  }
 0x249   : > { %2717 = vst [vmem:[#allocation2] sm:$0xff] %v2653_v26  ;;  %v2654_v61 = vadd.f32 %v2402_v50, %v571_v21  ;;  %v4599_v22 = vpop.f32.mrb[147].mxu1  ;;  %2324 = vmatmul.mubr.bf16.gmra.mrb[108].mxu0 %v11868_v56  ;;  %6905 = vmatprep.subr.bf16.mxu1 %v13863_v11  ;;  %v573_v26 = vld [vmem:[#allocation2 + $0x18] sm:$0xff] }
 0x24a   : > { %2331 = vmatprep.mubr.bf16.mxu0 %v11871_v2 }
 0x24b   : > { %2718 = vst [vmem:[#allocation2 + $0x8] sm:$0xff] %v2654_v61  ;;  %6669 = vmatmul.mubr.bf16.gmra.mrb[212].mxu1 %v12038_v51 }
 0x24c   : > { %v2117_v48 = vpop.f32.mrb[4].mxu0  ;;  %6676 = vmatprep.mubr.bf16.mxu1 %v12043_v29  ;;  %6906 = vmatpush1.bf16.msra.mxu1 %v10748_v57  ;;  %v12062_v57 = vld [vmem:[%s11056_s12 + $0x16c] ss:$20 sps:$4 sm:$0xff]  }
 0x24d   : > { %v2407_v4 = vadd.f32 %v11437_v54, %v2117_v48  ;;  %v2119_v50 = vpop.f32.mrb[5].mxu0  ;;  %6907 = vmatprep.subr.bf16.mxu1 %v13863_v11 }
 0x24e   : > { %v12053_v56 = vpop.f32.mrb[148].mxu1  ;;  %v2120_v2 = vpop.f32.mrb[6].mxu0 }
 0x24f   : > { %v2655_v21 = vadd.f32 %v2407_v4, %v572_v59  ;;  %v2410_v41 = vadd.f32 %v11444_v49, %v2120_v2  ;;  %v4604_v28 = vpop.f32.mrb[149].mxu1  ;;  %v2122_v35 = vpop.f32.mrb[7].mxu0  ;;  %v10756_v49 = vld [vmem:[%s11061_s15 + $0x358] sm:$0xff]   ;;  %v574_v59 = vld [vmem:[#allocation2 + $0x20] sm:$0xff]  ;;  %v575_v2 = vld [vmem:[#allocation2 + $0x28] sm:$0xff] }
 0x250   : > { %v12059_v61 = vpop.f32.mrb[150].mxu1  ;;  %6908 = vmatpush1.bf16.msra.mxu1 %v10756_v49  ;;  %v12075_v35 = vld [vmem:[%s11056_s12 + $0x168] ss:$20 sps:$4 sm:$0xff]  }
 0x251   : > { %2719 = vst [vmem:[#allocation2 + $0x10] sm:$0xff] %v2655_v21  ;;  %v2656_v54 = vadd.f32 %v2410_v41, %v573_v26  ;;  %v4607_v22 = vpop.f32.mrb[151].mxu1  ;;  %2332 = vmatmul.mubr.bf16.gmra.mrb[112].mxu0 %v11883_v1  ;;  %6909 = vmatprep.subr.bf16.mxu1 %v13863_v11 }
 0x252   : > { %2339 = vmatprep.mubr.bf16.mxu0 %v11888_v39  ;;  %v12080_v22 = vld [vmem:[%s11056_s12 + $0x194] ss:$20 sps:$4 sm:$0xff]  }
 0x253   : > { %2720 = vst [vmem:[#allocation2 + $0x18] sm:$0xff] %v2656_v54  ;;  %6677 = vmatmul.mubr.bf16.gmra.mrb[216].mxu1 %v12057_v30 }
 0x254   : > { %v2125_v48 = vpop.f32.mrb[8].mxu0  ;;  %6684 = vmatprep.mubr.bf16.mxu1 %v12062_v57 }
 0x255   : > { %v2415_v4 = vadd.f32 %v11464_v53, %v2125_v48  ;;  %v2127_v50 = vpop.f32.mrb[9].mxu0 }
 0x256   : > { %v12070_v26 = vpop.f32.mrb[152].mxu1  ;;  %v2128_v1 = vpop.f32.mrb[10].mxu0 }
 0x257   : > { %v2657_v39 = vadd.f32 %v2415_v4, %v574_v59  ;;  %v2418_v21 = vadd.f32 %v11469_v6, %v2128_v1  ;;  %v4612_v41 = vpop.f32.mrb[153].mxu1  ;;  %v2130_v28 = vpop.f32.mrb[11].mxu0  ;;  %v576_v6 = vld [vmem:[#allocation2 + $0x30] sm:$0xff] }
 0x258   : > { %v12077_v54 = vpop.f32.mrb[154].mxu1  ;;  %v12091_v41 = vld [vmem:[%s11056_s12 + $0x190] ss:$20 sps:$4 sm:$0xff]  }
 0x259   : > { %2721 = vst [vmem:[#allocation2 + $0x20] sm:$0xff] %v2657_v39  ;;  %v2658_v53 = vadd.f32 %v2418_v21, %v575_v2  ;;  %v4615_v49 = vpop.f32.mrb[155].mxu1  ;;  %2340 = vmatmul.mubr.bf16.gmra.mrb[116].mxu0 %v11897_v63  ;;  %v577_v2 = vld [vmem:[#allocation2 + $0x38] sm:$0xff] }
 0x25a   : > { %2347 = vmatprep.mubr.bf16.mxu0 %v11902_v8 }
 0x25b   : > { %2722 = vst [vmem:[#allocation2 + $0x28] sm:$0xff] %v2658_v53  ;;  %6685 = vmatmul.mubr.bf16.gmra.mrb[220].mxu1 %v12075_v35  ;;  %v12096_v53 = vld [vmem:[%s11056_s12 + $0x1bc] ss:$20 sps:$4 sm:$0xff]  }
 0x25c   : > { %v2133_v59 = vpop.f32.mrb[12].mxu0  ;;  %6692 = vmatprep.mubr.bf16.mxu1 %v12080_v22 }
 0x25d   : > { %v2423_v48 = vadd.f32 %v11459_v0, %v2133_v59  ;;  %v2135_v4 = vpop.f32.mrb[13].mxu0 }
 0x25e   : > { %v12087_v50 = vpop.f32.mrb[156].mxu1  ;;  %v2136_v1 = vpop.f32.mrb[14].mxu0 }
 0x25f   : > { %v2659_v63 = vadd.f32 %v2423_v48, %v576_v6  ;;  %v2426_v39 = vadd.f32 %v11466_v55, %v2136_v1  ;;  %v4620_v8 = vpop.f32.mrb[157].mxu1  ;;  %v2138_v21 = vpop.f32.mrb[15].mxu0  ;;  %v10764_v55 = vld [vmem:[%s11061_s15 + $0x360] sm:$0xff]   ;;  %v579_v1 = vld [vmem:[#allocation2 + $0x48] sm:$0xff] }
 0x260   : > { %v12093_v28 = vpop.f32.mrb[158].mxu1  ;;  %v578_v6 = vld [vmem:[#allocation2 + $0x40] sm:$0xff]  ;;  %6910 = vmatpush1.bf16.msra.mxu1 %v10764_v55 }
 0x261   : > { %2723 = vst [vmem:[#allocation2 + $0x30] sm:$0xff] %v2659_v63  ;;  %v2660_v49 = vadd.f32 %v2426_v39, %v577_v2  ;;  %v4623_v0 = vpop.f32.mrb[159].mxu1  ;;  %2348 = vmatmul.mubr.bf16.gmra.mrb[120].mxu0 %v11911_v47  ;;  %v10705_v63 = vld [vmem:[%s11056_s12 + $0x2c] ss:$20 sps:$4 sm:$0xff]   ;;  %6911 = vmatprep.subr.bf16.mxu1 %v13863_v11 }
 0x262   : > { %2355 = vmatprep.mubr.bf16.mxu0 %v11916_v13 }
 0x263   : > { %2724 = vst [vmem:[#allocation2 + $0x38] sm:$0xff] %v2660_v49  ;;  %6693 = vmatmul.mubr.bf16.gmra.mrb[224].mxu1 %v12091_v41  ;;  %v12110_v49 = vld [vmem:[%s11056_s12 + $0x1b8] ss:$20 sps:$4 sm:$0xff]  }
 0x264   : > { %v2141_v59 = vpop.f32.mrb[16].mxu0  ;;  %6700 = vmatprep.mubr.bf16.mxu1 %v12096_v53 }
 0x265   : > { %v2431_v48 = vadd.f32 %v11486_v60, %v2141_v59  ;;  %v2143_v4 = vpop.f32.mrb[17].mxu0  ;;  %v12115_v60 = vld [vmem:[%s11056_s12 + $0x1e4] ss:$20 sps:$4 sm:$0xff]  }
 0x266   : > { %v12104_v2 = vpop.f32.mrb[160].mxu1  ;;  %v2144_v47 = vpop.f32.mrb[18].mxu0 }
 0x267   : > { %13908 = vst [vmem:[#allocation60_spill] sm:$0xff] %v12104_v2  ;;  %v2661_v13 = vadd.f32 %v2431_v48, %v578_v6  ;;  %v2434_v39 = vadd.f32 %v11491_v14, %v2144_v47  ;;  %v4628_v8 = vpop.f32.mrb[161].mxu1  ;;  %v2146_v21 = vpop.f32.mrb[19].mxu0  ;;  %v580_v14 = vld [vmem:[#allocation2 + $0x50] sm:$0xff]  ;;  %v10703_v47 = vld [vmem:[%s11056_s12 + $0x28] ss:$20 sps:$4 sm:$0xff]  }
 0x268   : > { %v12112_v0 = vpop.f32.mrb[162].mxu1  ;;  %v12132_v2 = vld [vmem:[%s11056_s12 + $0x20c] ss:$20 sps:$4 sm:$0xff]  }
 0x269   : > { %13909 = vst [vmem:[#allocation61_spill] sm:$0xff] %v12112_v0  ;;  %2725 = vst [vmem:[#allocation2 + $0x40] sm:$0xff] %v2661_v13  ;;  %v2662_v55 = vadd.f32 %v2434_v39, %v579_v1  ;;  %v4631_v59 = vpop.f32.mrb[163].mxu1  ;;  %2356 = vmatmul.mubr.bf16.gmra.mrb[124].mxu0 %v11925_v20  ;;  %v581_v1 = vld [vmem:[#allocation2 + $0x58] sm:$0xff] }
 0x26a   : > { %4223 = vmatprep.mubr.bf16.mxu0 %v10705_v63  ;;  %v10718_v59 = vld [vmem:[%s11061_s15 + $0x248] sm:$0xff]  }
 0x26b   : > { %2726 = vst [vmem:[#allocation2 + $0x48] sm:$0xff] %v2662_v55  ;;  %6701 = vmatmul.mubr.bf16.gmra.mrb[228].mxu1 %v12110_v49  ;;  %v12126_v55 = vld [vmem:[%s11056_s12 + $0x1e0] ss:$20 sps:$4 sm:$0xff]  }
 0x26c   : > { %v2149_v6 = vpop.f32.mrb[20].mxu0  ;;  %6708 = vmatprep.mubr.bf16.mxu1 %v12115_v60 }
 0x26d   : > { %v2439_v48 = vadd.f32 %v11481_v9, %v2149_v6  ;;  %v2151_v4 = vpop.f32.mrb[21].mxu0 }
 0x26e   : > { %v12122_v13 = vpop.f32.mrb[164].mxu1  ;;  %v2152_v39 = vpop.f32.mrb[22].mxu0 }
 0x26f   : > { %v2663_v20 = vadd.f32 %v2439_v48, %v580_v14  ;;  %v2442_v63 = vadd.f32 %v11488_v62, %v2152_v39  ;;  %v4636_v8 = vpop.f32.mrb[165].mxu1  ;;  %v2154_v21 = vpop.f32.mrb[23].mxu0  ;;  %v10729_v62 = vld [vmem:[%s11061_s15 + $0x250] sm:$0xff]   ;;  %v10774_v14 = vld [vmem:[%s11061_s15 + $0x368] sm:$0xff]   ;;  %v582_v48 = vld [vmem:[#allocation2 + $0x60] sm:$0xff] }
 0x270   : > { %v12129_v0 = vpop.f32.mrb[166].mxu1  ;;  %6912 = vmatpush1.bf16.msra.mxu1 %v10774_v14  ;;  %v12152_v14 = vld [vmem:[%s11056_s12 + $0x234] ss:$20 sps:$4 sm:$0xff]  }
 0x271   : > { %2727 = vst [vmem:[#allocation2 + $0x50] sm:$0xff] %v2663_v20  ;;  %v2664_v9 = vadd.f32 %v2442_v63, %v581_v1  ;;  %v4639_v6 = vpop.f32.mrb[167].mxu1  ;;  %4224 = vmatmul.mubr.bf16.vlgmr.msra.gmra.mrb[128].mxu0 %v10703_v47  ;;  %6913 = vmatprep.subr.bf16.mxu1 %v13863_v11 }
 0x272   : > { %9731 = vmatpush3.bf16.msra.mxu0 %v11876_v12  ;;  %4231 = vmatprep.mubr.bf16.mxu0 %v11939_v18  ;;  %v583_v18 = vld [vmem:[#allocation2 + $0x68] sm:$0xff] }
 0x273   : > { %2728 = vst [vmem:[#allocation2 + $0x58] sm:$0xff] %v2664_v9  ;;  %6709 = vmatmul.mubr.bf16.gmra.mrb[232].mxu1 %v12126_v55  ;;  %9732 = vmatprep.subr.bf16.mxu0 %v10718_v59  ;;  %v12146_v9 = vld [vmem:[%s11056_s12 + $0x208] ss:$20 sps:$4 sm:$0xff]  }
 0x274   : > { %v2157_v4 = vpop.f32.mrb[24].mxu0  ;;  %6716 = vmatprep.mubr.bf16.mxu1 %v12132_v2 }
 0x275   : > { %v2447_v1 = vadd.f32 %v11508_v3, %v2157_v4  ;;  %v2159_v47 = vpop.f32.mrb[25].mxu0  ;;  %v10740_v3 = vld [vmem:[%s11061_s15 + $0x258] sm:$0xff]  }
 0x276   : > { %v12141_v12 = vpop.f32.mrb[168].mxu1  ;;  %v2160_v39 = vpop.f32.mrb[26].mxu0  ;;  %9733 = vmatpush3.bf16.msra.mxu0 %v10718_v59  ;;  %v584_v59 = vld [vmem:[#allocation2 + $0x70] sm:$0xff] }
 0x277   : > { %v2665_v20 = vadd.f32 %v2447_v1, %v582_v48  ;;  %v2450_v63 = vadd.f32 %v11513_v24, %v2160_v39  ;;  %v4644_v8 = vpop.f32.mrb[169].mxu1  ;;  %v2162_v21 = vpop.f32.mrb[27].mxu0  ;;  %9734 = vmatprep.subr.bf16.mxu0 %v10729_v62  ;;  %v10749_v24 = vld [vmem:[%s11061_s15 + $0x260] sm:$0xff]  }
 0x278   : > { %v12149_v6 = vpop.f32.mrb[170].mxu1  ;;  %v12164_v21 = vld [vmem:[%s11056_s12 + $0x230] ss:$20 sps:$4 sm:$0xff]  }
 0x279   : > { %2729 = vst [vmem:[#allocation2 + $0x60] sm:$0xff] %v2665_v20  ;;  %v2666_v4 = vadd.f32 %v2450_v63, %v583_v18  ;;  %v4647_v47 = vpop.f32.mrb[171].mxu1  ;;  %4232 = vmatmul.mubr.bf16.gmra.mrb[132].mxu0 %v11947_v33  ;;  %v585_v33 = vld [vmem:[#allocation2 + $0x78] sm:$0xff] }
 0x27a   : > { %4239 = vmatprep.mubr.bf16.mxu0 %v11953_v25  ;;  %9735 = vmatpush3.bf16.msra.mxu0 %v10729_v62 }
 0x27b   : > { %2730 = vst [vmem:[#allocation2 + $0x68] sm:$0xff] %v2666_v4  ;;  %6717 = vmatmul.mubr.bf16.gmra.mrb[236].mxu1 %v12146_v9  ;;  %9736 = vmatprep.subr.bf16.mxu0 %v10740_v3  ;;  %v10760_v4 = vld [vmem:[%s11061_s15 + $0x268] sm:$0xff]  }
 0x27c   : > { %v2165_v48 = vpop.f32.mrb[28].mxu0  ;;  %6724 = vmatprep.mubr.bf16.mxu1 %v12152_v14 }
 0x27d   : > { %v2455_v1 = vadd.f32 %v11503_v19, %v2165_v48  ;;  %v2167_v18 = vpop.f32.mrb[29].mxu0  ;;  %v12170_v19 = vld [vmem:[%s11056_s12 + $0x25c] ss:$20 sps:$4 sm:$0xff]  }
 0x27e   : > { %v12160_v39 = vpop.f32.mrb[172].mxu1  ;;  %v2168_v25 = vpop.f32.mrb[30].mxu0  ;;  %9737 = vmatpush3.bf16.msra.mxu0 %v10740_v3  ;;  %v10782_v3 = vld [vmem:[%s11061_s15 + $0x370] sm:$0xff]  }
 0x27f   : > { %v2667_v62 = vadd.f32 %v2455_v1, %v584_v59  ;;  %v2458_v20 = vadd.f32 %v11510_v5, %v2168_v25  ;;  %v4652_v63 = vpop.f32.mrb[173].mxu1  ;;  %v2170_v8 = vpop.f32.mrb[31].mxu0  ;;  %9738 = vmatprep.subr.bf16.mxu0 %v10749_v24  ;;  %v10775_v5 = vld [vmem:[%s11061_s15 + $0x270] sm:$0xff]   ;;  %v586_v59 = vld [vmem:[#allocation2 + $0x80] sm:$0xff]  ;;  %6914 = vmatpush1.bf16.msra.mxu1 %v10782_v3 }
 0x280   : > { %v12167_v47 = vpop.f32.mrb[174].mxu1  ;;  %6915 = vmatprep.subr.bf16.mxu1 %v13863_v11  ;;  %v588_v11 = vld [vmem:[#allocation2 + $0x90] sm:$0xff] }
 0x281   : > { %2731 = vst [vmem:[#allocation2 + $0x70] sm:$0xff] %v2667_v62  ;;  %v2668_v48 = vadd.f32 %v2458_v20, %v585_v33  ;;  %v4655_v18 = vpop.f32.mrb[175].mxu1  ;;  %4240 = vmatmul.mubr.bf16.gmra.mrb[136].mxu0 %v11964_v38 }
 0x282   : > { %4247 = vmatprep.mubr.bf16.mxu0 %v11969_v46  ;;  %9739 = vmatpush3.bf16.msra.mxu0 %v10749_v24  ;;  %v587_v46 = vld [vmem:[#allocation2 + $0x88] sm:$0xff] }
 0x283   : > { %2732 = vst [vmem:[#allocation2 + $0x78] sm:$0xff] %v2668_v48  ;;  %6725 = vmatmul.mubr.bf16.gmra.mrb[240].mxu1 %v12164_v21  ;;  %9740 = vmatprep.subr.bf16.mxu0 %v10760_v4  ;;  %v12184_v48 = vld [vmem:[%s11056_s12 + $0x258] ss:$20 sps:$4 sm:$0xff]  }
 0x284   : > { %v2173_v1 = vpop.f32.mrb[32].mxu0  ;;  %6732 = vmatprep.mubr.bf16.mxu1 %v12170_v19 }
 0x285   : > { %v2463_v33 = vadd.f32 %v11530_v10, %v2173_v1  ;;  %v2175_v25 = vpop.f32.mrb[33].mxu0  ;;  %v12189_v10 = vld [vmem:[%s11056_s12 + $0x284] ss:$20 sps:$4 sm:$0xff]  }
 0x286   : > { %v12179_v38 = vpop.f32.mrb[176].mxu1  ;;  %v2176_v24 = vpop.f32.mrb[34].mxu0  ;;  %9741 = vmatpush3.bf16.msra.mxu0 %v10760_v4 }
 0x287   : > { %v2669_v62 = vadd.f32 %v2463_v33, %v586_v59  ;;  %v2466_v20 = vadd.f32 %v11535_v32, %v2176_v24  ;;  %v4660_v63 = vpop.f32.mrb[177].mxu1  ;;  %v2178_v8 = vpop.f32.mrb[35].mxu0  ;;  %9742 = vmatprep.subr.bf16.mxu0 %v10775_v5  ;;  %v10786_v32 = vld [vmem:[%s11061_s15 + $0x278] sm:$0xff]  }
 0x288   : > { %v12186_v18 = vpop.f32.mrb[178].mxu1  ;;  %v10726_v8 = vld [vmem:[%s11056_s12 + $0x2ac] ss:$20 sps:$4 sm:$0xff]  }
 0x289   : > { %2733 = vst [vmem:[#allocation2 + $0x80] sm:$0xff] %v2669_v62  ;;  %v2670_v3 = vadd.f32 %v2466_v20, %v587_v46  ;;  %v4663_v1 = vpop.f32.mrb[179].mxu1  ;;  %4248 = vmatmul.mubr.bf16.gmra.mrb[140].mxu0 %v11982_v45  ;;  %v589_v45 = vld [vmem:[#allocation2 + $0x98] sm:$0xff]  ;;  %v12201_v20 = vld [vmem:[%s11056_s12 + $0x280] ss:$20 sps:$4 sm:$0xff]  }
 0x28a   : > { %4255 = vmatprep.mubr.bf16.mxu0 %v11987_v52  ;;  %9743 = vmatpush3.bf16.msra.mxu0 %v10775_v5  ;;  %v10790_v1 = vld [vmem:[%s11061_s15 + $0x378] sm:$0xff]  }
 0x28b   : > { %2734 = vst [vmem:[#allocation2 + $0x88] sm:$0xff] %v2670_v3  ;;  %6733 = vmatmul.mubr.bf16.gmra.mrb[244].mxu1 %v12184_v48  ;;  %9744 = vmatprep.subr.bf16.mxu0 %v10786_v32 }
 0x28c   : > { %v2181_v4 = vpop.f32.mrb[36].mxu0  ;;  %6740 = vmatprep.mubr.bf16.mxu1 %v12189_v10  ;;  %6916 = vmatpush1.bf16.msra.mxu1 %v10790_v1 }
 0x28d   : > { %v2471_v59 = vadd.f32 %v11525_v27, %v2181_v4  ;;  %v2183_v33 = vpop.f32.mrb[37].mxu0 }
 0x28e   : > { %v12197_v25 = vpop.f32.mrb[180].mxu1  ;;  %v2184_v46 = vpop.f32.mrb[38].mxu0  ;;  %9745 = vmatpush3.bf16.msra.mxu0 %v10786_v32  ;;  %v591_v33 = vld [vmem:[#allocation2 + $0xa8] sm:$0xff] }
 0x28f   : > { %v2671_v52 = vadd.f32 %v2471_v59, %v588_v11  ;;  %v2474_v5 = vadd.f32 %v11532_v31, %v2184_v46  ;;  %v4668_v24 = vpop.f32.mrb[181].mxu1  ;;  %v2186_v62 = vpop.f32.mrb[39].mxu0  ;;  %v590_v31 = vld [vmem:[#allocation2 + $0xa0] sm:$0xff] }
 0x290   : > { %v12203_v63 = vpop.f32.mrb[182].mxu1  ;;  %v12218_v62 = vld [vmem:[%s11056_s12 + $0x324] ss:$20 sps:$4 sm:$0xff]  }
 0x291   : > { %2735 = vst [vmem:[#allocation2 + $0x90] sm:$0xff] %v2671_v52  ;;  %v2672_v27 = vadd.f32 %v2474_v5, %v589_v45  ;;  %v4671_v3 = vpop.f32.mrb[183].mxu1  ;;  %4256 = vmatmul.mubr.bf16.gmra.mrb[144].mxu0 %v12000_v15  ;;  %v10728_v5 = vld [vmem:[%s11056_s12 + $0x2a8] ss:$20 sps:$4 sm:$0xff]  }
 0x292   : > { %4263 = vmatprep.mubr.bf16.mxu0 %v12005_v58 }
 0x293   : > { %2736 = vst [vmem:[#allocation2 + $0x98] sm:$0xff] %v2672_v27  ;;  %6741 = vmatmul.mubr.bf16.gmra.mrb[248].mxu1 %v12201_v20 }
 0x294   : > { %v2189_v32 = vpop.f32.mrb[40].mxu0  ;;  %6748 = vmatprep.mubr.bf16.mxu1 %v10726_v8 }
 0x295   : > { %v2479_v11 = vadd.f32 %v11548_v37, %v2189_v32  ;;  %v2191_v4 = vpop.f32.mrb[41].mxu0  ;;  %v592_v37 = vld [vmem:[#allocation2 + $0xb0] sm:$0xff]  ;;  %v593_v32 = vld [vmem:[#allocation2 + $0xb8] sm:$0xff] }
 0x296   : > { %v12211_v59 = vpop.f32.mrb[184].mxu1  ;;  %v2192_v45 = vpop.f32.mrb[42].mxu0 }
 0x297   : > { %v2673_v15 = vadd.f32 %v2479_v11, %v590_v31  ;;  %v2482_v58 = vadd.f32 %v11555_v17, %v2192_v45  ;;  %v4676_v46 = vpop.f32.mrb[185].mxu1  ;;  %v2194_v52 = vpop.f32.mrb[43].mxu0  ;;  %v12228_v45 = vld [vmem:[%s11056_s12 + $0x320] ss:$20 sps:$4 sm:$0xff]  }
 0x298   : > { %v12215_v24 = vpop.f32.mrb[186].mxu1  ;;  %v594_v52 = vld [vmem:[#allocation2 + $0xc0] sm:$0xff] }
 0x299   : > { %2737 = vst [vmem:[#allocation2 + $0xa0] sm:$0xff] %v2673_v15  ;;  %v2674_v8 = vadd.f32 %v2482_v58, %v591_v33  ;;  %v4679_v27 = vpop.f32.mrb[187].mxu1  ;;  %4264 = vmatmul.mubr.bf16.gmra.mrb[148].mxu0 %v12018_v34  ;;  %v12233_v58 = vld [vmem:[%s11056_s12 + $0x34c] ss:$20 sps:$4 sm:$0xff]  }
 0x29a   : > { %4271 = vmatprep.mubr.bf16.mxu0 %v12023_v40 }
 0x29b   : > { %2738 = vst [vmem:[#allocation2 + $0xa8] sm:$0xff] %v2674_v8  ;;  %6749 = vmatmul.mubr.bf16.gmra.mrb[252].mxu1 %v10728_v5 }
 0x29c   : > { %v2197_v17 = vpop.f32.mrb[44].mxu0  ;;  %6756 = vmatprep.mubr.bf16.mxu1 %v12218_v62 }
 0x29d   : > { %v2487_v3 = vadd.f32 %v11546_v36, %v2197_v17  ;;  %v2199_v1 = vpop.f32.mrb[45].mxu0 }
 0x29e   : > { %v12224_v31 = vpop.f32.mrb[188].mxu1  ;;  %v2200_v11 = vpop.f32.mrb[46].mxu0 }
 0x29f   : > { %v2675_v4 = vadd.f32 %v2487_v3, %v592_v37  ;;  %v2490_v34 = vadd.f32 %v11550_v16, %v2200_v11  ;;  %v4684_v33 = vpop.f32.mrb[189].mxu1  ;;  %v2202_v40 = vpop.f32.mrb[47].mxu0  ;;  %v12239_v16 = vld [vmem:[%s11061_s15 + $0x380] sm:$0xff]   ;;  %v12248_v11 = vld [vmem:[%s11056_s12 + $0x348] ss:$20 sps:$4 sm:$0xff]  }
 0x2a0   : > { %v12230_v15 = vpop.f32.mrb[190].mxu1  ;;  %9810 = vmatprep.subr.bf16.mxu0 %v12239_v16 }
 0x2a1   : > { %2739 = vst [vmem:[#allocation2 + $0xb0] sm:$0xff] %v2675_v4  ;;  %v2676_v46 = vadd.f32 %v2490_v34, %v593_v32  ;;  %v4687_v36 = vpop.f32.mrb[191].mxu1  ;;  %4272 = vmatmul.mubr.bf16.gmra.mrb[152].mxu0 %v12038_v51  ;;  %v595_v51 = vld [vmem:[#allocation2 + $0xc8] sm:$0xff] }
 0x2a2   : > { %4279 = vmatprep.mubr.bf16.mxu0 %v12043_v29  ;;  %v12253_v34 = vld [vmem:[%s11056_s12 + $0x374] ss:$20 sps:$4 sm:$0xff]  }
 0x2a3   : > { %2740 = vst [vmem:[#allocation2 + $0xb8] sm:$0xff] %v2676_v46  ;;  %6757 = vmatmul.mubr.bf16.gmra.mrb[0].mxu1 %v12228_v45 }
 0x2a4   : > { %v2205_v5 = vpop.f32.mrb[48].mxu0  ;;  %6764 = vmatprep.mubr.bf16.mxu1 %v12233_v58 }
 0x2a5   : > { %v2495_v8 = vadd.f32 %v11568_v43, %v2205_v5  ;;  %v2207_v27 = vpop.f32.mrb[49].mxu0  ;;  %v597_v5 = vld [vmem:[#allocation2 + $0xd8] sm:$0xff] }
 0x2a6   : > { %v12244_v37 = vpop.f32.mrb[64].mxu1  ;;  %v2208_v29 = vpop.f32.mrb[50].mxu0 }
 0x2a7   : > { %v2677_v17 = vadd.f32 %v2495_v8, %v594_v52  ;;  %v2498_v3 = vadd.f32 %v11575_v23, %v2208_v29  ;;  %v4692_v1 = vpop.f32.mrb[65].mxu1  ;;  %v2210_v32 = vpop.f32.mrb[51].mxu0  ;;  %v596_v23 = vld [vmem:[#allocation2 + $0xd0] sm:$0xff] }
 0x2a8   : > { %v12250_v4 = vpop.f32.mrb[66].mxu1  ;;  %v12269_v1 = vld [vmem:[%s11056_s12 + $0x39c] ss:$20 sps:$4 sm:$0xff]  }
 0x2a9   : > { %13910 = vst [vmem:[#allocation62_spill] sm:$0xff] %v12250_v4  ;;  %2741 = vst [vmem:[#allocation2 + $0xc0] sm:$0xff] %v2677_v17  ;;  %v2678_v43 = vadd.f32 %v2498_v3, %v595_v51  ;;  %v4695_v33 = vpop.f32.mrb[67].mxu1  ;;  %4280 = vmatmul.mubr.bf16.gmra.mrb[156].mxu0 %v12057_v30  ;;  %v13911_v30 = vld [vmem:[#allocation3_spill] sm:$0xff] }
 0x2aa   : > { %4287 = vmatprep.mubr.bf16.mxu0 %v12062_v57  ;;  %v12264_v17 = vld [vmem:[%s11056_s12 + $0x370] ss:$20 sps:$4 sm:$0xff]  }
 0x2ab   : > { %2742 = vst [vmem:[#allocation2 + $0xc8] sm:$0xff] %v2678_v43  ;;  %6765 = vmatmul.mubr.bf16.gmra.mrb[4].mxu1 %v12248_v11 }
 0x2ac   : > { %v2213_v40 = vpop.f32.mrb[52].mxu0  ;;  %6772 = vmatprep.mubr.bf16.mxu1 %v12253_v34 }
 0x2ad   : > { %v2503_v46 = vadd.f32 %v11565_v42, %v2213_v40  ;;  %v2215_v36 = vpop.f32.mrb[53].mxu0  ;;  %v598_v42 = vld [vmem:[#allocation2 + $0xe0] sm:$0xff] }
 0x2ae   : > { %v12260_v52 = vpop.f32.mrb[68].mxu1  ;;  %v2216_v8 = vpop.f32.mrb[54].mxu0 }
 0x2af   : > { %v2679_v27 = vadd.f32 %v2503_v46, %v596_v23  ;;  %v2506_v51 = vadd.f32 %v13911_v30, %v2216_v8  ;;  %v4700_v29 = vpop.f32.mrb[69].mxu1  ;;  %v2218_v57 = vpop.f32.mrb[55].mxu0  ;;  %v13912_v23 = vld [vmem:[#allocation5_spill] sm:$0xff] }
 0x2b0   : > { %v12266_v3 = vpop.f32.mrb[70].mxu1  ;;  %v12280_v29 = vld [vmem:[%s11056_s12 + $0x398] ss:$20 sps:$4 sm:$0xff]  }
 0x2b1   : > { %2743 = vst [vmem:[#allocation2 + $0xd0] sm:$0xff] %v2679_v27  ;;  %v2680_v32 = vadd.f32 %v2506_v51, %v597_v5  ;;  %v4703_v43 = vpop.f32.mrb[71].mxu1  ;;  %4288 = vmatmul.mubr.bf16.gmra.mrb[160].mxu0 %v12075_v35  ;;  %v599_v5 = vld [vmem:[#allocation2 + $0xe8] sm:$0xff]  ;;  %v13914_v35 = vld [vmem:[#allocation7_spill] sm:$0xff] }
 0x2b2   : > { %4295 = vmatprep.mubr.bf16.mxu0 %v12080_v22 }
 0x2b3   : > { %2744 = vst [vmem:[#allocation2 + $0xd8] sm:$0xff] %v2680_v32  ;;  %6773 = vmatmul.mubr.bf16.gmra.mrb[8].mxu1 %v12264_v17  ;;  %v12285_v32 = vld [vmem:[%s11056_s12 + $0x3c4] ss:$20 sps:$4 sm:$0xff]  }
 0x2b4   : > { %v2221_v33 = vpop.f32.mrb[56].mxu0  ;;  %6780 = vmatprep.mubr.bf16.mxu1 %v12269_v1 }
 0x2b5   : > { %v2511_v40 = vadd.f32 %v13912_v23, %v2221_v33  ;;  %v2223_v46 = vpop.f32.mrb[57].mxu0  ;;  %v13916_v23 = vld [vmem:[#allocation4_spill] sm:$0xff] }
 0x2b6   : > { %v12276_v36 = vpop.f32.mrb[72].mxu1  ;;  %v2224_v8 = vpop.f32.mrb[58].mxu0 }
 0x2b7   : > { %13913 = vst [vmem:[#allocation3_spill] sm:$0xff] %v12276_v36  ;;  %v2681_v27 = vadd.f32 %v2511_v40, %v598_v42  ;;  %v2514_v30 = vadd.f32 %v13914_v35, %v2224_v8  ;;  %v4708_v51 = vpop.f32.mrb[73].mxu1  ;;  %v2226_v22 = vpop.f32.mrb[59].mxu0  ;;  %v600_v42 = vld [vmem:[#allocation2 + $0xf0] sm:$0xff] }
 0x2b8   : > { %v12282_v57 = vpop.f32.mrb[74].mxu1  ;;  %v12296_v51 = vld [vmem:[%s11056_s12 + $0x3c0] ss:$20 sps:$4 sm:$0xff]  }
 0x2b9   : > { %13915 = vst [vmem:[#allocation5_spill] sm:$0xff] %v12282_v57  ;;  %2745 = vst [vmem:[#allocation2 + $0xe0] sm:$0xff] %v2681_v27  ;;  %v2682_v43 = vadd.f32 %v2514_v30, %v599_v5  ;;  %v4711_v4 = vpop.f32.mrb[75].mxu1  ;;  %4296 = vmatmul.mubr.bf16.gmra.mrb[164].mxu0 %v12091_v41  ;;  %v601_v5 = vld [vmem:[#allocation2 + $0xf8] sm:$0xff] }
 0x2ba   : > { %4303 = vmatprep.mubr.bf16.mxu0 %v12096_v53  ;;  %v13918_v41 = vld [vmem:[#allocation6_spill] sm:$0xff] }
 0x2bb   : > { %2746 = vst [vmem:[#allocation2 + $0xe8] sm:$0xff] %v2682_v43  ;;  %6781 = vmatmul.mubr.bf16.gmra.mrb[12].mxu1 %v12280_v29  ;;  %v10752_v43 = vld [vmem:[%s11056_s12 + $0x3ec] ss:$20 sps:$4 sm:$0xff]  }
 0x2bc   : > { %v2229_v33 = vpop.f32.mrb[60].mxu0  ;;  %6788 = vmatprep.mubr.bf16.mxu1 %v12285_v32 }
 0x2bd   : > { %v2519_v40 = vadd.f32 %v13916_v23, %v2229_v33  ;;  %v2231_v46 = vpop.f32.mrb[61].mxu0  ;;  %v13920_v23 = vld [vmem:[#allocation9_spill] sm:$0xff] }
 0x2be   : > { %v12292_v8 = vpop.f32.mrb[76].mxu1  ;;  %v2232_v4 = vpop.f32.mrb[62].mxu0 }
 0x2bf   : > { %13917 = vst [vmem:[#allocation7_spill] sm:$0xff] %v12292_v8  ;;  %v2683_v27 = vadd.f32 %v2519_v40, %v600_v42  ;;  %v2522_v35 = vadd.f32 %v13918_v41, %v2232_v4  ;;  %v4716_v30 = vpop.f32.mrb[77].mxu1  ;;  %v2234_v53 = vpop.f32.mrb[63].mxu0  ;;  %v602_v42 = vld [vmem:[#allocation2 + $0x100] sm:$0xff] }
 0x2c0   : > { %v12298_v22 = vpop.f32.mrb[78].mxu1  ;;  %v13921_v41 = vld [vmem:[#allocation11_spill] sm:$0xff]  ;;  %v10755_v53 = vld [vmem:[%s11056_s12 + $0x414] ss:$20 sps:$4 sm:$0xff]  }
 0x2c1   : > { %13919 = vst [vmem:[#allocation4_spill] sm:$0xff] %v12298_v22  ;;  %2747 = vst [vmem:[#allocation2 + $0xf0] sm:$0xff] %v2683_v27  ;;  %v2684_v57 = vadd.f32 %v2522_v35, %v601_v5  ;;  %v4719_v36 = vpop.f32.mrb[79].mxu1  ;;  %4304 = vmatmul.mubr.bf16.gmra.mrb[168].mxu0 %v12110_v49  ;;  %v603_v27 = vld [vmem:[#allocation2 + $0x108] sm:$0xff] }
 0x2c2   : > { %4311 = vmatprep.mubr.bf16.mxu0 %v12115_v60  ;;  %v10750_v60 = vld [vmem:[%s11056_s12 + $0x3e8] ss:$20 sps:$4 sm:$0xff]  }
 0x2c3   : > { %2748 = vst [vmem:[#allocation2 + $0xf8] sm:$0xff] %v2684_v57  ;;  %6789 = vmatmul.mubr.bf16.gmra.mrb[16].mxu1 %v12296_v51 }
 0x2c4   : > { %v2237_v33 = vpop.f32.mrb[64].mxu0  ;;  %6796 = vmatprep.mubr.bf16.mxu1 %v10752_v43  ;;  %v604_v43 = vld [vmem:[#allocation2 + $0x110] sm:$0xff] }
 0x2c5   : > { %v2527_v40 = vadd.f32 %v13920_v23, %v2237_v33  ;;  %v2239_v46 = vpop.f32.mrb[65].mxu0  ;;  %v13923_v33 = vld [vmem:[#allocation8_spill] sm:$0xff] }
 0x2c6   : > { %v12305_v4 = vpop.f32.mrb[80].mxu1  ;;  %v2240_v5 = vpop.f32.mrb[66].mxu0 }
 0x2c7   : > { %v2685_v36 = vadd.f32 %v2527_v40, %v602_v42  ;;  %v2530_v49 = vadd.f32 %v13921_v41, %v2240_v5  ;;  %v4724_v35 = vpop.f32.mrb[81].mxu1  ;;  %v2242_v30 = vpop.f32.mrb[67].mxu0  ;;  %v605_v5 = vld [vmem:[#allocation2 + $0x118] sm:$0xff] }
 0x2c8   : > { %v12309_v57 = vpop.f32.mrb[82].mxu1  ;;  %v10753_v35 = vld [vmem:[%s11056_s12 + $0x410] ss:$20 sps:$4 sm:$0xff]  }
 0x2c9   : > { %13922 = vst [vmem:[#allocation6_spill] sm:$0xff] %v12309_v57  ;;  %2749 = vst [vmem:[#allocation2 + $0x100] sm:$0xff] %v2685_v36  ;;  %v2686_v22 = vadd.f32 %v2530_v49, %v603_v27  ;;  %v4727_v8 = vpop.f32.mrb[83].mxu1  ;;  %4312 = vmatmul.mubr.bf16.gmra.mrb[172].mxu0 %v12126_v55  ;;  %v10940_v57 = vld [vmem:[%s11056_s12 + $0x4e4] ss:$20 sps:$4 sm:$0xff]  }
 0x2ca   : > { %4319 = vmatprep.mubr.bf16.mxu0 %v12132_v2  ;;  %v13924_v8 = vld [vmem:[#allocation10_spill] sm:$0xff] }
 0x2cb   : > { %2750 = vst [vmem:[#allocation2 + $0x108] sm:$0xff] %v2686_v22  ;;  %6797 = vmatmul.mubr.bf16.gmra.mrb[20].mxu1 %v10750_v60  ;;  %v10759_v22 = vld [vmem:[%s11056_s12 + $0x43c] ss:$20 sps:$4 sm:$0xff]  }
 0x2cc   : > { %v2245_v42 = vpop.f32.mrb[68].mxu0  ;;  %6804 = vmatprep.mubr.bf16.mxu1 %v10755_v53  ;;  %v606_v53 = vld [vmem:[#allocation2 + $0x120] sm:$0xff] }
 0x2cd   : > { %v2535_v23 = vadd.f32 %v13923_v33, %v2245_v42  ;;  %v2247_v40 = vpop.f32.mrb[69].mxu0  ;;  %v13925_v42 = vld [vmem:[#allocation13_spill] sm:$0xff] }
 0x2ce   : > { %v12315_v46 = vpop.f32.mrb[84].mxu1  ;;  %v2248_v36 = vpop.f32.mrb[70].mxu0 }
 0x2cf   : > { %v2687_v27 = vadd.f32 %v2535_v23, %v604_v43  ;;  %v2538_v41 = vadd.f32 %v13924_v8, %v2248_v36  ;;  %v4732_v55 = vpop.f32.mrb[85].mxu1  ;;  %v2250_v49 = vpop.f32.mrb[71].mxu0  ;;  %v607_v36 = vld [vmem:[#allocation2 + $0x128] sm:$0xff]  ;;  %v13927_v8 = vld [vmem:[#allocation15_spill] sm:$0xff] }
 0x2d0   : > { %v12319_v2 = vpop.f32.mrb[86].mxu1  ;;  %v10757_v49 = vld [vmem:[%s11056_s12 + $0x438] ss:$20 sps:$4 sm:$0xff]  }
 0x2d1   : > { %2751 = vst [vmem:[#allocation2 + $0x110] sm:$0xff] %v2687_v27  ;;  %v2688_v30 = vadd.f32 %v2538_v41, %v605_v5  ;;  %v4735_v60 = vpop.f32.mrb[87].mxu1  ;;  %4320 = vmatmul.mubr.bf16.gmra.mrb[176].mxu0 %v12146_v9 }
 0x2d2   : > { %4327 = vmatprep.mubr.bf16.mxu0 %v12152_v14 }
 0x2d3   : > { %2752 = vst [vmem:[#allocation2 + $0x118] sm:$0xff] %v2688_v30  ;;  %6805 = vmatmul.mubr.bf16.gmra.mrb[24].mxu1 %v10753_v35  ;;  %v10763_v30 = vld [vmem:[%s11056_s12 + $0x464] ss:$20 sps:$4 sm:$0xff]  }
 0x2d4   : > { %v2253_v43 = vpop.f32.mrb[72].mxu0  ;;  %6812 = vmatprep.mubr.bf16.mxu1 %v10759_v22  ;;  %v608_v22 = vld [vmem:[#allocation2 + $0x130] sm:$0xff] }
 0x2d5   : > { %v2543_v33 = vadd.f32 %v13925_v42, %v2253_v43  ;;  %v2255_v23 = vpop.f32.mrb[73].mxu0  ;;  %v13929_v43 = vld [vmem:[#allocation12_spill] sm:$0xff] }
 0x2d6   : > { %v12325_v40 = vpop.f32.mrb[88].mxu1  ;;  %v2256_v27 = vpop.f32.mrb[74].mxu0 }
 0x2d7   : > { %13926 = vst [vmem:[#allocation9_spill] sm:$0xff] %v12325_v40  ;;  %v2689_v5 = vadd.f32 %v2543_v33, %v606_v53  ;;  %v2546_v41 = vadd.f32 %v13927_v8, %v2256_v27  ;;  %v4740_v9 = vpop.f32.mrb[89].mxu1  ;;  %v2258_v55 = vpop.f32.mrb[75].mxu0  ;;  %v609_v27 = vld [vmem:[#allocation2 + $0x138] sm:$0xff] }
 0x2d8   : > { %v12329_v14 = vpop.f32.mrb[90].mxu1  ;;  %v13931_v8 = vld [vmem:[#allocation14_spill] sm:$0xff]  ;;  %v10761_v55 = vld [vmem:[%s11056_s12 + $0x460] ss:$20 sps:$4 sm:$0xff]  }
 0x2d9   : > { %13928 = vst [vmem:[#allocation11_spill] sm:$0xff] %v12329_v14  ;;  %2753 = vst [vmem:[#allocation2 + $0x120] sm:$0xff] %v2689_v5  ;;  %v2690_v35 = vadd.f32 %v2546_v41, %v607_v36  ;;  %v4743_v60 = vpop.f32.mrb[91].mxu1  ;;  %4328 = vmatmul.mubr.bf16.gmra.mrb[180].mxu0 %v12164_v21 }
 0x2da   : > { %4335 = vmatprep.mubr.bf16.mxu0 %v12170_v19  ;;  %v610_v60 = vld [vmem:[#allocation2 + $0x140] sm:$0xff] }
 0x2db   : > { %2754 = vst [vmem:[#allocation2 + $0x128] sm:$0xff] %v2690_v35  ;;  %6813 = vmatmul.mubr.bf16.gmra.mrb[28].mxu1 %v10757_v49  ;;  %v10767_v35 = vld [vmem:[%s11056_s12 + $0x48c] ss:$20 sps:$4 sm:$0xff]  }
 0x2dc   : > { %v2261_v53 = vpop.f32.mrb[76].mxu0  ;;  %6820 = vmatprep.mubr.bf16.mxu1 %v10763_v30 }
 0x2dd   : > { %v2551_v42 = vadd.f32 %v13929_v43, %v2261_v53  ;;  %v2263_v33 = vpop.f32.mrb[77].mxu0  ;;  %v13933_v53 = vld [vmem:[#allocation17_spill] sm:$0xff] }
 0x2de   : > { %v12335_v23 = vpop.f32.mrb[92].mxu1  ;;  %v2264_v5 = vpop.f32.mrb[78].mxu0 }
 0x2df   : > { %13930 = vst [vmem:[#allocation8_spill] sm:$0xff] %v12335_v23  ;;  %v2691_v36 = vadd.f32 %v2551_v42, %v608_v22  ;;  %v2554_v41 = vadd.f32 %v13931_v8, %v2264_v5  ;;  %v4748_v21 = vpop.f32.mrb[93].mxu1  ;;  %v2266_v9 = vpop.f32.mrb[79].mxu0  ;;  %v611_v5 = vld [vmem:[#allocation2 + $0x148] sm:$0xff]  ;;  %v10937_v23 = vld [vmem:[%s11056_s12 + $0x420] ss:$20 sps:$4 sm:$0xff]  }
 0x2e0   : > { %v12339_v19 = vpop.f32.mrb[94].mxu1  ;;  %v10765_v9 = vld [vmem:[%s11056_s12 + $0x488] ss:$20 sps:$4 sm:$0xff]  }
 0x2e1   : > { %13932 = vst [vmem:[#allocation10_spill] sm:$0xff] %v12339_v19  ;;  %2755 = vst [vmem:[#allocation2 + $0x130] sm:$0xff] %v2691_v36  ;;  %v2692_v49 = vadd.f32 %v2554_v41, %v609_v27  ;;  %v4751_v30 = vpop.f32.mrb[95].mxu1  ;;  %4336 = vmatmul.mubr.bf16.gmra.mrb[184].mxu0 %v12184_v48  ;;  %v10768_v27 = vld [vmem:[%s11056_s12 + $0x2fc] ss:$20 sps:$4 sm:$0xff]   ;;  %v13935_v41 = vld [vmem:[#allocation19_spill] sm:$0xff] }
 0x2e2   : > { %4343 = vmatprep.mubr.bf16.mxu0 %v12189_v10 }
 0x2e3   : > { %2756 = vst [vmem:[#allocation2 + $0x138] sm:$0xff] %v2692_v49  ;;  %6821 = vmatmul.mubr.bf16.gmra.mrb[32].mxu1 %v10761_v55  ;;  %v10773_v49 = vld [vmem:[%s11056_s12 + $0x4b4] ss:$20 sps:$4 sm:$0xff]  }
 0x2e4   : > { %v2269_v22 = vpop.f32.mrb[80].mxu0  ;;  %6828 = vmatprep.mubr.bf16.mxu1 %v10767_v35 }
 0x2e5   : > { %v2559_v43 = vadd.f32 %v13933_v53, %v2269_v22  ;;  %v2271_v42 = vpop.f32.mrb[81].mxu0  ;;  %v13937_v53 = vld [vmem:[#allocation16_spill] sm:$0xff] }
 0x2e6   : > { %v12345_v33 = vpop.f32.mrb[96].mxu1  ;;  %v2272_v36 = vpop.f32.mrb[82].mxu0 }
 0x2e7   : > { %13934 = vst [vmem:[#allocation13_spill] sm:$0xff] %v12345_v33  ;;  %v2693_v8 = vadd.f32 %v2559_v43, %v610_v60  ;;  %v2562_v48 = vadd.f32 %v13935_v41, %v2272_v36  ;;  %v4756_v21 = vpop.f32.mrb[97].mxu1  ;;  %v2274_v10 = vpop.f32.mrb[83].mxu0  ;;  %v612_v60 = vld [vmem:[#allocation2 + $0x150] sm:$0xff]  ;;  %v10770_v36 = vld [vmem:[%s11056_s12 + $0x2f8] ss:$20 sps:$4 sm:$0xff]  }
 0x2e8   : > { %v12350_v55 = vpop.f32.mrb[98].mxu1  ;;  %v613_v21 = vld [vmem:[#allocation2 + $0x158] sm:$0xff] }
 0x2e9   : > { %13936 = vst [vmem:[#allocation15_spill] sm:$0xff] %v12350_v55  ;;  %2757 = vst [vmem:[#allocation2 + $0x140] sm:$0xff] %v2693_v8  ;;  %v2694_v35 = vadd.f32 %v2562_v48, %v611_v5  ;;  %v4759_v30 = vpop.f32.mrb[99].mxu1  ;;  %4344 = vmatmul.mubr.bf16.gmra.mrb[188].mxu0 %v12201_v20  ;;  %v13939_v48 = vld [vmem:[#allocation18_spill] sm:$0xff] }
 0x2ea   : > { %4351 = vmatprep.mubr.bf16.mxu0 %v10768_v27  ;;  %v10771_v30 = vld [vmem:[%s11056_s12 + $0x4b0] ss:$20 sps:$4 sm:$0xff]  }
 0x2eb   : > { %2758 = vst [vmem:[#allocation2 + $0x148] sm:$0xff] %v2694_v35  ;;  %6829 = vmatmul.mubr.bf16.gmra.mrb[36].mxu1 %v10765_v9  ;;  %v10778_v9 = vld [vmem:[%s11056_s12 + $0x4dc] ss:$20 sps:$4 sm:$0xff]  }
 0x2ec   : > { %v2277_v22 = vpop.f32.mrb[84].mxu0  ;;  %6836 = vmatprep.mubr.bf16.mxu1 %v10773_v49 }
 0x2ed   : > { %v2567_v43 = vadd.f32 %v13937_v53, %v2277_v22  ;;  %v2279_v42 = vpop.f32.mrb[85].mxu0  ;;  %v614_v22 = vld [vmem:[#allocation2 + $0x160] sm:$0xff]  ;;  %v13941_v53 = vld [vmem:[#allocation21_spill] sm:$0xff] }
 0x2ee   : > { %v12356_v41 = vpop.f32.mrb[100].mxu1  ;;  %v2280_v8 = vpop.f32.mrb[86].mxu0 }
 0x2ef   : > { %13938 = vst [vmem:[#allocation12_spill] sm:$0xff] %v12356_v41  ;;  %v2695_v5 = vadd.f32 %v2567_v43, %v612_v60  ;;  %v2570_v10 = vadd.f32 %v13939_v48, %v2280_v8  ;;  %v4764_v20 = vpop.f32.mrb[101].mxu1  ;;  %v2282_v27 = vpop.f32.mrb[87].mxu0  ;;  %v615_v8 = vld [vmem:[#allocation2 + $0x168] sm:$0xff] }
 0x2f0   : > { %v12360_v35 = vpop.f32.mrb[102].mxu1  ;;  %v13942_v27 = vld [vmem:[#allocation23_spill] sm:$0xff] }
 0x2f1   : > { %13940 = vst [vmem:[#allocation14_spill] sm:$0xff] %v12360_v35  ;;  %2759 = vst [vmem:[#allocation2 + $0x150] sm:$0xff] %v2695_v5  ;;  %v2696_v55 = vadd.f32 %v2570_v10, %v613_v21  ;;  %v4767_v49 = vpop.f32.mrb[103].mxu1  ;;  %4352 = vmatmul.mubr.bf16.gmra.mrb[192].mxu0 %v10770_v36  ;;  %v10776_v10 = vld [vmem:[%s11056_s12 + $0x4d8] ss:$20 sps:$4 sm:$0xff]  }
 0x2f2   : > { %4359 = vmatprep.mubr.bf16.mxu0 %v12218_v62  ;;  %v10781_v49 = vld [vmem:[%s11056_s12 + $0x504] ss:$20 sps:$4 sm:$0xff]   ;;  %v616_v62 = vld [vmem:[#allocation2 + $0x170] sm:$0xff] }
 0x2f3   : > { %2760 = vst [vmem:[#allocation2 + $0x158] sm:$0xff] %v2696_v55  ;;  %6837 = vmatmul.mubr.bf16.gmra.mrb[40].mxu1 %v10771_v30  ;;  %v13943_v30 = vld [vmem:[#allocation20_spill] sm:$0xff] }
 0x2f4   : > { %v2285_v60 = vpop.f32.mrb[88].mxu0  ;;  %6844 = vmatprep.mubr.bf16.mxu1 %v10778_v9 }
 0x2f5   : > { %v2575_v43 = vadd.f32 %v13941_v53, %v2285_v60  ;;  %v2287_v42 = vpop.f32.mrb[89].mxu0  ;;  %v617_v60 = vld [vmem:[#allocation2 + $0x178] sm:$0xff] }
 0x2f6   : > { %v2288_v48 = vpop.f32.mrb[90].mxu0  ;;  %v13944_v42 = vld [vmem:[#allocation22_spill] sm:$0xff] }
 0x2f7   : > { %v2697_v20 = vadd.f32 %v2575_v43, %v614_v22  ;;  %v2578_v5 = vadd.f32 %v13942_v27, %v2288_v48  ;;  %v2290_v21 = vpop.f32.mrb[91].mxu0  ;;  %v10785_v27 = vld [vmem:[%s11056_s12 + $0x52c] ss:$20 sps:$4 sm:$0xff]  }
 0x2f8   : > { %v13945_v21 = vld [vmem:[#allocation25_spill] sm:$0xff] }
 0x2f9   : > { %2761 = vst [vmem:[#allocation2 + $0x160] sm:$0xff] %v2697_v20  ;;  %v2698_v36 = vadd.f32 %v2578_v5, %v615_v8  ;;  %4360 = vmatmul.mubr.bf16.gmra.mrb[196].mxu0 %v12228_v45  ;;  %v10779_v8 = vld [vmem:[%s11056_s12 + $0x500] ss:$20 sps:$4 sm:$0xff]  }
 0x2fa   : > { %4367 = vmatprep.mubr.bf16.mxu0 %v12233_v58  ;;  %v618_v58 = vld [vmem:[#allocation2 + $0x180] sm:$0xff] }
 0x2fb   : > { %2762 = vst [vmem:[#allocation2 + $0x168] sm:$0xff] %v2698_v36  ;;  %6845 = vmatmul.mubr.bf16.gmra.mrb[44].mxu1 %v10776_v10  ;;  %v619_v36 = vld [vmem:[#allocation2 + $0x188] sm:$0xff] }
 0x2fc   : > { %v2293_v55 = vpop.f32.mrb[92].mxu0  ;;  %6852 = vmatprep.mubr.bf16.mxu1 %v10781_v49 }
 0x2fd   : > { %v2583_v9 = vadd.f32 %v13943_v30, %v2293_v55  ;;  %v2295_v22 = vpop.f32.mrb[93].mxu0  ;;  %v13946_v30 = vld [vmem:[#allocation27_spill] sm:$0xff] }
 0x2fe   : > { %v2296_v53 = vpop.f32.mrb[94].mxu0 }
 0x2ff   : > { %v2699_v43 = vadd.f32 %v2583_v9, %v616_v62  ;;  %v2586_v48 = vadd.f32 %v13944_v42, %v2296_v53  ;;  %v2298_v20 = vpop.f32.mrb[95].mxu0  ;;  %v10789_v53 = vld [vmem:[%s11056_s12 + $0x554] ss:$20 sps:$4 sm:$0xff]  }
 0x300   : > { %v13947_v42 = vld [vmem:[#allocation24_spill] sm:$0xff] }
 0x301   : > { %2763 = vst [vmem:[#allocation2 + $0x170] sm:$0xff] %v2699_v43  ;;  %v2700_v45 = vadd.f32 %v2586_v48, %v617_v60  ;;  %4368 = vmatmul.mubr.bf16.gmra.mrb[200].mxu0 %v12248_v11  ;;  %v10783_v60 = vld [vmem:[%s11056_s12 + $0x528] ss:$20 sps:$4 sm:$0xff]  }
 0x302   : > { %4375 = vmatprep.mubr.bf16.mxu0 %v12253_v34  ;;  %v620_v34 = vld [vmem:[#allocation2 + $0x190] sm:$0xff] }
 0x303   : > { %2764 = vst [vmem:[#allocation2 + $0x178] sm:$0xff] %v2700_v45  ;;  %6853 = vmatmul.mubr.bf16.gmra.mrb[48].mxu1 %v10779_v8  ;;  %v621_v8 = vld [vmem:[#allocation2 + $0x198] sm:$0xff] }
 0x304   : > { %v2301_v5 = vpop.f32.mrb[96].mxu0  ;;  %6860 = vmatprep.mubr.bf16.mxu1 %v10785_v27 }
 0x305   : > { %v2591_v10 = vadd.f32 %v13945_v21, %v2301_v5  ;;  %v2303_v49 = vpop.f32.mrb[97].mxu0 }
 0x306   : > { %v2304_v62 = vpop.f32.mrb[98].mxu0  ;;  %v10793_v49 = vld [vmem:[%s11056_s12 + $0x57c] ss:$20 sps:$4 sm:$0xff]  }
 0x307   : > { %v2701_v55 = vadd.f32 %v2591_v10, %v618_v58  ;;  %v2594_v9 = vadd.f32 %v13946_v30, %v2304_v62  ;;  %v2306_v22 = vpop.f32.mrb[99].mxu0  ;;  %v13948_v58 = vld [vmem:[#allocation26_spill] sm:$0xff]  ;;  %v10787_v10 = vld [vmem:[%s11056_s12 + $0x550] ss:$20 sps:$4 sm:$0xff]  }
 0x308   : > { %v13949_v62 = vld [vmem:[#allocation29_spill] sm:$0xff] }
 0x309   : > { %2765 = vst [vmem:[#allocation2 + $0x180] sm:$0xff] %v2701_v55  ;;  %v2702_v11 = vadd.f32 %v2594_v9, %v619_v36  ;;  %4376 = vmatmul.mubr.bf16.gmra.mrb[204].mxu0 %v12264_v17  ;;  %v623_v9 = vld [vmem:[#allocation2 + $0x1a8] sm:$0xff] }
 0x30a   : > { %4383 = vmatprep.mubr.bf16.mxu0 %v12269_v1  ;;  %v622_v1 = vld [vmem:[#allocation2 + $0x1a0] sm:$0xff] }
 0x30b   : > { %2766 = vst [vmem:[#allocation2 + $0x188] sm:$0xff] %v2702_v11  ;;  %6861 = vmatmul.mubr.bf16.gmra.mrb[52].mxu1 %v10783_v60  ;;  %v10794_v60 = vld [vmem:[%s11056_s12 + $0x38] ss:$20 sps:$4 sm:$0xff]   ;;  %v13950_v11 = vld [vmem:[#allocation31_spill] sm:$0xff] }
 0x30c   : > { %v2309_v43 = vpop.f32.mrb[100].mxu0  ;;  %6868 = vmatprep.mubr.bf16.mxu1 %v10789_v53 }
 0x30d   : > { %v2599_v48 = vadd.f32 %v13947_v42, %v2309_v43  ;;  %v2311_v20 = vpop.f32.mrb[101].mxu0  ;;  %v10798_v42 = vld [vmem:[%s11056_s12 + $0x5c] ss:$20 sps:$4 sm:$0xff]  }
 0x30e   : > { %v2312_v27 = vpop.f32.mrb[102].mxu0 }
 0x30f   : > { %v2703_v45 = vadd.f32 %v2599_v48, %v620_v34  ;;  %v2602_v5 = vadd.f32 %v13948_v58, %v2312_v27  ;;  %v2314_v21 = vpop.f32.mrb[103].mxu0  ;;  %v624_v48 = vld [vmem:[#allocation2 + $0x1b0] sm:$0xff] }
 0x310   : > { %v10795_v58 = vld [vmem:[%s11056_s12 + $0x60] ss:$20 sps:$4 sm:$0xff]  }
 0x311   : > { %2767 = vst [vmem:[#allocation2 + $0x190] sm:$0xff] %v2703_v45  ;;  %v2704_v17 = vadd.f32 %v2602_v5, %v621_v8  ;;  %4384 = vmatmul.mubr.bf16.gmra.mrb[208].mxu0 %v12280_v29  ;;  %v10791_v29 = vld [vmem:[%s11056_s12 + $0x578] ss:$20 sps:$4 sm:$0xff]  }
 0x312   : > { %4391 = vmatprep.mubr.bf16.mxu0 %v12285_v32  ;;  %v13951_v8 = vld [vmem:[#allocation28_spill] sm:$0xff]  ;;  %v625_v5 = vld [vmem:[#allocation2 + $0x1b8] sm:$0xff] }
 0x313   : > { %2768 = vst [vmem:[#allocation2 + $0x198] sm:$0xff] %v2704_v17  ;;  %6869 = vmatmul.mubr.bf16.gmra.mrb[56].mxu1 %v10787_v10  ;;  %v10800_v10 = vld [vmem:[%s11056_s12 + $0x88] ss:$20 sps:$4 sm:$0xff]  }
 0x314   : > { %v2317_v36 = vpop.f32.mrb[104].mxu0  ;;  %6876 = vmatprep.mubr.bf16.mxu1 %v10793_v49  ;;  %v13952_v17 = vld [vmem:[#allocation30_spill] sm:$0xff] }
 0x315   : > { %v2607_v55 = vadd.f32 %v13949_v62, %v2317_v36  ;;  %v2319_v30 = vpop.f32.mrb[105].mxu0  ;;  %v10796_v36 = vld [vmem:[%s11056_s12 + $0x58] ss:$20 sps:$4 sm:$0xff]  }
 0x316   : > { %v2320_v22 = vpop.f32.mrb[106].mxu0  ;;  %v10809_v62 = vld [vmem:[%s11061_s15 + $0x388] sm:$0xff]  }
 0x317   : > { %v2705_v53 = vadd.f32 %v2607_v55, %v622_v1  ;;  %v2610_v34 = vadd.f32 %v13950_v11, %v2320_v22  ;;  %v2322_v43 = vpop.f32.mrb[107].mxu0  ;;  %v10802_v55 = vld [vmem:[%s11056_s12 + $0x84] ss:$20 sps:$4 sm:$0xff]  }
 0x318   : > { %v626_v22 = vld [vmem:[#allocation2 + $0x1c0] sm:$0xff] }
 0x319   : > { %2769 = vst [vmem:[#allocation2 + $0x1a0] sm:$0xff] %v2705_v53  ;;  %v2706_v32 = vadd.f32 %v2610_v34, %v623_v9  ;;  %4392 = vmatmul.mubr.bf16.gmra.mrb[212].mxu0 %v12296_v51  ;;  %v10820_v9 = vld [vmem:[%s11061_s15 + $0x390] sm:$0xff]  }
 0x31a   : > { %9746 = vmatprep.mubr.bf16.mxu0 %v10794_v60  ;;  %v13953_v53 = vld [vmem:[#allocation33_spill] sm:$0xff] }
 0x31b   : > { %2770 = vst [vmem:[#allocation2 + $0x1a8] sm:$0xff] %v2706_v32  ;;  %6877 = vmatmul.mubr.bf16.gmra.mrb[60].mxu1 %v10791_v29  ;;  %v10801_v43 = vld [vmem:[%s11056_s12 + $0xb0] ss:$20 sps:$4 sm:$0xff]   ;;  %v627_v29 = vld [vmem:[#allocation2 + $0x1c8] sm:$0xff] }
 0x31c   : > { %v2325_v20 = vpop.f32.mrb[108].mxu0  ;;  %6917 = vmatprep.mubr.bf16.mxu1 %v10798_v42  ;;  %v10805_v32 = vld [vmem:[%s11056_s12 + $0xd8] ss:$20 sps:$4 sm:$0xff]  }
 0x31d   : > { %v2615_v27 = vadd.f32 %v13951_v8, %v2325_v20  ;;  %v2327_v45 = vpop.f32.mrb[109].mxu0 }
 0x31e   : > { %v2328_v21 = vpop.f32.mrb[110].mxu0  ;;  %v10831_v45 = vld [vmem:[%s11061_s15 + $0x398] sm:$0xff]  }
 0x31f   : > { %v2707_v49 = vadd.f32 %v2615_v27, %v624_v48  ;;  %v2618_v51 = vadd.f32 %v13952_v17, %v2328_v21  ;;  %v2330_v1 = vpop.f32.mrb[111].mxu0  ;;  %v13954_v48 = vld [vmem:[#allocation35_spill] sm:$0xff]  ;;  %v13955_v17 = vld [vmem:[#allocation32_spill] sm:$0xff] }
 0x320   : > { %v10804_v27 = vld [vmem:[%s11056_s12 + $0x80] ss:$20 sps:$4 sm:$0xff]  }
 0x321   : > { %2771 = vst [vmem:[#allocation2 + $0x1b0] sm:$0xff] %v2707_v49  ;;  %v2708_v30 = vadd.f32 %v2618_v51, %v625_v5  ;;  %9747 = vmatmul.mubr.bf16.vlgmr.msra.gmra.mrb[216].mxu0 %v10795_v58  ;;  %v10807_v58 = vld [vmem:[%s11056_s12 + $0xac] ss:$20 sps:$4 sm:$0xff]  }
 0x322   : > { %9811 = vmatpush3.bf16.msra.mxu0 %v12239_v16  ;;  %9750 = vmatprep.mubr.bf16.mxu0 %v10800_v10  ;;  %v10842_v21 = vld [vmem:[%s11061_s15 + $0x3a0] sm:$0xff]   ;;  %v628_v10 = vld [vmem:[#allocation2 + $0x1d0] sm:$0xff] }
 0x323   : > { %2772 = vst [vmem:[#allocation2 + $0x1b8] sm:$0xff] %v2708_v30  ;;  %6918 = vmatmul.mubr.bf16.vlgmr.msra.gmra.mrb[192].mxu1 %v10796_v36  ;;  %9812 = vmatprep.subr.bf16.mxu0 %v10809_v62  ;;  %v10806_v36 = vld [vmem:[%s11056_s12 + $0x100] ss:$20 sps:$4 sm:$0xff]   ;;  %v10811_v30 = vld [vmem:[%s11056_s12 + $0x128] ss:$20 sps:$4 sm:$0xff]  }
 0x324   : > { %v2333_v60 = vpop.f32.mrb[112].mxu0  ;;  %6925 = vmatprep.mubr.bf16.mxu1 %v10802_v55 }
 0x325   : > { %v2623_v11 = vadd.f32 %v13953_v53, %v2333_v60  ;;  %v2335_v34 = vpop.f32.mrb[113].mxu0 }
 0x326   : > { %v2336_v42 = vpop.f32.mrb[114].mxu0  ;;  %9813 = vmatpush3.bf16.msra.mxu0 %v10809_v62  ;;  %v629_v62 = vld [vmem:[#allocation2 + $0x1d8] sm:$0xff]  ;;  %v10853_v34 = vld [vmem:[%s11061_s15 + $0x3a8] sm:$0xff]  }
 0x327   : > { %v2709_v16 = vadd.f32 %v2623_v11, %v626_v22  ;;  %v2626_v20 = vadd.f32 %v13954_v48, %v2336_v42  ;;  %v2338_v8 = vpop.f32.mrb[115].mxu0  ;;  %9814 = vmatprep.subr.bf16.mxu0 %v10820_v9  ;;  %v13956_v22 = vld [vmem:[#allocation34_spill] sm:$0xff]  ;;  %v10864_v42 = vld [vmem:[%s11061_s15 + $0x3b0] sm:$0xff]  }
 0x328   : > { %v10810_v11 = vld [vmem:[%s11056_s12 + $0xa8] ss:$20 sps:$4 sm:$0xff]   ;;  %v13957_v48 = vld [vmem:[#allocation37_spill] sm:$0xff] }
 0x329   : > { %2773 = vst [vmem:[#allocation2 + $0x1c0] sm:$0xff] %v2709_v16  ;;  %v2710_v5 = vadd.f32 %v2626_v20, %v627_v29  ;;  %9751 = vmatmul.mubr.bf16.gmra.mrb[220].mxu0 %v10801_v43  ;;  %v10813_v43 = vld [vmem:[%s11056_s12 + $0xd4] ss:$20 sps:$4 sm:$0xff]  }
 0x32a   : > { %9754 = vmatprep.mubr.bf16.mxu0 %v10805_v32  ;;  %9815 = vmatpush3.bf16.msra.mxu0 %v10820_v9  ;;  %v630_v32 = vld [vmem:[#allocation2 + $0x1e0] sm:$0xff] }
 0x32b   : > { %2774 = vst [vmem:[#allocation2 + $0x1c8] sm:$0xff] %v2710_v5  ;;  %6926 = vmatmul.mubr.bf16.gmra.mrb[196].mxu1 %v10804_v27  ;;  %9816 = vmatprep.subr.bf16.mxu0 %v10831_v45  ;;  %v10812_v27 = vld [vmem:[%s11056_s12 + $0x150] ss:$20 sps:$4 sm:$0xff]   ;;  %v10816_v5 = vld [vmem:[%s11056_s12 + $0x178] ss:$20 sps:$4 sm:$0xff]  }
 0x32c   : > { %v2341_v49 = vpop.f32.mrb[116].mxu0  ;;  %6933 = vmatprep.mubr.bf16.mxu1 %v10807_v58 }
 0x32d   : > { %v2631_v51 = vadd.f32 %v13955_v17, %v2341_v49  ;;  %v2343_v1 = vpop.f32.mrb[117].mxu0 }
 0x32e   : > { %v2344_v55 = vpop.f32.mrb[118].mxu0  ;;  %9817 = vmatpush3.bf16.msra.mxu0 %v10831_v45  ;;  %v631_v45 = vld [vmem:[#allocation2 + $0x1e8] sm:$0xff]  ;;  %v10875_v1 = vld [vmem:[%s11061_s15 + $0x3b8] sm:$0xff]  }
 0x32f   : > { %v2711_v9 = vadd.f32 %v2631_v51, %v628_v10  ;;  %v2634_v60 = vadd.f32 %v13956_v22, %v2344_v55  ;;  %v2346_v53 = vpop.f32.mrb[119].mxu0  ;;  %9818 = vmatprep.subr.bf16.mxu0 %v10842_v21  ;;  %v10815_v51 = vld [vmem:[%s11056_s12 + $0xd0] ss:$20 sps:$4 sm:$0xff]  }
 0x330   : > { %v632_v55 = vld [vmem:[#allocation2 + $0x1f0] sm:$0xff] }
 0x331   : > { %2775 = vst [vmem:[#allocation2 + $0x1d0] sm:$0xff] %v2711_v9  ;;  %v2712_v29 = vadd.f32 %v2634_v60, %v629_v62  ;;  %9755 = vmatmul.mubr.bf16.gmra.mrb[224].mxu0 %v10806_v36  ;;  %v10818_v36 = vld [vmem:[%s11056_s12 + $0xfc] ss:$20 sps:$4 sm:$0xff]   ;;  %v13959_v9 = vld [vmem:[#allocation36_spill] sm:$0xff]  ;;  %v10817_v53 = vld [vmem:[%s11056_s12 + $0x1a0] ss:$20 sps:$4 sm:$0xff]  }
 0x332   : > { %9758 = vmatprep.mubr.bf16.mxu0 %v10811_v30  ;;  %9819 = vmatpush3.bf16.msra.mxu0 %v10842_v21  ;;  %v13958_v21 = vld [vmem:[#allocation39_spill] sm:$0xff] }
 0x333   : > { %2776 = vst [vmem:[#allocation2 + $0x1d8] sm:$0xff] %v2712_v29  ;;  %6934 = vmatmul.mubr.bf16.gmra.mrb[200].mxu1 %v10810_v11  ;;  %9820 = vmatprep.subr.bf16.mxu0 %v10853_v34  ;;  %v633_v11 = vld [vmem:[#allocation2 + $0x1f8] sm:$0xff] }
 0x334   : > { %v2349_v16 = vpop.f32.mrb[120].mxu0  ;;  %6941 = vmatprep.mubr.bf16.mxu1 %v10813_v43  ;;  %v10822_v43 = vld [vmem:[%s11056_s12 + $0x1c8] ss:$20 sps:$4 sm:$0xff]  }
 0x335   : > { %v2639_v20 = vadd.f32 %v13957_v48, %v2349_v16  ;;  %v2351_v8 = vpop.f32.mrb[121].mxu0  ;;  %v10821_v48 = vld [vmem:[%s11056_s12 + $0xf8] ss:$20 sps:$4 sm:$0xff]  }
 0x336   : > { %v2352_v58 = vpop.f32.mrb[122].mxu0  ;;  %9821 = vmatpush3.bf16.msra.mxu0 %v10853_v34 }
 0x337   : > { %v2713_v10 = vadd.f32 %v2639_v20, %v630_v32  ;;  %v2642_v49 = vadd.f32 %v13958_v21, %v2352_v58  ;;  %v2354_v17 = vpop.f32.mrb[123].mxu0  ;;  %9822 = vmatprep.subr.bf16.mxu0 %v10864_v42  ;;  %v13960_v32 = vld [vmem:[#allocation38_spill] sm:$0xff] }
 0x338   : > { %v10824_v20 = vld [vmem:[%s11056_s12 + $0x124] ss:$20 sps:$4 sm:$0xff]   ;;  %v13962_v17 = vld [vmem:[#allocation41_spill] sm:$0xff] }
 0x339   : > { %2777 = vst [vmem:[#allocation2 + $0x1e0] sm:$0xff] %v2713_v10  ;;  %v2714_v62 = vadd.f32 %v2642_v49, %v631_v45  ;;  %9759 = vmatmul.mubr.bf16.gmra.mrb[228].mxu0 %v10812_v27  ;;  %v13961_v45 = vld [vmem:[#allocation40_spill] sm:$0xff]  ;;  %v10823_v10 = vld [vmem:[%s11056_s12 + $0x1f0] ss:$20 sps:$4 sm:$0xff]  }
 0x33a   : > { %9762 = vmatprep.mubr.bf16.mxu0 %v10816_v5  ;;  %9823 = vmatpush3.bf16.msra.mxu0 %v10864_v42  ;;  %v10827_v49 = vld [vmem:[%s11056_s12 + $0x218] ss:$20 sps:$4 sm:$0xff]  }
 0x33b   : > { %2778 = vst [vmem:[#allocation2 + $0x1e8] sm:$0xff] %v2714_v62  ;;  %6942 = vmatmul.mubr.bf16.gmra.mrb[204].mxu1 %v10815_v51  ;;  %9824 = vmatprep.subr.bf16.mxu0 %v10875_v1  ;;  %v10829_v62 = vld [vmem:[%s11056_s12 + $0x14c] ss:$20 sps:$4 sm:$0xff]  }
 0x33c   : > { %v2357_v30 = vpop.f32.mrb[124].mxu0  ;;  %6949 = vmatprep.mubr.bf16.mxu1 %v10818_v36  ;;  %v10826_v36 = vld [vmem:[%s11056_s12 + $0x120] ss:$20 sps:$4 sm:$0xff]  }
 0x33d   : > { %v2647_v22 = vadd.f32 %v13959_v9, %v2357_v30  ;;  %v2359_v60 = vpop.f32.mrb[125].mxu0  ;;  %v13963_v30 = vld [vmem:[#allocation42_spill] sm:$0xff] }
 0x33e   : > { %v2360_v34 = vpop.f32.mrb[126].mxu0  ;;  %9825 = vmatpush3.bf16.msra.mxu0 %v10875_v1  ;;  %v10828_v60 = vld [vmem:[%s11056_s12 + $0x240] ss:$20 sps:$4 sm:$0xff]  }
 0x33f   : > { %v2715_v29 = vadd.f32 %v2647_v22, %v632_v55  ;;  %v2650_v42 = vadd.f32 %v13960_v32, %v2360_v34  ;;  %v2362_v16 = vpop.f32.mrb[127].mxu0  ;;  %v13964_v34 = vld [vmem:[#allocation43_spill] sm:$0xff]  ;;  %v10832_v32 = vld [vmem:[%s11056_s12 + $0x148] ss:$20 sps:$4 sm:$0xff]  }
 0x341   : > { %2779 = vst [vmem:[#allocation2 + $0x1f0] sm:$0xff] %v2715_v29  ;;  %v2716_v8 = vadd.f32 %v2650_v42, %v633_v11  ;;  %9763 = vmatmul.mubr.bf16.gmra.mrb[232].mxu0 %v10817_v53  ;;  %v10833_v11 = vld [vmem:[%s11056_s12 + $0x268] ss:$20 sps:$4 sm:$0xff]  }
 0x342   : > { %9766 = vmatprep.mubr.bf16.mxu0 %v10822_v43  ;;  %v10835_v42 = vld [vmem:[%s11056_s12 + $0x174] ss:$20 sps:$4 sm:$0xff]  }
 0x343   : > { %2780 = vst [vmem:[#allocation2 + $0x1f8] sm:$0xff] %v2716_v8  ;;  %6950 = vmatmul.mubr.bf16.gmra.mrb[208].mxu1 %v10821_v48  ;;  %v13965_v48 = vld [vmem:[#allocation44_spill] sm:$0xff] }
 0x344   : > { %v4225_v27 = vpop.f32.mrb[128].mxu0  ;;  %6957 = vmatprep.mubr.bf16.mxu1 %v10824_v20 }
 0x345   : > { %v12433_v58 = vadd.f32 %v13961_v45, %v4225_v27  ;;  %v4227_v5 = vpop.f32.mrb[129].mxu0  ;;  %v10834_v27 = vld [vmem:[%s11056_s12 + $0x290] ss:$20 sps:$4 sm:$0xff]  }
 0x346   : > { %v4228_v21 = vpop.f32.mrb[130].mxu0  ;;  %v10838_v5 = vld [vmem:[%s11056_s12 + $0x308] ss:$20 sps:$4 sm:$0xff]  }
 0x347   : > { %v12438_v51 = vadd.f32 %v13962_v17, %v4228_v21  ;;  %v4230_v1 = vpop.f32.mrb[131].mxu0  ;;  %v10837_v17 = vld [vmem:[%s11056_s12 + $0x170] ss:$20 sps:$4 sm:$0xff]  }
 0x348   : > { %v10840_v1 = vld [vmem:[%s11056_s12 + $0x19c] ss:$20 sps:$4 sm:$0xff]  }
 0x349   : > { %9767 = vmatmul.mubr.bf16.gmra.mrb[236].mxu0 %v10823_v10  ;;  %v13966_v10 = vld [vmem:[#allocation45_spill] sm:$0xff] }
 0x34a   : > { %9770 = vmatprep.mubr.bf16.mxu0 %v10827_v49 }
 0x34b   : > { %6958 = vmatmul.mubr.bf16.gmra.mrb[212].mxu1 %v10826_v36 }
 0x34c   : > { %v4233_v55 = vpop.f32.mrb[132].mxu0  ;;  %6965 = vmatprep.mubr.bf16.mxu1 %v10829_v62  ;;  %v13967_v62 = vld [vmem:[#allocation46_spill] sm:$0xff] }
 0x34d   : > { %v12443_v9 = vadd.f32 %v13963_v30, %v4233_v55  ;;  %v4235_v22 = vpop.f32.mrb[133].mxu0 }
 0x34e   : > { %v4236_v53 = vpop.f32.mrb[134].mxu0  ;;  %v10839_v22 = vld [vmem:[%s11056_s12 + $0x330] ss:$20 sps:$4 sm:$0xff]  }
 0x34f   : > { %v12448_v43 = vadd.f32 %v13964_v34, %v4236_v53  ;;  %v4238_v29 = vpop.f32.mrb[135].mxu0  ;;  %v10844_v53 = vld [vmem:[%s11056_s12 + $0x358] ss:$20 sps:$4 sm:$0xff]  }
 0x351   : > { %9771 = vmatmul.mubr.bf16.gmra.mrb[240].mxu0 %v10828_v60 }
 0x352   : > { %9774 = vmatprep.mubr.bf16.mxu0 %v10833_v11  ;;  %v13968_v11 = vld [vmem:[#allocation47_spill] sm:$0xff] }
 0x353   : > { %6966 = vmatmul.mubr.bf16.gmra.mrb[216].mxu1 %v10832_v32  ;;  %v10843_v32 = vld [vmem:[%s11056_s12 + $0x198] ss:$20 sps:$4 sm:$0xff]  }
 0x354   : > { %v4241_v16 = vpop.f32.mrb[136].mxu0  ;;  %6973 = vmatprep.mubr.bf16.mxu1 %v10835_v42  ;;  %v10846_v42 = vld [vmem:[%s11056_s12 + $0x1c4] ss:$20 sps:$4 sm:$0xff]  }
 0x355   : > { %v12453_v20 = vadd.f32 %v13965_v48, %v4241_v16  ;;  %v4243_v8 = vpop.f32.mrb[137].mxu0  ;;  %v13969_v48 = vld [vmem:[#allocation48_spill] sm:$0xff] }
 0x356   : > { %v4244_v45 = vpop.f32.mrb[138].mxu0 }
 0x357   : > { %v12458_v21 = vadd.f32 %v13966_v10, %v4244_v45  ;;  %v4246_v49 = vpop.f32.mrb[139].mxu0  ;;  %v10845_v45 = vld [vmem:[%s11056_s12 + $0x380] ss:$20 sps:$4 sm:$0xff]   ;;  %v10849_v10 = vld [vmem:[%s11056_s12 + $0x3a8] ss:$20 sps:$4 sm:$0xff]  }
 0x358   : > { %v13970_v49 = vld [vmem:[#allocation49_spill] sm:$0xff] }
 0x359   : > { %9775 = vmatmul.mubr.bf16.gmra.mrb[244].mxu0 %v10834_v27 }
 0x35a   : > { %9778 = vmatprep.mubr.bf16.mxu0 %v10838_v5 }
 0x35b   : > { %6974 = vmatmul.mubr.bf16.gmra.mrb[220].mxu1 %v10837_v17 }
 0x35c   : > { %v4249_v36 = vpop.f32.mrb[140].mxu0  ;;  %6981 = vmatprep.mubr.bf16.mxu1 %v10840_v1 }
 0x35d   : > { %v12463_v55 = vadd.f32 %v13967_v62, %v4249_v36  ;;  %v4251_v30 = vpop.f32.mrb[141].mxu0  ;;  %v10848_v36 = vld [vmem:[%s11056_s12 + $0x1c0] ss:$20 sps:$4 sm:$0xff]  }
 0x35e   : > { %v4252_v60 = vpop.f32.mrb[142].mxu0  ;;  %v10851_v62 = vld [vmem:[%s11056_s12 + $0x1ec] ss:$20 sps:$4 sm:$0xff]  }
 0x35f   : > { %v12468_v34 = vadd.f32 %v13968_v11, %v4252_v60  ;;  %v4254_v29 = vpop.f32.mrb[143].mxu0  ;;  %v10850_v11 = vld [vmem:[%s11056_s12 + $0x3d0] ss:$20 sps:$4 sm:$0xff]  }
 0x361   : > { %9779 = vmatmul.mubr.bf16.gmra.mrb[248].mxu0 %v10839_v22  ;;  %v13971_v22 = vld [vmem:[#allocation50_spill] sm:$0xff] }
 0x362   : > { %9782 = vmatprep.mubr.bf16.mxu0 %v10844_v53 }
 0x363   : > { %6982 = vmatmul.mubr.bf16.gmra.mrb[224].mxu1 %v10843_v32  ;;  %v10855_v32 = vld [vmem:[%s11056_s12 + $0x3f8] ss:$20 sps:$4 sm:$0xff]  }
 0x364   : > { %v4257_v16 = vpop.f32.mrb[144].mxu0  ;;  %6989 = vmatprep.mubr.bf16.mxu1 %v10846_v42  ;;  %v13972_v42 = vld [vmem:[#allocation51_spill] sm:$0xff] }
 0x365   : > { %v12473_v8 = vadd.f32 %v13969_v48, %v4257_v16  ;;  %v4259_v27 = vpop.f32.mrb[145].mxu0 }
 0x366   : > { %v4260_v5 = vpop.f32.mrb[146].mxu0  ;;  %v10854_v27 = vld [vmem:[%s11056_s12 + $0x1e8] ss:$20 sps:$4 sm:$0xff]  }
 0x367   : > { %v12478_v17 = vadd.f32 %v13970_v49, %v4260_v5  ;;  %v4262_v1 = vpop.f32.mrb[147].mxu0 }
 0x369   : > { %9783 = vmatmul.mubr.bf16.gmra.mrb[252].mxu0 %v10845_v45  ;;  %v10857_v45 = vld [vmem:[%s11056_s12 + $0x214] ss:$20 sps:$4 sm:$0xff]  }
 0x36a   : > { %9786 = vmatprep.mubr.bf16.mxu0 %v10849_v10  ;;  %v13973_v10 = vld [vmem:[#allocation52_spill] sm:$0xff] }
 0x36b   : > { %6990 = vmatmul.mubr.bf16.gmra.mrb[228].mxu1 %v10848_v36  ;;  %v10856_v36 = vld [vmem:[%s11056_s12 + $0x420] ss:$20 sps:$4 sm:$0xff]  }
 0x36c   : > { %v4265_v30 = vpop.f32.mrb[148].mxu0  ;;  %6997 = vmatprep.mubr.bf16.mxu1 %v10851_v62 }
 0x36d   : > { %v12483_v60 = vadd.f32 %v13971_v22, %v4265_v30  ;;  %v4267_v53 = vpop.f32.mrb[149].mxu0  ;;  %v10860_v30 = vld [vmem:[%s11056_s12 + $0x448] ss:$20 sps:$4 sm:$0xff]   ;;  %v13974_v22 = vld [vmem:[#allocation53_spill] sm:$0xff] }
 0x36e   : > { %v4268_v29 = vpop.f32.mrb[150].mxu0 }
 0x36f   : > { %v12488_v16 = vadd.f32 %v13972_v42, %v4268_v29  ;;  %v4270_v48 = vpop.f32.mrb[151].mxu0 }
 0x370   : > { %v13975_v48 = vld [vmem:[#allocation54_spill] sm:$0xff] }
 0x371   : > { %9787 = vmatmul.mubr.bf16.gmra.mrb[0].mxu0 %v10850_v11  ;;  %v10859_v11 = vld [vmem:[%s11056_s12 + $0x210] ss:$20 sps:$4 sm:$0xff]  }
 0x372   : > { %9790 = vmatprep.mubr.bf16.mxu0 %v10855_v32  ;;  %v10862_v32 = vld [vmem:[%s11056_s12 + $0x23c] ss:$20 sps:$4 sm:$0xff]  }
 0x373   : > { %6998 = vmatmul.mubr.bf16.gmra.mrb[232].mxu1 %v10854_v27 }
 0x374   : > { %v4273_v5 = vpop.f32.mrb[152].mxu0  ;;  %7005 = vmatprep.mubr.bf16.mxu1 %v10857_v45 }
 0x375   : > { %v12493_v49 = vadd.f32 %v13973_v10, %v4273_v5  ;;  %v4275_v1 = vpop.f32.mrb[153].mxu0  ;;  %v10861_v5 = vld [vmem:[%s11056_s12 + $0x470] ss:$20 sps:$4 sm:$0xff]  }
 0x376   : > { %v4276_v62 = vpop.f32.mrb[154].mxu0  ;;  %v10866_v1 = vld [vmem:[%s11056_s12 + $0x498] ss:$20 sps:$4 sm:$0xff]  }
 0x377   : > { %v12498_v53 = vadd.f32 %v13974_v22, %v4276_v62  ;;  %v4278_v29 = vpop.f32.mrb[155].mxu0  ;;  %v13976_v62 = vld [vmem:[#allocation55_spill] sm:$0xff] }
 0x379   : > { %9791 = vmatmul.mubr.bf16.gmra.mrb[4].mxu0 %v10856_v36  ;;  %v10865_v36 = vld [vmem:[%s11056_s12 + $0x238] ss:$20 sps:$4 sm:$0xff]  }
 0x37a   : > { %9794 = vmatprep.mubr.bf16.mxu0 %v10860_v30  ;;  %v10868_v30 = vld [vmem:[%s11056_s12 + $0x264] ss:$20 sps:$4 sm:$0xff]  }
 0x37b   : > { %7006 = vmatmul.mubr.bf16.gmra.mrb[236].mxu1 %v10859_v11 }
 0x37c   : > { %v4281_v42 = vpop.f32.mrb[156].mxu0  ;;  %7013 = vmatprep.mubr.bf16.mxu1 %v10862_v32  ;;  %v13977_v32 = vld [vmem:[#allocation56_spill] sm:$0xff] }
 0x37d   : > { %v12503_v27 = vadd.f32 %v13975_v48, %v4281_v42  ;;  %v4283_v45 = vpop.f32.mrb[157].mxu0 }
 0x37e   : > { %v4284_v10 = vpop.f32.mrb[158].mxu0  ;;  %v10867_v45 = vld [vmem:[%s11056_s12 + $0x4c0] ss:$20 sps:$4 sm:$0xff]  }
 0x37f   : > { %v12508_v22 = vadd.f32 %v13976_v62, %v4284_v10  ;;  %v4286_v29 = vpop.f32.mrb[159].mxu0  ;;  %v10871_v10 = vld [vmem:[%s11056_s12 + $0x4e8] ss:$20 sps:$4 sm:$0xff]   ;;  %v13978_v62 = vld [vmem:[#allocation57_spill] sm:$0xff] }
 0x381   : > { %9795 = vmatmul.mubr.bf16.gmra.mrb[8].mxu0 %v10861_v5  ;;  %v10870_v5 = vld [vmem:[%s11056_s12 + $0x260] ss:$20 sps:$4 sm:$0xff]  }
 0x382   : > { %9798 = vmatprep.mubr.bf16.mxu0 %v10866_v1  ;;  %v10873_v1 = vld [vmem:[%s11056_s12 + $0x28c] ss:$20 sps:$4 sm:$0xff]  }
 0x383   : > { %7014 = vmatmul.mubr.bf16.gmra.mrb[240].mxu1 %v10865_v36 }
 0x384   : > { %v4289_v11 = vpop.f32.mrb[160].mxu0  ;;  %7021 = vmatprep.mubr.bf16.mxu1 %v10868_v30  ;;  %v13979_v30 = vld [vmem:[#allocation58_spill] sm:$0xff] }
 0x385   : > { %v12513_v42 = vadd.f32 %v13977_v32, %v4289_v11  ;;  %v4291_v48 = vpop.f32.mrb[161].mxu0 }
 0x386   : > { %v4292_v35 = vpop.f32.mrb[162].mxu0  ;;  %v10872_v48 = vld [vmem:[%s11056_s12 + $0x510] ss:$20 sps:$4 sm:$0xff]  }
 0x387   : > { %v12518_v33 = vadd.f32 %v13978_v62, %v4292_v35  ;;  %v4294_v29 = vpop.f32.mrb[163].mxu0  ;;  %v10877_v35 = vld [vmem:[%s11056_s12 + $0x538] ss:$20 sps:$4 sm:$0xff]   ;;  %v13980_v62 = vld [vmem:[#allocation59_spill] sm:$0xff] }
 0x389   : > { %9799 = vmatmul.mubr.bf16.gmra.mrb[12].mxu0 %v10867_v45  ;;  %v10876_v45 = vld [vmem:[%s11056_s12 + $0x288] ss:$20 sps:$4 sm:$0xff]  }
 0x38a   : > { %9802 = vmatprep.mubr.bf16.mxu0 %v10871_v10  ;;  %v10879_v10 = vld [vmem:[%s11056_s12 + $0x2b4] ss:$20 sps:$4 sm:$0xff]  }
 0x38b   : > { %7022 = vmatmul.mubr.bf16.gmra.mrb[244].mxu1 %v10870_v5 }
 0x38c   : > { %v4297_v36 = vpop.f32.mrb[164].mxu0  ;;  %7029 = vmatprep.mubr.bf16.mxu1 %v10873_v1 }
 0x38d   : > { %v12523_v11 = vadd.f32 %v13979_v30, %v4297_v36  ;;  %v4299_v32 = vpop.f32.mrb[165].mxu0  ;;  %v10878_v30 = vld [vmem:[%s11056_s12 + $0x560] ss:$20 sps:$4 sm:$0xff]  }
 0x38e   : > { %v4300_v41 = vpop.f32.mrb[166].mxu0 }
 0x38f   : > { %v12528_v14 = vadd.f32 %v13980_v62, %v4300_v41  ;;  %v4302_v29 = vpop.f32.mrb[167].mxu0  ;;  %v10882_v41 = vld [vmem:[%s11056_s12 + $0x60] ss:$20 sps:$4 sm:$0xff]  }
 0x391   : > { %9803 = vmatmul.mubr.bf16.gmra.mrb[16].mxu0 %v10872_v48  ;;  %v10881_v48 = vld [vmem:[%s11056_s12 + $0x2b0] ss:$20 sps:$4 sm:$0xff]  }
 0x392   : > { %9806 = vmatprep.mubr.bf16.mxu0 %v10877_v35  ;;  %v10885_v35 = vld [vmem:[%s11056_s12 + $0x32c] ss:$20 sps:$4 sm:$0xff]  }
 0x393   : > { %7030 = vmatmul.mubr.bf16.gmra.mrb[248].mxu1 %v10876_v45 }
 0x394   : > { %v4305_v5 = vpop.f32.mrb[168].mxu0  ;;  %7037 = vmatprep.mubr.bf16.mxu1 %v10879_v10 }
 0x395   : > { %v12533_v1 = vadd.f32 %v12034_v7, %v4305_v5  ;;  %v4307_v36 = vpop.f32.mrb[169].mxu0  ;;  %v10886_v5 = vld [vmem:[%s11056_s12 + $0x88] ss:$20 sps:$4 sm:$0xff]  }
 0x396   : > { %v4308_v32 = vpop.f32.mrb[170].mxu0 }
 0x397   : > { %v12538_v62 = vadd.f32 %v12040_v44, %v4308_v32  ;;  %v4310_v29 = vpop.f32.mrb[171].mxu0  ;;  %v10887_v44 = vld [vmem:[%s11056_s12 + $0xb0] ss:$20 sps:$4 sm:$0xff]  }
 0x399   : > { %9807 = vmatmul.mubr.bf16.gmra.mrb[20].mxu0 %v10878_v30  ;;  %v10883_v30 = vld [vmem:[%s11056_s12 + $0x328] ss:$20 sps:$4 sm:$0xff]  }
 0x39a   : > { %9826 = vmatprep.mubr.bf16.mxu0 %v10882_v41  ;;  %v10890_v41 = vld [vmem:[%s11056_s12 + $0x354] ss:$20 sps:$4 sm:$0xff]  }
 0x39b   : > { %7038 = vmatmul.mubr.bf16.gmra.mrb[252].mxu1 %v10881_v48 }
 0x39c   : > { %v4313_v45 = vpop.f32.mrb[172].mxu0  ;;  %7045 = vmatprep.mubr.bf16.mxu1 %v10885_v35 }
 0x39d   : > { %v12543_v7 = vadd.f32 %v12053_v56, %v4313_v45  ;;  %v4315_v10 = vpop.f32.mrb[173].mxu0  ;;  %v10891_v45 = vld [vmem:[%s11056_s12 + $0xd8] ss:$20 sps:$4 sm:$0xff]  }
 0x39e   : > { %v4316_v36 = vpop.f32.mrb[174].mxu0 }
 0x39f   : > { %v12548_v32 = vadd.f32 %v12059_v61, %v4316_v36  ;;  %v4318_v29 = vpop.f32.mrb[175].mxu0  ;;  %v10892_v61 = vld [vmem:[%s11056_s12 + $0x100] ss:$20 sps:$4 sm:$0xff]  }
 0x3a1   : > { %9827 = vmatmul.mubr.bf16.vlgmr.msra.gmra.mrb[24].mxu0 %v10886_v5  ;;  %v10888_v5 = vld [vmem:[%s11056_s12 + $0x350] ss:$20 sps:$4 sm:$0xff]  }
 0x3a2   : > { %9830 = vmatprep.mubr.bf16.mxu0 %v10887_v44  ;;  %v10895_v44 = vld [vmem:[%s11056_s12 + $0x37c] ss:$20 sps:$4 sm:$0xff]  }
 0x3a3   : > { %7046 = vmatmul.mubr.bf16.gmra.mrb[0].mxu1 %v10883_v30 }
 0x3a4   : > { %v4321_v48 = vpop.f32.mrb[176].mxu0  ;;  %7053 = vmatprep.mubr.bf16.mxu1 %v10890_v41 }
 0x3a5   : > { %v12553_v56 = vadd.f32 %v12070_v26, %v4321_v48  ;;  %v4323_v35 = vpop.f32.mrb[177].mxu0  ;;  %v10896_v48 = vld [vmem:[%s11056_s12 + $0x128] ss:$20 sps:$4 sm:$0xff]  }
 0x3a6   : > { %v4324_v10 = vpop.f32.mrb[178].mxu0 }
 0x3a7   : > { %v12558_v36 = vadd.f32 %v12077_v54, %v4324_v10  ;;  %v4326_v29 = vpop.f32.mrb[179].mxu0  ;;  %v10897_v54 = vld [vmem:[%s11056_s12 + $0x150] ss:$20 sps:$4 sm:$0xff]  }
 0x3a9   : > { %9831 = vmatmul.mubr.bf16.gmra.mrb[28].mxu0 %v10891_v45  ;;  %v10893_v45 = vld [vmem:[%s11056_s12 + $0x378] ss:$20 sps:$4 sm:$0xff]  }
 0x3aa   : > { %9834 = vmatprep.mubr.bf16.mxu0 %v10892_v61  ;;  %v10900_v61 = vld [vmem:[%s11056_s12 + $0x3a4] ss:$20 sps:$4 sm:$0xff]  }
 0x3ab   : > { %7054 = vmatmul.mubr.bf16.gmra.mrb[4].mxu1 %v10888_v5 }
 0x3ac   : > { %v4329_v30 = vpop.f32.mrb[180].mxu0  ;;  %7061 = vmatprep.mubr.bf16.mxu1 %v10895_v44 }
 0x3ad   : > { %v12563_v26 = vadd.f32 %v12087_v50, %v4329_v30  ;;  %v4331_v41 = vpop.f32.mrb[181].mxu0  ;;  %v13981_v50 = vld [vmem:[#allocation60_spill] sm:$0xff] }
 0x3ae   : > { %v4332_v35 = vpop.f32.mrb[182].mxu0  ;;  %v10901_v41 = vld [vmem:[%s11056_s12 + $0x178] ss:$20 sps:$4 sm:$0xff]  }
 0x3af   : > { %v12568_v10 = vadd.f32 %v12093_v28, %v4332_v35  ;;  %v4334_v29 = vpop.f32.mrb[183].mxu0  ;;  %v10902_v28 = vld [vmem:[%s11056_s12 + $0x1a0] ss:$20 sps:$4 sm:$0xff]  }
 0x3b0   : > { %v13982_v35 = vld [vmem:[#allocation61_spill] sm:$0xff] }
 0x3b1   : > { %9835 = vmatmul.mubr.bf16.gmra.mrb[32].mxu0 %v10896_v48  ;;  %v10898_v48 = vld [vmem:[%s11056_s12 + $0x3a0] ss:$20 sps:$4 sm:$0xff]  }
 0x3b2   : > { %9838 = vmatprep.mubr.bf16.mxu0 %v10897_v54  ;;  %v10905_v54 = vld [vmem:[%s11056_s12 + $0x3cc] ss:$20 sps:$4 sm:$0xff]  }
 0x3b3   : > { %7062 = vmatmul.mubr.bf16.gmra.mrb[8].mxu1 %v10893_v45 }
 0x3b4   : > { %v4337_v5 = vpop.f32.mrb[184].mxu0  ;;  %7069 = vmatprep.mubr.bf16.mxu1 %v10900_v61 }
 0x3b5   : > { %v12573_v44 = vadd.f32 %v13981_v50, %v4337_v5  ;;  %v4339_v30 = vpop.f32.mrb[185].mxu0  ;;  %v10906_v50 = vld [vmem:[%s11056_s12 + $0x1c8] ss:$20 sps:$4 sm:$0xff]  }
 0x3b6   : > { %v4340_v19 = vpop.f32.mrb[186].mxu0 }
 0x3b7   : > { %v12578_v40 = vadd.f32 %v13982_v35, %v4340_v19  ;;  %v4342_v29 = vpop.f32.mrb[187].mxu0  ;;  %v10907_v19 = vld [vmem:[%s11056_s12 + $0x1f0] ss:$20 sps:$4 sm:$0xff]  }
 0x3b9   : > { %9839 = vmatmul.mubr.bf16.gmra.mrb[36].mxu0 %v10901_v41  ;;  %v10903_v41 = vld [vmem:[%s11056_s12 + $0x3c8] ss:$20 sps:$4 sm:$0xff]  }
 0x3ba   : > { %9842 = vmatprep.mubr.bf16.mxu0 %v10902_v28  ;;  %v10910_v28 = vld [vmem:[%s11056_s12 + $0x3f4] ss:$20 sps:$4 sm:$0xff]  }
 0x3bb   : > { %7070 = vmatmul.mubr.bf16.gmra.mrb[12].mxu1 %v10898_v48 }
 0x3bc   : > { %v4345_v45 = vpop.f32.mrb[188].mxu0  ;;  %7077 = vmatprep.mubr.bf16.mxu1 %v10905_v54 }
 0x3bd   : > { %v12583_v61 = vadd.f32 %v12122_v13, %v4345_v45  ;;  %v4347_v5 = vpop.f32.mrb[189].mxu0  ;;  %v10911_v45 = vld [vmem:[%s11056_s12 + $0x218] ss:$20 sps:$4 sm:$0xff]  }
 0x3be   : > { %v4348_v30 = vpop.f32.mrb[190].mxu0 }
 0x3bf   : > { %v12588_v35 = vadd.f32 %v12129_v0, %v4348_v30  ;;  %v4350_v29 = vpop.f32.mrb[191].mxu0  ;;  %v10912_v0 = vld [vmem:[%s11056_s12 + $0x240] ss:$20 sps:$4 sm:$0xff]  }
 0x3c1   : > { %9843 = vmatmul.mubr.bf16.gmra.mrb[40].mxu0 %v10906_v50  ;;  %v10908_v50 = vld [vmem:[%s11056_s12 + $0x3f0] ss:$20 sps:$4 sm:$0xff]  }
 0x3c2   : > { %9846 = vmatprep.mubr.bf16.mxu0 %v10907_v19  ;;  %v10915_v19 = vld [vmem:[%s11056_s12 + $0x41c] ss:$20 sps:$4 sm:$0xff]  }
 0x3c3   : > { %7078 = vmatmul.mubr.bf16.gmra.mrb[16].mxu1 %v10903_v41 }
 0x3c4   : > { %v4353_v48 = vpop.f32.mrb[192].mxu0  ;;  %7085 = vmatprep.mubr.bf16.mxu1 %v10910_v28 }
 0x3c5   : > { %v12593_v13 = vadd.f32 %v12141_v12, %v4353_v48  ;;  %v4355_v54 = vpop.f32.mrb[193].mxu0  ;;  %v10916_v48 = vld [vmem:[%s11056_s12 + $0x268] ss:$20 sps:$4 sm:$0xff]  }
 0x3c6   : > { %v4356_v5 = vpop.f32.mrb[194].mxu0 }
 0x3c7   : > { %v12598_v30 = vadd.f32 %v12149_v6, %v4356_v5  ;;  %v4358_v29 = vpop.f32.mrb[195].mxu0  ;;  %v10917_v6 = vld [vmem:[%s11056_s12 + $0x290] ss:$20 sps:$4 sm:$0xff]  }
 0x3c9   : > { %9847 = vmatmul.mubr.bf16.gmra.mrb[44].mxu0 %v10911_v45  ;;  %v10913_v45 = vld [vmem:[%s11056_s12 + $0x418] ss:$20 sps:$4 sm:$0xff]  }
 0x3ca   : > { %9850 = vmatprep.mubr.bf16.mxu0 %v10912_v0  ;;  %v10920_v0 = vld [vmem:[%s11056_s12 + $0x444] ss:$20 sps:$4 sm:$0xff]  }
 0x3cb   : > { %7086 = vmatmul.mubr.bf16.gmra.mrb[20].mxu1 %v10908_v50 }
 0x3cc   : > { %v4361_v41 = vpop.f32.mrb[196].mxu0  ;;  %7093 = vmatprep.mubr.bf16.mxu1 %v10915_v19 }
 0x3cd   : > { %v12603_v12 = vadd.f32 %v12160_v39, %v4361_v41  ;;  %v4363_v28 = vpop.f32.mrb[197].mxu0  ;;  %v10921_v41 = vld [vmem:[%s11056_s12 + $0x2b8] ss:$20 sps:$4 sm:$0xff]  }
 0x3ce   : > { %v4364_v54 = vpop.f32.mrb[198].mxu0 }
 0x3cf   : > { %v12608_v5 = vadd.f32 %v12167_v47, %v4364_v54  ;;  %v4366_v29 = vpop.f32.mrb[199].mxu0  ;;  %v10922_v47 = vld [vmem:[%s11056_s12 + $0x330] ss:$20 sps:$4 sm:$0xff]  }
 0x3d1   : > { %9851 = vmatmul.mubr.bf16.gmra.mrb[48].mxu0 %v10916_v48  ;;  %v10918_v48 = vld [vmem:[%s11056_s12 + $0x440] ss:$20 sps:$4 sm:$0xff]  }
 0x3d2   : > { %9854 = vmatprep.mubr.bf16.mxu0 %v10917_v6  ;;  %v10925_v6 = vld [vmem:[%s11056_s12 + $0x46c] ss:$20 sps:$4 sm:$0xff]  }
 0x3d3   : > { %7094 = vmatmul.mubr.bf16.gmra.mrb[24].mxu1 %v10913_v45 }
 0x3d4   : > { %v4369_v50 = vpop.f32.mrb[200].mxu0  ;;  %7101 = vmatprep.mubr.bf16.mxu1 %v10920_v0 }
 0x3d5   : > { %v12613_v39 = vadd.f32 %v12179_v38, %v4369_v50  ;;  %v4371_v19 = vpop.f32.mrb[201].mxu0  ;;  %v10926_v50 = vld [vmem:[%s11056_s12 + $0x358] ss:$20 sps:$4 sm:$0xff]  }
 0x3d6   : > { %v4372_v28 = vpop.f32.mrb[202].mxu0 }
 0x3d7   : > { %v12618_v54 = vadd.f32 %v12186_v18, %v4372_v28  ;;  %v4374_v29 = vpop.f32.mrb[203].mxu0  ;;  %v10927_v18 = vld [vmem:[%s11056_s12 + $0x380] ss:$20 sps:$4 sm:$0xff]  }
 0x3d9   : > { %9855 = vmatmul.mubr.bf16.gmra.mrb[52].mxu0 %v10921_v41  ;;  %v10923_v41 = vld [vmem:[%s11056_s12 + $0x468] ss:$20 sps:$4 sm:$0xff]  }
 0x3da   : > { %9858 = vmatprep.mubr.bf16.mxu0 %v10922_v47  ;;  %v10930_v47 = vld [vmem:[%s11056_s12 + $0x494] ss:$20 sps:$4 sm:$0xff]  }
 0x3db   : > { %7102 = vmatmul.mubr.bf16.gmra.mrb[28].mxu1 %v10918_v48 }
 0x3dc   : > { %v4377_v45 = vpop.f32.mrb[204].mxu0  ;;  %7109 = vmatprep.mubr.bf16.mxu1 %v10925_v6 }
 0x3dd   : > { %v12623_v38 = vadd.f32 %v12197_v25, %v4377_v45  ;;  %v4379_v0 = vpop.f32.mrb[205].mxu0  ;;  %v10931_v45 = vld [vmem:[%s11056_s12 + $0x3a8] ss:$20 sps:$4 sm:$0xff]  }
 0x3de   : > { %v4380_v19 = vpop.f32.mrb[206].mxu0 }
 0x3df   : > { %v12628_v28 = vadd.f32 %v12203_v63, %v4380_v19  ;;  %v4382_v29 = vpop.f32.mrb[207].mxu0  ;;  %v10932_v63 = vld [vmem:[%s11056_s12 + $0x3d0] ss:$20 sps:$4 sm:$0xff]  }
 0x3e1   : > { %9859 = vmatmul.mubr.bf16.gmra.mrb[56].mxu0 %v10926_v50  ;;  %v10928_v50 = vld [vmem:[%s11056_s12 + $0x490] ss:$20 sps:$4 sm:$0xff]  }
 0x3e2   : > { %9862 = vmatprep.mubr.bf16.mxu0 %v10927_v18  ;;  %v10935_v18 = vld [vmem:[%s11056_s12 + $0x4bc] ss:$20 sps:$4 sm:$0xff]  }
 0x3e3   : > { %7110 = vmatmul.mubr.bf16.gmra.mrb[32].mxu1 %v10923_v41 }
 0x3e4   : > { %v4385_v48 = vpop.f32.mrb[208].mxu0  ;;  %7117 = vmatprep.mubr.bf16.mxu1 %v10930_v47 }
 0x3e5   : > { %v12633_v25 = vadd.f32 %v12211_v59, %v4385_v48  ;;  %v4387_v6 = vpop.f32.mrb[209].mxu0  ;;  %v10936_v48 = vld [vmem:[%s11056_s12 + $0x3f8] ss:$20 sps:$4 sm:$0xff]  }
 0x3e6   : > { %v4388_v0 = vpop.f32.mrb[210].mxu0 }
 0x3e7   : > { %v12638_v19 = vadd.f32 %v12215_v24, %v4388_v0  ;;  %v4390_v29 = vpop.f32.mrb[211].mxu0 }
 0x3e8   : > { %v10933_v29 = vld [vmem:[%s11056_s12 + $0x4b8] ss:$20 sps:$4 sm:$0xff]  }
 0x3e9   : > { %9863 = vmatmul.mubr.bf16.gmra.mrb[60].mxu0 %v10931_v45 }
 0x3ea   : > { %9866 = vmatprep.mubr.bf16.mxu0 %v10932_v63 }
 0x3eb   : > { %7118 = vmatmul.mubr.bf16.gmra.mrb[36].mxu1 %v10928_v50  ;;  %v10941_v50 = vld [vmem:[%s11056_s12 + $0x448] ss:$20 sps:$4 sm:$0xff]  }
 0x3ec   : > { %v4393_v41 = vpop.f32.mrb[212].mxu0  ;;  %7125 = vmatprep.mubr.bf16.mxu1 %v10935_v18 }
 0x3ed   : > { %v12643_v59 = vadd.f32 %v12224_v31, %v4393_v41  ;;  %v4395_v47 = vpop.f32.mrb[213].mxu0 }
 0x3ee   : > { %v4396_v6 = vpop.f32.mrb[214].mxu0  ;;  %v10942_v47 = vld [vmem:[%s11056_s12 + $0x470] ss:$20 sps:$4 sm:$0xff]  }
 0x3ef   : > { %v12648_v24 = vadd.f32 %v12230_v15, %v4396_v6  ;;  %v4398_v0 = vpop.f32.mrb[215].mxu0 }
 0x3f0   : > { %v10938_v0 = vld [vmem:[%s11056_s12 + $0x4e0] ss:$20 sps:$4 sm:$0xff]  }
 0x3f1   : > { %9867 = vmatmul.mubr.bf16.gmra.mrb[64].mxu0 %v10936_v48 }
 0x3f2   : > { %9870 = vmatprep.mubr.bf16.mxu0 %v10937_v23 }
 0x3f3   : > { %7126 = vmatmul.mubr.bf16.gmra.mrb[40].mxu1 %v10933_v29  ;;  %v10945_v29 = vld [vmem:[%s11056_s12 + $0x50c] ss:$20 sps:$4 sm:$0xff]  }
 0x3f4   : > { %v9748_v45 = vpop.f32.mrb[216].mxu0  ;;  %7133 = vmatprep.mubr.bf16.mxu1 %v10940_v57 }
 0x3f5   : > { %v12653_v31 = vadd.f32 %v9748_v45, %v12443_v9  ;;  %v4803_v63 = vpop.f32.mrb[217].mxu0 }
 0x3f6   : > { %v12657_v18 = vadd.f32 %v4803_v63, %v12433_v58  ;;  %v12659_v15 = vpop.f32.mrb[192].mxu1  ;;  %v9749_v41 = vpop.f32.mrb[218].mxu0 }
 0x3f7   : > { %v12663_v48 = vadd.f32 %v9749_v41, %v12448_v43  ;;  %v6921_v23 = vpop.f32.mrb[193].mxu1  ;;  %v4806_v6 = vpop.f32.mrb[219].mxu0  ;;  %v10946_v41 = vld [vmem:[%s11056_s12 + $0x498] ss:$20 sps:$4 sm:$0xff]  }
 0x3f8   : > { %v12667_v57 = vadd.f32 %v4806_v6, %v12438_v51  ;;  %v12669_v9 = vpop.f32.mrb[194].mxu1 }
 0x3f9   : > { %13983 = vst [vmem:[#allocation17_spill] sm:$0xff] %v12669_v9  ;;  %v6924_v58 = vpop.f32.mrb[195].mxu1  ;;  %9871 = vmatmul.mubr.bf16.gmra.mrb[68].mxu0 %v10941_v50  ;;  %v10947_v9 = vld [vmem:[%s11056_s12 + $0x4c0] ss:$20 sps:$4 sm:$0xff]  }
 0x3fa   : > { %9874 = vmatprep.mubr.bf16.mxu0 %v10942_v47  ;;  %v10943_v58 = vld [vmem:[%s11056_s12 + $0x508] ss:$20 sps:$4 sm:$0xff]  }
 0x3fb   : > { %7134 = vmatmul.mubr.bf16.gmra.mrb[44].mxu1 %v10938_v0 }
 0x3fc   : > { %v9752_v45 = vpop.f32.mrb[220].mxu0  ;;  %7141 = vmatprep.mubr.bf16.mxu1 %v10945_v29 }
 0x3fd   : > { %v12673_v43 = vadd.f32 %v9752_v45, %v12463_v55  ;;  %v4819_v63 = vpop.f32.mrb[221].mxu0  ;;  %v10950_v45 = vld [vmem:[%s11056_s12 + $0x534] ss:$20 sps:$4 sm:$0xff]  }
 0x3fe   : > { %v12677_v23 = vadd.f32 %v4819_v63, %v12453_v20  ;;  %v12679_v51 = vpop.f32.mrb[196].mxu1  ;;  %v9753_v6 = vpop.f32.mrb[222].mxu0 }
 0x3ff   : > { %v12683_v50 = vadd.f32 %v9753_v6, %v12468_v34  ;;  %v6929_v47 = vpop.f32.mrb[197].mxu1  ;;  %v4822_v0 = vpop.f32.mrb[223].mxu0 }
 0x400   : > { %v12687_v55 = vadd.f32 %v4822_v0, %v12458_v21  ;;  %v12689_v29 = vpop.f32.mrb[198].mxu1  ;;  %v10951_v47 = vld [vmem:[%s11056_s12 + $0x4e8] ss:$20 sps:$4 sm:$0xff]  }
 0x401   : > { %13984 = vst [vmem:[#allocation19_spill] sm:$0xff] %v12683_v50  ;;  %v6932_v20 = vpop.f32.mrb[199].mxu1  ;;  %9875 = vmatmul.mubr.bf16.gmra.mrb[72].mxu0 %v10946_v41 }
 0x402   : > { %13985 = vst [vmem:[#allocation16_spill] sm:$0xff] %v12687_v55  ;;  %9878 = vmatprep.mubr.bf16.mxu0 %v10947_v9  ;;  %v10952_v55 = vld [vmem:[%s11056_s12 + $0x510] ss:$20 sps:$4 sm:$0xff]  }
 0x403   : > { %7142 = vmatmul.mubr.bf16.gmra.mrb[48].mxu1 %v10943_v58  ;;  %v10948_v20 = vld [vmem:[%s11056_s12 + $0x530] ss:$20 sps:$4 sm:$0xff]  }
 0x404   : > { %v9756_v63 = vpop.f32.mrb[224].mxu0  ;;  %7149 = vmatprep.mubr.bf16.mxu1 %v10950_v45 }
 0x405   : > { %v12693_v34 = vadd.f32 %v9756_v63, %v12483_v60  ;;  %v4835_v6 = vpop.f32.mrb[225].mxu0  ;;  %v10955_v63 = vld [vmem:[%s11056_s12 + $0x55c] ss:$20 sps:$4 sm:$0xff]  }
 0x406   : > { %v12697_v50 = vadd.f32 %v4835_v6, %v12473_v8  ;;  %v12699_v21 = vpop.f32.mrb[200].mxu1  ;;  %v9757_v0 = vpop.f32.mrb[226].mxu0 }
 0x407   : > { %v12703_v41 = vadd.f32 %v9757_v0, %v12488_v16  ;;  %v6937_v9 = vpop.f32.mrb[201].mxu1  ;;  %v4838_v58 = vpop.f32.mrb[227].mxu0 }
 0x408   : > { %v12707_v60 = vadd.f32 %v4838_v58, %v12478_v17  ;;  %v12709_v45 = vpop.f32.mrb[202].mxu1  ;;  %v10956_v9 = vld [vmem:[%s11056_s12 + $0x538] ss:$20 sps:$4 sm:$0xff]  }
 0x409   : > { %13986 = vst [vmem:[#allocation18_spill] sm:$0xff] %v12703_v41  ;;  %v6940_v8 = vpop.f32.mrb[203].mxu1  ;;  %9879 = vmatmul.mubr.bf16.gmra.mrb[76].mxu0 %v10951_v47 }
 0x40a   : > { %13987 = vst [vmem:[#allocation21_spill] sm:$0xff] %v12707_v60  ;;  %9882 = vmatprep.mubr.bf16.mxu0 %v10952_v55  ;;  %v10957_v60 = vld [vmem:[%s11056_s12 + $0x560] ss:$20 sps:$4 sm:$0xff]   ;;  %v10953_v8 = vld [vmem:[%s11056_s12 + $0x558] ss:$20 sps:$4 sm:$0xff]  }
 0x40b   : > { %7150 = vmatmul.mubr.bf16.gmra.mrb[52].mxu1 %v10948_v20 }
 0x40c   : > { %v9760_v6 = vpop.f32.mrb[228].mxu0  ;;  %7157 = vmatprep.mubr.bf16.mxu1 %v10955_v63 }
 0x40d   : > { %v12713_v16 = vadd.f32 %v9760_v6, %v12503_v27  ;;  %v4851_v0 = vpop.f32.mrb[229].mxu0  ;;  %v10960_v6 = vld [vmem:[%s11056_s12 + $0x584] ss:$20 sps:$4 sm:$0xff]  }
 0x40e   : > { %v12717_v41 = vadd.f32 %v4851_v0, %v12493_v49  ;;  %v12719_v17 = vpop.f32.mrb[204].mxu1  ;;  %v9761_v58 = vpop.f32.mrb[230].mxu0 }
 0x40f   : > { %v12723_v47 = vadd.f32 %v9761_v58, %v12508_v22  ;;  %v6945_v55 = vpop.f32.mrb[205].mxu1  ;;  %v4854_v20 = vpop.f32.mrb[231].mxu0  ;;  %v10961_v58 = vld [vmem:[%s11056_s12 + $0x588] ss:$20 sps:$4 sm:$0xff]  }
 0x410   : > { %13988 = vst [vmem:[#allocation23_spill] sm:$0xff] %v12717_v41  ;;  %v12727_v63 = vadd.f32 %v4854_v20, %v12498_v53  ;;  %v12729_v27 = vpop.f32.mrb[206].mxu1 }
 0x411   : > { %v6948_v49 = vpop.f32.mrb[207].mxu1  ;;  %9883 = vmatmul.mubr.bf16.gmra.mrb[80].mxu0 %v10956_v9 }
 0x412   : > { %13989 = vst [vmem:[#allocation20_spill] sm:$0xff] %v12727_v63  ;;  %9886 = vmatprep.mubr.bf16.mxu0 %v10957_v60  ;;  %v10958_v60 = vld [vmem:[%s11056_s12 + $0x580] ss:$20 sps:$4 sm:$0xff]  }
 0x413   : > { %7158 = vmatmul.mubr.bf16.gmra.mrb[56].mxu1 %v10953_v8 }
 0x414   : > { %v9764_v0 = vpop.f32.mrb[232].mxu0  ;;  %7165 = vmatprep.mubr.bf16.mxu1 %v10960_v6 }
 0x415   : > { %v12733_v41 = vadd.f32 %v9764_v0, %v12523_v11  ;;  %v4867_v22 = vpop.f32.mrb[233].mxu0 }
 0x416   : > { %v12737_v55 = vadd.f32 %v4867_v22, %v12513_v42  ;;  %v12739_v53 = vpop.f32.mrb[208].mxu1  ;;  %v9765_v20 = vpop.f32.mrb[234].mxu0 }
 0x417   : > { %v12742_v63 = vadd.f32 %v9765_v20, %v12528_v14  ;;  %v6953_v49 = vpop.f32.mrb[209].mxu1  ;;  %v4870_v9 = vpop.f32.mrb[235].mxu0 }
 0x418   : > { %13990 = vst [vmem:[#allocation22_spill] sm:$0xff] %v12737_v55  ;;  %v12746_v8 = vadd.f32 %v4870_v9, %v12518_v33  ;;  %v12748_v6 = vpop.f32.mrb[210].mxu1 }
 0x419   : > { %v6956_v11 = vpop.f32.mrb[211].mxu1  ;;  %9887 = vmatmul.mubr.bf16.gmra.mrb[84].mxu0 %v10961_v58 }
 0x41b   : > { %7166 = vmatmul.mubr.bf16.gmra.mrb[60].mxu1 %v10958_v60 }
 0x41c   : > { %v9768_v0 = vpop.f32.mrb[236].mxu0 }
 0x41d   : > { %v12751_v42 = vadd.f32 %v9768_v0, %v12543_v7  ;;  %v4883_v22 = vpop.f32.mrb[237].mxu0 }
 0x41e   : > { %v12754_v55 = vadd.f32 %v4883_v22, %v12533_v1  ;;  %v12756_v14 = vpop.f32.mrb[212].mxu1  ;;  %v9769_v20 = vpop.f32.mrb[238].mxu0 }
 0x41f   : > { %v12759_v49 = vadd.f32 %v9769_v20, %v12548_v32  ;;  %v6961_v33 = vpop.f32.mrb[213].mxu1  ;;  %v4886_v9 = vpop.f32.mrb[239].mxu0 }
 0x420   : > { %13991 = vst [vmem:[#allocation25_spill] sm:$0xff] %v12754_v55  ;;  %v12762_v11 = vadd.f32 %v4886_v9, %v12538_v62  ;;  %v12764_v58 = vpop.f32.mrb[214].mxu1 }
 0x421   : > { %v6964_v60 = vpop.f32.mrb[215].mxu1 }
 0x422   : > { %13992 = vst [vmem:[#allocation27_spill] sm:$0xff] %v12762_v11 }
 0x424   : > { %v9772_v7 = vpop.f32.mrb[240].mxu0 }
 0x425   : > { %v12767_v0 = vadd.f32 %v9772_v7, %v12563_v26  ;;  %v4899_v1 = vpop.f32.mrb[241].mxu0 }
 0x426   : > { %v12770_v22 = vadd.f32 %v4899_v1, %v12553_v56  ;;  %v12772_v55 = vpop.f32.mrb[216].mxu1  ;;  %v9773_v32 = vpop.f32.mrb[242].mxu0 }
 0x427   : > { %v12775_v20 = vadd.f32 %v9773_v32, %v12568_v10  ;;  %v6969_v33 = vpop.f32.mrb[217].mxu1  ;;  %v4902_v62 = vpop.f32.mrb[243].mxu0 }
 0x428   : > { %13993 = vst [vmem:[#allocation24_spill] sm:$0xff] %v12770_v22  ;;  %v12778_v9 = vadd.f32 %v4902_v62, %v12558_v36  ;;  %v12780_v60 = vpop.f32.mrb[218].mxu1 }
 0x429   : > { %v6972_v11 = vpop.f32.mrb[219].mxu1 }
 0x42a   : > { %13994 = vst [vmem:[#allocation26_spill] sm:$0xff] %v12778_v9 }
 0x42c   : > { %v9776_v26 = vpop.f32.mrb[244].mxu0 }
 0x42d   : > { %v12783_v7 = vadd.f32 %v9776_v26, %v12583_v61  ;;  %v4915_v56 = vpop.f32.mrb[245].mxu0 }
 0x42e   : > { %v12786_v1 = vadd.f32 %v4915_v56, %v12573_v44  ;;  %v12788_v22 = vpop.f32.mrb[220].mxu1  ;;  %v9777_v10 = vpop.f32.mrb[246].mxu0 }
 0x42f   : > { %v12791_v32 = vadd.f32 %v9777_v10, %v12588_v35  ;;  %v6977_v33 = vpop.f32.mrb[221].mxu1  ;;  %v4918_v36 = vpop.f32.mrb[247].mxu0 }
 0x430   : > { %13995 = vst [vmem:[#allocation29_spill] sm:$0xff] %v12786_v1  ;;  %v12794_v62 = vadd.f32 %v4918_v36, %v12578_v40  ;;  %v12796_v11 = vpop.f32.mrb[222].mxu1 }
 0x431   : > { %13996 = vst [vmem:[#allocation31_spill] sm:$0xff] %v12791_v32  ;;  %v6980_v9 = vpop.f32.mrb[223].mxu1 }
 0x432   : > { %13997 = vst [vmem:[#allocation28_spill] sm:$0xff] %v12794_v62 }
 0x434   : > { %v9780_v61 = vpop.f32.mrb[248].mxu0 }
 0x435   : > { %v12799_v26 = vadd.f32 %v9780_v61, %v12603_v12  ;;  %v4931_v44 = vpop.f32.mrb[249].mxu0 }
 0x436   : > { %v12802_v56 = vadd.f32 %v4931_v44, %v12593_v13  ;;  %v12804_v1 = vpop.f32.mrb[224].mxu1  ;;  %v9781_v35 = vpop.f32.mrb[250].mxu0 }
 0x437   : > { %13998 = vst [vmem:[#allocation30_spill] sm:$0xff] %v12799_v26  ;;  %v12807_v10 = vadd.f32 %v9781_v35, %v12608_v5  ;;  %v6985_v33 = vpop.f32.mrb[225].mxu1  ;;  %v4934_v40 = vpop.f32.mrb[251].mxu0 }
 0x438   : > { %13999 = vst [vmem:[#allocation33_spill] sm:$0xff] %v12802_v56  ;;  %v12810_v36 = vadd.f32 %v4934_v40, %v12598_v30  ;;  %v12812_v9 = vpop.f32.mrb[226].mxu1 }
 0x439   : > { %14000 = vst [vmem:[#allocation35_spill] sm:$0xff] %v12807_v10  ;;  %v6988_v62 = vpop.f32.mrb[227].mxu1 }
 0x43a   : > { %14001 = vst [vmem:[#allocation32_spill] sm:$0xff] %v12810_v36 }
 0x43c   : > { %v9784_v12 = vpop.f32.mrb[252].mxu0 }
 0x43d   : > { %v12815_v61 = vadd.f32 %v9784_v12, %v12623_v38  ;;  %v4947_v13 = vpop.f32.mrb[253].mxu0 }
 0x43e   : > { %v12818_v44 = vadd.f32 %v4947_v13, %v12613_v39  ;;  %v12820_v56 = vpop.f32.mrb[228].mxu1  ;;  %v9785_v5 = vpop.f32.mrb[254].mxu0 }
 0x43f   : > { %14002 = vst [vmem:[#allocation34_spill] sm:$0xff] %v12815_v61  ;;  %v12823_v35 = vadd.f32 %v9785_v5, %v12628_v28  ;;  %v6993_v33 = vpop.f32.mrb[229].mxu1  ;;  %v4950_v30 = vpop.f32.mrb[255].mxu0 }
 0x440   : > { %14003 = vst [vmem:[#allocation37_spill] sm:$0xff] %v12818_v44  ;;  %v12826_v40 = vadd.f32 %v4950_v30, %v12618_v54  ;;  %v12828_v62 = vpop.f32.mrb[230].mxu1 }
 0x441   : > { %14004 = vst [vmem:[#allocation39_spill] sm:$0xff] %v12823_v35  ;;  %v6996_v36 = vpop.f32.mrb[231].mxu1 }
 0x442   : > { %14005 = vst [vmem:[#allocation36_spill] sm:$0xff] %v12826_v40 }
 0x444   : > { %v9788_v38 = vpop.f32.mrb[0].mxu0 }
 0x445   : > { %v12831_v12 = vadd.f32 %v9788_v38, %v12643_v59  ;;  %v4963_v39 = vpop.f32.mrb[1].mxu0 }
 0x446   : > { %v12834_v13 = vadd.f32 %v4963_v39, %v12633_v25  ;;  %v12836_v44 = vpop.f32.mrb[232].mxu1  ;;  %v9789_v28 = vpop.f32.mrb[2].mxu0 }
 0x447   : > { %14006 = vst [vmem:[#allocation38_spill] sm:$0xff] %v12831_v12  ;;  %v12839_v5 = vadd.f32 %v9789_v28, %v12648_v24  ;;  %v7001_v33 = vpop.f32.mrb[233].mxu1  ;;  %v4966_v54 = vpop.f32.mrb[3].mxu0 }
 0x448   : > { %14007 = vst [vmem:[#allocation40_spill] sm:$0xff] %v12834_v13  ;;  %v12842_v30 = vadd.f32 %v4966_v54, %v12638_v19  ;;  %v12844_v36 = vpop.f32.mrb[234].mxu1  ;;  %v14013_v54 = vld [vmem:[#allocation62_spill] sm:$0xff] }
 0x449   : > { %14008 = vst [vmem:[#allocation41_spill] sm:$0xff] %v12839_v5  ;;  %v7004_v40 = vpop.f32.mrb[235].mxu1 }
 0x44a   : > { %14009 = vst [vmem:[#allocation42_spill] sm:$0xff] %v12842_v30 }
 0x44c   : > { %v9792_v59 = vpop.f32.mrb[4].mxu0 }
 0x44d   : > { %v12847_v38 = vadd.f32 %v9792_v59, %v12260_v52  ;;  %v4979_v25 = vpop.f32.mrb[5].mxu0  ;;  %v14015_v59 = vld [vmem:[#allocation7_spill] sm:$0xff] }
 0x44e   : > { %v12850_v39 = vadd.f32 %v4979_v25, %v12244_v37  ;;  %v12852_v13 = vpop.f32.mrb[236].mxu1  ;;  %v9793_v24 = vpop.f32.mrb[6].mxu0  ;;  %v14017_v25 = vld [vmem:[#allocation3_spill] sm:$0xff] }
 0x44f   : > { %14010 = vst [vmem:[#allocation43_spill] sm:$0xff] %v12847_v38  ;;  %v12855_v28 = vadd.f32 %v9793_v24, %v12266_v3  ;;  %v7009_v33 = vpop.f32.mrb[237].mxu1  ;;  %v4982_v19 = vpop.f32.mrb[7].mxu0  ;;  %v14019_v24 = vld [vmem:[#allocation4_spill] sm:$0xff] }
 0x450   : > { %14011 = vst [vmem:[#allocation44_spill] sm:$0xff] %v12850_v39  ;;  %v12858_v30 = vadd.f32 %v4982_v19, %v14013_v54  ;;  %v12860_v40 = vpop.f32.mrb[238].mxu1  ;;  %v14021_v54 = vld [vmem:[#allocation5_spill] sm:$0xff] }
 0x451   : > { %14012 = vst [vmem:[#allocation45_spill] sm:$0xff] %v12855_v28  ;;  %v7012_v5 = vpop.f32.mrb[239].mxu1 }
 0x452   : > { %14014 = vst [vmem:[#allocation46_spill] sm:$0xff] %v12858_v30 }
 0x454   : > { %v9796_v52 = vpop.f32.mrb[8].mxu0 }
 0x455   : > { %v12863_v38 = vadd.f32 %v9796_v52, %v14015_v59  ;;  %v4995_v37 = vpop.f32.mrb[9].mxu0 }
 0x456   : > { %v12866_v39 = vadd.f32 %v4995_v37, %v14017_v25  ;;  %v12868_v12 = vpop.f32.mrb[240].mxu1  ;;  %v9797_v3 = vpop.f32.mrb[10].mxu0 }
 0x457   : > { %14016 = vst [vmem:[#allocation47_spill] sm:$0xff] %v12863_v38  ;;  %v12871_v33 = vadd.f32 %v9797_v3, %v14019_v24  ;;  %v7017_v28 = vpop.f32.mrb[241].mxu1  ;;  %v4998_v19 = vpop.f32.mrb[11].mxu0 }
 0x458   : > { %14018 = vst [vmem:[#allocation48_spill] sm:$0xff] %v12866_v39  ;;  %v12874_v30 = vadd.f32 %v4998_v19, %v14021_v54  ;;  %v12876_v5 = vpop.f32.mrb[242].mxu1  ;;  %v14026_v54 = vld [vmem:[#allocation6_spill] sm:$0xff] }
 0x459   : > { %14020 = vst [vmem:[#allocation49_spill] sm:$0xff] %v12871_v33  ;;  %v7020_v35 = vpop.f32.mrb[243].mxu1 }
 0x45a   : > { %14022 = vst [vmem:[#allocation50_spill] sm:$0xff] %v12874_v30 }
 0x45c   : > { %v9800_v52 = vpop.f32.mrb[12].mxu0 }
 0x45d   : > { %v12879_v59 = vadd.f32 %v9800_v52, %v12315_v46  ;;  %v5011_v37 = vpop.f32.mrb[13].mxu0  ;;  %v14028_v52 = vld [vmem:[#allocation8_spill] sm:$0xff] }
 0x45e   : > { %v12882_v25 = vadd.f32 %v5011_v37, %v12305_v4  ;;  %v12884_v39 = vpop.f32.mrb[244].mxu1  ;;  %v9801_v3 = vpop.f32.mrb[14].mxu0  ;;  %v14030_v37 = vld [vmem:[#allocation9_spill] sm:$0xff] }
 0x45f   : > { %14023 = vst [vmem:[#allocation51_spill] sm:$0xff] %v12879_v59  ;;  %v12887_v28 = vadd.f32 %v9801_v3, %v12319_v2  ;;  %v7025_v24 = vpop.f32.mrb[245].mxu1  ;;  %v5014_v19 = vpop.f32.mrb[15].mxu0  ;;  %v14032_v3 = vld [vmem:[#allocation10_spill] sm:$0xff] }
 0x460   : > { %14024 = vst [vmem:[#allocation52_spill] sm:$0xff] %v12882_v25  ;;  %v12890_v30 = vadd.f32 %v5014_v19, %v14026_v54  ;;  %v12892_v35 = vpop.f32.mrb[246].mxu1  ;;  %v14034_v54 = vld [vmem:[#allocation11_spill] sm:$0xff] }
 0x461   : > { %14025 = vst [vmem:[#allocation53_spill] sm:$0xff] %v12887_v28  ;;  %v7028_v33 = vpop.f32.mrb[247].mxu1 }
 0x462   : > { %14027 = vst [vmem:[#allocation54_spill] sm:$0xff] %v12890_v30 }
 0x464   : > { %v9804_v46 = vpop.f32.mrb[16].mxu0 }
 0x465   : > { %v12895_v59 = vadd.f32 %v9804_v46, %v14028_v52  ;;  %v5027_v4 = vpop.f32.mrb[17].mxu0  ;;  %v14037_v52 = vld [vmem:[#allocation12_spill] sm:$0xff] }
 0x466   : > { %v12898_v25 = vadd.f32 %v5027_v4, %v14030_v37  ;;  %v12900_v38 = vpop.f32.mrb[248].mxu1  ;;  %v9805_v2 = vpop.f32.mrb[18].mxu0  ;;  %v14039_v37 = vld [vmem:[#allocation13_spill] sm:$0xff] }
 0x467   : > { %14029 = vst [vmem:[#allocation55_spill] sm:$0xff] %v12895_v59  ;;  %v12903_v24 = vadd.f32 %v9805_v2, %v14032_v3  ;;  %v7033_v28 = vpop.f32.mrb[249].mxu1  ;;  %v5030_v19 = vpop.f32.mrb[19].mxu0  ;;  %v14041_v3 = vld [vmem:[#allocation14_spill] sm:$0xff] }
 0x468   : > { %14031 = vst [vmem:[#allocation56_spill] sm:$0xff] %v12898_v25  ;;  %v12906_v30 = vadd.f32 %v5030_v19, %v14034_v54  ;;  %v12908_v33 = vpop.f32.mrb[250].mxu1  ;;  %v14043_v54 = vld [vmem:[#allocation15_spill] sm:$0xff] }
 0x469   : > { %14033 = vst [vmem:[#allocation57_spill] sm:$0xff] %v12903_v24  ;;  %14036 = vst [vmem:[#allocation59_spill] sm:$0xff] %v12908_v33  ;;  %v7036_v61 = vpop.f32.mrb[251].mxu1 }
 0x46a   : > { %14035 = vst [vmem:[#allocation58_spill] sm:$0xff] %v12906_v30 }
 0x46c   : > { %v9808_v46 = vpop.f32.mrb[20].mxu0 }
 0x46d   : > { %v12911_v59 = vadd.f32 %v9808_v46, %v14037_v52  ;;  %v5043_v4 = vpop.f32.mrb[21].mxu0  ;;  %v2976_v46 = vld [vmem:[#allocation2 + $0x10] sm:$0xff] }
 0x46e   : > { %v12914_v25 = vadd.f32 %v5043_v4, %v14039_v37  ;;  %v12916_v10 = vpop.f32.mrb[252].mxu1  ;;  %v9809_v2 = vpop.f32.mrb[22].mxu0  ;;  %v2974_v4 = vld [vmem:[#allocation2] sm:$0xff] }
 0x46f   : > { %14038 = vst [vmem:[#allocation60_spill] sm:$0xff] %v12911_v59  ;;  %v12919_v28 = vadd.f32 %v9809_v2, %v14041_v3  ;;  %v7041_v24 = vpop.f32.mrb[253].mxu1  ;;  %v5046_v19 = vpop.f32.mrb[23].mxu0  ;;  %v5060_v59 = vadd.f32 %v12653_v31, %v2976_v46  ;;  %v5058_v33 = vadd.f32 %v12657_v18, %v2974_v4  ;;  %v2977_v2 = vld [vmem:[#allocation2 + $0x18] sm:$0xff]  ;;  %v14047_v18 = vld [vmem:[#allocation17_spill] sm:$0xff] }
 0x470   : > { %14040 = vst [vmem:[#allocation61_spill] sm:$0xff] %v12914_v25  ;;  %v12922_v30 = vadd.f32 %v5046_v19, %v14043_v54  ;;  %v12924_v61 = vpop.f32.mrb[254].mxu1  ;;  %v5061_v54 = vadd.f32 %v12663_v48, %v2977_v2  ;;  %v2980_v48 = vld [vmem:[#allocation2 + $0x30] sm:$0xff]  ;;  %v14048_v2 = vld [vmem:[#allocation19_spill] sm:$0xff] }
 0x471   : > { %14042 = vst [vmem:[#allocation62_spill] sm:$0xff] %v12919_v28  ;;  %14045 = vst [vmem:[#allocation3_spill] sm:$0xff] %v12924_v61  ;;  %v7044_v26 = vpop.f32.mrb[255].mxu1  ;;  %v2975_v28 = vld [vmem:[#allocation2 + $0x8] sm:$0xff] }
 0x472   : > { %14044 = vst [vmem:[#allocation7_spill] sm:$0xff] %v12922_v30  ;;  %v5059_v46 = vadd.f32 %v12667_v57, %v2975_v28  ;;  %v2981_v28 = vld [vmem:[#allocation2 + $0x38] sm:$0xff] }
 0x474   : > { %v9828_v52 = vpop.f32.mrb[24].mxu0 }
 0x475   : > { %v7217_v37 = vadd.f32 %v9828_v52, %v12679_v51  ;;  %v7208_v25 = vpop.f32.mrb[25].mxu0 }
 0x476   : > { %v12929_v3 = vpop.f32.mrb[0].mxu1  ;;  %v7209_v24 = vadd.f32 %v7208_v25, %v12659_v15  ;;  %v9829_v19 = vpop.f32.mrb[26].mxu0 }
 0x477   : > { %14046 = vst [vmem:[#allocation4_spill] sm:$0xff] %v12929_v3  ;;  %v7465_v26 = vadd.f32 %v7217_v37, %v5060_v59  ;;  %v7049_v30 = vpop.f32.mrb[1].mxu1  ;;  %v7220_v61 = vadd.f32 %v9829_v19, %v12689_v29  ;;  %v7211_v31 = vpop.f32.mrb[27].mxu0  ;;  %v2978_v29 = vld [vmem:[#allocation2 + $0x20] sm:$0xff] }
 0x478   : > { %v7463_v51 = vadd.f32 %v7209_v24, %v5058_v33  ;;  %v12935_v52 = vpop.f32.mrb[2].mxu1  ;;  %v7212_v4 = vadd.f32 %v7211_v31, %v14047_v18  ;;  %v5064_v30 = vadd.f32 %v12673_v43, %v2980_v48  ;;  %v5062_v33 = vadd.f32 %v12677_v23, %v2978_v29  ;;  %v14049_v31 = vld [vmem:[#allocation16_spill] sm:$0xff] }
 0x479   : > { %7529 = vst [vmem:[#allocation2 + $0x10] sm:$0xff] %v7465_v26  ;;  %v7466_v3 = vadd.f32 %v7220_v61, %v5061_v54  ;;  %v7052_v32 = vpop.f32.mrb[3].mxu1  ;;  %v5065_v24 = vadd.f32 %v14048_v2, %v2981_v28  ;;  %v2983_v2 = vld [vmem:[#allocation2 + $0x48] sm:$0xff] }
 0x47a   : > { %7527 = vst [vmem:[#allocation2] sm:$0xff] %v7463_v51  ;;  %v7464_v15 = vadd.f32 %v7212_v4, %v5059_v46 }
 0x47b   : > { %7530 = vst [vmem:[#allocation2 + $0x18] sm:$0xff] %v7466_v3  ;;  %v2979_v3 = vld [vmem:[#allocation2 + $0x28] sm:$0xff] }
 0x47c   : > { %7528 = vst [vmem:[#allocation2 + $0x8] sm:$0xff] %v7464_v15  ;;  %v9832_v59 = vpop.f32.mrb[28].mxu0  ;;  %v5063_v46 = vadd.f32 %v14049_v31, %v2979_v3  ;;  %v2984_v15 = vld [vmem:[#allocation2 + $0x50] sm:$0xff] }
 0x47d   : > { %v7233_v25 = vadd.f32 %v9832_v59, %v12719_v17  ;;  %v7224_v57 = vpop.f32.mrb[29].mxu0  ;;  %v5068_v59 = vadd.f32 %v12693_v34, %v2984_v15  ;;  %v14052_v15 = vld [vmem:[#allocation23_spill] sm:$0xff] }
 0x47e   : > { %v12941_v37 = vpop.f32.mrb[4].mxu1  ;;  %v7225_v61 = vadd.f32 %v7224_v57, %v12699_v21  ;;  %v9833_v32 = vpop.f32.mrb[30].mxu0  ;;  %v2985_v57 = vld [vmem:[#allocation2 + $0x58] sm:$0xff] }
 0x47f   : > { %v7469_v19 = vadd.f32 %v7233_v25, %v5064_v30  ;;  %v7057_v54 = vpop.f32.mrb[5].mxu1  ;;  %v7236_v26 = vadd.f32 %v9833_v32, %v12729_v27  ;;  %v7227_v43 = vpop.f32.mrb[31].mxu0  ;;  %v2982_v27 = vld [vmem:[#allocation2 + $0x40] sm:$0xff] }
 0x480   : > { %v7467_v17 = vadd.f32 %v7225_v61, %v5062_v33  ;;  %v12947_v51 = vpop.f32.mrb[6].mxu1  ;;  %v7228_v23 = vadd.f32 %v7227_v43, %v12709_v45  ;;  %v5066_v25 = vadd.f32 %v12697_v50, %v2982_v27  ;;  %v14050_v61 = vld [vmem:[#allocation18_spill] sm:$0xff]  ;;  %v14051_v54 = vld [vmem:[#allocation21_spill] sm:$0xff] }
 0x481   : > { %7533 = vst [vmem:[#allocation2 + $0x30] sm:$0xff] %v7469_v19  ;;  %v7470_v18 = vadd.f32 %v7236_v26, %v5065_v24  ;;  %v7060_v4 = vpop.f32.mrb[7].mxu1  ;;  %v5069_v32 = vadd.f32 %v14050_v61, %v2985_v57  ;;  %v5067_v26 = vadd.f32 %v14051_v54, %v2983_v2  ;;  %v14053_v61 = vld [vmem:[#allocation20_spill] sm:$0xff] }
 0x482   : > { %7531 = vst [vmem:[#allocation2 + $0x20] sm:$0xff] %v7467_v17  ;;  %v7468_v21 = vadd.f32 %v7228_v23, %v5063_v46  ;;  %v2988_v17 = vld [vmem:[#allocation2 + $0x70] sm:$0xff] }
 0x483   : > { %7534 = vst [vmem:[#allocation2 + $0x38] sm:$0xff] %v7470_v18  ;;  %v5072_v18 = vadd.f32 %v12713_v16, %v2988_v17 }
 0x484   : > { %7532 = vst [vmem:[#allocation2 + $0x28] sm:$0xff] %v7468_v21  ;;  %v9836_v48 = vpop.f32.mrb[32].mxu0 }
 0x485   : > { %v7249_v30 = vadd.f32 %v9836_v48, %v12756_v14  ;;  %v7240_v29 = vpop.f32.mrb[33].mxu0 }
 0x486   : > { %v12953_v33 = vpop.f32.mrb[8].mxu1  ;;  %v7241_v45 = vadd.f32 %v7240_v29, %v12739_v53  ;;  %v9837_v28 = vpop.f32.mrb[34].mxu0 }
 0x487   : > { %v7473_v24 = vadd.f32 %v7249_v30, %v5068_v59  ;;  %v7065_v3 = vpop.f32.mrb[9].mxu1  ;;  %v7252_v19 = vadd.f32 %v9837_v28, %v12764_v58  ;;  %v7243_v34 = vpop.f32.mrb[35].mxu0  ;;  %v2986_v58 = vld [vmem:[#allocation2 + $0x60] sm:$0xff]  ;;  %v2989_v59 = vld [vmem:[#allocation2 + $0x78] sm:$0xff] }
 0x488   : > { %v7471_v14 = vadd.f32 %v7241_v45, %v5066_v25  ;;  %v12959_v43 = vpop.f32.mrb[10].mxu1  ;;  %v7244_v50 = vadd.f32 %v7243_v34, %v12748_v6  ;;  %v5070_v48 = vadd.f32 %v14052_v15, %v2986_v58  ;;  %v5073_v29 = vadd.f32 %v12723_v47, %v2989_v59  ;;  %v2987_v25 = vld [vmem:[#allocation2 + $0x68] sm:$0xff]  ;;  %v2992_v47 = vld [vmem:[#allocation2 + $0x90] sm:$0xff] }
 0x489   : > { %7537 = vst [vmem:[#allocation2 + $0x50] sm:$0xff] %v7473_v24  ;;  %v7474_v31 = vadd.f32 %v7252_v19, %v5069_v32  ;;  %v7068_v46 = vpop.f32.mrb[11].mxu1  ;;  %v5071_v32 = vadd.f32 %v14053_v61, %v2987_v25  ;;  %v5076_v54 = vadd.f32 %v12733_v41, %v2992_v47  ;;  %v14056_v47 = vld [vmem:[#allocation27_spill] sm:$0xff] }
 0x48a   : > { %7535 = vst [vmem:[#allocation2 + $0x40] sm:$0xff] %v7471_v14  ;;  %v7472_v53 = vadd.f32 %v7244_v50, %v5067_v26  ;;  %v14054_v50 = vld [vmem:[#allocation22_spill] sm:$0xff] }
 0x48b   : > { %7538 = vst [vmem:[#allocation2 + $0x58] sm:$0xff] %v7474_v31  ;;  %v2993_v46 = vld [vmem:[#allocation2 + $0x98] sm:$0xff] }
 0x48c   : > { %7536 = vst [vmem:[#allocation2 + $0x48] sm:$0xff] %v7472_v53  ;;  %v9840_v23 = vpop.f32.mrb[36].mxu0 }
 0x48d   : > { %v7265_v4 = vadd.f32 %v9840_v23, %v12788_v22  ;;  %v7256_v21 = vpop.f32.mrb[37].mxu0  ;;  %v5077_v23 = vadd.f32 %v12742_v63, %v2993_v46  ;;  %v2996_v63 = vld [vmem:[#allocation2 + $0xb0] sm:$0xff] }
 0x48e   : > { %v12965_v27 = vpop.f32.mrb[12].mxu1  ;;  %v7257_v6 = vadd.f32 %v7256_v21, %v12772_v55  ;;  %v9841_v30 = vpop.f32.mrb[38].mxu0  ;;  %v5080_v25 = vadd.f32 %v12751_v42, %v2996_v63 }
 0x48f   : > { %v7477_v57 = vadd.f32 %v7265_v4, %v5072_v18  ;;  %v7073_v45 = vpop.f32.mrb[13].mxu1  ;;  %v7268_v28 = vadd.f32 %v9841_v30, %v12796_v11  ;;  %v7259_v16 = vpop.f32.mrb[39].mxu0  ;;  %v2990_v11 = vld [vmem:[#allocation2 + $0x80] sm:$0xff]  ;;  %v2991_v18 = vld [vmem:[#allocation2 + $0x88] sm:$0xff] }
 0x490   : > { %v7475_v22 = vadd.f32 %v7257_v6, %v5070_v48  ;;  %v12971_v2 = vpop.f32.mrb[14].mxu1  ;;  %v7260_v24 = vadd.f32 %v7259_v16, %v12780_v60  ;;  %v5074_v31 = vadd.f32 %v14054_v50, %v2990_v11  ;;  %v5075_v15 = vadd.f32 %v12746_v8, %v2991_v18  ;;  %v14055_v45 = vld [vmem:[#allocation25_spill] sm:$0xff]  ;;  %v2997_v16 = vld [vmem:[#allocation2 + $0xb8] sm:$0xff] }
 0x491   : > { %7541 = vst [vmem:[#allocation2 + $0x70] sm:$0xff] %v7477_v57  ;;  %v7478_v3 = vadd.f32 %v7268_v28, %v5073_v29  ;;  %v7076_v19 = vpop.f32.mrb[15].mxu1  ;;  %v3001_v18 = vld [vmem:[#allocation2 + $0xd8] sm:$0xff] }
 0x492   : > { %7539 = vst [vmem:[#allocation2 + $0x60] sm:$0xff] %v7475_v22  ;;  %v7476_v55 = vadd.f32 %v7260_v24, %v5071_v32  ;;  %v5081_v22 = vadd.f32 %v12759_v49, %v2997_v16  ;;  %v2995_v24 = vld [vmem:[#allocation2 + $0xa8] sm:$0xff]  ;;  %v3000_v49 = vld [vmem:[#allocation2 + $0xd0] sm:$0xff] }
 0x493   : > { %7542 = vst [vmem:[#allocation2 + $0x78] sm:$0xff] %v7478_v3 }
 0x494   : > { %7540 = vst [vmem:[#allocation2 + $0x68] sm:$0xff] %v7476_v55  ;;  %v9844_v34 = vpop.f32.mrb[40].mxu0 }
 0x495   : > { %v7281_v26 = vadd.f32 %v9844_v34, %v12820_v56  ;;  %v7272_v14 = vpop.f32.mrb[41].mxu0  ;;  %v5079_v34 = vadd.f32 %v14056_v47, %v2995_v24  ;;  %v14060_v24 = vld [vmem:[#allocation31_spill] sm:$0xff] }
 0x496   : > { %v12977_v53 = vpop.f32.mrb[16].mxu1  ;;  %v7273_v60 = vadd.f32 %v7272_v14, %v12804_v1  ;;  %v9845_v17 = vpop.f32.mrb[42].mxu0  ;;  %v14061_v47 = vld [vmem:[#allocation3_spill] sm:$0xff] }
 0x497   : > { %v7481_v58 = vadd.f32 %v7281_v26, %v5076_v54  ;;  %v7081_v4 = vpop.f32.mrb[17].mxu1  ;;  %v7284_v21 = vadd.f32 %v9845_v17, %v12828_v62  ;;  %v7275_v41 = vpop.f32.mrb[43].mxu0  ;;  %v2994_v62 = vld [vmem:[#allocation2 + $0xa0] sm:$0xff]  ;;  %v14057_v17 = vld [vmem:[#allocation24_spill] sm:$0xff] }
 0x498   : > { %v7479_v56 = vadd.f32 %v7273_v60, %v5074_v31  ;;  %v12983_v48 = vpop.f32.mrb[18].mxu1  ;;  %v7276_v59 = vadd.f32 %v7275_v41, %v12812_v9  ;;  %v5078_v28 = vadd.f32 %v14055_v45, %v2994_v62  ;;  %v5084_v31 = vadd.f32 %v12767_v0, %v3000_v49  ;;  %v2999_v41 = vld [vmem:[#allocation2 + $0xc8] sm:$0xff] }
 0x499   : > { %7545 = vst [vmem:[#allocation2 + $0x90] sm:$0xff] %v7481_v58  ;;  %v7482_v6 = vadd.f32 %v7284_v21, %v5077_v23  ;;  %v7084_v30 = vpop.f32.mrb[19].mxu1  ;;  %v5085_v21 = vadd.f32 %v12775_v20, %v3001_v18  ;;  %v3004_v20 = vld [vmem:[#allocation2 + $0xf0] sm:$0xff] }
 0x49a   : > { %7543 = vst [vmem:[#allocation2 + $0x80] sm:$0xff] %v7479_v56  ;;  %v7480_v1 = vadd.f32 %v7276_v59, %v5075_v15 }
 0x49b   : > { %7546 = vst [vmem:[#allocation2 + $0x98] sm:$0xff] %v7482_v6  ;;  %v14058_v6 = vld [vmem:[#allocation26_spill] sm:$0xff] }
 0x49c   : > { %7544 = vst [vmem:[#allocation2 + $0x88] sm:$0xff] %v7480_v1  ;;  %v9848_v29 = vpop.f32.mrb[44].mxu0  ;;  %v5083_v30 = vadd.f32 %v14058_v6, %v2999_v41 }
 0x49d   : > { %v7297_v57 = vadd.f32 %v9848_v29, %v12852_v13  ;;  %v7288_v8 = vpop.f32.mrb[45].mxu0 }
 0x49e   : > { %v12989_v61 = vpop.f32.mrb[20].mxu1  ;;  %v7289_v9 = vadd.f32 %v7288_v8, %v12836_v44  ;;  %v9849_v32 = vpop.f32.mrb[46].mxu0 }
 0x49f   : > { %v7485_v3 = vadd.f32 %v7297_v57, %v5080_v25  ;;  %v7089_v19 = vpop.f32.mrb[21].mxu1  ;;  %v7300_v55 = vadd.f32 %v9849_v32, %v12860_v40  ;;  %v7291_v42 = vpop.f32.mrb[47].mxu0  ;;  %v2998_v40 = vld [vmem:[#allocation2 + $0xc0] sm:$0xff]  ;;  %v5088_v57 = vadd.f32 %v12783_v7, %v3004_v20 }
 0x4a0   : > { %v7483_v13 = vadd.f32 %v7289_v9, %v5078_v28  ;;  %v12995_v54 = vpop.f32.mrb[22].mxu1  ;;  %v7292_v11 = vadd.f32 %v7291_v42, %v12844_v36  ;;  %v5082_v23 = vadd.f32 %v14057_v17, %v2998_v40  ;;  %v14059_v28 = vld [vmem:[#allocation29_spill] sm:$0xff]  ;;  %v3005_v9 = vld [vmem:[#allocation2 + $0xf8] sm:$0xff]  ;;  %v3003_v19 = vld [vmem:[#allocation2 + $0xe8] sm:$0xff] }
 0x4a1   : > { %7549 = vst [vmem:[#allocation2 + $0xb0] sm:$0xff] %v7485_v3  ;;  %v7486_v26 = vadd.f32 %v7300_v55, %v5081_v22  ;;  %v7092_v14 = vpop.f32.mrb[23].mxu1  ;;  %v5089_v3 = vadd.f32 %v14060_v24, %v3005_v9  ;;  %v3006_v17 = vld [vmem:[#allocation2 + $0x100] sm:$0xff]  ;;  %v14069_v9 = vld [vmem:[#allocation34_spill] sm:$0xff] }
 0x4a2   : > { %7547 = vst [vmem:[#allocation2 + $0xa0] sm:$0xff] %v7483_v13  ;;  %v7484_v44 = vadd.f32 %v7292_v11, %v5079_v34  ;;  %v14062_v13 = vld [vmem:[#allocation28_spill] sm:$0xff]  ;;  %v14063_v14 = vld [vmem:[#allocation59_spill] sm:$0xff] }
 0x4a3   : > { %7550 = vst [vmem:[#allocation2 + $0xb8] sm:$0xff] %v7486_v26  ;;  %v5087_v11 = vadd.f32 %v14062_v13, %v3003_v19  ;;  %v3011_v13 = vld [vmem:[#allocation2 + $0x128] sm:$0xff] }
 0x4a4   : > { %7548 = vst [vmem:[#allocation2 + $0xa8] sm:$0xff] %v7484_v44  ;;  %v9852_v50 = vpop.f32.mrb[48].mxu0 }
 0x4a5   : > { %v7313_v46 = vadd.f32 %v9852_v50, %v12884_v39  ;;  %v7304_v60 = vpop.f32.mrb[49].mxu0 }
 0x4a6   : > { %v13001_v58 = vpop.f32.mrb[24].mxu1  ;;  %v7305_v36 = vadd.f32 %v7304_v60, %v12868_v12  ;;  %v9853_v4 = vpop.f32.mrb[50].mxu0 }
 0x4a7   : > { %v7489_v15 = vadd.f32 %v7313_v46, %v5084_v31  ;;  %v7097_v56 = vpop.f32.mrb[25].mxu1  ;;  %v7316_v59 = vadd.f32 %v9853_v4, %v12892_v35  ;;  %v7307_v0 = vpop.f32.mrb[51].mxu0  ;;  %v3002_v35 = vld [vmem:[#allocation2 + $0xe0] sm:$0xff]  ;;  %v3008_v31 = vld [vmem:[#allocation2 + $0x110] sm:$0xff]  ;;  %v14064_v46 = vld [vmem:[#allocation30_spill] sm:$0xff] }
 0x4a8   : > { %v7487_v39 = vadd.f32 %v7305_v36, %v5082_v23  ;;  %v13007_v1 = vpop.f32.mrb[26].mxu1  ;;  %v7308_v63 = vadd.f32 %v7307_v0, %v12876_v5  ;;  %v5086_v16 = vadd.f32 %v14059_v28, %v3002_v35  ;;  %v5092_v60 = vadd.f32 %v14064_v46, %v3008_v31  ;;  %v14065_v36 = vld [vmem:[#allocation33_spill] sm:$0xff]  ;;  %v14067_v0 = vld [vmem:[#allocation35_spill] sm:$0xff] }
 0x4a9   : > { %7553 = vst [vmem:[#allocation2 + $0xd0] sm:$0xff] %v7489_v15  ;;  %v7490_v29 = vadd.f32 %v7316_v59, %v5085_v21  ;;  %v7100_v25 = vpop.f32.mrb[27].mxu1  ;;  %v5090_v4 = vadd.f32 %v14065_v36, %v3006_v17  ;;  %v3009_v21 = vld [vmem:[#allocation2 + $0x118] sm:$0xff]  ;;  %v14066_v15 = vld [vmem:[#allocation4_spill] sm:$0xff]  ;;  %v3012_v28 = vld [vmem:[#allocation2 + $0x130] sm:$0xff] }
 0x4aa   : > { %7551 = vst [vmem:[#allocation2 + $0xc0] sm:$0xff] %v7487_v39  ;;  %v7488_v12 = vadd.f32 %v7308_v63, %v5083_v30  ;;  %v5093_v6 = vadd.f32 %v14067_v0, %v3009_v21  ;;  %v3007_v30 = vld [vmem:[#allocation2 + $0x108] sm:$0xff] }
 0x4ab   : > { %7554 = vst [vmem:[#allocation2 + $0xd8] sm:$0xff] %v7490_v29  ;;  %v14074_v21 = vld [vmem:[#allocation40_spill] sm:$0xff] }
 0x4ac   : > { %7552 = vst [vmem:[#allocation2 + $0xc8] sm:$0xff] %v7488_v12  ;;  %v9856_v62 = vpop.f32.mrb[52].mxu0  ;;  %v14068_v12 = vld [vmem:[#allocation32_spill] sm:$0xff] }
 0x4ad   : > { %v7329_v8 = vadd.f32 %v9856_v62, %v12916_v10  ;;  %v7320_v45 = vpop.f32.mrb[53].mxu0  ;;  %v5091_v20 = vadd.f32 %v14068_v12, %v3007_v30 }
 0x4ae   : > { %v13013_v32 = vpop.f32.mrb[28].mxu1  ;;  %v7321_v5 = vadd.f32 %v7320_v45, %v12900_v38  ;;  %v9857_v22 = vpop.f32.mrb[54].mxu0 }
 0x4af   : > { %v7493_v55 = vadd.f32 %v7329_v8, %v5088_v57  ;;  %v7105_v42 = vpop.f32.mrb[29].mxu1  ;;  %v7332_v34 = vadd.f32 %v9857_v22, %v14061_v47  ;;  %v7323_v7 = vpop.f32.mrb[55].mxu0 }
 0x4b0   : > { %v7491_v10 = vadd.f32 %v7321_v5, %v5086_v16  ;;  %v13019_v26 = vpop.f32.mrb[30].mxu1  ;;  %v7324_v44 = vadd.f32 %v7323_v7, %v14063_v14  ;;  %v5096_v5 = vadd.f32 %v14069_v9, %v3012_v28  ;;  %v3020_v28 = vld [vmem:[#allocation2 + $0x170] sm:$0xff]  ;;  %v14077_v9 = vld [vmem:[#allocation43_spill] sm:$0xff] }
 0x4b1   : > { %7557 = vst [vmem:[#allocation2 + $0xf0] sm:$0xff] %v7493_v55  ;;  %v7494_v49 = vadd.f32 %v7332_v34, %v5089_v3  ;;  %v7108_v50 = vpop.f32.mrb[31].mxu1  ;;  %v14070_v3 = vld [vmem:[#allocation37_spill] sm:$0xff]  ;;  %v3013_v55 = vld [vmem:[#allocation2 + $0x138] sm:$0xff]  ;;  %v14071_v34 = vld [vmem:[#allocation39_spill] sm:$0xff] }
 0x4b2   : > { %7555 = vst [vmem:[#allocation2 + $0xe0] sm:$0xff] %v7491_v10  ;;  %v7492_v38 = vadd.f32 %v7324_v44, %v5087_v11  ;;  %v5097_v7 = vadd.f32 %v14071_v34, %v3013_v55 }
 0x4b3   : > { %7558 = vst [vmem:[#allocation2 + $0xf8] sm:$0xff] %v7494_v49  ;;  %v14072_v49 = vld [vmem:[#allocation36_spill] sm:$0xff] }
 0x4b4   : > { %7556 = vst [vmem:[#allocation2 + $0xe8] sm:$0xff] %v7492_v38  ;;  %v9860_v40 = vpop.f32.mrb[56].mxu0  ;;  %v5095_v50 = vadd.f32 %v14072_v49, %v3011_v13 }
 0x4b5   : > { %v7345_v23 = vadd.f32 %v9860_v40, %v12941_v37  ;;  %v7336_v18 = vpop.f32.mrb[57].mxu0 }
 0x4b6   : > { %v13025_v41 = vpop.f32.mrb[32].mxu1  ;;  %v7337_v56 = vadd.f32 %v7336_v18, %v14066_v15  ;;  %v9861_v59 = vpop.f32.mrb[58].mxu0 }
 0x4b7   : > { %v7497_v39 = vadd.f32 %v7345_v23, %v5092_v60  ;;  %v7113_v63 = vpop.f32.mrb[33].mxu1  ;;  %v7348_v29 = vadd.f32 %v9861_v59, %v12947_v51  ;;  %v7339_v25 = vpop.f32.mrb[59].mxu0  ;;  %v3010_v51 = vld [vmem:[#allocation2 + $0x120] sm:$0xff]  ;;  %v3016_v60 = vld [vmem:[#allocation2 + $0x150] sm:$0xff]  ;;  %v14073_v23 = vld [vmem:[#allocation38_spill] sm:$0xff] }
 0x4b8   : > { %v7495_v37 = vadd.f32 %v7337_v56, %v5090_v4  ;;  %v13031_v62 = vpop.f32.mrb[34].mxu1  ;;  %v7340_v57 = vadd.f32 %v7339_v25, %v12935_v52  ;;  %v5094_v19 = vadd.f32 %v14070_v3, %v3010_v51  ;;  %v5100_v18 = vadd.f32 %v14073_v23, %v3016_v60  ;;  %v3017_v56 = vld [vmem:[#allocation2 + $0x158] sm:$0xff]  ;;  %v14081_v60 = vld [vmem:[#allocation47_spill] sm:$0xff] }
 0x4b9   : > { %7561 = vst [vmem:[#allocation2 + $0x110] sm:$0xff] %v7497_v39  ;;  %v7498_v35 = vadd.f32 %v7348_v29, %v5093_v6  ;;  %v7116_v8 = vpop.f32.mrb[35].mxu1  ;;  %v14075_v6 = vld [vmem:[#allocation41_spill] sm:$0xff]  ;;  %v3015_v39 = vld [vmem:[#allocation2 + $0x148] sm:$0xff]  ;;  %v3022_v23 = vld [vmem:[#allocation2 + $0x180] sm:$0xff] }
 0x4ba   : > { %7559 = vst [vmem:[#allocation2 + $0x100] sm:$0xff] %v7495_v37  ;;  %v7496_v45 = vadd.f32 %v7340_v57, %v5091_v20  ;;  %v5101_v30 = vadd.f32 %v14075_v6, %v3017_v56  ;;  %v14076_v20 = vld [vmem:[#allocation42_spill] sm:$0xff]  ;;  %v14083_v56 = vld [vmem:[#allocation49_spill] sm:$0xff] }
 0x4bb   : > { %7562 = vst [vmem:[#allocation2 + $0x118] sm:$0xff] %v7498_v35  ;;  %v5099_v37 = vadd.f32 %v14076_v20, %v3015_v39 }
 0x4bc   : > { %7560 = vst [vmem:[#allocation2 + $0x108] sm:$0xff] %v7496_v45  ;;  %v9864_v16 = vpop.f32.mrb[60].mxu0 }
 0x4bd   : > { %v7361_v22 = vadd.f32 %v9864_v16, %v12965_v27  ;;  %v7352_v24 = vpop.f32.mrb[61].mxu0 }
 0x4be   : > { %v13037_v42 = vpop.f32.mrb[36].mxu1  ;;  %v7353_v52 = vadd.f32 %v7352_v24, %v12953_v33  ;;  %v9865_v47 = vpop.f32.mrb[62].mxu0  ;;  %v14078_v24 = vld [vmem:[#allocation44_spill] sm:$0xff] }
 0x4bf   : > { %v7501_v11 = vadd.f32 %v7361_v22, %v5096_v5  ;;  %v7121_v10 = vpop.f32.mrb[37].mxu1  ;;  %v7364_v14 = vadd.f32 %v9865_v47, %v12971_v2  ;;  %v7355_v44 = vpop.f32.mrb[63].mxu0  ;;  %v3014_v2 = vld [vmem:[#allocation2 + $0x140] sm:$0xff]  ;;  %v5104_v5 = vadd.f32 %v14077_v9, %v3020_v28  ;;  %v14079_v47 = vld [vmem:[#allocation45_spill] sm:$0xff]  ;;  %v14086_v9 = vld [vmem:[#allocation52_spill] sm:$0xff] }
 0x4c0   : > { %v7499_v27 = vadd.f32 %v7353_v52, %v5094_v19  ;;  %v13043_v38 = vpop.f32.mrb[38].mxu1  ;;  %v7356_v31 = vadd.f32 %v7355_v44, %v12959_v43  ;;  %v5098_v15 = vadd.f32 %v14074_v21, %v3014_v2  ;;  %v3021_v19 = vld [vmem:[#allocation2 + $0x178] sm:$0xff]  ;;  %v14082_v2 = vld [vmem:[#allocation48_spill] sm:$0xff]  ;;  %v3026_v28 = vld [vmem:[#allocation2 + $0x1a0] sm:$0xff] }
 0x4c1   : > { %7565 = vst [vmem:[#allocation2 + $0x130] sm:$0xff] %v7501_v11  ;;  %v7502_v40 = vadd.f32 %v7364_v14, %v5097_v7  ;;  %v7124_v46 = vpop.f32.mrb[39].mxu1  ;;  %v5105_v34 = vadd.f32 %v14079_v47, %v3021_v19  ;;  %v3019_v7 = vld [vmem:[#allocation2 + $0x168] sm:$0xff]  ;;  %v14080_v44 = vld [vmem:[#allocation46_spill] sm:$0xff] }
 0x4c2   : > { %7563 = vst [vmem:[#allocation2 + $0x120] sm:$0xff] %v7499_v27  ;;  %v7500_v33 = vadd.f32 %v7356_v31, %v5095_v50  ;;  %v5103_v49 = vadd.f32 %v14080_v44, %v3019_v7  ;;  %v3024_v46 = vld [vmem:[#allocation2 + $0x190] sm:$0xff]  ;;  %v3027_v19 = vld [vmem:[#allocation2 + $0x1a8] sm:$0xff]  ;;  %v14088_v7 = vld [vmem:[#allocation54_spill] sm:$0xff] }
 0x4c3   : > { %7566 = vst [vmem:[#allocation2 + $0x138] sm:$0xff] %v7502_v40 }
 0x4c4   : > { %7564 = vst [vmem:[#allocation2 + $0x128] sm:$0xff] %v7500_v33  ;;  %v9868_v17 = vpop.f32.mrb[64].mxu0 }
 0x4c5   : > { %v7377_v36 = vadd.f32 %v9868_v17, %v12989_v61  ;;  %v7368_v4 = vpop.f32.mrb[65].mxu0  ;;  %v5108_v17 = vadd.f32 %v14081_v60, %v3024_v46  ;;  %v14090_v46 = vld [vmem:[#allocation56_spill] sm:$0xff]  ;;  %v3033_v60 = vld [vmem:[#allocation2 + $0x1d8] sm:$0xff] }
 0x4c6   : > { %v13049_v59 = vpop.f32.mrb[40].mxu1  ;;  %v7369_v43 = vadd.f32 %v7368_v4, %v12977_v53  ;;  %v9869_v0 = vpop.f32.mrb[66].mxu0  ;;  %v3025_v4 = vld [vmem:[#allocation2 + $0x198] sm:$0xff] }
 0x4c7   : > { %v7505_v63 = vadd.f32 %v7377_v36, %v5100_v18  ;;  %v7129_v29 = vpop.f32.mrb[41].mxu1  ;;  %v7380_v25 = vadd.f32 %v9869_v0, %v12995_v54  ;;  %v7371_v12 = vpop.f32.mrb[67].mxu0  ;;  %v3018_v54 = vld [vmem:[#allocation2 + $0x160] sm:$0xff]  ;;  %v5106_v36 = vadd.f32 %v14082_v2, %v3022_v23  ;;  %v3023_v0 = vld [vmem:[#allocation2 + $0x188] sm:$0xff] }
 0x4c8   : > { %v7503_v61 = vadd.f32 %v7369_v43, %v5098_v15  ;;  %v13055_v57 = vpop.f32.mrb[42].mxu1  ;;  %v7372_v35 = vadd.f32 %v7371_v12, %v12983_v48  ;;  %v5102_v3 = vadd.f32 %v14078_v24, %v3018_v54  ;;  %v5109_v43 = vadd.f32 %v14083_v56, %v3025_v4  ;;  %v14084_v29 = vld [vmem:[#allocation50_spill] sm:$0xff]  ;;  %v14087_v24 = vld [vmem:[#allocation53_spill] sm:$0xff]  ;;  %v3031_v2 = vld [vmem:[#allocation2 + $0x1c8] sm:$0xff] }
 0x4c9   : > { %7569 = vst [vmem:[#allocation2 + $0x150] sm:$0xff] %v7505_v63  ;;  %v7506_v8 = vadd.f32 %v7380_v25, %v5101_v30  ;;  %v7132_v45 = vpop.f32.mrb[43].mxu1  ;;  %v5107_v25 = vadd.f32 %v14084_v29, %v3023_v0  ;;  %v3029_v54 = vld [vmem:[#allocation2 + $0x1b8] sm:$0xff] }
 0x4ca   : > { %7567 = vst [vmem:[#allocation2 + $0x140] sm:$0xff] %v7503_v61  ;;  %v7504_v53 = vadd.f32 %v7372_v35, %v5099_v37  ;;  %v3028_v35 = vld [vmem:[#allocation2 + $0x1b0] sm:$0xff]  ;;  %v14085_v45 = vld [vmem:[#allocation51_spill] sm:$0xff]  ;;  %v14092_v56 = vld [vmem:[#allocation58_spill] sm:$0xff] }
 0x4cb   : > { %7570 = vst [vmem:[#allocation2 + $0x158] sm:$0xff] %v7506_v8 }
 0x4cc   : > { %7568 = vst [vmem:[#allocation2 + $0x148] sm:$0xff] %v7504_v53  ;;  %v9872_v16 = vpop.f32.mrb[68].mxu0  ;;  %v5112_v53 = vadd.f32 %v14085_v45, %v3028_v35  ;;  %v14094_v45 = vld [vmem:[#allocation60_spill] sm:$0xff] }
 0x4cd   : > { %v7393_v51 = vadd.f32 %v9872_v16, %v13013_v32  ;;  %v7384_v22 = vpop.f32.mrb[69].mxu0 }
 0x4ce   : > { %v7135_v55 = vpop.f32.mrb[44].mxu1  ;;  %v7385_v48 = vadd.f32 %v7384_v22, %v13001_v58  ;;  %v9873_v52 = vpop.f32.mrb[70].mxu0 }
 0x4cf   : > { %v7509_v13 = vadd.f32 %v7393_v51, %v5104_v5  ;;  %v7137_v11 = vpop.f32.mrb[45].mxu1  ;;  %v7396_v10 = vadd.f32 %v9873_v52, %v13019_v26  ;;  %v7387_v14 = vpop.f32.mrb[71].mxu0  ;;  %v5110_v5 = vadd.f32 %v14086_v9, %v3026_v28  ;;  %v3035_v28 = vld [vmem:[#allocation2 + $0x1e8] sm:$0xff]  ;;  %v3037_v9 = vld [vmem:[#allocation2 + $0x1f8] sm:$0xff] }
 0x4d0   : > { %v7507_v50 = vadd.f32 %v7385_v48, %v5102_v3  ;;  %v7138_v32 = vpop.f32.mrb[46].mxu1  ;;  %v7388_v27 = vadd.f32 %v7387_v14, %v13007_v1  ;;  %v5113_v3 = vadd.f32 %v14087_v24, %v3029_v54  ;;  %v14096_v24 = vld [vmem:[#allocation62_spill] sm:$0xff] }
 0x4d1   : > { %7573 = vst [vmem:[#allocation2 + $0x170] sm:$0xff] %v7509_v13  ;;  %v7510_v31 = vadd.f32 %v7396_v10, %v5105_v34  ;;  %v7140_v40 = vpop.f32.mrb[47].mxu1  ;;  %v5111_v13 = vadd.f32 %v14088_v7, %v3027_v19 }
 0x4d2   : > { %7571 = vst [vmem:[#allocation2 + $0x160] sm:$0xff] %v7507_v50  ;;  %v7508_v58 = vadd.f32 %v7388_v27, %v5103_v49  ;;  %v14089_v27 = vld [vmem:[#allocation55_spill] sm:$0xff] }
 0x4d3   : > { %7574 = vst [vmem:[#allocation2 + $0x178] sm:$0xff] %v7510_v31  ;;  %v3030_v40 = vld [vmem:[#allocation2 + $0x1c0] sm:$0xff] }
 0x4d4   : > { %7572 = vst [vmem:[#allocation2 + $0x168] sm:$0xff] %v7508_v58  ;;  %v9876_v33 = vpop.f32.mrb[72].mxu0 }
 0x4d5   : > { %v7409_v26 = vadd.f32 %v9876_v33, %v13037_v42  ;;  %v7400_v18 = vpop.f32.mrb[73].mxu0  ;;  %v5114_v33 = vadd.f32 %v14090_v46, %v3030_v40 }
 0x4d6   : > { %v7143_v21 = vpop.f32.mrb[48].mxu1  ;;  %v7401_v1 = vadd.f32 %v7400_v18, %v13025_v41  ;;  %v9877_v15 = vpop.f32.mrb[74].mxu0 }
 0x4d7   : > { %v7513_v6 = vadd.f32 %v7409_v26, %v5108_v17  ;;  %v7145_v30 = vpop.f32.mrb[49].mxu1  ;;  %v7412_v39 = vadd.f32 %v9877_v15, %v13043_v38  ;;  %v7403_v63 = vpop.f32.mrb[75].mxu0  ;;  %v14091_v26 = vld [vmem:[#allocation57_spill] sm:$0xff] }
 0x4d8   : > { %v7511_v12 = vadd.f32 %v7401_v1, %v5106_v36  ;;  %v7146_v42 = vpop.f32.mrb[50].mxu1  ;;  %v7404_v20 = vadd.f32 %v7403_v63, %v13031_v62  ;;  %v5117_v18 = vadd.f32 %v14091_v26, %v3033_v60 }
 0x4d9   : > { %7577 = vst [vmem:[#allocation2 + $0x190] sm:$0xff] %v7513_v6  ;;  %v7514_v37 = vadd.f32 %v7412_v39, %v5109_v43  ;;  %v7148_v61 = vpop.f32.mrb[51].mxu1  ;;  %v5115_v43 = vadd.f32 %v14092_v56, %v3031_v2 }
 0x4da   : > { %7575 = vst [vmem:[#allocation2 + $0x180] sm:$0xff] %v7511_v12  ;;  %v7512_v41 = vadd.f32 %v7404_v20, %v5107_v25  ;;  %v3034_v25 = vld [vmem:[#allocation2 + $0x1e0] sm:$0xff]  ;;  %v3036_v20 = vld [vmem:[#allocation2 + $0x1f0] sm:$0xff] }
 0x4db   : > { %7578 = vst [vmem:[#allocation2 + $0x198] sm:$0xff] %v7514_v37  ;;  %v14093_v37 = vld [vmem:[#allocation61_spill] sm:$0xff] }
 0x4dc   : > { %7576 = vst [vmem:[#allocation2 + $0x188] sm:$0xff] %v7512_v41  ;;  %v9880_v8 = vpop.f32.mrb[76].mxu0  ;;  %v5118_v61 = vadd.f32 %v14093_v37, %v3034_v25 }
 0x4dd   : > { %v7425_v38 = vadd.f32 %v9880_v8, %v7135_v55  ;;  %v7416_v16 = vpop.f32.mrb[77].mxu0 }
 0x4de   : > { %v7151_v51 = vpop.f32.mrb[52].mxu1  ;;  %v7417_v62 = vadd.f32 %v7416_v16, %v13049_v59  ;;  %v9881_v22 = vpop.f32.mrb[78].mxu0  ;;  %v3032_v59 = vld [vmem:[#allocation2 + $0x1d0] sm:$0xff] }
 0x4df   : > { %v7517_v48 = vadd.f32 %v7425_v38, %v5112_v53  ;;  %v7153_v52 = vpop.f32.mrb[53].mxu1  ;;  %v7428_v47 = vadd.f32 %v9881_v22, %v7138_v32  ;;  %v7419_v34 = vpop.f32.mrb[79].mxu0  ;;  %v5116_v31 = vadd.f32 %v14089_v27, %v3032_v59  ;;  %v5120_v53 = vadd.f32 %v14094_v45, %v3036_v20 }
 0x4e0   : > { %v7515_v11 = vadd.f32 %v7417_v62, %v5110_v5  ;;  %v7154_v10 = vpop.f32.mrb[54].mxu1  ;;  %v7420_v55 = vadd.f32 %v7419_v34, %v13055_v57  ;;  %v14095_v5 = vld [vmem:[#allocation7_spill] sm:$0xff] }
 0x4e1   : > { %7581 = vst [vmem:[#allocation2 + $0x1b0] sm:$0xff] %v7517_v48  ;;  %v7518_v14 = vadd.f32 %v7428_v47, %v5113_v3  ;;  %v7156_v44 = vpop.f32.mrb[55].mxu1  ;;  %v5119_v54 = vadd.f32 %v14095_v5, %v3035_v28  ;;  %v5121_v3 = vadd.f32 %v14096_v24, %v3037_v9 }
 0x4e2   : > { %7579 = vst [vmem:[#allocation2 + $0x1a0] sm:$0xff] %v7515_v11  ;;  %v7516_v49 = vadd.f32 %v7420_v55, %v5111_v13 }
 0x4e3   : > { %7582 = vst [vmem:[#allocation2 + $0x1b8] sm:$0xff] %v7518_v14 }
 0x4e4   : > { %7580 = vst [vmem:[#allocation2 + $0x1a8] sm:$0xff] %v7516_v49  ;;  %v9884_v50 = vpop.f32.mrb[80].mxu0 }
 0x4e5   : > { %v7441_v32 = vadd.f32 %v9884_v50, %v7151_v51  ;;  %v7432_v58 = vpop.f32.mrb[81].mxu0 }
 0x4e6   : > { %v7159_v17 = vpop.f32.mrb[56].mxu1  ;;  %v7433_v23 = vadd.f32 %v7432_v58, %v7143_v21  ;;  %v9885_v57 = vpop.f32.mrb[82].mxu0 }
 0x4e7   : > { %v7521_v36 = vadd.f32 %v7441_v32, %v5116_v31  ;;  %v7161_v4 = vpop.f32.mrb[57].mxu1  ;;  %v7444_v1 = vadd.f32 %v9885_v57, %v7154_v10  ;;  %v7435_v15 = vpop.f32.mrb[83].mxu0 }
 0x4e8   : > { %v7519_v0 = vadd.f32 %v7433_v23, %v5114_v33  ;;  %v7162_v6 = vpop.f32.mrb[58].mxu1  ;;  %v7436_v30 = vadd.f32 %v7435_v15, %v7146_v42 }
 0x4e9   : > { %7585 = vst [vmem:[#allocation2 + $0x1d0] sm:$0xff] %v7521_v36  ;;  %v7522_v39 = vadd.f32 %v7444_v1, %v5117_v18  ;;  %v7164_v63 = vpop.f32.mrb[59].mxu1 }
 0x4ea   : > { %7583 = vst [vmem:[#allocation2 + $0x1c0] sm:$0xff] %v7519_v0  ;;  %v7520_v29 = vadd.f32 %v7436_v30, %v5115_v43 }
 0x4eb   : > { %7586 = vst [vmem:[#allocation2 + $0x1d8] sm:$0xff] %v7522_v39 }
 0x4ec   : > { %7584 = vst [vmem:[#allocation2 + $0x1c8] sm:$0xff] %v7520_v29  ;;  %v9888_v21 = vpop.f32.mrb[84].mxu0 }
 0x4ed   : > { %v7448_v12 = vpop.f32.mrb[85].mxu0 }
 0x4ee   : > { %v7167_v41 = vpop.f32.mrb[60].mxu1  ;;  %v7449_v35 = vadd.f32 %v7448_v12, %v7159_v17  ;;  %v9889_v8 = vpop.f32.mrb[86].mxu0 }
 0x4ef   : > { %v7457_v42 = vadd.f32 %v9888_v21, %v7167_v41  ;;  %v7169_v38 = vpop.f32.mrb[61].mxu1  ;;  %v7451_v16 = vpop.f32.mrb[87].mxu0  ;;  %7594 = sbr.rel (%p9502_p5) target bundleno = 1863 (0x747), region = 56 }
 0x4f0   : > { %v7523_v51 = vadd.f32 %v7449_v35, %v5118_v61  ;;  %v7170_v62 = vpop.f32.mrb[62].mxu1  ;;  %v7452_v22 = vadd.f32 %v7451_v16, %v7162_v6 }
 0x4f1   : > { %v7525_v19 = vadd.f32 %v7457_v42, %v5120_v53  ;;  %v7460_v48 = vadd.f32 %v9889_v8, %v7170_v62  ;;  %v7172_v52 = vpop.f32.mrb[63].mxu1 }
 0x4f2   : > { %7587 = vst [vmem:[#allocation2 + $0x1e0] sm:$0xff] %v7523_v51  ;;  %v7524_v47 = vadd.f32 %v7452_v22, %v5119_v54 }
 0x4f3   : > { %7589 = vst [vmem:[#allocation2 + $0x1f0] sm:$0xff] %v7525_v19  ;;  %v7526_v34 = vadd.f32 %v7460_v48, %v5121_v3 }
 0x4f4   : > { %7588 = vst [vmem:[#allocation2 + $0x1e8] sm:$0xff] %v7524_v47 }
 0x4f5   : > { %7590 = vst [vmem:[#allocation2 + $0x1f8] sm:$0xff] %v7526_v34 }
 0x4f6   : > { %v7945_v7 = vld [vmem:[%s13783_s3] sm:$0xff]  ;;  %v7946_v13 = vld [vmem:[%s13783_s3 + $0x8] sm:$0xff]  ;;  %v7947_v11 = vld [vmem:[%s13783_s3 + $0x10] sm:$0xff]  ;;  %v10992_v10 = vmov 0.0|0.0   ;;  %vm10993_vm0 = vmmov 0   ;;  %v10994_v44 = vmov 0.0  }
 0x4f7   : > { %9932 = vmatprep.subr.bf16.mxu0 %v10992_v10  ;;  %v9933_v55 = vpack.c.bf16 %v7946_v13, %v7945_v7  ;;  %v7948_v14 = vld [vmem:[%s13783_s3 + $0x18] sm:$0xff]  ;;  %9922 = vmatprep.mubr.msk.f32.mxu0 %vm10993_vm0, %v10994_v44  ;;  %v7949_v59 = vld [vmem:[%s13783_s3 + $0x20] sm:$0xff]  ;;  %v7950_v50 = vld [vmem:[%s13783_s3 + $0x28] sm:$0xff]  ;;  %vm7970_vm1 = vcmask 1041409   ;;  %vm8053_vm2 = vcmask 130048  }
 0x4f8   : > { %9956 = vmatprep.subr.bf16.mxu1 %v10992_v10  ;;  %9929 = vmatprep.mubr.msk.f32.mxu1 %vm10993_vm0, %v10994_v44  ;;  %v9936_v49 = vpack.c.bf16 %v7948_v14, %v7947_v11  ;;  %v9939_v27 = vpack.c.bf16 %v7950_v50, %v7949_v59  ;;  %v7951_v31 = vld [vmem:[%s13783_s3 + $0x30] sm:$0xff]  ;;  %v7952_v40 = vld [vmem:[%s13783_s3 + $0x38] sm:$0xff]  ;;  %v7953_v58 = vld [vmem:[%s13783_s3 + $0x40] sm:$0xff] }
 0x4f9   : > { %9934 = vmatpush3.bf16.msra.mxu0 %v9933_v55  ;;  %v9942_v32 = vpack.c.bf16 %v7952_v40, %v7951_v31  ;;  %v7954_v46 = vld [vmem:[%s13783_s3 + $0x48] sm:$0xff]  ;;  %v7955_v60 = vld [vmem:[%s13783_s3 + $0x50] sm:$0xff]  ;;  %v7956_v17 = vld [vmem:[%s13783_s3 + $0x58] sm:$0xff] }
 0x4fa   : > { %9935 = vmatprep.subr.bf16.mxu0 %v10992_v10  ;;  %v9945_v33 = vpack.c.bf16 %v7954_v46, %v7953_v58  ;;  %v9948_v23 = vpack.c.bf16 %v7956_v17, %v7955_v60  ;;  %v7957_v57 = vld [vmem:[%s13783_s3 + $0x60] sm:$0xff]  ;;  %v7958_v26 = vld [vmem:[%s13783_s3 + $0x68] sm:$0xff]  ;;  %v7959_v2 = vld [vmem:[%s13783_s3 + $0x70] sm:$0xff] }
 0x4fb   : > { %v9951_v18 = vpack.c.bf16 %v7958_v26, %v7957_v57  ;;  %v7960_v36 = vld [vmem:[%s13783_s3 + $0x78] sm:$0xff]  ;;  %v7595_v1 = vld [vmem:[#allocation2] sm:$0xff]  ;;  %v7596_v15 = vld [vmem:[#allocation2 + $0x8] sm:$0xff] }
 0x4fc   : > { %v9954_v4 = vpack.c.bf16 %v7960_v36, %v7959_v2  ;;  %v7627_v56 = vld [vmem:[#allocation2 + $0x100] sm:$0xff]  ;;  %v7628_v43 = vld [vmem:[#allocation2 + $0x108] sm:$0xff]  ;;  %v7597_v6 = vld [vmem:[#allocation2 + $0x10] sm:$0xff] }
 0x4fd   : > { %9937 = vmatpush3.bf16.msra.mxu0 %v9936_v49  ;;  %v13140_v0 = vld [vmem:[%s13782_s2] ss:$0 sm:$0xff]  ;;  %v7629_v30 = vld [vmem:[#allocation2 + $0x110] sm:$0xff]  ;;  %v7598_v39 = vld [vmem:[#allocation2 + $0x18] sm:$0xff] }
 0x4fe   : > { %9938 = vmatprep.subr.bf16.mxu0 %v10992_v10  ;;  %v7630_v63 = vld [vmem:[#allocation2 + $0x118] sm:$0xff]  ;;  %v7666_v29 = vadd.f32 %v13140_v0, %v7595_v1  ;;  %v7667_v21 = vadd.f32 %v13140_v0, %v7596_v15  ;;  %v7698_v25 = vadd.f32 %v13140_v0, %v7627_v56  ;;  %v7699_v12 = vadd.f32 %v13140_v0, %v7628_v43  ;;  %v7599_v61 = vld [vmem:[#allocation2 + $0x20] sm:$0xff]  ;;  %v7600_v45 = vld [vmem:[#allocation2 + $0x28] sm:$0xff] }
 0x4ff   : > { %v7668_v20 = vadd.f32 %v13140_v0, %v7597_v6  ;;  %v7700_v37 = vadd.f32 %v13140_v0, %v7629_v30  ;;  %v7631_v41 = vld [vmem:[#allocation2 + $0x120] sm:$0xff]  ;;  %v7669_v35 = vadd.f32 %v13140_v0, %v7598_v39  ;;  %v7701_v8 = vadd.f32 %v13140_v0, %v7630_v63  ;;  %v7632_v53 = vld [vmem:[#allocation2 + $0x128] sm:$0xff]  ;;  %v7601_v9 = vld [vmem:[#allocation2 + $0x30] sm:$0xff] }
 0x500   : > { %v13150_v28 = vmax.f32 %v7666_v29, 0.0  ;;  %v13152_v42 = vmax.f32 %v7667_v21, 0.0  ;;  %v13154_v38 = vmax.f32 %v7698_v25, 0.0  ;;  %v13156_v16 = vmax.f32 %v7699_v12, 0.0  ;;  %v7633_v5 = vld [vmem:[#allocation2 + $0x130] sm:$0xff]  ;;  %v7602_v19 = vld [vmem:[#allocation2 + $0x38] sm:$0xff] }
 0x501   : > { %9940 = vmatpush3.bf16.msra.mxu0 %v9939_v27  ;;  %v7670_v54 = vadd.f32 %v13140_v0, %v7599_v61  ;;  %v7702_v51 = vadd.f32 %v13140_v0, %v7631_v41  ;;  %v13160_v62 = vmax.f32 %v7668_v20, 0.0  ;;  %v13162_v22 = vmax.f32 %v7700_v37, 0.0  ;;  %v7634_v48 = vld [vmem:[#allocation2 + $0x138] sm:$0xff]  ;;  %v7635_v55 = vld [vmem:[#allocation2 + $0x140] sm:$0xff]  ;;  %v7604_v31 = vld [vmem:[#allocation2 + $0x48] sm:$0xff] }
 0x502   : > { %9941 = vmatprep.subr.bf16.mxu0 %v10992_v10  ;;  %14097 = vst [vmem:[#allocation63_spill] sm:$0xff] %v13150_v28  ;;  %14098 = vst [vmem:[#allocation64_spill] sm:$0xff] %v13152_v42  ;;  %v7671_v24 = vadd.f32 %v13140_v0, %v7600_v45  ;;  %v7703_v3 = vadd.f32 %v13140_v0, %v7632_v53  ;;  %v13166_v52 = vmax.f32 %v7669_v35, 0.0  ;;  %v13168_v47 = vmax.f32 %v7701_v8, 0.0  ;;  %v7636_v40 = vld [vmem:[#allocation2 + $0x148] sm:$0xff]  ;;  %v7637_v57 = vld [vmem:[#allocation2 + $0x150] sm:$0xff] }
 0x503   : > { %14099 = vst [vmem:[#allocation65_spill] sm:$0xff] %v13154_v38  ;;  %14100 = vst [vmem:[#allocation66_spill] sm:$0xff] %v13156_v16  ;;  %v7794_v34 = vadd.f32 %v13152_v42, %v13150_v28  ;;  %v7831_v7 = vadd.f32 %v13156_v16, %v13154_v38  ;;  %v7672_v13 = vadd.f32 %v13140_v0, %v7601_v9  ;;  %v13176_v14 = vmax.f32 %v7670_v54, 0.0  ;;  %v7606_v15 = vld [vmem:[#allocation2 + $0x58] sm:$0xff]  ;;  %v7607_v21 = vld [vmem:[#allocation2 + $0x60] sm:$0xff] }
 0x504   : > { %14101 = vst [vmem:[#allocation67_spill] sm:$0xff] %v13160_v62  ;;  %14102 = vst [vmem:[#allocation68_spill] sm:$0xff] %v13162_v22  ;;  %v7704_v11 = vadd.f32 %v13140_v0, %v7633_v5  ;;  %v13178_v44 = vmax.f32 %v7702_v51, 0.0  ;;  %v7673_v50 = vadd.f32 %v13140_v0, %v7602_v19  ;;  %v7705_v27 = vadd.f32 %v13140_v0, %v7634_v48  ;;  %v7638_v56 = vld [vmem:[#allocation2 + $0x158] sm:$0xff]  ;;  %v7639_v25 = vld [vmem:[#allocation2 + $0x160] sm:$0xff] }
 0x505   : > { %9943 = vmatpush3.bf16.msra.mxu0 %v9942_v32  ;;  %14103 = vst [vmem:[#allocation69_spill] sm:$0xff] %v13166_v52  ;;  %14104 = vst [vmem:[#allocation70_spill] sm:$0xff] %v13168_v47  ;;  %v7795_v49 = vadd.f32 %v7794_v34, %v13160_v62  ;;  %v7832_v59 = vadd.f32 %v7831_v7, %v13162_v22  ;;  %v13184_v32 = vmax.f32 %v7671_v24, 0.0  ;;  %v13186_v58 = vmax.f32 %v7703_v3, 0.0  ;;  %v7608_v8 = vld [vmem:[#allocation2 + $0x68] sm:$0xff]  ;;  %v7609_v3 = vld [vmem:[#allocation2 + $0x70] sm:$0xff] }
 0x506   : > { %9944 = vmatprep.subr.bf16.mxu0 %v10992_v10  ;;  %v7706_v17 = vadd.f32 %v13140_v0, %v7635_v55  ;;  %v13192_v26 = vmax.f32 %v7672_v13, 0.0  ;;  %v7707_v1 = vadd.f32 %v13140_v0, %v7636_v40  ;;  %v13200_v43 = vmax.f32 %v7673_v50, 0.0  ;;  %v7640_v45 = vld [vmem:[#allocation2 + $0x168] sm:$0xff]  ;;  %v7641_v19 = vld [vmem:[#allocation2 + $0x170] sm:$0xff]  ;;  %v7610_v55 = vld [vmem:[#allocation2 + $0x78] sm:$0xff] }
 0x507   : > { %v7796_v46 = vadd.f32 %v7795_v49, %v13166_v52  ;;  %v13202_v6 = vmax.f32 %v7705_v27, 0.0  ;;  %v7708_v29 = vadd.f32 %v13140_v0, %v7637_v57  ;;  %v7677_v41 = vadd.f32 %v13140_v0, %v7606_v15  ;;  %v7642_v49 = vld [vmem:[#allocation2 + $0x178] sm:$0xff]  ;;  %v7644_v15 = vld [vmem:[#allocation2 + $0x188] sm:$0xff]  ;;  %v7621_v42 = vld [vmem:[#allocation2 + $0xd0] sm:$0xff] }
 0x508   : > { %v13210_v20 = vmax.f32 %v7706_v17, 0.0  ;;  %v7709_v35 = vadd.f32 %v13140_v0, %v7638_v56  ;;  %v13218_v9 = vmax.f32 %v7707_v1, 0.0  ;;  %v7678_v51 = vadd.f32 %v13140_v0, %v7607_v21  ;;  %v7612_v1 = vld [vmem:[#allocation2 + $0x88] sm:$0xff]  ;;  %v7622_v16 = vld [vmem:[#allocation2 + $0xd8] sm:$0xff]  ;;  %v7623_v28 = vld [vmem:[#allocation2 + $0xe0] sm:$0xff] }
 0x509   : > { %9946 = vmatpush3.bf16.msra.mxu0 %v9945_v33  ;;  %v7833_v33 = vadd.f32 %v7832_v59, %v13168_v47  ;;  %v7797_v2 = vadd.f32 %v7796_v46, %v13176_v14  ;;  %14105 = vst [vmem:[#allocation71_spill] sm:$0xff] %v13202_v6  ;;  %v7710_v24 = vadd.f32 %v13140_v0, %v7639_v25  ;;  %v13226_v34 = vmax.f32 %v7708_v29, 0.0  ;;  %v7613_v25 = vld [vmem:[#allocation2 + $0x90] sm:$0xff]  ;;  %v7624_v38 = vld [vmem:[#allocation2 + $0xe8] sm:$0xff] }
 0x50a   : > { %9947 = vmatprep.subr.bf16.mxu0 %v10992_v10  ;;  %14106 = vst [vmem:[#allocation72_spill] sm:$0xff] %v13210_v20  ;;  %14107 = vst [vmem:[#allocation73_spill] sm:$0xff] %v13218_v9  ;;  %v13232_v59 = vmax.f32 %v7677_v41, 0.0  ;;  %v13234_v50 = vmax.f32 %v7709_v35, 0.0  ;;  %v7680_v40 = vadd.f32 %v13140_v0, %v7609_v3  ;;  %v7712_v46 = vadd.f32 %v13140_v0, %v7641_v19 }
 0x50b   : > { %v7834_v36 = vadd.f32 %v7833_v33, %v13178_v44  ;;  %v7798_v30 = vadd.f32 %v7797_v2, %v13184_v32  ;;  %14108 = vst [vmem:[#allocation74_spill] sm:$0xff] %v13226_v34  ;;  %v7611_v33 = vld [vmem:[#allocation2 + $0x80] sm:$0xff]  ;;  %v13240_v17 = vmax.f32 %v7678_v51, 0.0  ;;  %v7646_v51 = vld [vmem:[#allocation2 + $0x198] sm:$0xff] }
 0x50c   : > { %14109 = vst [vmem:[#allocation75_spill] sm:$0xff] %v13234_v50  ;;  %v7682_v29 = vadd.f32 %v13140_v0, %v7611_v33  ;;  %v13258_v41 = vmax.f32 %v7712_v46, 0.0  ;;  %v7717_v33 = vadd.f32 %v13140_v0, %v7646_v51 }
 0x50d   : > { %9949 = vmatpush3.bf16.msra.mxu0 %v9948_v23  ;;  %v7605_v23 = vld [vmem:[#allocation2 + $0x50] sm:$0xff]  ;;  %v7835_v39 = vadd.f32 %v7834_v36, %v13186_v58  ;;  %v7799_v37 = vadd.f32 %v7798_v30, %v13192_v26  ;;  %v7681_v36 = vadd.f32 %v13140_v0, %v7610_v55  ;;  %v7647_v55 = vld [vmem:[#allocation2 + $0x1a0] sm:$0xff] }
 0x50e   : > { %9950 = vmatprep.subr.bf16.mxu0 %v10992_v10  ;;  %v7676_v63 = vadd.f32 %v13140_v0, %v7605_v23  ;;  %v13242_v23 = vmax.f32 %v7710_v24, 0.0  ;;  %14112 = vst [vmem:[#allocation78_spill] sm:$0xff] %v13258_v41 }
 0x50f   : > { %v7800_v5 = vadd.f32 %v7799_v37, %v13200_v43  ;;  %v7645_v37 = vld [vmem:[#allocation2 + $0x190] sm:$0xff]  ;;  %v13264_v24 = vmax.f32 %v7681_v36, 0.0 }
 0x510   : > { %v13224_v48 = vmax.f32 %v7676_v63, 0.0  ;;  %14110 = vst [vmem:[#allocation76_spill] sm:$0xff] %v13242_v23 }
 0x511   : > { %9952 = vmatpush3.bf16.msra.mxu0 %v9951_v18  ;;  %v13194_v18 = vmax.f32 %v7704_v11, 0.0  ;;  %v7679_v11 = vadd.f32 %v13140_v0, %v7608_v8 }
 0x512   : > { %9953 = vmatprep.subr.bf16.mxu0 %v10992_v10  ;;  %v7603_v10 = vld [vmem:[#allocation2 + $0x40] sm:$0xff] }
 0x513   : > { %v7674_v60 = vadd.f32 %v13140_v0, %v7603_v10  ;;  %v7836_v61 = vadd.f32 %v7835_v39, %v13194_v18  ;;  %v7711_v10 = vadd.f32 %v13140_v0, %v7640_v45  ;;  %v13248_v56 = vmax.f32 %v7679_v11, 0.0 }
 0x514   : > { %v7683_v45 = vadd.f32 %v13140_v0, %v7612_v1  ;;  %v7716_v11 = vadd.f32 %v13140_v0, %v7645_v37 }
 0x515   : > { %9955 = vmatpush3.bf16.msra.mxu0 %v9954_v4  ;;  %v7675_v4 = vadd.f32 %v13140_v0, %v7604_v31  ;;  %v13208_v12 = vmax.f32 %v7674_v60, 0.0  ;;  %v7837_v54 = vadd.f32 %v7836_v61, %v13202_v6  ;;  %v7643_v60 = vld [vmem:[#allocation2 + $0x180] sm:$0xff]  ;;  %v13250_v30 = vmax.f32 %v7711_v10, 0.0 }
 0x516   : > { %v7714_v21 = vadd.f32 %v13140_v0, %v7643_v60  ;;  %v13256_v61 = vmax.f32 %v7680_v40, 0.0  ;;  %v7615_v10 = vld [vmem:[#allocation2 + $0xa0] sm:$0xff]  ;;  %v7616_v60 = vld [vmem:[#allocation2 + $0xa8] sm:$0xff] }
 0x517   : > { %v13216_v53 = vmax.f32 %v7675_v4, 0.0  ;;  %v7801_v7 = vadd.f32 %v7800_v5, %v13208_v12  ;;  %v7838_v13 = vadd.f32 %v7837_v54, %v13210_v20  ;;  %v7713_v4 = vadd.f32 %v13140_v0, %v7642_v49  ;;  %14111 = vst [vmem:[#allocation77_spill] sm:$0xff] %v13250_v30  ;;  %v7614_v54 = vld [vmem:[#allocation2 + $0x98] sm:$0xff] }
 0x518   : > { %v7715_v5 = vadd.f32 %v13140_v0, %v7644_v15  ;;  %v13272_v49 = vmax.f32 %v7682_v29, 0.0  ;;  %v7685_v46 = vadd.f32 %v13140_v0, %v7614_v54  ;;  %v7686_v15 = vadd.f32 %v13140_v0, %v7615_v10  ;;  %v7649_v29 = vld [vmem:[#allocation2 + $0x1b0] sm:$0xff]  ;;  %v7650_v54 = vld [vmem:[#allocation2 + $0x1b8] sm:$0xff] }
 0x519   : > { %v7802_v27 = vadd.f32 %v7801_v7, %v13216_v53  ;;  %v7839_v31 = vadd.f32 %v7838_v13, %v13218_v9  ;;  %v13266_v3 = vmax.f32 %v7713_v4, 0.0  ;;  %v7684_v13 = vadd.f32 %v13140_v0, %v7613_v25 }
 0x51a   : > { %v13282_v36 = vmax.f32 %v7715_v5, 0.0  ;;  %v13290_v25 = vmax.f32 %v7716_v11, 0.0  ;;  %v7618_v5 = vld [vmem:[#allocation2 + $0xb8] sm:$0xff]  ;;  %v13296_v51 = vmax.f32 %v7685_v46, 0.0  ;;  %v7720_v10 = vadd.f32 %v13140_v0, %v7649_v29 }
 0x51b   : > { %v7803_v57 = vadd.f32 %v7802_v27, %v13224_v48  ;;  %v7840_v2 = vadd.f32 %v7839_v31, %v13226_v34  ;;  %14113 = vst [vmem:[#allocation79_spill] sm:$0xff] %v13266_v3  ;;  %v13274_v27 = vmax.f32 %v7714_v21, 0.0  ;;  %v13288_v21 = vmax.f32 %v7684_v13, 0.0 }
 0x51c   : > { %14115 = vst [vmem:[#allocation81_spill] sm:$0xff] %v13282_v36  ;;  %14116 = vst [vmem:[#allocation82_spill] sm:$0xff] %v13290_v25 }
 0x51d   : > { %v7804_v39 = vadd.f32 %v7803_v57, %v13232_v59  ;;  %v7841_v63 = vadd.f32 %v7840_v2, %v13234_v50  ;;  %14114 = vst [vmem:[#allocation80_spill] sm:$0xff] %v13274_v27  ;;  %v7648_v57 = vld [vmem:[#allocation2 + $0x1a8] sm:$0xff]  ;;  %v13280_v2 = vmax.f32 %v7683_v45, 0.0 }
 0x51e   : > { %v7719_v45 = vadd.f32 %v13140_v0, %v7648_v57 }
 0x51f   : > { %v7805_v35 = vadd.f32 %v7804_v39, %v13240_v17  ;;  %v7842_v8 = vadd.f32 %v7841_v63, %v13242_v23  ;;  %v7718_v39 = vadd.f32 %v13140_v0, %v7647_v55  ;;  %v7617_v63 = vld [vmem:[#allocation2 + $0xb0] sm:$0xff]  ;;  %v7619_v55 = vld [vmem:[#allocation2 + $0xc0] sm:$0xff] }
 0x520   : > { %v7688_v11 = vadd.f32 %v13140_v0, %v7617_v63  ;;  %v13314_v63 = vmax.f32 %v7719_v45, 0.0 }
 0x521   : > { %v7806_v19 = vadd.f32 %v7805_v35, %v13248_v56  ;;  %v7843_v7 = vadd.f32 %v7842_v8, %v13250_v30  ;;  %v7687_v8 = vadd.f32 %v13140_v0, %v7616_v60  ;;  %v13306_v60 = vmax.f32 %v7718_v39, 0.0 }
 0x522   : > { %14119 = vst [vmem:[#allocation85_spill] sm:$0xff] %v13314_v63  ;;  %v7690_v39 = vadd.f32 %v13140_v0, %v7619_v55  ;;  %v13320_v52 = vmax.f32 %v7688_v11, 0.0 }
 0x523   : > { %v7807_v31 = vadd.f32 %v7806_v19, %v13256_v61  ;;  %v7844_v40 = vadd.f32 %v7843_v7, %v13258_v41  ;;  %v13298_v19 = vmax.f32 %v7717_v33, 0.0  ;;  %14118 = vst [vmem:[#allocation84_spill] sm:$0xff] %v13306_v60  ;;  %v7689_v33 = vadd.f32 %v13140_v0, %v7618_v5 }
 0x524   : > { %14120 = vst [vmem:[#allocation86_spill] sm:$0xff] %v13320_v52  ;;  %v13322_v5 = vmax.f32 %v7720_v10, 0.0  ;;  %v7692_v10 = vadd.f32 %v13140_v0, %v7621_v42  ;;  %v13336_v62 = vmax.f32 %v7690_v39, 0.0 }
 0x525   : > { %v7808_v4 = vadd.f32 %v7807_v31, %v13264_v24  ;;  %v7845_v1 = vadd.f32 %v7844_v40, %v13266_v3  ;;  %14117 = vst [vmem:[#allocation83_spill] sm:$0xff] %v13298_v19  ;;  %v7651_v31 = vld [vmem:[#allocation2 + $0x1c0] sm:$0xff]  ;;  %v13304_v40 = vmax.f32 %v7686_v15, 0.0  ;;  %v13328_v47 = vmax.f32 %v7689_v33, 0.0 }
 0x526   : > { %14121 = vst [vmem:[#allocation87_spill] sm:$0xff] %v13322_v5  ;;  %14124 = vst [vmem:[#allocation90_spill] sm:$0xff] %v13336_v62 }
 0x527   : > { %v7809_v37 = vadd.f32 %v7808_v4, %v13272_v49  ;;  %v7846_v35 = vadd.f32 %v7845_v1, %v13274_v27  ;;  %v7721_v4 = vadd.f32 %v13140_v0, %v7650_v54  ;;  %v7620_v1 = vld [vmem:[#allocation2 + $0xc8] sm:$0xff]  ;;  %14122 = vst [vmem:[#allocation88_spill] sm:$0xff] %v13328_v47 }
 0x528   : > { %v7691_v45 = vadd.f32 %v13140_v0, %v7620_v1 }
 0x529   : > { %v7810_v7 = vadd.f32 %v7809_v37, %v13280_v2  ;;  %v7847_v13 = vadd.f32 %v7846_v35, %v13282_v36  ;;  %v7652_v37 = vld [vmem:[#allocation2 + $0x1c8] sm:$0xff]  ;;  %v13312_v35 = vmax.f32 %v7687_v8, 0.0  ;;  %v13330_v55 = vmax.f32 %v7721_v4, 0.0 }
 0x52a   : > { %v7693_v4 = vadd.f32 %v13140_v0, %v7622_v16  ;;  %v13344_v22 = vmax.f32 %v7691_v45, 0.0 }
 0x52b   : > { %v7811_v57 = vadd.f32 %v7810_v7, %v13288_v21  ;;  %v7848_v46 = vadd.f32 %v7847_v13, %v13290_v25  ;;  %v7722_v7 = vadd.f32 %v13140_v0, %v7651_v31  ;;  %v7653_v13 = vld [vmem:[#allocation2 + $0x1d0] sm:$0xff]  ;;  %14123 = vst [vmem:[#allocation89_spill] sm:$0xff] %v13330_v55 }
 0x52d   : > { %v7812_v29 = vadd.f32 %v7811_v57, %v13296_v51  ;;  %v7849_v15 = vadd.f32 %v7848_v46, %v13298_v19  ;;  %v7723_v57 = vadd.f32 %v13140_v0, %v7652_v37  ;;  %v7654_v46 = vld [vmem:[#allocation2 + $0x1d8] sm:$0xff]  ;;  %v13338_v1 = vmax.f32 %v7722_v7, 0.0 }
 0x52e   : > { %v7694_v7 = vadd.f32 %v13140_v0, %v7623_v28 }
 0x52f   : > { %v7813_v54 = vadd.f32 %v7812_v29, %v13304_v40  ;;  %v7850_v8 = vadd.f32 %v7849_v15, %v13306_v60  ;;  %v7724_v29 = vadd.f32 %v13140_v0, %v7653_v13  ;;  %v7655_v15 = vld [vmem:[#allocation2 + $0x1e0] sm:$0xff]  ;;  %14125 = vst [vmem:[#allocation91_spill] sm:$0xff] %v13338_v1  ;;  %v13346_v42 = vmax.f32 %v7723_v57, 0.0 }
 0x530   : > { %v7695_v57 = vadd.f32 %v13140_v0, %v7624_v38 }
 0x531   : > { %v7814_v31 = vadd.f32 %v7813_v54, %v13312_v35  ;;  %v7851_v11 = vadd.f32 %v7850_v8, %v13314_v63  ;;  %v7725_v54 = vadd.f32 %v13140_v0, %v7654_v46  ;;  %v7656_v8 = vld [vmem:[#allocation2 + $0x1e8] sm:$0xff]  ;;  %14126 = vst [vmem:[#allocation92_spill] sm:$0xff] %v13346_v42  ;;  %v13354_v16 = vmax.f32 %v7724_v29, 0.0 }
 0x533   : > { %v7815_v37 = vadd.f32 %v7814_v31, %v13320_v52  ;;  %v7852_v33 = vadd.f32 %v7851_v11, %v13322_v5  ;;  %v7726_v31 = vadd.f32 %v13140_v0, %v7655_v15  ;;  %v7625_v52 = vld [vmem:[#allocation2 + $0xf0] sm:$0xff]  ;;  %v13352_v5 = vmax.f32 %v7692_v10, 0.0  ;;  %14127 = vst [vmem:[#allocation93_spill] sm:$0xff] %v13354_v16 }
 0x534   : > { %v7657_v11 = vld [vmem:[#allocation2 + $0x1f0] sm:$0xff]  ;;  %v13362_v28 = vmax.f32 %v7725_v54, 0.0  ;;  %v7696_v29 = vadd.f32 %v13140_v0, %v7625_v52 }
 0x535   : > { %v7816_v13 = vadd.f32 %v7815_v37, %v13328_v47  ;;  %v7853_v39 = vadd.f32 %v7852_v33, %v13330_v55  ;;  %v7727_v37 = vadd.f32 %v13140_v0, %v7656_v8  ;;  %v7626_v47 = vld [vmem:[#allocation2 + $0xf8] sm:$0xff]  ;;  %v13360_v55 = vmax.f32 %v7693_v4, 0.0 }
 0x536   : > { %v7658_v33 = vld [vmem:[#allocation2 + $0x1f8] sm:$0xff]  ;;  %14129 = vst [vmem:[#allocation95_spill] sm:$0xff] %v13362_v28  ;;  %v7697_v4 = vadd.f32 %v13140_v0, %v7626_v47 }
 0x537   : > { %v7817_v46 = vadd.f32 %v7816_v13, %v13336_v62  ;;  %v7854_v45 = vadd.f32 %v7853_v39, %v13338_v1  ;;  %14128 = vst [vmem:[#allocation94_spill] sm:$0xff] %v13360_v55  ;;  %v7728_v13 = vadd.f32 %v13140_v0, %v7657_v11  ;;  %v13368_v62 = vmax.f32 %v7694_v7, 0.0 }
 0x538   : > { %v13370_v39 = vmax.f32 %v7726_v31, 0.0  ;;  %v7729_v54 = vadd.f32 %v13140_v0, %v7658_v33  ;;  %v13376_v1 = vmax.f32 %v7695_v57, 0.0  ;;  %v13382_v7 = vmax.f32 %v7696_v29, 0.0 }
 0x539   : > { %v7818_v15 = vadd.f32 %v7817_v46, %v13344_v22  ;;  %v7855_v10 = vadd.f32 %v7854_v45, %v13346_v42  ;;  %14130 = vst [vmem:[#allocation96_spill] sm:$0xff] %v13368_v62  ;;  %v13378_v46 = vmax.f32 %v7727_v37, 0.0  ;;  %v13384_v31 = vmax.f32 %v7728_v13, 0.0 }
 0x53a   : > { %14131 = vst [vmem:[#allocation97_spill] sm:$0xff] %v13370_v39  ;;  %14132 = vst [vmem:[#allocation98_spill] sm:$0xff] %v13376_v1  ;;  %v13390_v47 = vmax.f32 %v7729_v54, 0.0 }
 0x53b   : > { %v7819_v38 = vadd.f32 %v7818_v15, %v13352_v5  ;;  %v7856_v8 = vadd.f32 %v7855_v10, %v13354_v16  ;;  %14133 = vst [vmem:[#allocation99_spill] sm:$0xff] %v13378_v46  ;;  %14134 = vst [vmem:[#allocation100_spill] sm:$0xff] %v13382_v7  ;;  %v13388_v10 = vmax.f32 %v7697_v4, 0.0 }
 0x53c   : > { %14135 = vst [vmem:[#allocation101_spill] sm:$0xff] %v13384_v31  ;;  %14136 = vst [vmem:[#allocation102_spill] sm:$0xff] %v13390_v47 }
 0x53d   : > { %v7820_v52 = vadd.f32 %v7819_v38, %v13360_v55  ;;  %v7857_v11 = vadd.f32 %v7856_v8, %v13362_v28 }
 0x53f   : > { %v7821_v45 = vadd.f32 %v7820_v52, %v13368_v62  ;;  %v7858_v15 = vadd.f32 %v7857_v11, %v13370_v39 }
 0x541   : > { %v7822_v0 = vadd.f32 %v7821_v45, %v13376_v1  ;;  %v7859_v57 = vadd.f32 %v7858_v15, %v13378_v46 }
 0x543   : > { %v7823_v37 = vadd.f32 %v7822_v0, %v13382_v7  ;;  %v7860_v33 = vadd.f32 %v7859_v57, %v13384_v31 }
 0x545   : > { %v7824_v29 = vadd.f32 %v7823_v37, %v13388_v10  ;;  %v7861_v13 = vadd.f32 %v7860_v33, %v13390_v47  ;;  %v8044_v37 = vld [vmem:[%s13785_s5] sm:$0xff]  ;;  %v8045_v33 = vld [vmem:[%s13785_s5 + $0x8] sm:$0xff] }
 0x547   : > { %v7825_v38 = vrot.slane %v7824_v29, 4  ;;  %v7862_v8 = vrot.slane %v7861_v13, 4 }
 0x549   : > { %v7826_v52 = vadd.f32 %v7825_v38, %v7824_v29  ;;  %v7863_v11 = vadd.f32 %v7862_v8, %v7861_v13  ;;  %v9957_v29 = vpack.c.bf16 %v8045_v33, %v8044_v37  ;;  %v7910_v13 = vmax.f32 %v13186_v58, %v13178_v44 }
 0x54a   : > { %v7873_v38 = vmax.f32 %v13184_v32, %v13176_v14 }
 0x54b   : > { %v7827_v4 = vrot.slane %v7826_v52, 2  ;;  %v7864_v62 = vrot.slane %v7863_v11, 2  ;;  %9958 = vmatpush3.bf16.msra.mxu1 %v9957_v29  ;;  %v7911_v8 = vmax.f32 %v13194_v18, %v7910_v13 }
 0x54d   : > { %v7828_v54 = vadd.f32 %v7827_v4, %v7826_v52  ;;  %v7865_v39 = vadd.f32 %v7864_v62, %v7863_v11  ;;  %v9504_v62 = vld [vmem:[%s13784_s4] ss:$0 sm:$0xff]  ;;  %v7874_v52 = vmax.f32 %v13192_v26, %v7873_v38  ;;  %v7912_v11 = vmax.f32 %v13202_v6, %v7911_v8 }
 0x54f   : > { %v7829_v55 = vrot.slane %v7828_v54, 1  ;;  %v7866_v45 = vrot.slane %v7865_v39, 1  ;;  %v7875_v4 = vmax.f32 %v13200_v43, %v7874_v52 }
 0x551   : > { %v7830_v1 = vadd.f32 %v7829_v55, %v7828_v54  ;;  %v7867_v15 = vadd.f32 %v7866_v45, %v7865_v39  ;;  %v7913_v54 = vmax.f32 %v13210_v20, %v7912_v11  ;;  %v7876_v45 = vmax.f32 %v13208_v12, %v7875_v4 }
 0x553   : > { %v7869_v0 = vmul.f32 0.00390625, %v7830_v1  ;;  %v7870_v7 = vmul.f32 0.00390625, %v7867_v15  ;;  %v7914_v15 = vmax.f32 %v13218_v9, %v7913_v54  ;;  %v8137_v9 = vlaneseq }
 0x555   : > { %v7971_v57 = vsel %vm7970_vm1, %v7870_v7, %v7869_v0  ;;  %v7877_v0 = vmax.f32 %v13216_v53, %v7876_v45 }
 0x556   : > { %9923 = vmatmul.mubr.f32.vlgmr.msra.gmra.mrb[0].mxu0 %v7971_v57  ;;  %v7915_v57 = vmax.f32 %v13226_v34, %v7914_v15 }
 0x557   : > { %v7878_v37 = vmax.f32 %v13224_v48, %v7877_v0 }
 0x558   : > { %v7916_v33 = vmax.f32 %v13234_v50, %v7915_v57  ;;  %v10995_v50 = vmov 1966171168  }
 0x559   : > { %v7879_v29 = vmax.f32 %v13232_v59, %v7878_v37  ;;  %v8135_v34 = vunpack.c.l.s4 %v10995_v50 }
 0x629   : > { %v8039_v55 = vpop.f32.mrb[0].mxu0 }
 0x62a   : > { %v8040_v1 = vadd.f32 %v9504_v62, %v8039_v55  ;;  %v9924_v39 = vpop.f32.mrb[1].mxu0  ;;  %v7917_v62 = vmax.f32 %v13242_v23, %v7916_v33  ;;  %v7880_v55 = vmax.f32 %v13240_v17, %v7879_v29 }
 0x62c   : > { %v8043_v7 = vmax.f32 %v8040_v1, 0.0  ;;  %v7918_v1 = vmax.f32 %v13250_v30, %v7917_v62  ;;  %v7881_v39 = vmax.f32 %v13248_v56, %v7880_v55  ;;  %v14137_v55 = vld [vmem:[#allocation87_spill] sm:$0xff] }
 0x62e   : > { %9930 = vmatmul.mubr.msk.f32.vlgmr.msra.gmra.mrb[0].mxu1 %vm8053_vm2, %v8043_v7  ;;  %v7919_v7 = vmax.f32 %v13258_v41, %v7918_v1  ;;  %v7882_v13 = vmax.f32 %v13256_v61, %v7881_v39  ;;  %v14138_v39 = vld [vmem:[#allocation86_spill] sm:$0xff] }
 0x630   : > { %v7920_v38 = vmax.f32 %v13266_v3, %v7919_v7  ;;  %v7883_v8 = vmax.f32 %v13264_v24, %v7882_v13  ;;  %v14139_v13 = vld [vmem:[#allocation89_spill] sm:$0xff] }
 0x632   : > { %v7921_v52 = vmax.f32 %v13274_v27, %v7920_v38  ;;  %v7884_v11 = vmax.f32 %v13272_v49, %v7883_v8  ;;  %v14140_v8 = vld [vmem:[#allocation88_spill] sm:$0xff] }
 0x634   : > { %v7922_v4 = vmax.f32 %v13282_v36, %v7921_v52  ;;  %v7885_v54 = vmax.f32 %v13280_v2, %v7884_v11  ;;  %v14141_v11 = vld [vmem:[#allocation91_spill] sm:$0xff] }
 0x636   : > { %v7923_v45 = vmax.f32 %v13290_v25, %v7922_v4  ;;  %v7886_v15 = vmax.f32 %v13288_v21, %v7885_v54  ;;  %v14142_v54 = vld [vmem:[#allocation90_spill] sm:$0xff] }
 0x638   : > { %v7924_v0 = vmax.f32 %v13298_v19, %v7923_v45  ;;  %v7887_v57 = vmax.f32 %v13296_v51, %v7886_v15 }
 0x63a   : > { %v7925_v37 = vmax.f32 %v13306_v60, %v7924_v0  ;;  %v7888_v33 = vmax.f32 %v13304_v40, %v7887_v57  ;;  %v14155_v60 = vld [vmem:[#allocation64_spill] sm:$0xff] }
 0x63c   : > { %v7926_v29 = vmax.f32 %v13314_v63, %v7925_v37  ;;  %v7889_v62 = vmax.f32 %v13312_v35, %v7888_v33 }
 0x63e   : > { %v7927_v1 = vmax.f32 %v14137_v55, %v7926_v29  ;;  %v7890_v7 = vmax.f32 %v14138_v39, %v7889_v62  ;;  %v14143_v29 = vld [vmem:[#allocation94_spill] sm:$0xff]  ;;  %v14144_v55 = vld [vmem:[#allocation97_spill] sm:$0xff] }
 0x640   : > { %v7928_v38 = vmax.f32 %v14139_v13, %v7927_v1  ;;  %v7891_v52 = vmax.f32 %v14140_v8, %v7890_v7  ;;  %v14145_v13 = vld [vmem:[#allocation96_spill] sm:$0xff] }
 0x642   : > { %v7929_v4 = vmax.f32 %v14141_v11, %v7928_v38  ;;  %v7892_v45 = vmax.f32 %v14142_v54, %v7891_v52  ;;  %v14146_v11 = vld [vmem:[#allocation98_spill] sm:$0xff] }
 0x644   : > { %v7930_v15 = vmax.f32 %v13346_v42, %v7929_v4  ;;  %v7893_v0 = vmax.f32 %v13344_v22, %v7892_v45  ;;  %v14147_v42 = vld [vmem:[#allocation100_spill] sm:$0xff] }
 0x646   : > { %v7931_v57 = vmax.f32 %v13354_v16, %v7930_v15  ;;  %v7894_v37 = vmax.f32 %v13352_v5, %v7893_v0  ;;  %v14148_v16 = vld [vmem:[#allocation68_spill] sm:$0xff]  ;;  %v14149_v0 = vld [vmem:[#allocation65_spill] sm:$0xff] }
 0x647   : > { %v7908_v63 = vmax.f32 %v14149_v0, %v14148_v16 }
 0x648   : > { %v7932_v33 = vmax.f32 %v13362_v28, %v7931_v57  ;;  %v7895_v62 = vmax.f32 %v14143_v29, %v7894_v37  ;;  %v14150_v37 = vld [vmem:[#allocation67_spill] sm:$0xff] }
 0x649   : > { %v14151_v28 = vld [vmem:[#allocation63_spill] sm:$0xff] }
 0x64a   : > { %v7933_v1 = vmax.f32 %v14144_v55, %v7932_v33  ;;  %v7896_v7 = vmax.f32 %v14145_v13, %v7895_v62  ;;  %v7871_v33 = vmax.f32 %v14151_v28, %v14150_v37  ;;  %v9505_v62 = vld [vmem:[%s13786_s6] ss:$0 sm:$0xff] }
 0x64c   : > { %v7934_v38 = vmax.f32 %v13378_v46, %v7933_v1  ;;  %v7897_v52 = vmax.f32 %v14146_v11, %v7896_v7  ;;  %v14152_v7 = vld [vmem:[#allocation70_spill] sm:$0xff] }
 0x64d   : > { %v14153_v46 = vld [vmem:[#allocation66_spill] sm:$0xff] }
 0x64e   : > { %v7935_v4 = vmax.f32 %v13384_v31, %v7934_v38  ;;  %v7898_v45 = vmax.f32 %v14147_v42, %v7897_v52  ;;  %v7909_v38 = vmax.f32 %v14153_v46, %v14152_v7 }
 0x650   : > { %v7936_v15 = vmax.f32 %v13390_v47, %v7935_v4  ;;  %v7899_v57 = vmax.f32 %v13388_v10, %v7898_v45  ;;  %v14154_v47 = vld [vmem:[#allocation69_spill] sm:$0xff] }
 0x651   : > { %v7872_v19 = vmax.f32 %v14155_v60, %v14154_v47 }
 0x652   : > { %v7937_v1 = vmax.f32 %v7908_v63, %v7936_v15  ;;  %v7900_v4 = vmax.f32 %v7871_v33, %v7899_v57  ;;  %v8136_v57 = vunpack.c.0.s8 %v8135_v34  ;;  %v8138_v33 = vshrl.u32 %v8137_v9, 7 }
 0x654   : > { %v7938_v25 = vmax.f32 %v7909_v38, %v7937_v1  ;;  %v7901_v36 = vmax.f32 %v7872_v19, %v7900_v4  ;;  %v8139_v38 = vsub.s32 %v8136_v57, %v8138_v33 }
 0x656   : > { %v7939_v27 = vrot.slane %v7938_v25, 4  ;;  %v7902_v3 = vrot.slane %v7901_v36, 4 }
 0x658   : > { %v7940_v41 = vmax.f32 %v7938_v25, %v7939_v27  ;;  %v7903_v30 = vmax.f32 %v7901_v36, %v7902_v3  ;;  %v8158_v27 = vsub.s32 0, %v8138_v33 }
 0x65a   : > { %v7941_v63 = vrot.slane %v7940_v41, 2 }
 0x701   : > { %v8123_v31 = vpop.f32.mrb[0].mxu1 }
 0x702   : > { %v8124_v52 = vadd.f32 %v9505_v62, %v8123_v31  ;;  %v9931_v55 = vpop.f32.mrb[1].mxu1  ;;  %v7904_v31 = vrot.slane %v7903_v30, 2 }
 0x703   : > { %v7942_v55 = vmax.f32 %v7940_v41, %v7941_v63 }
 0x704   : > { %v9507_v45 = vmul.f32 -1.442695, %v8124_v52  ;;  %v7905_v62 = vmax.f32 %v7903_v30, %v7904_v31 }
 0x705   : > { %v7943_v1 = vrot.slane %v7942_v55, 1 }
 0x706   : > { %10978 = vpow2.f32 %v9507_v45  ;;  %v7906_v52 = vrot.slane %v7905_v62, 1 }
 0x707   : > { %v7944_v19 = vmax.f32 %v7942_v55, %v7943_v1 }
 0x708   : > { %v7907_v36 = vmax.f32 %v7905_v62, %v7906_v52 }
 0x710   : > { %v10979_v23 = vpop.eup %10978 }
 0x711   : > { %v8130_v15 = vadd.f32 1.0, %v10979_v23 }
 0x713   : > { %10980 = vrcp.f32 %v8130_v15 }
 0x71d   : > { %v10981_v4 = vpop.eup %10980 }
 0x71e   : > { %v8140_v45 = vrot.slane %v10981_v4, %v8139_v38  ;;  %v8294_v3 = vrot.slane %v10981_v4, 1  ;;  %v13477_v15 = vmul.f32 %v10981_v4, %v7907_v36 }
 0x720   : > { %v8141_v25 = vcombine.high %v8140_v45, %v8140_v45  ;;  %v8148_v23 = vrot.slane %v8140_v45, %v8139_v38  ;;  %v13475_v20 = vmul.f32 %v8294_v3, %v7944_v19  ;;  %v14162_v19 = vld [vmem:[#allocation77_spill] sm:$0xff]  ;;  %v14163_v45 = vld [vmem:[#allocation78_spill] sm:$0xff]  ;;  %v14164_v3 = vld [vmem:[#allocation79_spill] sm:$0xff] }
 0x722   : > { %v8155_v50 = vrot.slane %v8141_v25, %v8139_v38  ;;  %v8159_v6 = vrot.slane %v8148_v23, %v8158_v27  ;;  %v8301_v9 = vrot.slane %v13475_v20, 7  ;;  %v14165_v25 = vld [vmem:[#allocation80_spill] sm:$0xff] }
 0x724   : > { %v13480_v34 = vrot.slane %v8155_v50, %v8158_v27  ;;  %v8166_v30 = vmul.f32 %v8159_v6, %v14151_v28  ;;  %v8167_v41 = vmul.f32 %v8159_v6, %v14155_v60  ;;  %v8168_v63 = vmul.f32 %v8159_v6, %v14150_v37  ;;  %v14166_v50 = vld [vmem:[#allocation81_spill] sm:$0xff] }
 0x725   : > { %v8169_v31 = vmul.f32 %v8159_v6, %v14154_v47  ;;  %v8170_v55 = vmul.f32 %v8159_v6, %v13176_v14  ;;  %v8171_v57 = vmul.f32 %v8159_v6, %v13184_v32  ;;  %v8172_v33 = vmul.f32 %v8159_v6, %v13192_v26 }
 0x726   : > { %v8173_v62 = vmul.f32 %v8159_v6, %v13200_v43  ;;  %v8174_v1 = vmul.f32 %v8159_v6, %v13208_v12  ;;  %v8175_v38 = vmul.f32 %v8159_v6, %v13216_v53  ;;  %v8176_v28 = vmul.f32 %v8159_v6, %v13224_v48  ;;  %8230 = vst [vmem:[%s13787_s7] sm:$0xff] %v8166_v30 }
 0x727   : > { %8231 = vst [vmem:[%s13787_s7 + $0x8] sm:$0xff] %v8167_v41  ;;  %8232 = vst [vmem:[%s13787_s7 + $0x10] sm:$0xff] %v8168_v63  ;;  %v8177_v14 = vmul.f32 %v8159_v6, %v13232_v59  ;;  %v8178_v32 = vmul.f32 %v8159_v6, %v13240_v17  ;;  %v8179_v26 = vmul.f32 %v8159_v6, %v13248_v56  ;;  %v14167_v41 = vld [vmem:[#allocation82_spill] sm:$0xff] }
 0x728   : > { %v8180_v43 = vmul.f32 %v8159_v6, %v13256_v61  ;;  %8233 = vst [vmem:[%s13787_s7 + $0x18] sm:$0xff] %v8169_v31  ;;  %8234 = vst [vmem:[%s13787_s7 + $0x20] sm:$0xff] %v8170_v55  ;;  %v8181_v12 = vmul.f32 %v8159_v6, %v13264_v24  ;;  %v8182_v53 = vmul.f32 %v8159_v6, %v13272_v49  ;;  %v14168_v31 = vld [vmem:[#allocation83_spill] sm:$0xff] }
 0x729   : > { %8235 = vst [vmem:[%s13787_s7 + $0x28] sm:$0xff] %v8171_v57  ;;  %8236 = vst [vmem:[%s13787_s7 + $0x30] sm:$0xff] %v8172_v33  ;;  %v8183_v48 = vmul.f32 %v8159_v6, %v13280_v2  ;;  %v8184_v59 = vmul.f32 %v8159_v6, %v13288_v21  ;;  %v8185_v17 = vmul.f32 %v8159_v6, %v13296_v51  ;;  %v14169_v57 = vld [vmem:[#allocation84_spill] sm:$0xff] }
 0x72a   : > { %8237 = vst [vmem:[%s13787_s7 + $0x38] sm:$0xff] %v8173_v62  ;;  %8238 = vst [vmem:[%s13787_s7 + $0x40] sm:$0xff] %v8174_v1  ;;  %v8186_v56 = vmul.f32 %v8159_v6, %v13304_v40  ;;  %v8187_v61 = vmul.f32 %v8159_v6, %v13312_v35  ;;  %v8188_v24 = vmul.f32 %v8159_v6, %v14138_v39  ;;  %v14170_v62 = vld [vmem:[#allocation85_spill] sm:$0xff] }
 0x72b   : > { %8239 = vst [vmem:[%s13787_s7 + $0x48] sm:$0xff] %v8175_v38  ;;  %8240 = vst [vmem:[%s13787_s7 + $0x50] sm:$0xff] %v8176_v28  ;;  %v8189_v49 = vmul.f32 %v8159_v6, %v14140_v8  ;;  %v8190_v2 = vmul.f32 %v8159_v6, %v14142_v54  ;;  %v8191_v21 = vmul.f32 %v8159_v6, %v13344_v22  ;;  %v14158_v8 = vld [vmem:[#allocation73_spill] sm:$0xff]  ;;  %v14159_v54 = vld [vmem:[#allocation74_spill] sm:$0xff] }
 0x72c   : > { %8241 = vst [vmem:[%s13787_s7 + $0x58] sm:$0xff] %v8177_v14  ;;  %8242 = vst [vmem:[%s13787_s7 + $0x60] sm:$0xff] %v8178_v32  ;;  %v8192_v51 = vmul.f32 %v8159_v6, %v13352_v5  ;;  %v8193_v22 = vmul.f32 %v8159_v6, %v14143_v29  ;;  %v8194_v40 = vmul.f32 %v8159_v6, %v14145_v13  ;;  %v14171_v38 = vld [vmem:[#allocation87_spill] sm:$0xff]  ;;  %v14172_v14 = vld [vmem:[#allocation89_spill] sm:$0xff] }
 0x72d   : > { %8243 = vst [vmem:[%s13787_s7 + $0x68] sm:$0xff] %v8179_v26  ;;  %8244 = vst [vmem:[%s13787_s7 + $0x70] sm:$0xff] %v8180_v43  ;;  %v8195_v60 = vmul.f32 %v8159_v6, %v14146_v11  ;;  %v8196_v35 = vmul.f32 %v8159_v6, %v14147_v42  ;;  %v8197_v5 = vmul.f32 %v8159_v6, %v13388_v10  ;;  %v14173_v26 = vld [vmem:[#allocation91_spill] sm:$0xff] }
 0x72e   : > { %8245 = vst [vmem:[%s13787_s7 + $0x78] sm:$0xff] %v8181_v12  ;;  %8246 = vst [vmem:[%s13787_s7 + $0x80] sm:$0xff] %v8182_v53  ;;  %v8198_v42 = vmul.f32 %v13480_v34, %v14149_v0  ;;  %v8199_v47 = vmul.f32 %v13480_v34, %v14153_v46  ;;  %v8200_v39 = vmul.f32 %v13480_v34, %v14148_v16  ;;  %v14160_v0 = vld [vmem:[#allocation75_spill] sm:$0xff]  ;;  %v14174_v12 = vld [vmem:[#allocation92_spill] sm:$0xff] }
 0x72f   : > { %8247 = vst [vmem:[%s13787_s7 + $0x88] sm:$0xff] %v8183_v48  ;;  %8248 = vst [vmem:[%s13787_s7 + $0x90] sm:$0xff] %v8184_v59  ;;  %v8201_v6 = vmul.f32 %v13480_v34, %v14152_v7  ;;  %v8202_v16 = vmul.f32 %v13480_v34, %v13178_v44  ;;  %v8203_v46 = vmul.f32 %v13480_v34, %v13186_v58  ;;  %v14156_v44 = vld [vmem:[#allocation71_spill] sm:$0xff]  ;;  %v14161_v7 = vld [vmem:[#allocation76_spill] sm:$0xff] }
 0x730   : > { %8249 = vst [vmem:[%s13787_s7 + $0x98] sm:$0xff] %v8185_v17  ;;  %8250 = vst [vmem:[%s13787_s7 + $0xa0] sm:$0xff] %v8186_v56  ;;  %v8204_v10 = vmul.f32 %v13480_v34, %v13194_v18  ;;  %v8205_v58 = vmul.f32 %v13480_v34, %v14156_v44  ;;  %v14157_v18 = vld [vmem:[#allocation72_spill] sm:$0xff]  ;;  %v8207_v11 = vmul.f32 %v13480_v34, %v14158_v8  ;;  %v14175_v48 = vld [vmem:[#allocation93_spill] sm:$0xff] }
 0x731   : > { %8251 = vst [vmem:[%s13787_s7 + $0xa8] sm:$0xff] %v8187_v61  ;;  %8252 = vst [vmem:[%s13787_s7 + $0xb0] sm:$0xff] %v8188_v24  ;;  %v8206_v13 = vmul.f32 %v13480_v34, %v14157_v18  ;;  %v8208_v29 = vmul.f32 %v13480_v34, %v14159_v54  ;;  %v8209_v37 = vmul.f32 %v13480_v34, %v14160_v0  ;;  %v14176_v17 = vld [vmem:[#allocation95_spill] sm:$0xff]  ;;  %v14177_v61 = vld [vmem:[#allocation97_spill] sm:$0xff] }
 0x732   : > { %8253 = vst [vmem:[%s13787_s7 + $0xb8] sm:$0xff] %v8189_v49  ;;  %8254 = vst [vmem:[%s13787_s7 + $0xc0] sm:$0xff] %v8190_v2  ;;  %v8210_v52 = vmul.f32 %v13480_v34, %v14161_v7  ;;  %v8211_v4 = vmul.f32 %v13480_v34, %v14162_v19  ;;  %v8212_v27 = vmul.f32 %v13480_v34, %v14163_v45  ;;  %v14178_v49 = vld [vmem:[#allocation99_spill] sm:$0xff] }
 0x733   : > { %8255 = vst [vmem:[%s13787_s7 + $0xc8] sm:$0xff] %v8191_v21  ;;  %8256 = vst [vmem:[%s13787_s7 + $0xd0] sm:$0xff] %v8192_v51  ;;  %v8213_v36 = vmul.f32 %v13480_v34, %v14164_v3  ;;  %v8214_v23 = vmul.f32 %v13480_v34, %v14165_v25  ;;  %v8215_v30 = vmul.f32 %v13480_v34, %v14166_v50  ;;  %v14179_v21 = vld [vmem:[#allocation101_spill] sm:$0xff] }
 0x734   : > { %8257 = vst [vmem:[%s13787_s7 + $0xd8] sm:$0xff] %v8193_v22  ;;  %8258 = vst [vmem:[%s13787_s7 + $0xe0] sm:$0xff] %v8194_v40  ;;  %v8216_v63 = vmul.f32 %v13480_v34, %v14167_v41  ;;  %v8217_v55 = vmul.f32 %v13480_v34, %v14168_v31  ;;  %v8218_v33 = vmul.f32 %v13480_v34, %v14169_v57  ;;  %v14180_v22 = vld [vmem:[#allocation102_spill] sm:$0xff] }
 0x735   : > { %8259 = vst [vmem:[%s13787_s7 + $0xe8] sm:$0xff] %v8195_v60  ;;  %8260 = vst [vmem:[%s13787_s7 + $0xf0] sm:$0xff] %v8196_v35  ;;  %v8219_v1 = vmul.f32 %v13480_v34, %v14170_v62  ;;  %v8220_v28 = vmul.f32 %v13480_v34, %v14171_v38  ;;  %v8221_v32 = vmul.f32 %v13480_v34, %v14172_v14 }
 0x736   : > { %8261 = vst [vmem:[%s13787_s7 + $0xf8] sm:$0xff] %v8197_v5  ;;  %8262 = vst [vmem:[%s13787_s7 + $0x100] sm:$0xff] %v8198_v42  ;;  %v8222_v43 = vmul.f32 %v13480_v34, %v14173_v26  ;;  %v8223_v53 = vmul.f32 %v13480_v34, %v14174_v12  ;;  %v8224_v59 = vmul.f32 %v13480_v34, %v14175_v48 }
 0x737   : > { %8263 = vst [vmem:[%s13787_s7 + $0x108] sm:$0xff] %v8199_v47  ;;  %8264 = vst [vmem:[%s13787_s7 + $0x110] sm:$0xff] %v8200_v39  ;;  %v8225_v56 = vmul.f32 %v13480_v34, %v14176_v17  ;;  %v8226_v24 = vmul.f32 %v13480_v34, %v14177_v61  ;;  %v8227_v2 = vmul.f32 %v13480_v34, %v14178_v49 }
 0x738   : > { %8265 = vst [vmem:[%s13787_s7 + $0x118] sm:$0xff] %v8201_v6  ;;  %8266 = vst [vmem:[%s13787_s7 + $0x120] sm:$0xff] %v8202_v16  ;;  %v8228_v51 = vmul.f32 %v13480_v34, %v14179_v21  ;;  %v8229_v40 = vmul.f32 %v13480_v34, %v14180_v22  ;;  %v8302_v34 = vsel %vm7970_vm1, %v8301_v9, %v13477_v15 }
 0x739   : > { %8267 = vst [vmem:[%s13787_s7 + $0x128] sm:$0xff] %v8203_v46  ;;  %8268 = vst [vmem:[%s13787_s7 + $0x130] sm:$0xff] %v8204_v10 }
 0x73a   : > { %8269 = vst [vmem:[%s13787_s7 + $0x138] sm:$0xff] %v8205_v58  ;;  %8270 = vst [vmem:[%s13787_s7 + $0x140] sm:$0xff] %v8206_v13 }
 0x73b   : > { %8271 = vst [vmem:[%s13787_s7 + $0x148] sm:$0xff] %v8207_v11  ;;  %8272 = vst [vmem:[%s13787_s7 + $0x150] sm:$0xff] %v8208_v29 }
 0x73c   : > { %8273 = vst [vmem:[%s13787_s7 + $0x158] sm:$0xff] %v8209_v37  ;;  %8274 = vst [vmem:[%s13787_s7 + $0x160] sm:$0xff] %v8210_v52 }
 0x73d   : > { %8275 = vst [vmem:[%s13787_s7 + $0x168] sm:$0xff] %v8211_v4  ;;  %8276 = vst [vmem:[%s13787_s7 + $0x170] sm:$0xff] %v8212_v27 }
 0x73e   : > { %8277 = vst [vmem:[%s13787_s7 + $0x178] sm:$0xff] %v8213_v36  ;;  %8278 = vst [vmem:[%s13787_s7 + $0x180] sm:$0xff] %v8214_v23 }
 0x73f   : > { %8279 = vst [vmem:[%s13787_s7 + $0x188] sm:$0xff] %v8215_v30  ;;  %8280 = vst [vmem:[%s13787_s7 + $0x190] sm:$0xff] %v8216_v63 }
 0x740   : > { %8281 = vst [vmem:[%s13787_s7 + $0x198] sm:$0xff] %v8217_v55  ;;  %8282 = vst [vmem:[%s13787_s7 + $0x1a0] sm:$0xff] %v8218_v33 }
 0x741   : > { %8283 = vst [vmem:[%s13787_s7 + $0x1a8] sm:$0xff] %v8219_v1  ;;  %8284 = vst [vmem:[%s13787_s7 + $0x1b0] sm:$0xff] %v8220_v28 }
 0x742   : > { %8285 = vst [vmem:[%s13787_s7 + $0x1b8] sm:$0xff] %v8221_v32  ;;  %8286 = vst [vmem:[%s13787_s7 + $0x1c0] sm:$0xff] %v8222_v43 }
 0x743   : > { %8287 = vst [vmem:[%s13787_s7 + $0x1c8] sm:$0xff] %v8223_v53  ;;  %8288 = vst [vmem:[%s13787_s7 + $0x1d0] sm:$0xff] %v8224_v59 }
 0x744   : > { %8289 = vst [vmem:[%s13787_s7 + $0x1d8] sm:$0xff] %v8225_v56  ;;  %8290 = vst [vmem:[%s13787_s7 + $0x1e0] sm:$0xff] %v8226_v24 }
 0x745   : > { %8291 = vst [vmem:[%s13787_s7 + $0x1e8] sm:$0xff] %v8227_v2  ;;  %8292 = vst [vmem:[%s13787_s7 + $0x1f0] sm:$0xff] %v8228_v51 }
 0x746   : > { %8304 = vst [vmem:[%s13788_s8] sm:$0x3] %v8302_v34  ;;  %8293 = vst [vmem:[%s13787_s7 + $0x1f8] sm:$0xff] %v8229_v40 }
 0x747 PF: > { %s19_s27 = sadd.s32 1, %s10988_s27  }
 0x748   : > { %p16_p6 = scmp.ge.s32.totalorder %s19_s27, 5  }
 0x74a   :  { %18 = sbr.rel (!%p16_p6) target bundleno = 1 (0x1), region = 97 }

// kernel: isuei_d2_forward.19
= control target key start
LH: loop header
LB: loop body
LE: loop exit
PB: predicated region body
PF: predicated region fallthrough
CT: control target
= control target key end

     0   :  { %s1140_s9 = smov 0   ;;  %s1142_s10 = smov 0   ;;  %s1384_s0 = inlined_call_operand.vmem [shape: bf16[128,128], index: 0, kind: input, shape index: {}]   ;;  %s1385_s1 = inlined_call_operand.vmem [shape: bf16[128,1024], index: 1, kind: input, shape index: {}]   ;;  %s1386_s2 = inlined_call_operand.vmem [shape: f32[128,1024], index: 2, kind: output, shape index: {}]  }
   0x1   :  { %s1144_s11 = smov 0   ;;  %s1146_s12 = smov 0  }
   0x2   :  { %s1148_s13 = smov 0  }
   0x3 LB: > { %s27_s14 = sadd.s32 1, %s1118_s12  ;;  %s953_s15 = sadd.s32 4294967295, %s1122_s13   ;;  %s1122_s13 = sphi %s1148_s13, %s12_s13   ;;  %s1118_s12 = sphi %s1146_s12, %s1391_s12   ;;  %s1114_s11 = sphi %s1144_s11, %s1390_s11   ;;  %s1110_s10 = sphi %s1142_s10, %s1389_s10   ;;  %s1106_s9 = sphi %s1140_s9, %s1388_s9  }
   0x4   : > { %p29_p0 = scmp.ge.s32.totalorder %s27_s14, 4  ;;  %p75_p1 = scmp.ne.s32.totalorder %s1110_s10, %s1106_s9 }
   0x5   : > { %p76_p2 = scmp.eq.s32.totalorder %s1122_s13, 0  ;;  %p107_p4 = scmp.eq.s32.totalorder %s953_s15, 3 }
   0x6   : > { %s1393_s14 = smov (%p29_p0, %s27_s14), 0  ;;  %s68_s17 = sadd.s32 1, %s1110_s10 }
   0x7   : > { %p77_p3 = por %p76_p2, %p75_p1  ;;  %s64_s16 = ssub.s32 %s1118_s12, %s1393_s14 }
   0x8   : > { %p66_p5 = scmp.eq.s32.totalorder %s64_s16, 0  ;;  %p1175_p6 = por %p107_p4, %p75_p1 }
   0x9   : > { %p957_p7 = scmp.ge.s32.totalorder %s1122_s13, 4 }
   0xa   : > { %s1180_s19 = scalar_select %p66_p5, %s1110_s10, %s68_s17  }
   0xb   : > { %141 = sbr.rel (%p957_p7) target bundleno = 38 (0x26), region = 20 }
  0x12   : > { %144 = sbr.rel (!%p77_p3) target bundleno = 38 (0x26), region = 24  ;;  %s146_s20 = sand.u32 (%p77_p3), 1, %s1110_s10  }
  0x13   : > { %s993_s21 = sshll.u32 (%p77_p3), %s1118_s12, 3  ;;  %s958_s22 = sshll.u32 (%p77_p3), %s146_s20, 7 }
  0x14   : > { %s1188_s25 = scalar_lea.vmem (%p77_p3), %s1385_s1, %s993_s21  ;;  %s148_s26 = scalar_lea.vmem (%p77_p3), [#allocation3], %s958_s22 }
  0x15   : > { %v212_v0 = vld [vmem:[%s1188_s25] sm:$0xff] (%p77_p3) }
  0x16   : > { %v214_v1 = vld [vmem:[%s1188_s25 + $0x20] sm:$0xff] (%p77_p3)  ;;  %213 = vst [vmem:[%s148_s26] sm:$0xff] (%p77_p3), %v212_v0 }
  0x17   : > { %v216_v2 = vld [vmem:[%s1188_s25 + $0x40] sm:$0xff] (%p77_p3)  ;;  %215 = vst [vmem:[%s148_s26 + $0x8] sm:$0xff] (%p77_p3), %v214_v1 }
  0x18   : > { %217 = vst [vmem:[%s148_s26 + $0x10] sm:$0xff] (%p77_p3), %v216_v2  ;;  %v218_v3 = vld [vmem:[%s1188_s25 + $0x60] sm:$0xff] (%p77_p3) }
  0x19   : > { %v220_v4 = vld [vmem:[%s1188_s25 + $0x80] sm:$0xff]  ;;  %219 = vst [vmem:[%s148_s26 + $0x18] sm:$0xff] %v218_v3 }
  0x1a   : > { %v222_v5 = vld [vmem:[%s1188_s25 + $0xa0] sm:$0xff]  ;;  %221 = vst [vmem:[%s148_s26 + $0x20] sm:$0xff] %v220_v4 }
  0x1b   : > { %223 = vst [vmem:[%s148_s26 + $0x28] sm:$0xff] %v222_v5  ;;  %v224_v6 = vld [vmem:[%s1188_s25 + $0xc0] sm:$0xff] }
  0x1c   : > { %v226_v7 = vld [vmem:[%s1188_s25 + $0xe0] sm:$0xff]  ;;  %225 = vst [vmem:[%s148_s26 + $0x30] sm:$0xff] %v224_v6 }
  0x1d   : > { %v228_v8 = vld [vmem:[%s1188_s25 + $0x100] sm:$0xff]  ;;  %227 = vst [vmem:[%s148_s26 + $0x38] sm:$0xff] %v226_v7 }
  0x1e   : > { %229 = vst [vmem:[%s148_s26 + $0x40] sm:$0xff] %v228_v8  ;;  %v230_v9 = vld [vmem:[%s1188_s25 + $0x120] sm:$0xff] }
  0x1f   : > { %v232_v10 = vld [vmem:[%s1188_s25 + $0x140] sm:$0xff]  ;;  %231 = vst [vmem:[%s148_s26 + $0x48] sm:$0xff] %v230_v9 }
  0x20   : > { %v234_v11 = vld [vmem:[%s1188_s25 + $0x160] sm:$0xff]  ;;  %233 = vst [vmem:[%s148_s26 + $0x50] sm:$0xff] %v232_v10 }
  0x21   : > { %235 = vst [vmem:[%s148_s26 + $0x58] sm:$0xff] %v234_v11  ;;  %v236_v12 = vld [vmem:[%s1188_s25 + $0x180] sm:$0xff] }
  0x22   : > { %v238_v13 = vld [vmem:[%s1188_s25 + $0x1a0] sm:$0xff]  ;;  %237 = vst [vmem:[%s148_s26 + $0x60] sm:$0xff] %v236_v12 }
  0x23   : > { %v240_v14 = vld [vmem:[%s1188_s25 + $0x1c0] sm:$0xff]  ;;  %239 = vst [vmem:[%s148_s26 + $0x68] sm:$0xff] %v238_v13 }
  0x24   : > { %241 = vst [vmem:[%s148_s26 + $0x70] sm:$0xff] %v240_v14  ;;  %v242_v15 = vld [vmem:[%s1188_s25 + $0x1e0] sm:$0xff] }
  0x25   : > { %243 = vst [vmem:[%s148_s26 + $0x78] sm:$0xff] %v242_v15 }
  0x26 PF: > { %p961_p8 = scmp.ge.s32.totalorder %s1122_s13, 1  ;;  %p248_p9 = scmp.lt.s32.totalorder %s1122_s13, 5 }
  0x28   : > { %p249_p10 = pnand %p961_p8, %p248_p9 }
  0x29   : > { %s255_s27 = sand.u32 (!%p249_p10), 1, %s1106_s9   ;;  %v1124_v16 = vmov (!%p249_p10), 0   ;;  %v1076_v33 = vld [vmem:[%s1384_s0] sm:$0xff] (!%p249_p10)   ;;  %v1078_v35 = vld [vmem:[%s1384_s0 + $0x8] sm:$0xff] (!%p249_p10)   ;;  %v1080_v37 = vld [vmem:[%s1384_s0 + $0x10] sm:$0xff] (!%p249_p10)  }
  0x2a   : > { %252 = sbr.rel (%p249_p10) target bundleno = 326 (0x146), region = 62  ;;  %s962_s28 = sshll.u32 (!%p249_p10), %s255_s27, 7  ;;  %557 = vmatprep.mubr.bf16.mxu0 (!%p249_p10), %v1124_v16  ;;  %597 = vmatprep.mubr.bf16.mxu1 (!%p249_p10), %v1124_v16  ;;  %v1077_v34 = vld [vmem:[%s1384_s0 + $0x20] sm:$0xff] (!%p249_p10)   ;;  %v1079_v36 = vld [vmem:[%s1384_s0 + $0x28] sm:$0xff] (!%p249_p10)   ;;  %v1081_v38 = vld [vmem:[%s1384_s0 + $0x30] sm:$0xff] (!%p249_p10)  }
  0x2b   : > { %s1213_s29 = scalar_lea.vmem (!%p249_p10), [#allocation3], %s962_s28  ;;  %v1082_v39 = vld [vmem:[%s1384_s0 + $0x18] sm:$0xff] (!%p249_p10)   ;;  %s963_s26 = sshll.u32 (!%p249_p10), %s255_s27, 8 }
  0x2c   : > { %v1052_v17 = vld [vmem:[%s1213_s29 + $0x4] ss:$8 sps:$4 sm:$0xff] (!%p249_p10)   ;;  %v1054_v18 = vld [vmem:[%s1213_s29] ss:$8 sps:$4 sm:$0xff] (!%p249_p10)   ;;  %v1055_v19 = vld [vmem:[%s1213_s29 + $0x14] ss:$8 sps:$4 sm:$0xff] (!%p249_p10)  }
  0x2d   : > { %525 = vmatprep.subr.bf16.mxu0 (!%p249_p10), %v1052_v17  ;;  %995 = vmatprep.subr.bf16.mxu1 (!%p249_p10), %v1052_v17  ;;  %v1057_v20 = vld [vmem:[%s1213_s29 + $0x10] ss:$8 sps:$4 sm:$0xff] (!%p249_p10)   ;;  %v1058_v21 = vld [vmem:[%s1213_s29 + $0x24] ss:$8 sps:$4 sm:$0xff] (!%p249_p10)   ;;  %v1060_v22 = vld [vmem:[%s1213_s29 + $0x20] ss:$8 sps:$4 sm:$0xff] (!%p249_p10)  }
  0x2e   : > { %526 = vmatpush1.bf16.msra.mxu0 (!%p249_p10), %v1054_v18  ;;  %1003 = vmatpush1.bf16.msra.mxu1 (!%p249_p10), %v1054_v18  ;;  %v1061_v23 = vld [vmem:[%s1213_s29 + $0x34] ss:$8 sps:$4 sm:$0xff] (!%p249_p10)   ;;  %v1063_v24 = vld [vmem:[%s1213_s29 + $0x30] ss:$8 sps:$4 sm:$0xff] (!%p249_p10)   ;;  %v1064_v25 = vld [vmem:[%s1213_s29 + $0x44] ss:$8 sps:$4 sm:$0xff] (!%p249_p10)  }
  0x2f   : > { %527 = vmatprep.subr.bf16.mxu0 (!%p249_p10), %v1055_v19  ;;  %996 = vmatprep.subr.bf16.mxu1 (!%p249_p10), %v1055_v19  ;;  %v1066_v26 = vld [vmem:[%s1213_s29 + $0x40] ss:$8 sps:$4 sm:$0xff] (!%p249_p10)   ;;  %v1067_v27 = vld [vmem:[%s1213_s29 + $0x54] ss:$8 sps:$4 sm:$0xff] (!%p249_p10)   ;;  %v1069_v28 = vld [vmem:[%s1213_s29 + $0x50] ss:$8 sps:$4 sm:$0xff] (!%p249_p10)  }
  0x30   : > { %v1070_v29 = vld [vmem:[%s1213_s29 + $0x64] ss:$8 sps:$4 sm:$0xff] (!%p249_p10)   ;;  %v1072_v30 = vld [vmem:[%s1213_s29 + $0x60] ss:$8 sps:$4 sm:$0xff] (!%p249_p10)   ;;  %v1073_v31 = vld [vmem:[%s1213_s29 + $0x74] ss:$8 sps:$4 sm:$0xff] (!%p249_p10)  }
  0x31   : > { %v1075_v32 = vld [vmem:[%s1213_s29 + $0x70] ss:$8 sps:$4 sm:$0xff]   ;;  %s1263_s28 = scalar_lea.vmem [#allocation4], %s963_s26  ;;  %s994_s9 = sshll.u32 (%p1175_p6), %s1114_s11, 4 }
  0x32   : > { %528 = vmatpush1.bf16.msra.mxu0 %v1057_v20  ;;  %1004 = vmatpush1.bf16.msra.mxu1 %v1057_v20  ;;  %v1083_v40 = vld [vmem:[%s1384_s0 + $0x38] sm:$0xff]   ;;  %s1306_s30 = scalar_lea.vmem (%p1175_p6), %s1386_s2, %s994_s9 }
  0x33   : > { %529 = vmatprep.subr.bf16.mxu0 %v1058_v21  ;;  %997 = vmatprep.subr.bf16.mxu1 %v1058_v21 }
  0x36   : > { %530 = vmatpush1.bf16.msra.mxu0 %v1060_v22  ;;  %1005 = vmatpush1.bf16.msra.mxu1 %v1060_v22 }
  0x37   : > { %531 = vmatprep.subr.bf16.mxu0 %v1061_v23  ;;  %998 = vmatprep.subr.bf16.mxu1 %v1061_v23 }
  0x3a   : > { %532 = vmatpush1.bf16.msra.mxu0 %v1063_v24  ;;  %1006 = vmatpush1.bf16.msra.mxu1 %v1063_v24 }
  0x3b   : > { %533 = vmatprep.subr.bf16.mxu0 %v1064_v25  ;;  %999 = vmatprep.subr.bf16.mxu1 %v1064_v25 }
  0x3e   : > { %534 = vmatpush1.bf16.msra.mxu0 %v1066_v26  ;;  %1007 = vmatpush1.bf16.msra.mxu1 %v1066_v26 }
  0x3f   : > { %535 = vmatprep.subr.bf16.mxu0 %v1067_v27  ;;  %1000 = vmatprep.subr.bf16.mxu1 %v1067_v27 }
  0x42   : > { %536 = vmatpush1.bf16.msra.mxu0 %v1069_v28  ;;  %1008 = vmatpush1.bf16.msra.mxu1 %v1069_v28 }
  0x43   : > { %537 = vmatprep.subr.bf16.mxu0 %v1070_v29  ;;  %1001 = vmatprep.subr.bf16.mxu1 %v1070_v29 }
  0x46   : > { %538 = vmatpush1.bf16.msra.mxu0 %v1072_v30  ;;  %1009 = vmatpush1.bf16.msra.mxu1 %v1072_v30 }
  0x47   : > { %539 = vmatprep.subr.bf16.mxu0 %v1073_v31  ;;  %1002 = vmatprep.subr.bf16.mxu1 %v1073_v31 }
  0x4a   : > { %540 = vmatpush1.bf16.msra.mxu0 %v1075_v32  ;;  %1010 = vmatpush1.bf16.msra.mxu1 %v1075_v32 }
  0x4d   : > { %558 = vmatmul.mubr.bf16.vlgmr.msra.gmra.mrb[0].mxu0 %v1076_v33  ;;  %598 = vmatmul.mubr.bf16.vlgmr.msra.gmra.mrb[0].mxu1 %v1077_v34 }
  0x4e   : > { %567 = vmatprep.mubr.bf16.mxu0 %v1124_v16  ;;  %607 = vmatprep.mubr.bf16.mxu1 %v1124_v16 }
  0x55   : > { %568 = vmatmul.mubr.bf16.gmra.mrb[4].mxu0 %v1078_v35  ;;  %608 = vmatmul.mubr.bf16.gmra.mrb[4].mxu1 %v1079_v36 }
  0x56   : > { %577 = vmatprep.mubr.bf16.mxu0 %v1124_v16  ;;  %617 = vmatprep.mubr.bf16.mxu1 %v1124_v16 }
  0x5d   : > { %578 = vmatmul.mubr.bf16.gmra.mrb[8].mxu0 %v1080_v37  ;;  %618 = vmatmul.mubr.bf16.gmra.mrb[8].mxu1 %v1081_v38 }
  0x5e   : > { %587 = vmatprep.mubr.bf16.mxu0 %v1124_v16  ;;  %627 = vmatprep.mubr.bf16.mxu1 %v1124_v16 }
  0x65   : > { %588 = vmatmul.mubr.bf16.gmra.mrb[12].mxu0 %v1082_v39  ;;  %628 = vmatmul.mubr.bf16.gmra.mrb[12].mxu1 %v1083_v40 }
 0x120   : > { %v559_v41 = vpop.f32.mrb[0].mxu0  ;;  %v599_v42 = vpop.f32.mrb[0].mxu1 }
 0x121   : > { %737 = vst [vmem:[%s1263_s28] sm:$0xff] %v559_v41  ;;  %753 = vst [vmem:[%s1263_s28 + $0x80] sm:$0xff] %v599_v42  ;;  %v561_v43 = vpop.f32.mrb[1].mxu0  ;;  %v601_v44 = vpop.f32.mrb[1].mxu1 }
 0x122   : > { %738 = vst [vmem:[%s1263_s28 + $0x8] sm:$0xff] %v561_v43  ;;  %754 = vst [vmem:[%s1263_s28 + $0x88] sm:$0xff] %v601_v44  ;;  %v563_v45 = vpop.f32.mrb[2].mxu0  ;;  %v603_v46 = vpop.f32.mrb[2].mxu1 }
 0x123   : > { %739 = vst [vmem:[%s1263_s28 + $0x10] sm:$0xff] %v563_v45  ;;  %755 = vst [vmem:[%s1263_s28 + $0x90] sm:$0xff] %v603_v46  ;;  %v565_v47 = vpop.f32.mrb[3].mxu0  ;;  %v605_v48 = vpop.f32.mrb[3].mxu1 }
 0x124   : > { %740 = vst [vmem:[%s1263_s28 + $0x18] sm:$0xff] %v565_v47  ;;  %756 = vst [vmem:[%s1263_s28 + $0x98] sm:$0xff] %v605_v48 }
 0x128   : > { %v569_v49 = vpop.f32.mrb[4].mxu0  ;;  %v609_v50 = vpop.f32.mrb[4].mxu1  ;;  %v794_v9 = vld [vmem:[%s1263_s28] sm:$0xff] (%p1175_p6) }
 0x129   : > { %741 = vst [vmem:[%s1263_s28 + $0x20] sm:$0xff] %v569_v49  ;;  %757 = vst [vmem:[%s1263_s28 + $0xa0] sm:$0xff] %v609_v50  ;;  %v571_v51 = vpop.f32.mrb[5].mxu0  ;;  %v611_v52 = vpop.f32.mrb[5].mxu1  ;;  %v796_v10 = vld [vmem:[%s1263_s28 + $0x8] sm:$0xff] (%p1175_p6)  ;;  %v826_v25 = vld [vmem:[%s1263_s28 + $0x80] sm:$0xff] (%p1175_p6) }
 0x12a   : > { %742 = vst [vmem:[%s1263_s28 + $0x28] sm:$0xff] %v571_v51  ;;  %758 = vst [vmem:[%s1263_s28 + $0xa8] sm:$0xff] %v611_v52  ;;  %v573_v53 = vpop.f32.mrb[6].mxu0  ;;  %v613_v54 = vpop.f32.mrb[6].mxu1  ;;  %v798_v11 = vld [vmem:[%s1263_s28 + $0x10] sm:$0xff] (%p1175_p6)  ;;  %v828_v26 = vld [vmem:[%s1263_s28 + $0x88] sm:$0xff] (%p1175_p6) }
 0x12b   : > { %743 = vst [vmem:[%s1263_s28 + $0x30] sm:$0xff] %v573_v53  ;;  %759 = vst [vmem:[%s1263_s28 + $0xb0] sm:$0xff] %v613_v54  ;;  %v575_v55 = vpop.f32.mrb[7].mxu0  ;;  %v615_v56 = vpop.f32.mrb[7].mxu1  ;;  %v800_v12 = vld [vmem:[%s1263_s28 + $0x18] sm:$0xff] (%p1175_p6)  ;;  %v830_v27 = vld [vmem:[%s1263_s28 + $0x90] sm:$0xff] (%p1175_p6) }
 0x12c   : > { %744 = vst [vmem:[%s1263_s28 + $0x38] sm:$0xff] %v575_v55  ;;  %760 = vst [vmem:[%s1263_s28 + $0xb8] sm:$0xff] %v615_v56  ;;  %v832_v28 = vld [vmem:[%s1263_s28 + $0x98] sm:$0xff] (%p1175_p6) }
 0x12d   : > { %795 = vst [vmem:[%s1306_s30] sm:$0xff] (%p1175_p6), %v794_v9  ;;  %797 = vst [vmem:[%s1306_s30 + $0x8] sm:$0xff] (%p1175_p6), %v796_v10 }
 0x12e   : > { %799 = vst [vmem:[%s1306_s30 + $0x40] sm:$0xff] (%p1175_p6), %v798_v11  ;;  %801 = vst [vmem:[%s1306_s30 + $0x48] sm:$0xff] (%p1175_p6), %v800_v12 }
 0x12f   : > { %827 = vst [vmem:[%s1306_s30 + $0x200] sm:$0xff] (%p1175_p6), %v826_v25  ;;  %829 = vst [vmem:[%s1306_s30 + $0x208] sm:$0xff] (%p1175_p6), %v828_v26 }
 0x130   : > { %v579_v57 = vpop.f32.mrb[8].mxu0  ;;  %v619_v58 = vpop.f32.mrb[8].mxu1  ;;  %v802_v13 = vld [vmem:[%s1263_s28 + $0x20] sm:$0xff] (%p1175_p6)  ;;  %831 = vst [vmem:[%s1306_s30 + $0x240] sm:$0xff] (%p1175_p6), %v830_v27  ;;  %833 = vst [vmem:[%s1306_s30 + $0x248] sm:$0xff] (%p1175_p6), %v832_v28 }
 0x131   : > { %745 = vst [vmem:[%s1263_s28 + $0x40] sm:$0xff] %v579_v57  ;;  %761 = vst [vmem:[%s1263_s28 + $0xc0] sm:$0xff] %v619_v58  ;;  %v581_v59 = vpop.f32.mrb[9].mxu0  ;;  %v621_v60 = vpop.f32.mrb[9].mxu1  ;;  %v804_v14 = vld [vmem:[%s1263_s28 + $0x28] sm:$0xff] (%p1175_p6)  ;;  %v834_v29 = vld [vmem:[%s1263_s28 + $0xa0] sm:$0xff] (%p1175_p6) }
 0x132   : > { %746 = vst [vmem:[%s1263_s28 + $0x48] sm:$0xff] %v581_v59  ;;  %762 = vst [vmem:[%s1263_s28 + $0xc8] sm:$0xff] %v621_v60  ;;  %v583_v61 = vpop.f32.mrb[10].mxu0  ;;  %v623_v62 = vpop.f32.mrb[10].mxu1  ;;  %v806_v15 = vld [vmem:[%s1263_s28 + $0x30] sm:$0xff] (%p1175_p6)  ;;  %v836_v30 = vld [vmem:[%s1263_s28 + $0xa8] sm:$0xff] (%p1175_p6) }
 0x133   : > { %747 = vst [vmem:[%s1263_s28 + $0x50] sm:$0xff] %v583_v61  ;;  %763 = vst [vmem:[%s1263_s28 + $0xd0] sm:$0xff] %v623_v62  ;;  %v585_v63 = vpop.f32.mrb[11].mxu0  ;;  %v625_v0 = vpop.f32.mrb[11].mxu1  ;;  %v808_v16 = vld [vmem:[%s1263_s28 + $0x38] sm:$0xff] (%p1175_p6)  ;;  %v838_v31 = vld [vmem:[%s1263_s28 + $0xb0] sm:$0xff] (%p1175_p6) }
 0x134   : > { %748 = vst [vmem:[%s1263_s28 + $0x58] sm:$0xff] %v585_v63  ;;  %764 = vst [vmem:[%s1263_s28 + $0xd8] sm:$0xff] %v625_v0  ;;  %v840_v32 = vld [vmem:[%s1263_s28 + $0xb8] sm:$0xff] (%p1175_p6) }
 0x135   : > { %803 = vst [vmem:[%s1306_s30 + $0x80] sm:$0xff] (%p1175_p6), %v802_v13  ;;  %805 = vst [vmem:[%s1306_s30 + $0x88] sm:$0xff] (%p1175_p6), %v804_v14 }
 0x136   : > { %775 = sbr.rel (!%p1175_p6) target bundleno = 326 (0x146), region = 78  ;;  %807 = vst [vmem:[%s1306_s30 + $0xc0] sm:$0xff] (%p1175_p6), %v806_v15  ;;  %809 = vst [vmem:[%s1306_s30 + $0xc8] sm:$0xff] (%p1175_p6), %v808_v16 }
 0x137   : > { %835 = vst [vmem:[%s1306_s30 + $0x280] sm:$0xff] (%p1175_p6), %v834_v29  ;;  %837 = vst [vmem:[%s1306_s30 + $0x288] sm:$0xff] (%p1175_p6), %v836_v30 }
 0x138   : > { %v589_v1 = vpop.f32.mrb[12].mxu0  ;;  %v629_v2 = vpop.f32.mrb[12].mxu1  ;;  %v810_v17 = vld [vmem:[%s1263_s28 + $0x40] sm:$0xff] (%p1175_p6)  ;;  %839 = vst [vmem:[%s1306_s30 + $0x2c0] sm:$0xff] (%p1175_p6), %v838_v31  ;;  %841 = vst [vmem:[%s1306_s30 + $0x2c8] sm:$0xff] (%p1175_p6), %v840_v32 }
 0x139   : > { %749 = vst [vmem:[%s1263_s28 + $0x60] sm:$0xff] %v589_v1  ;;  %765 = vst [vmem:[%s1263_s28 + $0xe0] sm:$0xff] %v629_v2  ;;  %v591_v3 = vpop.f32.mrb[13].mxu0  ;;  %v631_v4 = vpop.f32.mrb[13].mxu1  ;;  %v812_v18 = vld [vmem:[%s1263_s28 + $0x48] sm:$0xff] (%p1175_p6)  ;;  %v842_v33 = vld [vmem:[%s1263_s28 + $0xc0] sm:$0xff] (%p1175_p6) }
 0x13a   : > { %750 = vst [vmem:[%s1263_s28 + $0x68] sm:$0xff] %v591_v3  ;;  %766 = vst [vmem:[%s1263_s28 + $0xe8] sm:$0xff] %v631_v4  ;;  %v593_v5 = vpop.f32.mrb[14].mxu0  ;;  %v633_v6 = vpop.f32.mrb[14].mxu1  ;;  %v814_v19 = vld [vmem:[%s1263_s28 + $0x50] sm:$0xff] (%p1175_p6)  ;;  %v844_v34 = vld [vmem:[%s1263_s28 + $0xc8] sm:$0xff] (%p1175_p6) }
 0x13b   : > { %751 = vst [vmem:[%s1263_s28 + $0x70] sm:$0xff] %v593_v5  ;;  %767 = vst [vmem:[%s1263_s28 + $0xf0] sm:$0xff] %v633_v6  ;;  %v595_v7 = vpop.f32.mrb[15].mxu0  ;;  %v635_v8 = vpop.f32.mrb[15].mxu1  ;;  %v816_v20 = vld [vmem:[%s1263_s28 + $0x58] sm:$0xff] (%p1175_p6)  ;;  %v846_v35 = vld [vmem:[%s1263_s28 + $0xd0] sm:$0xff] (%p1175_p6) }
 0x13c   : > { %752 = vst [vmem:[%s1263_s28 + $0x78] sm:$0xff] %v595_v7  ;;  %768 = vst [vmem:[%s1263_s28 + $0xf8] sm:$0xff] %v635_v8  ;;  %v848_v36 = vld [vmem:[%s1263_s28 + $0xd8] sm:$0xff] (%p1175_p6) }
 0x13d   : > { %811 = vst [vmem:[%s1306_s30 + $0x100] sm:$0xff] %v810_v17  ;;  %813 = vst [vmem:[%s1306_s30 + $0x108] sm:$0xff] %v812_v18 }
 0x13e   : > { %815 = vst [vmem:[%s1306_s30 + $0x140] sm:$0xff] %v814_v19  ;;  %817 = vst [vmem:[%s1306_s30 + $0x148] sm:$0xff] %v816_v20 }
 0x13f   : > { %843 = vst [vmem:[%s1306_s30 + $0x300] sm:$0xff] %v842_v33  ;;  %845 = vst [vmem:[%s1306_s30 + $0x308] sm:$0xff] %v844_v34 }
 0x140   : > { %v818_v21 = vld [vmem:[%s1263_s28 + $0x60] sm:$0xff]  ;;  %847 = vst [vmem:[%s1306_s30 + $0x340] sm:$0xff] %v846_v35  ;;  %849 = vst [vmem:[%s1306_s30 + $0x348] sm:$0xff] %v848_v36 }
 0x141   : > { %v820_v22 = vld [vmem:[%s1263_s28 + $0x68] sm:$0xff]  ;;  %819 = vst [vmem:[%s1306_s30 + $0x180] sm:$0xff] %v818_v21  ;;  %v850_v37 = vld [vmem:[%s1263_s28 + $0xe0] sm:$0xff] }
 0x142   : > { %v822_v23 = vld [vmem:[%s1263_s28 + $0x70] sm:$0xff]  ;;  %821 = vst [vmem:[%s1306_s30 + $0x188] sm:$0xff] %v820_v22  ;;  %v852_v38 = vld [vmem:[%s1263_s28 + $0xe8] sm:$0xff]  ;;  %851 = vst [vmem:[%s1306_s30 + $0x380] sm:$0xff] %v850_v37 }
 0x143   : > { %823 = vst [vmem:[%s1306_s30 + $0x1c0] sm:$0xff] %v822_v23  ;;  %v824_v24 = vld [vmem:[%s1263_s28 + $0x78] sm:$0xff]  ;;  %853 = vst [vmem:[%s1306_s30 + $0x388] sm:$0xff] %v852_v38  ;;  %v854_v39 = vld [vmem:[%s1263_s28 + $0xf0] sm:$0xff] }
 0x144   : > { %825 = vst [vmem:[%s1306_s30 + $0x1c8] sm:$0xff] %v824_v24  ;;  %v856_v40 = vld [vmem:[%s1263_s28 + $0xf8] sm:$0xff]  ;;  %855 = vst [vmem:[%s1306_s30 + $0x3c0] sm:$0xff] %v854_v39 }
 0x145   : > { %857 = vst [vmem:[%s1306_s30 + $0x3c8] sm:$0xff] %v856_v40 }
 0x146 PF: > { %s12_s13 = sadd.s32 1, %s1122_s13   ;;  %s1388_s9 = smov %s1110_s10 }
 0x147   : > { %p9_p11 = scmp.ge.s32.totalorder %s12_s13, 6   ;;  %s1389_s10 = smov %s1180_s19 }
 0x148   : > { %s1390_s11 = smov %s1118_s12  ;;  %s1391_s12 = smov %s1393_s14 }
 0x149   :  { %11 = sbr.rel (!%p9_p11) target bundleno = 3 (0x3), region = 135 }

// kernel: isuei_d2_forward.16
= control target key start
LH: loop header
LB: loop body
LE: loop exit
PB: predicated region body
PF: predicated region fallthrough
CT: control target
= control target key end

     0   :  { %v193_v0 = vmov 0.0   ;;  %vm194_vm0 = vmmov 0   ;;  %s248_s1 = inlined_call_operand.vmem [shape: bf16[128,128], index: 1, kind: input, shape index: {}]   ;;  %s249_s0 = inlined_call_operand.vmem [shape: bf16[8,128], index: 0, kind: input, shape index: {}]   ;;  %s250_s2 = inlined_call_operand.vmem [shape: f32[1,128], index: 2, kind: input, shape index: {}]   ;;  %s251_s3 = inlined_call_operand.vmem [shape: f32[8,128], index: 3, kind: output, shape index: {}]  }
   0x1   :  { %163 = vmatprep.subr.bf16.mxu0 %v193_v0  ;;  %v185_v1 = vld [vmem:[%s248_s1] sm:$0xff]   ;;  %179 = vmatprep.mubr.msk.bf16.mxu0 %vm194_vm0, %v193_v0  ;;  %v186_v2 = vld [vmem:[%s248_s1 + $0x8] sm:$0xff]   ;;  %v187_v3 = vld [vmem:[%s248_s1 + $0x10] sm:$0xff]  }
   0x2   :  { %164 = vmatpush3.bf16.msra.mxu0 %v185_v1  ;;  %v188_v4 = vld [vmem:[%s248_s1 + $0x18] sm:$0xff]   ;;  %v189_v5 = vld [vmem:[%s248_s1 + $0x20] sm:$0xff]   ;;  %v190_v6 = vld [vmem:[%s248_s1 + $0x28] sm:$0xff]  }
   0x3   :  { %165 = vmatprep.subr.bf16.mxu0 %v193_v0  ;;  %v191_v7 = vld [vmem:[%s248_s1 + $0x30] sm:$0xff]   ;;  %v192_v8 = vld [vmem:[%s248_s1 + $0x38] sm:$0xff]   ;;  %v21_v9 = vld [vmem:[%s249_s0] sm:$0xf] }
   0x4   :  { %v153_v10 = vld [vmem:[%s250_s2] ss:$0 sm:$0xff] }
   0x6   :  { %166 = vmatpush3.bf16.msra.mxu0 %v186_v2 }
   0x7   :  { %167 = vmatprep.subr.bf16.mxu0 %v193_v0 }
   0xa   :  { %168 = vmatpush3.bf16.msra.mxu0 %v187_v3 }
   0xb   :  { %169 = vmatprep.subr.bf16.mxu0 %v193_v0 }
   0xe   :  { %170 = vmatpush3.bf16.msra.mxu0 %v188_v4 }
   0xf   :  { %171 = vmatprep.subr.bf16.mxu0 %v193_v0 }
  0x12   :  { %172 = vmatpush3.bf16.msra.mxu0 %v189_v5 }
  0x13   :  { %173 = vmatprep.subr.bf16.mxu0 %v193_v0 }
  0x16   :  { %174 = vmatpush3.bf16.msra.mxu0 %v190_v6 }
  0x17   :  { %175 = vmatprep.subr.bf16.mxu0 %v193_v0 }
  0x1a   :  { %176 = vmatpush3.bf16.msra.mxu0 %v191_v7 }
  0x1b   :  { %177 = vmatprep.subr.bf16.mxu0 %v193_v0 }
  0x1e   :  { %178 = vmatpush3.bf16.msra.mxu0 %v192_v8 }
  0x21   :  { %180 = vmatmul.mubr.bf16.vlgmr.msra.gmra.mrb[0].mxu0 %v21_v9 }
  0xf4   :  { %v120_v11 = vpop.f32.mrb[0].mxu0 }
  0xf5   :  { %v139_v12 = vadd.f32 %v153_v10, %v120_v11  ;;  %v181_v13 = vpop.f32.mrb[1].mxu0 }
  0xf6   :  { %v123_v14 = vpop.f32.mrb[2].mxu0 }
  0xf7   :  { %140 = vst [vmem:[%s251_s3] sm:$0xff] %v139_v12  ;;  %v182_v15 = vpop.f32.mrb[3].mxu0 }

</bundles_post_ra>
